<compile_context>
chip_gen: v5e
topology: v5e:2x2
jax: 0.10.0
libtpu: 0.0.40
codegen_flags: <defaults>
</compile_context>

<pallas_src>
import jax
import jax.numpy as jnp
from jax import lax
from jax.experimental import pallas as pl
from jax.experimental.pallas import tpu as pltpu


def _round_up(x, m):
    return (x + m - 1) // m * m


def bayar_constraint(kernel, out_channels, in_channels, kernel_size):
    """Reproduces BayarConv2d.bayarConstraint().

    kernel: (in_channels, out_channels, kernel_size**2 - 1)
    returns real_kernel: (out_channels, in_channels, kernel_size, kernel_size)
    """
    # torch: permute(2,0,1); div by sum over dim 0; permute back
    #   == divide by the sum over the last (tap) dimension.
    k = kernel / kernel.sum(axis=2, keepdims=True)
    ctr = kernel_size ** 2 // 2
    minus1 = -jnp.ones((in_channels, out_channels, 1), kernel.dtype)
    real = jnp.concatenate([k[:, :, :ctr], minus1, k[:, :, ctr:]], axis=2)
    # NOTE: PyTorch reshapes the (in, out, K*K) buffer directly to
    # (out, in, K, K) (a raw row-major re-view) -- reproduce that exactly.
    real = real.reshape(out_channels, in_channels, kernel_size, kernel_size)
    return real


def _tpu_budgets():
    """(vmem_capacity_bytes, num_tensorcores) with conservative fallbacks."""
    vmem_bytes = 128 * 1024 * 1024
    num_tc = 1
    try:
        info = pltpu.get_tpu_info()
        for attr in ("vmem_capacity_bytes", "vmem_bytes", "vmem_size_bytes"):
            val = getattr(info, attr, None)
            if val:
                vmem_bytes = int(val)
                break
        for attr in ("num_cores", "num_tensorcores", "tensorcores_per_chip"):
            val = getattr(info, attr, None)
            if val:
                num_tc = int(val)
                break
    except Exception:
        pass
    try:
        kind = jax.devices()[0].device_kind.lower()
        if "v7" in kind:                       # v7x: 2 TCs, 64 MiB VMEM per TC
            num_tc = max(num_tc, 2)
            vmem_bytes = min(vmem_bytes, 64 * 1024 * 1024)
    except Exception:
        pass
    vmem_bytes = max(32 * 1024 * 1024, min(vmem_bytes, 256 * 1024 * 1024))
    return vmem_bytes, num_tc


def _make_conv_kernel(Bg, G, C_in, C_out, K, Wp, A, chunk, n_parts):
    """Unrolled shift-MAC kernel for one block of Bg groups of G images."""
    taps = [(ci, kh * Wp + kw)
            for ci in range(C_in) for kh in range(K) for kw in range(K)]

    def conv_kernel(w_ref, x_ref, o_ref):
        # w_ref: (C_out, T)           f32, column t = (ci*K + kh)*K + kw
        # x_ref: (Bg, G*C_in, LF)     flattened zero-padded image groups
        # o_ref: (Bg, G*C_out, A)     flattened dense (stride-1) outputs

        def group_body(g):
            # Lane-chunked accumulation: per-chunk accumulators die at the
            # chunk's store, bounding live vregs regardless of A.
            for c0 in range(0, A, chunk):
                parts = [[jnp.zeros((C_out, chunk), jnp.float32)
                          for _ in range(n_parts)] for _ in range(G)]
                for t, (ci, d) in enumerate(taps):
                    # Per-tap weight column, loaded + lane-broadcast ONCE and
                    # reused by every image in the group (hoisted out of the
                    # image loop; full 100-column hoisting would spill vregs).
                    wb = jnp.broadcast_to(w_ref[:, t:t + 1], (C_out, chunk))
                    for gi in range(G):
                        row = gi * C_in + ci
                        xs = x_ref[g, row:row + 1,
                                   c0 + d:c0 + d + chunk]        # (1, chunk)
                        p = t % n_parts
                        parts[gi][p] = parts[gi][p] + wb * xs     # (C_out, chunk)
                accs = []
                for gi in range(G):
                    ps = parts[gi]
                    while len(ps) > 1:          # tree-reduce the partials
                        nxt = [ps[i] + ps[i + 1]
                               for i in range(0, len(ps) - 1, 2)]
                        if len(ps) % 2:
                            nxt.append(ps[-1])
                        ps = nxt
                    accs.append(ps[0])
                blk = jnp.concatenate(accs, axis=0) if G > 1 else accs[0]
                # Full-8-sublane, lane-aligned (unmasked) store.
                o_ref[g, :, c0:c0 + chunk] = blk.astype(o_ref.dtype)

        if Bg <= 2:
            # Small blocks: static unroll keeps live state tiny and avoids any
            # dynamic indexing.
            for g in range(Bg):
                group_body(g)
        else:
            # fori_loop bounds accumulator live ranges to one group and keeps
            # unrolled code size independent of the block batch.
            def body(g, carry):
                group_body(g)
                return carry
            lax.fori_loop(0, Bg, body, 0)

    return conv_kernel


def bayar_conv2d(x, kernel, *, kernel_size=5, stride=1, padding=0):
    """Forward pass of BayarConv2d.

    x:      (N, C_in, H, W)  float32, NCHW
    kernel: (C_in, C_out, kernel_size**2 - 1) float32 (the nn.Parameter)
    """
    in_channels, out_channels, _ = kernel.shape
    out_dtype = x.dtype
    w = bayar_constraint(kernel, out_channels, in_channels, kernel_size)
    # (C_out, C_in*K*K): C_out on sublanes so per-tap (C_out, 1) weight columns
    # lane-broadcast against the (1, chunk) image slices with no relayout.
    w2 = w.reshape(out_channels, -1).astype(jnp.float32)

    N, C_in, H, W = x.shape
    assert C_in == in_channels, (C_in, in_channels)
    K, s = kernel_size, stride
    Hp, Wp = H + 2 * padding, W + 2 * padding
    assert Hp >= K and Wp >= K, "input smaller than kernel"
    OH_d, OW_d = Hp - K + 1, Wp - K + 1     # dense (stride-1) output grid

    # --- Dense-sublane grouping: pack G images so channels fill 8*k sublanes.
    G = 1
    while (G * C_in) % 8 or (G * out_channels) % 8:
        G += 1                               # G <= 8 always terminates
    Npad = _round_up(N, G)
    Ng = Npad // G

    # --- Flattened geometry.  flat_in = q + kh*Wp + kw for output lane q.
    A_raw = OH_d * Wp
    A = _round_up(A_raw, 128)                # lane-dense output length
    d_max = (K - 1) * Wp + (K - 1)           # largest tap offset
    rows_total = max(Hp, -(-(A + d_max) // Wp))
    extra_rows = rows_total - Hp
    LF = rows_total * Wp                     # flattened input length

    # --- Single fused layout pad: batch pad (to a multiple of G), conv
    # padding, and the flat tail rows in ONE jnp.pad + one reshape.
    if (Npad - N) or padding or extra_rows:
        x = jnp.pad(x, ((0, Npad - N), (0, 0),
                        (padding, padding + extra_rows), (padding, padding)))
    xg = x.reshape(Ng, G * C_in, LF).astype(jnp.float32)

    # --- Lane chunk (<=512) that divides A; n_parts=2 gives enough ILP.
    if A <= 512:
        chunk = A
    elif A % 512 == 0:
        chunk = 512
    elif A % 256 == 0:
        chunk = 256
    else:
        chunk = 128
    T = C_in * K * K
    n_parts = 2 if T >= 2 else 1

    # --- Generation-aware block/VMEM budgets.
    vmem_bytes, num_tc = _tpu_budgets()
    vmem_cap = (6 * vmem_bytes) // 10        # ~38 MiB on v7x, ~77 MiB on v5e/v6e
    per_group_bytes = (_round_up(G * C_in, 8) * _round_up(LF, 128)
                       + _round_up(G * out_channels, 8) * _round_up(A, 128)) * 4
    block_budget = max(per_group_bytes, vmem_cap // 3)
    b_cap = max(1, block_budget // per_group_bytes)
    divs = [d for d in range(1, Ng + 1) if Ng % d == 0 and d <= b_cap] or [1]
    if num_tc >= 2 and Ng > 1:
        even_steps = [d for d in divs if (Ng // d) >= 2 and (Ng // d) % 2 == 0]
        multi = [d for d in divs if (Ng // d) >= 2]
        Bg = max(even_steps) if even_steps else (max(multi) if multi else max(divs))
    else:
        Bg = max(divs)                       # single-TC: fewer, fatter steps
    steps = Ng // Bg

    w_bytes = _round_up(out_channels, 8) * _round_up(T, 128) * 4
    vmem_limit = int(min(vmem_cap,
                         max(16 * 1024 * 1024,
                             2 * Bg * per_group_bytes + w_bytes + (2 << 20))))

    conv_kernel = _make_conv_kernel(Bg, G, C_in, out_channels, K, Wp, A,
                                    chunk, n_parts)

    out_flat = pl.pallas_call(
        conv_kernel,
        out_shape=jax.ShapeDtypeStruct((Ng, G * out_channels, A), jnp.float32),
        grid=(steps,),
        in_specs=[
            pl.BlockSpec((out_channels, T), lambda i: (0, 0)),        # weights
            pl.BlockSpec((Bg, G * C_in, LF), lambda i: (i, 0, 0)),    # images
        ],
        out_specs=pl.BlockSpec((Bg, G * out_channels, A), lambda i: (i, 0, 0)),
        compiler_params=pltpu.CompilerParams(
            dimension_semantics=("parallel",),
            vmem_limit_bytes=vmem_limit),
    )(w2, xg)

    # --- Un-flatten: drop batch pad, garbage rows/cols, then stride subsample.
    out = out_flat.reshape(Npad, out_channels, A)[:N, :, :A_raw]
    out = out.reshape(N, out_channels, OH_d, Wp)[:, :, :, :OW_d]
    if s > 1:
        out = out[:, :, ::s, ::s]
    return out.astype(out_dtype)


if __name__ == "__main__":
    # Module config consistent with BayarConv2d(in_channels=4, out_channels=4)
    in_channels, out_channels, kernel_size = 4, 4, 5

    key = jax.random.PRNGKey(0)
    kx, kw = jax.random.split(key)

    # torch.rand -> uniform [0, 1)
    kernel_param = jax.random.uniform(
        kw, (in_channels, out_channels, kernel_size ** 2 - 1), dtype=jnp.float32)
    x = jax.random.normal(kx, (2, 4, 16, 16), dtype=jnp.float32)

    w_ref = bayar_constraint(kernel_param, out_channels, in_channels, kernel_size)

    # (stride, padding) configs: module default, a padded config (pad fold),
    # and a stride=2 config (dense compute + wrapper subsample path).
    for stride, padding in [(1, 0), (1, 2), (2, 0)]:
        y = bayar_conv2d(x, kernel_param, kernel_size=kernel_size,
                         stride=stride, padding=padding)
        y = jax.block_until_ready(y)
        y_ref = jax.lax.conv_general_dilated(
            x, w_ref, window_strides=(stride, stride),
            padding=[(padding, padding), (padding, padding)],
            dimension_numbers=("NCHW", "OIHW", "NCHW"))
        assert y.shape == y_ref.shape, (y.shape, y_ref.shape)
        assert jnp.allclose(y, y_ref, rtol=1e-3, atol=1e-3), (
            f"mismatch vs lax.conv (stride={stride}, padding={padding})")

    print("KERNEL_OK")
</pallas_src>

<mosaic_0001>
module attributes {stable_mosaic.version = 11 : i64} {
  func.func @conv_kernel(%arg0: i32, %arg1: memref<4x100xf32, #tpu.memory_space<vmem>>, %arg2: memref<1x8x336xf32, #tpu.memory_space<vmem>>, %arg3: memref<1x8x256xf32, #tpu.memory_space<vmem>>) attributes {dimension_semantics = [#tpu.dimension_semantics<parallel>], iteration_bounds = array<i64: 1>, scalar_prefetch = 0 : i64, scratch_operands = 0 : i64, tpu.core_type = #tpu.core_type<tc>, window_params = [{pipeline_mode = #tpu.pipeline_mode<synchronous>, transform_indices = @transform_0, window_bounds = array<i64: 4, 100>}, {transform_indices = @transform_1, window_bounds = array<i64: 1, 8, 336>}, {transform_indices = @transform_2, window_bounds = array<i64: 1, 8, 256>}]} {
    %cst = arith.constant 0.000000e+00 : f32
    %0 = vector.broadcast %cst : f32 to vector<4x256xf32>
    %cst_0 = arith.constant 0.000000e+00 : f32
    %1 = vector.broadcast %cst_0 : f32 to vector<4x256xf32>
    %cst_1 = arith.constant 0.000000e+00 : f32
    %2 = vector.broadcast %cst_1 : f32 to vector<4x256xf32>
    %cst_2 = arith.constant 0.000000e+00 : f32
    %3 = vector.broadcast %cst_2 : f32 to vector<4x256xf32>
    %c0 = arith.constant 0 : index
    %c0_3 = arith.constant 0 : index
    %4 = vector.load %arg1[%c0, %c0_3] : memref<4x100xf32, #tpu.memory_space<vmem>>, vector<4x1xf32>
    %5 = vector.shape_cast %4 : vector<4x1xf32> to vector<4x1xf32>
    %6 = vector.broadcast %5 : vector<4x1xf32> to vector<4x256xf32>
    %c0_4 = arith.constant 0 : index
    %c0_5 = arith.constant 0 : index
    %c0_6 = arith.constant 0 : index
    %7 = vector.load %arg2[%c0_4, %c0_5, %c0_6] : memref<1x8x336xf32, #tpu.memory_space<vmem>>, vector<1x1x256xf32>
    %8 = vector.shape_cast %7 : vector<1x1x256xf32> to vector<1x256xf32>
    %9 = vector.broadcast %8 : vector<1x256xf32> to vector<4x256xf32>
    %10 = arith.mulf %6, %9 : vector<4x256xf32>
    %11 = arith.addf %0, %10 : vector<4x256xf32>
    %c0_7 = arith.constant 0 : index
    %c4 = arith.constant 4 : index
    %c0_8 = arith.constant 0 : index
    %12 = vector.load %arg2[%c0_7, %c4, %c0_8] : memref<1x8x336xf32, #tpu.memory_space<vmem>>, vector<1x1x256xf32>
    %13 = vector.shape_cast %12 : vector<1x1x256xf32> to vector<1x256xf32>
    %14 = vector.broadcast %13 : vector<1x256xf32> to vector<4x256xf32>
    %15 = arith.mulf %6, %14 : vector<4x256xf32>
    %16 = arith.addf %2, %15 : vector<4x256xf32>
    %c0_9 = arith.constant 0 : index
    %c1 = arith.constant 1 : index
    %17 = vector.load %arg1[%c0_9, %c1] : memref<4x100xf32, #tpu.memory_space<vmem>>, vector<4x1xf32>
    %18 = vector.shape_cast %17 : vector<4x1xf32> to vector<4x1xf32>
    %19 = vector.broadcast %18 : vector<4x1xf32> to vector<4x256xf32>
    %c0_10 = arith.constant 0 : index
    %c0_11 = arith.constant 0 : index
    %c1_12 = arith.constant 1 : index
    %20 = vector.load %arg2[%c0_10, %c0_11, %c1_12] : memref<1x8x336xf32, #tpu.memory_space<vmem>>, vector<1x1x256xf32>
    %21 = vector.shape_cast %20 : vector<1x1x256xf32> to vector<1x256xf32>
    %22 = vector.broadcast %21 : vector<1x256xf32> to vector<4x256xf32>
    %23 = arith.mulf %19, %22 : vector<4x256xf32>
    %24 = arith.addf %1, %23 : vector<4x256xf32>
    %c0_13 = arith.constant 0 : index
    %c4_14 = arith.constant 4 : index
    %c1_15 = arith.constant 1 : index
    %25 = vector.load %arg2[%c0_13, %c4_14, %c1_15] : memref<1x8x336xf32, #tpu.memory_space<vmem>>, vector<1x1x256xf32>
    %26 = vector.shape_cast %25 : vector<1x1x256xf32> to vector<1x256xf32>
    %27 = vector.broadcast %26 : vector<1x256xf32> to vector<4x256xf32>
    %28 = arith.mulf %19, %27 : vector<4x256xf32>
    %29 = arith.addf %3, %28 : vector<4x256xf32>
    %c0_16 = arith.constant 0 : index
    %c2 = arith.constant 2 : index
    %30 = vector.load %arg1[%c0_16, %c2] : memref<4x100xf32, #tpu.memory_space<vmem>>, vector<4x1xf32>
    %31 = vector.shape_cast %30 : vector<4x1xf32> to vector<4x1xf32>
    %32 = vector.broadcast %31 : vector<4x1xf32> to vector<4x256xf32>
    %c0_17 = arith.constant 0 : index
    %c0_18 = arith.constant 0 : index
    %c2_19 = arith.constant 2 : index
    %33 = vector.load %arg2[%c0_17, %c0_18, %c2_19] : memref<1x8x336xf32, #tpu.memory_space<vmem>>, vector<1x1x256xf32>
    %34 = vector.shape_cast %33 : vector<1x1x256xf32> to vector<1x256xf32>
    %35 = vector.broadcast %34 : vector<1x256xf32> to vector<4x256xf32>
    %36 = arith.mulf %32, %35 : vector<4x256xf32>
    %37 = arith.addf %11, %36 : vector<4x256xf32>
    %c0_20 = arith.constant 0 : index
    %c4_21 = arith.constant 4 : index
    %c2_22 = arith.constant 2 : index
    %38 = vector.load %arg2[%c0_20, %c4_21, %c2_22] : memref<1x8x336xf32, #tpu.memory_space<vmem>>, vector<1x1x256xf32>
    %39 = vector.shape_cast %38 : vector<1x1x256xf32> to vector<1x256xf32>
    %40 = vector.broadcast %39 : vector<1x256xf32> to vector<4x256xf32>
    %41 = arith.mulf %32, %40 : vector<4x256xf32>
    %42 = arith.addf %16, %41 : vector<4x256xf32>
    %c0_23 = arith.constant 0 : index
    %c3 = arith.constant 3 : index
    %43 = vector.load %arg1[%c0_23, %c3] : memref<4x100xf32, #tpu.memory_space<vmem>>, vector<4x1xf32>
    %44 = vector.shape_cast %43 : vector<4x1xf32> to vector<4x1xf32>
    %45 = vector.broadcast %44 : vector<4x1xf32> to vector<4x256xf32>
    %c0_24 = arith.constant 0 : index
    %c0_25 = arith.constant 0 : index
    %c3_26 = arith.constant 3 : index
    %46 = vector.load %arg2[%c0_24, %c0_25, %c3_26] : memref<1x8x336xf32, #tpu.memory_space<vmem>>, vector<1x1x256xf32>
    %47 = vector.shape_cast %46 : vector<1x1x256xf32> to vector<1x256xf32>
    %48 = vector.broadcast %47 : vector<1x256xf32> to vector<4x256xf32>
    %49 = arith.mulf %45, %48 : vector<4x256xf32>
    %50 = arith.addf %24, %49 : vector<4x256xf32>
    %c0_27 = arith.constant 0 : index
    %c4_28 = arith.constant 4 : index
    %c3_29 = arith.constant 3 : index
    %51 = vector.load %arg2[%c0_27, %c4_28, %c3_29] : memref<1x8x336xf32, #tpu.memory_space<vmem>>, vector<1x1x256xf32>
    %52 = vector.shape_cast %51 : vector<1x1x256xf32> to vector<1x256xf32>
    %53 = vector.broadcast %52 : vector<1x256xf32> to vector<4x256xf32>
    %54 = arith.mulf %45, %53 : vector<4x256xf32>
    %55 = arith.addf %29, %54 : vector<4x256xf32>
    %c0_30 = arith.constant 0 : index
    %c4_31 = arith.constant 4 : index
    %56 = vector.load %arg1[%c0_30, %c4_31] : memref<4x100xf32, #tpu.memory_space<vmem>>, vector<4x1xf32>
    %57 = vector.shape_cast %56 : vector<4x1xf32> to vector<4x1xf32>
    %58 = vector.broadcast %57 : vector<4x1xf32> to vector<4x256xf32>
    %c0_32 = arith.constant 0 : index
    %c0_33 = arith.constant 0 : index
    %c4_34 = arith.constant 4 : index
    %59 = vector.load %arg2[%c0_32, %c0_33, %c4_34] : memref<1x8x336xf32, #tpu.memory_space<vmem>>, vector<1x1x256xf32>
    %60 = vector.shape_cast %59 : vector<1x1x256xf32> to vector<1x256xf32>
    %61 = vector.broadcast %60 : vector<1x256xf32> to vector<4x256xf32>
    %62 = arith.mulf %58, %61 : vector<4x256xf32>
    %63 = arith.addf %37, %62 : vector<4x256xf32>
    %c0_35 = arith.constant 0 : index
    %c4_36 = arith.constant 4 : index
    %c4_37 = arith.constant 4 : index
    %64 = vector.load %arg2[%c0_35, %c4_36, %c4_37] : memref<1x8x336xf32, #tpu.memory_space<vmem>>, vector<1x1x256xf32>
    %65 = vector.shape_cast %64 : vector<1x1x256xf32> to vector<1x256xf32>
    %66 = vector.broadcast %65 : vector<1x256xf32> to vector<4x256xf32>
    %67 = arith.mulf %58, %66 : vector<4x256xf32>
    %68 = arith.addf %42, %67 : vector<4x256xf32>
    %c0_38 = arith.constant 0 : index
    %c5 = arith.constant 5 : index
    %69 = vector.load %arg1[%c0_38, %c5] : memref<4x100xf32, #tpu.memory_space<vmem>>, vector<4x1xf32>
    %70 = vector.shape_cast %69 : vector<4x1xf32> to vector<4x1xf32>
    %71 = vector.broadcast %70 : vector<4x1xf32> to vector<4x256xf32>
    %c0_39 = arith.constant 0 : index
    %c0_40 = arith.constant 0 : index
    %c16 = arith.constant 16 : index
    %72 = vector.load %arg2[%c0_39, %c0_40, %c16] : memref<1x8x336xf32, #tpu.memory_space<vmem>>, vector<1x1x256xf32>
    %73 = vector.shape_cast %72 : vector<1x1x256xf32> to vector<1x256xf32>
    %74 = vector.broadcast %73 : vector<1x256xf32> to vector<4x256xf32>
    %75 = arith.mulf %71, %74 : vector<4x256xf32>
    %76 = arith.addf %50, %75 : vector<4x256xf32>
    %c0_41 = arith.constant 0 : index
    %c4_42 = arith.constant 4 : index
    %c16_43 = arith.constant 16 : index
    %77 = vector.load %arg2[%c0_41, %c4_42, %c16_43] : memref<1x8x336xf32, #tpu.memory_space<vmem>>, vector<1x1x256xf32>
    %78 = vector.shape_cast %77 : vector<1x1x256xf32> to vector<1x256xf32>
    %79 = vector.broadcast %78 : vector<1x256xf32> to vector<4x256xf32>
    %80 = arith.mulf %71, %79 : vector<4x256xf32>
    %81 = arith.addf %55, %80 : vector<4x256xf32>
    %c0_44 = arith.constant 0 : index
    %c6 = arith.constant 6 : index
    %82 = vector.load %arg1[%c0_44, %c6] : memref<4x100xf32, #tpu.memory_space<vmem>>, vector<4x1xf32>
    %83 = vector.shape_cast %82 : vector<4x1xf32> to vector<4x1xf32>
    %84 = vector.broadcast %83 : vector<4x1xf32> to vector<4x256xf32>
    %c0_45 = arith.constant 0 : index
    %c0_46 = arith.constant 0 : index
    %c17 = arith.constant 17 : index
    %85 = vector.load %arg2[%c0_45, %c0_46, %c17] : memref<1x8x336xf32, #tpu.memory_space<vmem>>, vector<1x1x256xf32>
    %86 = vector.shape_cast %85 : vector<1x1x256xf32> to vector<1x256xf32>
    %87 = vector.broadcast %86 : vector<1x256xf32> to vector<4x256xf32>
    %88 = arith.mulf %84, %87 : vector<4x256xf32>
    %89 = arith.addf %63, %88 : vector<4x256xf32>
    %c0_47 = arith.constant 0 : index
    %c4_48 = arith.constant 4 : index
    %c17_49 = arith.constant 17 : index
    %90 = vector.load %arg2[%c0_47, %c4_48, %c17_49] : memref<1x8x336xf32, #tpu.memory_space<vmem>>, vector<1x1x256xf32>
    %91 = vector.shape_cast %90 : vector<1x1x256xf32> to vector<1x256xf32>
    %92 = vector.broadcast %91 : vector<1x256xf32> to vector<4x256xf32>
    %93 = arith.mulf %84, %92 : vector<4x256xf32>
    %94 = arith.addf %68, %93 : vector<4x256xf32>
    %c0_50 = arith.constant 0 : index
    %c7 = arith.constant 7 : index
    %95 = vector.load %arg1[%c0_50, %c7] : memref<4x100xf32, #tpu.memory_space<vmem>>, vector<4x1xf32>
    %96 = vector.shape_cast %95 : vector<4x1xf32> to vector<4x1xf32>
    %97 = vector.broadcast %96 : vector<4x1xf32> to vector<4x256xf32>
    %c0_51 = arith.constant 0 : index
    %c0_52 = arith.constant 0 : index
    %c18 = arith.constant 18 : index
    %98 = vector.load %arg2[%c0_51, %c0_52, %c18] : memref<1x8x336xf32, #tpu.memory_space<vmem>>, vector<1x1x256xf32>
    %99 = vector.shape_cast %98 : vector<1x1x256xf32> to vector<1x256xf32>
    %100 = vector.broadcast %99 : vector<1x256xf32> to vector<4x256xf32>
    %101 = arith.mulf %97, %100 : vector<4x256xf32>
    %102 = arith.addf %76, %101 : vector<4x256xf32>
    %c0_53 = arith.constant 0 : index
    %c4_54 = arith.constant 4 : index
    %c18_55 = arith.constant 18 : index
    %103 = vector.load %arg2[%c0_53, %c4_54, %c18_55] : memref<1x8x336xf32, #tpu.memory_space<vmem>>, vector<1x1x256xf32>
    %104 = vector.shape_cast %103 : vector<1x1x256xf32> to vector<1x256xf32>
    %105 = vector.broadcast %104 : vector<1x256xf32> to vector<4x256xf32>
    %106 = arith.mulf %97, %105 : vector<4x256xf32>
    %107 = arith.addf %81, %106 : vector<4x256xf32>
    %c0_56 = arith.constant 0 : index
    %c8 = arith.constant 8 : index
    %108 = vector.load %arg1[%c0_56, %c8] : memref<4x100xf32, #tpu.memory_space<vmem>>, vector<4x1xf32>
    %109 = vector.shape_cast %108 : vector<4x1xf32> to vector<4x1xf32>
    %110 = vector.broadcast %109 : vector<4x1xf32> to vector<4x256xf32>
    %c0_57 = arith.constant 0 : index
    %c0_58 = arith.constant 0 : index
    %c19 = arith.constant 19 : index
    %111 = vector.load %arg2[%c0_57, %c0_58, %c19] : memref<1x8x336xf32, #tpu.memory_space<vmem>>, vector<1x1x256xf32>
    %112 = vector.shape_cast %111 : vector<1x1x256xf32> to vector<1x256xf32>
    %113 = vector.broadcast %112 : vector<1x256xf32> to vector<4x256xf32>
    %114 = arith.mulf %110, %113 : vector<4x256xf32>
    %115 = arith.addf %89, %114 : vector<4x256xf32>
    %c0_59 = arith.constant 0 : index
    %c4_60 = arith.constant 4 : index
    %c19_61 = arith.constant 19 : index
    %116 = vector.load %arg2[%c0_59, %c4_60, %c19_61] : memref<1x8x336xf32, #tpu.memory_space<vmem>>, vector<1x1x256xf32>
    %117 = vector.shape_cast %116 : vector<1x1x256xf32> to vector<1x256xf32>
    %118 = vector.broadcast %117 : vector<1x256xf32> to vector<4x256xf32>
    %119 = arith.mulf %110, %118 : vector<4x256xf32>
    %120 = arith.addf %94, %119 : vector<4x256xf32>
    %c0_62 = arith.constant 0 : index
    %c9 = arith.constant 9 : index
    %121 = vector.load %arg1[%c0_62, %c9] : memref<4x100xf32, #tpu.memory_space<vmem>>, vector<4x1xf32>
    %122 = vector.shape_cast %121 : vector<4x1xf32> to vector<4x1xf32>
    %123 = vector.broadcast %122 : vector<4x1xf32> to vector<4x256xf32>
    %c0_63 = arith.constant 0 : index
    %c0_64 = arith.constant 0 : index
    %c20 = arith.constant 20 : index
    %124 = vector.load %arg2[%c0_63, %c0_64, %c20] : memref<1x8x336xf32, #tpu.memory_space<vmem>>, vector<1x1x256xf32>
    %125 = vector.shape_cast %124 : vector<1x1x256xf32> to vector<1x256xf32>
    %126 = vector.broadcast %125 : vector<1x256xf32> to vector<4x256xf32>
    %127 = arith.mulf %123, %126 : vector<4x256xf32>
    %128 = arith.addf %102, %127 : vector<4x256xf32>
    %c0_65 = arith.constant 0 : index
    %c4_66 = arith.constant 4 : index
    %c20_67 = arith.constant 20 : index
    %129 = vector.load %arg2[%c0_65, %c4_66, %c20_67] : memref<1x8x336xf32, #tpu.memory_space<vmem>>, vector<1x1x256xf32>
    %130 = vector.shape_cast %129 : vector<1x1x256xf32> to vector<1x256xf32>
    %131 = vector.broadcast %130 : vector<1x256xf32> to vector<4x256xf32>
    %132 = arith.mulf %123, %131 : vector<4x256xf32>
    %133 = arith.addf %107, %132 : vector<4x256xf32>
    %c0_68 = arith.constant 0 : index
    %c10 = arith.constant 10 : index
    %134 = vector.load %arg1[%c0_68, %c10] : memref<4x100xf32, #tpu.memory_space<vmem>>, vector<4x1xf32>
    %135 = vector.shape_cast %134 : vector<4x1xf32> to vector<4x1xf32>
    %136 = vector.broadcast %135 : vector<4x1xf32> to vector<4x256xf32>
    %c0_69 = arith.constant 0 : index
    %c0_70 = arith.constant 0 : index
    %c32 = arith.constant 32 : index
    %137 = vector.load %arg2[%c0_69, %c0_70, %c32] : memref<1x8x336xf32, #tpu.memory_space<vmem>>, vector<1x1x256xf32>
    %138 = vector.shape_cast %137 : vector<1x1x256xf32> to vector<1x256xf32>
    %139 = vector.broadcast %138 : vector<1x256xf32> to vector<4x256xf32>
    %140 = arith.mulf %136, %139 : vector<4x256xf32>
    %141 = arith.addf %115, %140 : vector<4x256xf32>
    %c0_71 = arith.constant 0 : index
    %c4_72 = arith.constant 4 : index
    %c32_73 = arith.constant 32 : index
    %142 = vector.load %arg2[%c0_71, %c4_72, %c32_73] : memref<1x8x336xf32, #tpu.memory_space<vmem>>, vector<1x1x256xf32>
    %143 = vector.shape_cast %142 : vector<1x1x256xf32> to vector<1x256xf32>
    %144 = vector.broadcast %143 : vector<1x256xf32> to vector<4x256xf32>
    %145 = arith.mulf %136, %144 : vector<4x256xf32>
    %146 = arith.addf %120, %145 : vector<4x256xf32>
    %c0_74 = arith.constant 0 : index
    %c11 = arith.constant 11 : index
    %147 = vector.load %arg1[%c0_74, %c11] : memref<4x100xf32, #tpu.memory_space<vmem>>, vector<4x1xf32>
    %148 = vector.shape_cast %147 : vector<4x1xf32> to vector<4x1xf32>
    %149 = vector.broadcast %148 : vector<4x1xf32> to vector<4x256xf32>
    %c0_75 = arith.constant 0 : index
    %c0_76 = arith.constant 0 : index
    %c33 = arith.constant 33 : index
    %150 = vector.load %arg2[%c0_75, %c0_76, %c33] : memref<1x8x336xf32, #tpu.memory_space<vmem>>, vector<1x1x256xf32>
    %151 = vector.shape_cast %150 : vector<1x1x256xf32> to vector<1x256xf32>
    %152 = vector.broadcast %151 : vector<1x256xf32> to vector<4x256xf32>
    %153 = arith.mulf %149, %152 : vector<4x256xf32>
    %154 = arith.addf %128, %153 : vector<4x256xf32>
    %c0_77 = arith.constant 0 : index
    %c4_78 = arith.constant 4 : index
    %c33_79 = arith.constant 33 : index
    %155 = vector.load %arg2[%c0_77, %c4_78, %c33_79] : memref<1x8x336xf32, #tpu.memory_space<vmem>>, vector<1x1x256xf32>
    %156 = vector.shape_cast %155 : vector<1x1x256xf32> to vector<1x256xf32>
    %157 = vector.broadcast %156 : vector<1x256xf32> to vector<4x256xf32>
    %158 = arith.mulf %149, %157 : vector<4x256xf32>
    %159 = arith.addf %133, %158 : vector<4x256xf32>
    %c0_80 = arith.constant 0 : index
    %c12 = arith.constant 12 : index
    %160 = vector.load %arg1[%c0_80, %c12] : memref<4x100xf32, #tpu.memory_space<vmem>>, vector<4x1xf32>
    %161 = vector.shape_cast %160 : vector<4x1xf32> to vector<4x1xf32>
    %162 = vector.broadcast %161 : vector<4x1xf32> to vector<4x256xf32>
    %c0_81 = arith.constant 0 : index
    %c0_82 = arith.constant 0 : index
    %c34 = arith.constant 34 : index
    %163 = vector.load %arg2[%c0_81, %c0_82, %c34] : memref<1x8x336xf32, #tpu.memory_space<vmem>>, vector<1x1x256xf32>
    %164 = vector.shape_cast %163 : vector<1x1x256xf32> to vector<1x256xf32>
    %165 = vector.broadcast %164 : vector<1x256xf32> to vector<4x256xf32>
    %166 = arith.mulf %162, %165 : vector<4x256xf32>
    %167 = arith.addf %141, %166 : vector<4x256xf32>
    %c0_83 = arith.constant 0 : index
    %c4_84 = arith.constant 4 : index
    %c34_85 = arith.constant 34 : index
    %168 = vector.load %arg2[%c0_83, %c4_84, %c34_85] : memref<1x8x336xf32, #tpu.memory_space<vmem>>, vector<1x1x256xf32>
    %169 = vector.shape_cast %168 : vector<1x1x256xf32> to vector<1x256xf32>
    %170 = vector.broadcast %169 : vector<1x256xf32> to vector<4x256xf32>
    %171 = arith.mulf %162, %170 : vector<4x256xf32>
    %172 = arith.addf %146, %171 : vector<4x256xf32>
    %c0_86 = arith.constant 0 : index
    %c13 = arith.constant 13 : index
    %173 = vector.load %arg1[%c0_86, %c13] : memref<4x100xf32, #tpu.memory_space<vmem>>, vector<4x1xf32>
    %174 = vector.shape_cast %173 : vector<4x1xf32> to vector<4x1xf32>
    %175 = vector.broadcast %174 : vector<4x1xf32> to vector<4x256xf32>
    %c0_87 = arith.constant 0 : index
    %c0_88 = arith.constant 0 : index
    %c35 = arith.constant 35 : index
    %176 = vector.load %arg2[%c0_87, %c0_88, %c35] : memref<1x8x336xf32, #tpu.memory_space<vmem>>, vector<1x1x256xf32>
    %177 = vector.shape_cast %176 : vector<1x1x256xf32> to vector<1x256xf32>
    %178 = vector.broadcast %177 : vector<1x256xf32> to vector<4x256xf32>
    %179 = arith.mulf %175, %178 : vector<4x256xf32>
    %180 = arith.addf %154, %179 : vector<4x256xf32>
    %c0_89 = arith.constant 0 : index
    %c4_90 = arith.constant 4 : index
    %c35_91 = arith.constant 35 : index
    %181 = vector.load %arg2[%c0_89, %c4_90, %c35_91] : memref<1x8x336xf32, #tpu.memory_space<vmem>>, vector<1x1x256xf32>
    %182 = vector.shape_cast %181 : vector<1x1x256xf32> to vector<1x256xf32>
    %183 = vector.broadcast %182 : vector<1x256xf32> to vector<4x256xf32>
    %184 = arith.mulf %175, %183 : vector<4x256xf32>
    %185 = arith.addf %159, %184 : vector<4x256xf32>
    %c0_92 = arith.constant 0 : index
    %c14 = arith.constant 14 : index
    %186 = vector.load %arg1[%c0_92, %c14] : memref<4x100xf32, #tpu.memory_space<vmem>>, vector<4x1xf32>
    %187 = vector.shape_cast %186 : vector<4x1xf32> to vector<4x1xf32>
    %188 = vector.broadcast %187 : vector<4x1xf32> to vector<4x256xf32>
    %c0_93 = arith.constant 0 : index
    %c0_94 = arith.constant 0 : index
    %c36 = arith.constant 36 : index
    %189 = vector.load %arg2[%c0_93, %c0_94, %c36] : memref<1x8x336xf32, #tpu.memory_space<vmem>>, vector<1x1x256xf32>
    %190 = vector.shape_cast %189 : vector<1x1x256xf32> to vector<1x256xf32>
    %191 = vector.broadcast %190 : vector<1x256xf32> to vector<4x256xf32>
    %192 = arith.mulf %188, %191 : vector<4x256xf32>
    %193 = arith.addf %167, %192 : vector<4x256xf32>
    %c0_95 = arith.constant 0 : index
    %c4_96 = arith.constant 4 : index
    %c36_97 = arith.constant 36 : index
    %194 = vector.load %arg2[%c0_95, %c4_96, %c36_97] : memref<1x8x336xf32, #tpu.memory_space<vmem>>, vector<1x1x256xf32>
    %195 = vector.shape_cast %194 : vector<1x1x256xf32> to vector<1x256xf32>
    %196 = vector.broadcast %195 : vector<1x256xf32> to vector<4x256xf32>
    %197 = arith.mulf %188, %196 : vector<4x256xf32>
    %198 = arith.addf %172, %197 : vector<4x256xf32>
    %c0_98 = arith.constant 0 : index
    %c15 = arith.constant 15 : index
    %199 = vector.load %arg1[%c0_98, %c15] : memref<4x100xf32, #tpu.memory_space<vmem>>, vector<4x1xf32>
    %200 = vector.shape_cast %199 : vector<4x1xf32> to vector<4x1xf32>
    %201 = vector.broadcast %200 : vector<4x1xf32> to vector<4x256xf32>
    %c0_99 = arith.constant 0 : index
    %c0_100 = arith.constant 0 : index
    %c48 = arith.constant 48 : index
    %202 = vector.load %arg2[%c0_99, %c0_100, %c48] : memref<1x8x336xf32, #tpu.memory_space<vmem>>, vector<1x1x256xf32>
    %203 = vector.shape_cast %202 : vector<1x1x256xf32> to vector<1x256xf32>
    %204 = vector.broadcast %203 : vector<1x256xf32> to vector<4x256xf32>
    %205 = arith.mulf %201, %204 : vector<4x256xf32>
    %206 = arith.addf %180, %205 : vector<4x256xf32>
    %c0_101 = arith.constant 0 : index
    %c4_102 = arith.constant 4 : index
    %c48_103 = arith.constant 48 : index
    %207 = vector.load %arg2[%c0_101, %c4_102, %c48_103] : memref<1x8x336xf32, #tpu.memory_space<vmem>>, vector<1x1x256xf32>
    %208 = vector.shape_cast %207 : vector<1x1x256xf32> to vector<1x256xf32>
    %209 = vector.broadcast %208 : vector<1x256xf32> to vector<4x256xf32>
    %210 = arith.mulf %201, %209 : vector<4x256xf32>
    %211 = arith.addf %185, %210 : vector<4x256xf32>
    %c0_104 = arith.constant 0 : index
    %c16_105 = arith.constant 16 : index
    %212 = vector.load %arg1[%c0_104, %c16_105] : memref<4x100xf32, #tpu.memory_space<vmem>>, vector<4x1xf32>
    %213 = vector.shape_cast %212 : vector<4x1xf32> to vector<4x1xf32>
    %214 = vector.broadcast %213 : vector<4x1xf32> to vector<4x256xf32>
    %c0_106 = arith.constant 0 : index
    %c0_107 = arith.constant 0 : index
    %c49 = arith.constant 49 : index
    %215 = vector.load %arg2[%c0_106, %c0_107, %c49] : memref<1x8x336xf32, #tpu.memory_space<vmem>>, vector<1x1x256xf32>
    %216 = vector.shape_cast %215 : vector<1x1x256xf32> to vector<1x256xf32>
    %217 = vector.broadcast %216 : vector<1x256xf32> to vector<4x256xf32>
    %218 = arith.mulf %214, %217 : vector<4x256xf32>
    %219 = arith.addf %193, %218 : vector<4x256xf32>
    %c0_108 = arith.constant 0 : index
    %c4_109 = arith.constant 4 : index
    %c49_110 = arith.constant 49 : index
    %220 = vector.load %arg2[%c0_108, %c4_109, %c49_110] : memref<1x8x336xf32, #tpu.memory_space<vmem>>, vector<1x1x256xf32>
    %221 = vector.shape_cast %220 : vector<1x1x256xf32> to vector<1x256xf32>
    %222 = vector.broadcast %221 : vector<1x256xf32> to vector<4x256xf32>
    %223 = arith.mulf %214, %222 : vector<4x256xf32>
    %224 = arith.addf %198, %223 : vector<4x256xf32>
    %c0_111 = arith.constant 0 : index
    %c17_112 = arith.constant 17 : index
    %225 = vector.load %arg1[%c0_111, %c17_112] : memref<4x100xf32, #tpu.memory_space<vmem>>, vector<4x1xf32>
    %226 = vector.shape_cast %225 : vector<4x1xf32> to vector<4x1xf32>
    %227 = vector.broadcast %226 : vector<4x1xf32> to vector<4x256xf32>
    %c0_113 = arith.constant 0 : index
    %c0_114 = arith.constant 0 : index
    %c50 = arith.constant 50 : index
    %228 = vector.load %arg2[%c0_113, %c0_114, %c50] : memref<1x8x336xf32, #tpu.memory_space<vmem>>, vector<1x1x256xf32>
    %229 = vector.shape_cast %228 : vector<1x1x256xf32> to vector<1x256xf32>
    %230 = vector.broadcast %229 : vector<1x256xf32> to vector<4x256xf32>
    %231 = arith.mulf %227, %230 : vector<4x256xf32>
    %232 = arith.addf %206, %231 : vector<4x256xf32>
    %c0_115 = arith.constant 0 : index
    %c4_116 = arith.constant 4 : index
    %c50_117 = arith.constant 50 : index
    %233 = vector.load %arg2[%c0_115, %c4_116, %c50_117] : memref<1x8x336xf32, #tpu.memory_space<vmem>>, vector<1x1x256xf32>
    %234 = vector.shape_cast %233 : vector<1x1x256xf32> to vector<1x256xf32>
    %235 = vector.broadcast %234 : vector<1x256xf32> to vector<4x256xf32>
    %236 = arith.mulf %227, %235 : vector<4x256xf32>
    %237 = arith.addf %211, %236 : vector<4x256xf32>
    %c0_118 = arith.constant 0 : index
    %c18_119 = arith.constant 18 : index
    %238 = vector.load %arg1[%c0_118, %c18_119] : memref<4x100xf32, #tpu.memory_space<vmem>>, vector<4x1xf32>
    %239 = vector.shape_cast %238 : vector<4x1xf32> to vector<4x1xf32>
    %240 = vector.broadcast %239 : vector<4x1xf32> to vector<4x256xf32>
    %c0_120 = arith.constant 0 : index
    %c0_121 = arith.constant 0 : index
    %c51 = arith.constant 51 : index
    %241 = vector.load %arg2[%c0_120, %c0_121, %c51] : memref<1x8x336xf32, #tpu.memory_space<vmem>>, vector<1x1x256xf32>
    %242 = vector.shape_cast %241 : vector<1x1x256xf32> to vector<1x256xf32>
    %243 = vector.broadcast %242 : vector<1x256xf32> to vector<4x256xf32>
    %244 = arith.mulf %240, %243 : vector<4x256xf32>
    %245 = arith.addf %219, %244 : vector<4x256xf32>
    %c0_122 = arith.constant 0 : index
    %c4_123 = arith.constant 4 : index
    %c51_124 = arith.constant 51 : index
    %246 = vector.load %arg2[%c0_122, %c4_123, %c51_124] : memref<1x8x336xf32, #tpu.memory_space<vmem>>, vector<1x1x256xf32>
    %247 = vector.shape_cast %246 : vector<1x1x256xf32> to vector<1x256xf32>
    %248 = vector.broadcast %247 : vector<1x256xf32> to vector<4x256xf32>
    %249 = arith.mulf %240, %248 : vector<4x256xf32>
    %250 = arith.addf %224, %249 : vector<4x256xf32>
    %c0_125 = arith.constant 0 : index
    %c19_126 = arith.constant 19 : index
    %251 = vector.load %arg1[%c0_125, %c19_126] : memref<4x100xf32, #tpu.memory_space<vmem>>, vector<4x1xf32>
    %252 = vector.shape_cast %251 : vector<4x1xf32> to vector<4x1xf32>
    %253 = vector.broadcast %252 : vector<4x1xf32> to vector<4x256xf32>
    %c0_127 = arith.constant 0 : index
    %c0_128 = arith.constant 0 : index
    %c52 = arith.constant 52 : index
    %254 = vector.load %arg2[%c0_127, %c0_128, %c52] : memref<1x8x336xf32, #tpu.memory_space<vmem>>, vector<1x1x256xf32>
    %255 = vector.shape_cast %254 : vector<1x1x256xf32> to vector<1x256xf32>
    %256 = vector.broadcast %255 : vector<1x256xf32> to vector<4x256xf32>
    %257 = arith.mulf %253, %256 : vector<4x256xf32>
    %258 = arith.addf %232, %257 : vector<4x256xf32>
    %c0_129 = arith.constant 0 : index
    %c4_130 = arith.constant 4 : index
    %c52_131 = arith.constant 52 : index
    %259 = vector.load %arg2[%c0_129, %c4_130, %c52_131] : memref<1x8x336xf32, #tpu.memory_space<vmem>>, vector<1x1x256xf32>
    %260 = vector.shape_cast %259 : vector<1x1x256xf32> to vector<1x256xf32>
    %261 = vector.broadcast %260 : vector<1x256xf32> to vector<4x256xf32>
    %262 = arith.mulf %253, %261 : vector<4x256xf32>
    %263 = arith.addf %237, %262 : vector<4x256xf32>
    %c0_132 = arith.constant 0 : index
    %c20_133 = arith.constant 20 : index
    %264 = vector.load %arg1[%c0_132, %c20_133] : memref<4x100xf32, #tpu.memory_space<vmem>>, vector<4x1xf32>
    %265 = vector.shape_cast %264 : vector<4x1xf32> to vector<4x1xf32>
    %266 = vector.broadcast %265 : vector<4x1xf32> to vector<4x256xf32>
    %c0_134 = arith.constant 0 : index
    %c0_135 = arith.constant 0 : index
    %c64 = arith.constant 64 : index
    %267 = vector.load %arg2[%c0_134, %c0_135, %c64] : memref<1x8x336xf32, #tpu.memory_space<vmem>>, vector<1x1x256xf32>
    %268 = vector.shape_cast %267 : vector<1x1x256xf32> to vector<1x256xf32>
    %269 = vector.broadcast %268 : vector<1x256xf32> to vector<4x256xf32>
    %270 = arith.mulf %266, %269 : vector<4x256xf32>
    %271 = arith.addf %245, %270 : vector<4x256xf32>
    %c0_136 = arith.constant 0 : index
    %c4_137 = arith.constant 4 : index
    %c64_138 = arith.constant 64 : index
    %272 = vector.load %arg2[%c0_136, %c4_137, %c64_138] : memref<1x8x336xf32, #tpu.memory_space<vmem>>, vector<1x1x256xf32>
    %273 = vector.shape_cast %272 : vector<1x1x256xf32> to vector<1x256xf32>
    %274 = vector.broadcast %273 : vector<1x256xf32> to vector<4x256xf32>
    %275 = arith.mulf %266, %274 : vector<4x256xf32>
    %276 = arith.addf %250, %275 : vector<4x256xf32>
    %c0_139 = arith.constant 0 : index
    %c21 = arith.constant 21 : index
    %277 = vector.load %arg1[%c0_139, %c21] : memref<4x100xf32, #tpu.memory_space<vmem>>, vector<4x1xf32>
    %278 = vector.shape_cast %277 : vector<4x1xf32> to vector<4x1xf32>
    %279 = vector.broadcast %278 : vector<4x1xf32> to vector<4x256xf32>
    %c0_140 = arith.constant 0 : index
    %c0_141 = arith.constant 0 : index
    %c65 = arith.constant 65 : index
    %280 = vector.load %arg2[%c0_140, %c0_141, %c65] : memref<1x8x336xf32, #tpu.memory_space<vmem>>, vector<1x1x256xf32>
    %281 = vector.shape_cast %280 : vector<1x1x256xf32> to vector<1x256xf32>
    %282 = vector.broadcast %281 : vector<1x256xf32> to vector<4x256xf32>
    %283 = arith.mulf %279, %282 : vector<4x256xf32>
    %284 = arith.addf %258, %283 : vector<4x256xf32>
    %c0_142 = arith.constant 0 : index
    %c4_143 = arith.constant 4 : index
    %c65_144 = arith.constant 65 : index
    %285 = vector.load %arg2[%c0_142, %c4_143, %c65_144] : memref<1x8x336xf32, #tpu.memory_space<vmem>>, vector<1x1x256xf32>
    %286 = vector.shape_cast %285 : vector<1x1x256xf32> to vector<1x256xf32>
    %287 = vector.broadcast %286 : vector<1x256xf32> to vector<4x256xf32>
    %288 = arith.mulf %279, %287 : vector<4x256xf32>
    %289 = arith.addf %263, %288 : vector<4x256xf32>
    %c0_145 = arith.constant 0 : index
    %c22 = arith.constant 22 : index
    %290 = vector.load %arg1[%c0_145, %c22] : memref<4x100xf32, #tpu.memory_space<vmem>>, vector<4x1xf32>
    %291 = vector.shape_cast %290 : vector<4x1xf32> to vector<4x1xf32>
    %292 = vector.broadcast %291 : vector<4x1xf32> to vector<4x256xf32>
    %c0_146 = arith.constant 0 : index
    %c0_147 = arith.constant 0 : index
    %c66 = arith.constant 66 : index
    %293 = vector.load %arg2[%c0_146, %c0_147, %c66] : memref<1x8x336xf32, #tpu.memory_space<vmem>>, vector<1x1x256xf32>
    %294 = vector.shape_cast %293 : vector<1x1x256xf32> to vector<1x256xf32>
    %295 = vector.broadcast %294 : vector<1x256xf32> to vector<4x256xf32>
    %296 = arith.mulf %292, %295 : vector<4x256xf32>
    %297 = arith.addf %271, %296 : vector<4x256xf32>
    %c0_148 = arith.constant 0 : index
    %c4_149 = arith.constant 4 : index
    %c66_150 = arith.constant 66 : index
    %298 = vector.load %arg2[%c0_148, %c4_149, %c66_150] : memref<1x8x336xf32, #tpu.memory_space<vmem>>, vector<1x1x256xf32>
    %299 = vector.shape_cast %298 : vector<1x1x256xf32> to vector<1x256xf32>
    %300 = vector.broadcast %299 : vector<1x256xf32> to vector<4x256xf32>
    %301 = arith.mulf %292, %300 : vector<4x256xf32>
    %302 = arith.addf %276, %301 : vector<4x256xf32>
    %c0_151 = arith.constant 0 : index
    %c23 = arith.constant 23 : index
    %303 = vector.load %arg1[%c0_151, %c23] : memref<4x100xf32, #tpu.memory_space<vmem>>, vector<4x1xf32>
    %304 = vector.shape_cast %303 : vector<4x1xf32> to vector<4x1xf32>
    %305 = vector.broadcast %304 : vector<4x1xf32> to vector<4x256xf32>
    %c0_152 = arith.constant 0 : index
    %c0_153 = arith.constant 0 : index
    %c67 = arith.constant 67 : index
    %306 = vector.load %arg2[%c0_152, %c0_153, %c67] : memref<1x8x336xf32, #tpu.memory_space<vmem>>, vector<1x1x256xf32>
    %307 = vector.shape_cast %306 : vector<1x1x256xf32> to vector<1x256xf32>
    %308 = vector.broadcast %307 : vector<1x256xf32> to vector<4x256xf32>
    %309 = arith.mulf %305, %308 : vector<4x256xf32>
    %310 = arith.addf %284, %309 : vector<4x256xf32>
    %c0_154 = arith.constant 0 : index
    %c4_155 = arith.constant 4 : index
    %c67_156 = arith.constant 67 : index
    %311 = vector.load %arg2[%c0_154, %c4_155, %c67_156] : memref<1x8x336xf32, #tpu.memory_space<vmem>>, vector<1x1x256xf32>
    %312 = vector.shape_cast %311 : vector<1x1x256xf32> to vector<1x256xf32>
    %313 = vector.broadcast %312 : vector<1x256xf32> to vector<4x256xf32>
    %314 = arith.mulf %305, %313 : vector<4x256xf32>
    %315 = arith.addf %289, %314 : vector<4x256xf32>
    %c0_157 = arith.constant 0 : index
    %c24 = arith.constant 24 : index
    %316 = vector.load %arg1[%c0_157, %c24] : memref<4x100xf32, #tpu.memory_space<vmem>>, vector<4x1xf32>
    %317 = vector.shape_cast %316 : vector<4x1xf32> to vector<4x1xf32>
    %318 = vector.broadcast %317 : vector<4x1xf32> to vector<4x256xf32>
    %c0_158 = arith.constant 0 : index
    %c0_159 = arith.constant 0 : index
    %c68 = arith.constant 68 : index
    %319 = vector.load %arg2[%c0_158, %c0_159, %c68] : memref<1x8x336xf32, #tpu.memory_space<vmem>>, vector<1x1x256xf32>
    %320 = vector.shape_cast %319 : vector<1x1x256xf32> to vector<1x256xf32>
    %321 = vector.broadcast %320 : vector<1x256xf32> to vector<4x256xf32>
    %322 = arith.mulf %318, %321 : vector<4x256xf32>
    %323 = arith.addf %297, %322 : vector<4x256xf32>
    %c0_160 = arith.constant 0 : index
    %c4_161 = arith.constant 4 : index
    %c68_162 = arith.constant 68 : index
    %324 = vector.load %arg2[%c0_160, %c4_161, %c68_162] : memref<1x8x336xf32, #tpu.memory_space<vmem>>, vector<1x1x256xf32>
    %325 = vector.shape_cast %324 : vector<1x1x256xf32> to vector<1x256xf32>
    %326 = vector.broadcast %325 : vector<1x256xf32> to vector<4x256xf32>
    %327 = arith.mulf %318, %326 : vector<4x256xf32>
    %328 = arith.addf %302, %327 : vector<4x256xf32>
    %c0_163 = arith.constant 0 : index
    %c25 = arith.constant 25 : index
    %329 = vector.load %arg1[%c0_163, %c25] : memref<4x100xf32, #tpu.memory_space<vmem>>, vector<4x1xf32>
    %330 = vector.shape_cast %329 : vector<4x1xf32> to vector<4x1xf32>
    %331 = vector.broadcast %330 : vector<4x1xf32> to vector<4x256xf32>
    %c0_164 = arith.constant 0 : index
    %c1_165 = arith.constant 1 : index
    %c0_166 = arith.constant 0 : index
    %332 = vector.load %arg2[%c0_164, %c1_165, %c0_166] : memref<1x8x336xf32, #tpu.memory_space<vmem>>, vector<1x1x256xf32>
    %333 = vector.shape_cast %332 : vector<1x1x256xf32> to vector<1x256xf32>
    %334 = vector.broadcast %333 : vector<1x256xf32> to vector<4x256xf32>
    %335 = arith.mulf %331, %334 : vector<4x256xf32>
    %336 = arith.addf %310, %335 : vector<4x256xf32>
    %c0_167 = arith.constant 0 : index
    %c5_168 = arith.constant 5 : index
    %c0_169 = arith.constant 0 : index
    %337 = vector.load %arg2[%c0_167, %c5_168, %c0_169] : memref<1x8x336xf32, #tpu.memory_space<vmem>>, vector<1x1x256xf32>
    %338 = vector.shape_cast %337 : vector<1x1x256xf32> to vector<1x256xf32>
    %339 = vector.broadcast %338 : vector<1x256xf32> to vector<4x256xf32>
    %340 = arith.mulf %331, %339 : vector<4x256xf32>
    %341 = arith.addf %315, %340 : vector<4x256xf32>
    %c0_170 = arith.constant 0 : index
    %c26 = arith.constant 26 : index
    %342 = vector.load %arg1[%c0_170, %c26] : memref<4x100xf32, #tpu.memory_space<vmem>>, vector<4x1xf32>
    %343 = vector.shape_cast %342 : vector<4x1xf32> to vector<4x1xf32>
    %344 = vector.broadcast %343 : vector<4x1xf32> to vector<4x256xf32>
    %c0_171 = arith.constant 0 : index
    %c1_172 = arith.constant 1 : index
    %c1_173 = arith.constant 1 : index
    %345 = vector.load %arg2[%c0_171, %c1_172, %c1_173] : memref<1x8x336xf32, #tpu.memory_space<vmem>>, vector<1x1x256xf32>
    %346 = vector.shape_cast %345 : vector<1x1x256xf32> to vector<1x256xf32>
    %347 = vector.broadcast %346 : vector<1x256xf32> to vector<4x256xf32>
    %348 = arith.mulf %344, %347 : vector<4x256xf32>
    %349 = arith.addf %323, %348 : vector<4x256xf32>
    %c0_174 = arith.constant 0 : index
    %c5_175 = arith.constant 5 : index
    %c1_176 = arith.constant 1 : index
    %350 = vector.load %arg2[%c0_174, %c5_175, %c1_176] : memref<1x8x336xf32, #tpu.memory_space<vmem>>, vector<1x1x256xf32>
    %351 = vector.shape_cast %350 : vector<1x1x256xf32> to vector<1x256xf32>
    %352 = vector.broadcast %351 : vector<1x256xf32> to vector<4x256xf32>
    %353 = arith.mulf %344, %352 : vector<4x256xf32>
    %354 = arith.addf %328, %353 : vector<4x256xf32>
    %c0_177 = arith.constant 0 : index
    %c27 = arith.constant 27 : index
    %355 = vector.load %arg1[%c0_177, %c27] : memref<4x100xf32, #tpu.memory_space<vmem>>, vector<4x1xf32>
    %356 = vector.shape_cast %355 : vector<4x1xf32> to vector<4x1xf32>
    %357 = vector.broadcast %356 : vector<4x1xf32> to vector<4x256xf32>
    %c0_178 = arith.constant 0 : index
    %c1_179 = arith.constant 1 : index
    %c2_180 = arith.constant 2 : index
    %358 = vector.load %arg2[%c0_178, %c1_179, %c2_180] : memref<1x8x336xf32, #tpu.memory_space<vmem>>, vector<1x1x256xf32>
    %359 = vector.shape_cast %358 : vector<1x1x256xf32> to vector<1x256xf32>
    %360 = vector.broadcast %359 : vector<1x256xf32> to vector<4x256xf32>
    %361 = arith.mulf %357, %360 : vector<4x256xf32>
    %362 = arith.addf %336, %361 : vector<4x256xf32>
    %c0_181 = arith.constant 0 : index
    %c5_182 = arith.constant 5 : index
    %c2_183 = arith.constant 2 : index
    %363 = vector.load %arg2[%c0_181, %c5_182, %c2_183] : memref<1x8x336xf32, #tpu.memory_space<vmem>>, vector<1x1x256xf32>
    %364 = vector.shape_cast %363 : vector<1x1x256xf32> to vector<1x256xf32>
    %365 = vector.broadcast %364 : vector<1x256xf32> to vector<4x256xf32>
    %366 = arith.mulf %357, %365 : vector<4x256xf32>
    %367 = arith.addf %341, %366 : vector<4x256xf32>
    %c0_184 = arith.constant 0 : index
    %c28 = arith.constant 28 : index
    %368 = vector.load %arg1[%c0_184, %c28] : memref<4x100xf32, #tpu.memory_space<vmem>>, vector<4x1xf32>
    %369 = vector.shape_cast %368 : vector<4x1xf32> to vector<4x1xf32>
    %370 = vector.broadcast %369 : vector<4x1xf32> to vector<4x256xf32>
    %c0_185 = arith.constant 0 : index
    %c1_186 = arith.constant 1 : index
    %c3_187 = arith.constant 3 : index
    %371 = vector.load %arg2[%c0_185, %c1_186, %c3_187] : memref<1x8x336xf32, #tpu.memory_space<vmem>>, vector<1x1x256xf32>
    %372 = vector.shape_cast %371 : vector<1x1x256xf32> to vector<1x256xf32>
    %373 = vector.broadcast %372 : vector<1x256xf32> to vector<4x256xf32>
    %374 = arith.mulf %370, %373 : vector<4x256xf32>
    %375 = arith.addf %349, %374 : vector<4x256xf32>
    %c0_188 = arith.constant 0 : index
    %c5_189 = arith.constant 5 : index
    %c3_190 = arith.constant 3 : index
    %376 = vector.load %arg2[%c0_188, %c5_189, %c3_190] : memref<1x8x336xf32, #tpu.memory_space<vmem>>, vector<1x1x256xf32>
    %377 = vector.shape_cast %376 : vector<1x1x256xf32> to vector<1x256xf32>
    %378 = vector.broadcast %377 : vector<1x256xf32> to vector<4x256xf32>
    %379 = arith.mulf %370, %378 : vector<4x256xf32>
    %380 = arith.addf %354, %379 : vector<4x256xf32>
    %c0_191 = arith.constant 0 : index
    %c29 = arith.constant 29 : index
    %381 = vector.load %arg1[%c0_191, %c29] : memref<4x100xf32, #tpu.memory_space<vmem>>, vector<4x1xf32>
    %382 = vector.shape_cast %381 : vector<4x1xf32> to vector<4x1xf32>
    %383 = vector.broadcast %382 : vector<4x1xf32> to vector<4x256xf32>
    %c0_192 = arith.constant 0 : index
    %c1_193 = arith.constant 1 : index
    %c4_194 = arith.constant 4 : index
    %384 = vector.load %arg2[%c0_192, %c1_193, %c4_194] : memref<1x8x336xf32, #tpu.memory_space<vmem>>, vector<1x1x256xf32>
    %385 = vector.shape_cast %384 : vector<1x1x256xf32> to vector<1x256xf32>
    %386 = vector.broadcast %385 : vector<1x256xf32> to vector<4x256xf32>
    %387 = arith.mulf %383, %386 : vector<4x256xf32>
    %388 = arith.addf %362, %387 : vector<4x256xf32>
    %c0_195 = arith.constant 0 : index
    %c5_196 = arith.constant 5 : index
    %c4_197 = arith.constant 4 : index
    %389 = vector.load %arg2[%c0_195, %c5_196, %c4_197] : memref<1x8x336xf32, #tpu.memory_space<vmem>>, vector<1x1x256xf32>
    %390 = vector.shape_cast %389 : vector<1x1x256xf32> to vector<1x256xf32>
    %391 = vector.broadcast %390 : vector<1x256xf32> to vector<4x256xf32>
    %392 = arith.mulf %383, %391 : vector<4x256xf32>
    %393 = arith.addf %367, %392 : vector<4x256xf32>
    %c0_198 = arith.constant 0 : index
    %c30 = arith.constant 30 : index
    %394 = vector.load %arg1[%c0_198, %c30] : memref<4x100xf32, #tpu.memory_space<vmem>>, vector<4x1xf32>
    %395 = vector.shape_cast %394 : vector<4x1xf32> to vector<4x1xf32>
    %396 = vector.broadcast %395 : vector<4x1xf32> to vector<4x256xf32>
    %c0_199 = arith.constant 0 : index
    %c1_200 = arith.constant 1 : index
    %c16_201 = arith.constant 16 : index
    %397 = vector.load %arg2[%c0_199, %c1_200, %c16_201] : memref<1x8x336xf32, #tpu.memory_space<vmem>>, vector<1x1x256xf32>
    %398 = vector.shape_cast %397 : vector<1x1x256xf32> to vector<1x256xf32>
    %399 = vector.broadcast %398 : vector<1x256xf32> to vector<4x256xf32>
    %400 = arith.mulf %396, %399 : vector<4x256xf32>
    %401 = arith.addf %375, %400 : vector<4x256xf32>
    %c0_202 = arith.constant 0 : index
    %c5_203 = arith.constant 5 : index
    %c16_204 = arith.constant 16 : index
    %402 = vector.load %arg2[%c0_202, %c5_203, %c16_204] : memref<1x8x336xf32, #tpu.memory_space<vmem>>, vector<1x1x256xf32>
    %403 = vector.shape_cast %402 : vector<1x1x256xf32> to vector<1x256xf32>
    %404 = vector.broadcast %403 : vector<1x256xf32> to vector<4x256xf32>
    %405 = arith.mulf %396, %404 : vector<4x256xf32>
    %406 = arith.addf %380, %405 : vector<4x256xf32>
    %c0_205 = arith.constant 0 : index
    %c31 = arith.constant 31 : index
    %407 = vector.load %arg1[%c0_205, %c31] : memref<4x100xf32, #tpu.memory_space<vmem>>, vector<4x1xf32>
    %408 = vector.shape_cast %407 : vector<4x1xf32> to vector<4x1xf32>
    %409 = vector.broadcast %408 : vector<4x1xf32> to vector<4x256xf32>
    %c0_206 = arith.constant 0 : index
    %c1_207 = arith.constant 1 : index
    %c17_208 = arith.constant 17 : index
    %410 = vector.load %arg2[%c0_206, %c1_207, %c17_208] : memref<1x8x336xf32, #tpu.memory_space<vmem>>, vector<1x1x256xf32>
    %411 = vector.shape_cast %410 : vector<1x1x256xf32> to vector<1x256xf32>
    %412 = vector.broadcast %411 : vector<1x256xf32> to vector<4x256xf32>
    %413 = arith.mulf %409, %412 : vector<4x256xf32>
    %414 = arith.addf %388, %413 : vector<4x256xf32>
    %c0_209 = arith.constant 0 : index
    %c5_210 = arith.constant 5 : index
    %c17_211 = arith.constant 17 : index
    %415 = vector.load %arg2[%c0_209, %c5_210, %c17_211] : memref<1x8x336xf32, #tpu.memory_space<vmem>>, vector<1x1x256xf32>
    %416 = vector.shape_cast %415 : vector<1x1x256xf32> to vector<1x256xf32>
    %417 = vector.broadcast %416 : vector<1x256xf32> to vector<4x256xf32>
    %418 = arith.mulf %409, %417 : vector<4x256xf32>
    %419 = arith.addf %393, %418 : vector<4x256xf32>
    %c0_212 = arith.constant 0 : index
    %c32_213 = arith.constant 32 : index
    %420 = vector.load %arg1[%c0_212, %c32_213] : memref<4x100xf32, #tpu.memory_space<vmem>>, vector<4x1xf32>
    %421 = vector.shape_cast %420 : vector<4x1xf32> to vector<4x1xf32>
    %422 = vector.broadcast %421 : vector<4x1xf32> to vector<4x256xf32>
    %c0_214 = arith.constant 0 : index
    %c1_215 = arith.constant 1 : index
    %c18_216 = arith.constant 18 : index
    %423 = vector.load %arg2[%c0_214, %c1_215, %c18_216] : memref<1x8x336xf32, #tpu.memory_space<vmem>>, vector<1x1x256xf32>
    %424 = vector.shape_cast %423 : vector<1x1x256xf32> to vector<1x256xf32>
    %425 = vector.broadcast %424 : vector<1x256xf32> to vector<4x256xf32>
    %426 = arith.mulf %422, %425 : vector<4x256xf32>
    %427 = arith.addf %401, %426 : vector<4x256xf32>
    %c0_217 = arith.constant 0 : index
    %c5_218 = arith.constant 5 : index
    %c18_219 = arith.constant 18 : index
    %428 = vector.load %arg2[%c0_217, %c5_218, %c18_219] : memref<1x8x336xf32, #tpu.memory_space<vmem>>, vector<1x1x256xf32>
    %429 = vector.shape_cast %428 : vector<1x1x256xf32> to vector<1x256xf32>
    %430 = vector.broadcast %429 : vector<1x256xf32> to vector<4x256xf32>
    %431 = arith.mulf %422, %430 : vector<4x256xf32>
    %432 = arith.addf %406, %431 : vector<4x256xf32>
    %c0_220 = arith.constant 0 : index
    %c33_221 = arith.constant 33 : index
    %433 = vector.load %arg1[%c0_220, %c33_221] : memref<4x100xf32, #tpu.memory_space<vmem>>, vector<4x1xf32>
    %434 = vector.shape_cast %433 : vector<4x1xf32> to vector<4x1xf32>
    %435 = vector.broadcast %434 : vector<4x1xf32> to vector<4x256xf32>
    %c0_222 = arith.constant 0 : index
    %c1_223 = arith.constant 1 : index
    %c19_224 = arith.constant 19 : index
    %436 = vector.load %arg2[%c0_222, %c1_223, %c19_224] : memref<1x8x336xf32, #tpu.memory_space<vmem>>, vector<1x1x256xf32>
    %437 = vector.shape_cast %436 : vector<1x1x256xf32> to vector<1x256xf32>
    %438 = vector.broadcast %437 : vector<1x256xf32> to vector<4x256xf32>
    %439 = arith.mulf %435, %438 : vector<4x256xf32>
    %440 = arith.addf %414, %439 : vector<4x256xf32>
    %c0_225 = arith.constant 0 : index
    %c5_226 = arith.constant 5 : index
    %c19_227 = arith.constant 19 : index
    %441 = vector.load %arg2[%c0_225, %c5_226, %c19_227] : memref<1x8x336xf32, #tpu.memory_space<vmem>>, vector<1x1x256xf32>
    %442 = vector.shape_cast %441 : vector<1x1x256xf32> to vector<1x256xf32>
    %443 = vector.broadcast %442 : vector<1x256xf32> to vector<4x256xf32>
    %444 = arith.mulf %435, %443 : vector<4x256xf32>
    %445 = arith.addf %419, %444 : vector<4x256xf32>
    %c0_228 = arith.constant 0 : index
    %c34_229 = arith.constant 34 : index
    %446 = vector.load %arg1[%c0_228, %c34_229] : memref<4x100xf32, #tpu.memory_space<vmem>>, vector<4x1xf32>
    %447 = vector.shape_cast %446 : vector<4x1xf32> to vector<4x1xf32>
    %448 = vector.broadcast %447 : vector<4x1xf32> to vector<4x256xf32>
    %c0_230 = arith.constant 0 : index
    %c1_231 = arith.constant 1 : index
    %c20_232 = arith.constant 20 : index
    %449 = vector.load %arg2[%c0_230, %c1_231, %c20_232] : memref<1x8x336xf32, #tpu.memory_space<vmem>>, vector<1x1x256xf32>
    %450 = vector.shape_cast %449 : vector<1x1x256xf32> to vector<1x256xf32>
    %451 = vector.broadcast %450 : vector<1x256xf32> to vector<4x256xf32>
    %452 = arith.mulf %448, %451 : vector<4x256xf32>
    %453 = arith.addf %427, %452 : vector<4x256xf32>
    %c0_233 = arith.constant 0 : index
    %c5_234 = arith.constant 5 : index
    %c20_235 = arith.constant 20 : index
    %454 = vector.load %arg2[%c0_233, %c5_234, %c20_235] : memref<1x8x336xf32, #tpu.memory_space<vmem>>, vector<1x1x256xf32>
    %455 = vector.shape_cast %454 : vector<1x1x256xf32> to vector<1x256xf32>
    %456 = vector.broadcast %455 : vector<1x256xf32> to vector<4x256xf32>
    %457 = arith.mulf %448, %456 : vector<4x256xf32>
    %458 = arith.addf %432, %457 : vector<4x256xf32>
    %c0_236 = arith.constant 0 : index
    %c35_237 = arith.constant 35 : index
    %459 = vector.load %arg1[%c0_236, %c35_237] : memref<4x100xf32, #tpu.memory_space<vmem>>, vector<4x1xf32>
    %460 = vector.shape_cast %459 : vector<4x1xf32> to vector<4x1xf32>
    %461 = vector.broadcast %460 : vector<4x1xf32> to vector<4x256xf32>
    %c0_238 = arith.constant 0 : index
    %c1_239 = arith.constant 1 : index
    %c32_240 = arith.constant 32 : index
    %462 = vector.load %arg2[%c0_238, %c1_239, %c32_240] : memref<1x8x336xf32, #tpu.memory_space<vmem>>, vector<1x1x256xf32>
    %463 = vector.shape_cast %462 : vector<1x1x256xf32> to vector<1x256xf32>
    %464 = vector.broadcast %463 : vector<1x256xf32> to vector<4x256xf32>
    %465 = arith.mulf %461, %464 : vector<4x256xf32>
    %466 = arith.addf %440, %465 : vector<4x256xf32>
    %c0_241 = arith.constant 0 : index
    %c5_242 = arith.constant 5 : index
    %c32_243 = arith.constant 32 : index
    %467 = vector.load %arg2[%c0_241, %c5_242, %c32_243] : memref<1x8x336xf32, #tpu.memory_space<vmem>>, vector<1x1x256xf32>
    %468 = vector.shape_cast %467 : vector<1x1x256xf32> to vector<1x256xf32>
    %469 = vector.broadcast %468 : vector<1x256xf32> to vector<4x256xf32>
    %470 = arith.mulf %461, %469 : vector<4x256xf32>
    %471 = arith.addf %445, %470 : vector<4x256xf32>
    %c0_244 = arith.constant 0 : index
    %c36_245 = arith.constant 36 : index
    %472 = vector.load %arg1[%c0_244, %c36_245] : memref<4x100xf32, #tpu.memory_space<vmem>>, vector<4x1xf32>
    %473 = vector.shape_cast %472 : vector<4x1xf32> to vector<4x1xf32>
    %474 = vector.broadcast %473 : vector<4x1xf32> to vector<4x256xf32>
    %c0_246 = arith.constant 0 : index
    %c1_247 = arith.constant 1 : index
    %c33_248 = arith.constant 33 : index
    %475 = vector.load %arg2[%c0_246, %c1_247, %c33_248] : memref<1x8x336xf32, #tpu.memory_space<vmem>>, vector<1x1x256xf32>
    %476 = vector.shape_cast %475 : vector<1x1x256xf32> to vector<1x256xf32>
    %477 = vector.broadcast %476 : vector<1x256xf32> to vector<4x256xf32>
    %478 = arith.mulf %474, %477 : vector<4x256xf32>
    %479 = arith.addf %453, %478 : vector<4x256xf32>
    %c0_249 = arith.constant 0 : index
    %c5_250 = arith.constant 5 : index
    %c33_251 = arith.constant 33 : index
    %480 = vector.load %arg2[%c0_249, %c5_250, %c33_251] : memref<1x8x336xf32, #tpu.memory_space<vmem>>, vector<1x1x256xf32>
    %481 = vector.shape_cast %480 : vector<1x1x256xf32> to vector<1x256xf32>
    %482 = vector.broadcast %481 : vector<1x256xf32> to vector<4x256xf32>
    %483 = arith.mulf %474, %482 : vector<4x256xf32>
    %484 = arith.addf %458, %483 : vector<4x256xf32>
    %c0_252 = arith.constant 0 : index
    %c37 = arith.constant 37 : index
    %485 = vector.load %arg1[%c0_252, %c37] : memref<4x100xf32, #tpu.memory_space<vmem>>, vector<4x1xf32>
    %486 = vector.shape_cast %485 : vector<4x1xf32> to vector<4x1xf32>
    %487 = vector.broadcast %486 : vector<4x1xf32> to vector<4x256xf32>
    %c0_253 = arith.constant 0 : index
    %c1_254 = arith.constant 1 : index
    %c34_255 = arith.constant 34 : index
    %488 = vector.load %arg2[%c0_253, %c1_254, %c34_255] : memref<1x8x336xf32, #tpu.memory_space<vmem>>, vector<1x1x256xf32>
    %489 = vector.shape_cast %488 : vector<1x1x256xf32> to vector<1x256xf32>
    %490 = vector.broadcast %489 : vector<1x256xf32> to vector<4x256xf32>
    %491 = arith.mulf %487, %490 : vector<4x256xf32>
    %492 = arith.addf %466, %491 : vector<4x256xf32>
    %c0_256 = arith.constant 0 : index
    %c5_257 = arith.constant 5 : index
    %c34_258 = arith.constant 34 : index
    %493 = vector.load %arg2[%c0_256, %c5_257, %c34_258] : memref<1x8x336xf32, #tpu.memory_space<vmem>>, vector<1x1x256xf32>
    %494 = vector.shape_cast %493 : vector<1x1x256xf32> to vector<1x256xf32>
    %495 = vector.broadcast %494 : vector<1x256xf32> to vector<4x256xf32>
    %496 = arith.mulf %487, %495 : vector<4x256xf32>
    %497 = arith.addf %471, %496 : vector<4x256xf32>
    %c0_259 = arith.constant 0 : index
    %c38 = arith.constant 38 : index
    %498 = vector.load %arg1[%c0_259, %c38] : memref<4x100xf32, #tpu.memory_space<vmem>>, vector<4x1xf32>
    %499 = vector.shape_cast %498 : vector<4x1xf32> to vector<4x1xf32>
    %500 = vector.broadcast %499 : vector<4x1xf32> to vector<4x256xf32>
    %c0_260 = arith.constant 0 : index
    %c1_261 = arith.constant 1 : index
    %c35_262 = arith.constant 35 : index
    %501 = vector.load %arg2[%c0_260, %c1_261, %c35_262] : memref<1x8x336xf32, #tpu.memory_space<vmem>>, vector<1x1x256xf32>
    %502 = vector.shape_cast %501 : vector<1x1x256xf32> to vector<1x256xf32>
    %503 = vector.broadcast %502 : vector<1x256xf32> to vector<4x256xf32>
    %504 = arith.mulf %500, %503 : vector<4x256xf32>
    %505 = arith.addf %479, %504 : vector<4x256xf32>
    %c0_263 = arith.constant 0 : index
    %c5_264 = arith.constant 5 : index
    %c35_265 = arith.constant 35 : index
    %506 = vector.load %arg2[%c0_263, %c5_264, %c35_265] : memref<1x8x336xf32, #tpu.memory_space<vmem>>, vector<1x1x256xf32>
    %507 = vector.shape_cast %506 : vector<1x1x256xf32> to vector<1x256xf32>
    %508 = vector.broadcast %507 : vector<1x256xf32> to vector<4x256xf32>
    %509 = arith.mulf %500, %508 : vector<4x256xf32>
    %510 = arith.addf %484, %509 : vector<4x256xf32>
    %c0_266 = arith.constant 0 : index
    %c39 = arith.constant 39 : index
    %511 = vector.load %arg1[%c0_266, %c39] : memref<4x100xf32, #tpu.memory_space<vmem>>, vector<4x1xf32>
    %512 = vector.shape_cast %511 : vector<4x1xf32> to vector<4x1xf32>
    %513 = vector.broadcast %512 : vector<4x1xf32> to vector<4x256xf32>
    %c0_267 = arith.constant 0 : index
    %c1_268 = arith.constant 1 : index
    %c36_269 = arith.constant 36 : index
    %514 = vector.load %arg2[%c0_267, %c1_268, %c36_269] : memref<1x8x336xf32, #tpu.memory_space<vmem>>, vector<1x1x256xf32>
    %515 = vector.shape_cast %514 : vector<1x1x256xf32> to vector<1x256xf32>
    %516 = vector.broadcast %515 : vector<1x256xf32> to vector<4x256xf32>
    %517 = arith.mulf %513, %516 : vector<4x256xf32>
    %518 = arith.addf %492, %517 : vector<4x256xf32>
    %c0_270 = arith.constant 0 : index
    %c5_271 = arith.constant 5 : index
    %c36_272 = arith.constant 36 : index
    %519 = vector.load %arg2[%c0_270, %c5_271, %c36_272] : memref<1x8x336xf32, #tpu.memory_space<vmem>>, vector<1x1x256xf32>
    %520 = vector.shape_cast %519 : vector<1x1x256xf32> to vector<1x256xf32>
    %521 = vector.broadcast %520 : vector<1x256xf32> to vector<4x256xf32>
    %522 = arith.mulf %513, %521 : vector<4x256xf32>
    %523 = arith.addf %497, %522 : vector<4x256xf32>
    %c0_273 = arith.constant 0 : index
    %c40 = arith.constant 40 : index
    %524 = vector.load %arg1[%c0_273, %c40] : memref<4x100xf32, #tpu.memory_space<vmem>>, vector<4x1xf32>
    %525 = vector.shape_cast %524 : vector<4x1xf32> to vector<4x1xf32>
    %526 = vector.broadcast %525 : vector<4x1xf32> to vector<4x256xf32>
    %c0_274 = arith.constant 0 : index
    %c1_275 = arith.constant 1 : index
    %c48_276 = arith.constant 48 : index
    %527 = vector.load %arg2[%c0_274, %c1_275, %c48_276] : memref<1x8x336xf32, #tpu.memory_space<vmem>>, vector<1x1x256xf32>
    %528 = vector.shape_cast %527 : vector<1x1x256xf32> to vector<1x256xf32>
    %529 = vector.broadcast %528 : vector<1x256xf32> to vector<4x256xf32>
    %530 = arith.mulf %526, %529 : vector<4x256xf32>
    %531 = arith.addf %505, %530 : vector<4x256xf32>
    %c0_277 = arith.constant 0 : index
    %c5_278 = arith.constant 5 : index
    %c48_279 = arith.constant 48 : index
    %532 = vector.load %arg2[%c0_277, %c5_278, %c48_279] : memref<1x8x336xf32, #tpu.memory_space<vmem>>, vector<1x1x256xf32>
    %533 = vector.shape_cast %532 : vector<1x1x256xf32> to vector<1x256xf32>
    %534 = vector.broadcast %533 : vector<1x256xf32> to vector<4x256xf32>
    %535 = arith.mulf %526, %534 : vector<4x256xf32>
    %536 = arith.addf %510, %535 : vector<4x256xf32>
    %c0_280 = arith.constant 0 : index
    %c41 = arith.constant 41 : index
    %537 = vector.load %arg1[%c0_280, %c41] : memref<4x100xf32, #tpu.memory_space<vmem>>, vector<4x1xf32>
    %538 = vector.shape_cast %537 : vector<4x1xf32> to vector<4x1xf32>
    %539 = vector.broadcast %538 : vector<4x1xf32> to vector<4x256xf32>
    %c0_281 = arith.constant 0 : index
    %c1_282 = arith.constant 1 : index
    %c49_283 = arith.constant 49 : index
    %540 = vector.load %arg2[%c0_281, %c1_282, %c49_283] : memref<1x8x336xf32, #tpu.memory_space<vmem>>, vector<1x1x256xf32>
    %541 = vector.shape_cast %540 : vector<1x1x256xf32> to vector<1x256xf32>
    %542 = vector.broadcast %541 : vector<1x256xf32> to vector<4x256xf32>
    %543 = arith.mulf %539, %542 : vector<4x256xf32>
    %544 = arith.addf %518, %543 : vector<4x256xf32>
    %c0_284 = arith.constant 0 : index
    %c5_285 = arith.constant 5 : index
    %c49_286 = arith.constant 49 : index
    %545 = vector.load %arg2[%c0_284, %c5_285, %c49_286] : memref<1x8x336xf32, #tpu.memory_space<vmem>>, vector<1x1x256xf32>
    %546 = vector.shape_cast %545 : vector<1x1x256xf32> to vector<1x256xf32>
    %547 = vector.broadcast %546 : vector<1x256xf32> to vector<4x256xf32>
    %548 = arith.mulf %539, %547 : vector<4x256xf32>
    %549 = arith.addf %523, %548 : vector<4x256xf32>
    %c0_287 = arith.constant 0 : index
    %c42 = arith.constant 42 : index
    %550 = vector.load %arg1[%c0_287, %c42] : memref<4x100xf32, #tpu.memory_space<vmem>>, vector<4x1xf32>
    %551 = vector.shape_cast %550 : vector<4x1xf32> to vector<4x1xf32>
    %552 = vector.broadcast %551 : vector<4x1xf32> to vector<4x256xf32>
    %c0_288 = arith.constant 0 : index
    %c1_289 = arith.constant 1 : index
    %c50_290 = arith.constant 50 : index
    %553 = vector.load %arg2[%c0_288, %c1_289, %c50_290] : memref<1x8x336xf32, #tpu.memory_space<vmem>>, vector<1x1x256xf32>
    %554 = vector.shape_cast %553 : vector<1x1x256xf32> to vector<1x256xf32>
    %555 = vector.broadcast %554 : vector<1x256xf32> to vector<4x256xf32>
    %556 = arith.mulf %552, %555 : vector<4x256xf32>
    %557 = arith.addf %531, %556 : vector<4x256xf32>
    %c0_291 = arith.constant 0 : index
    %c5_292 = arith.constant 5 : index
    %c50_293 = arith.constant 50 : index
    %558 = vector.load %arg2[%c0_291, %c5_292, %c50_293] : memref<1x8x336xf32, #tpu.memory_space<vmem>>, vector<1x1x256xf32>
    %559 = vector.shape_cast %558 : vector<1x1x256xf32> to vector<1x256xf32>
    %560 = vector.broadcast %559 : vector<1x256xf32> to vector<4x256xf32>
    %561 = arith.mulf %552, %560 : vector<4x256xf32>
    %562 = arith.addf %536, %561 : vector<4x256xf32>
    %c0_294 = arith.constant 0 : index
    %c43 = arith.constant 43 : index
    %563 = vector.load %arg1[%c0_294, %c43] : memref<4x100xf32, #tpu.memory_space<vmem>>, vector<4x1xf32>
    %564 = vector.shape_cast %563 : vector<4x1xf32> to vector<4x1xf32>
    %565 = vector.broadcast %564 : vector<4x1xf32> to vector<4x256xf32>
    %c0_295 = arith.constant 0 : index
    %c1_296 = arith.constant 1 : index
    %c51_297 = arith.constant 51 : index
    %566 = vector.load %arg2[%c0_295, %c1_296, %c51_297] : memref<1x8x336xf32, #tpu.memory_space<vmem>>, vector<1x1x256xf32>
    %567 = vector.shape_cast %566 : vector<1x1x256xf32> to vector<1x256xf32>
    %568 = vector.broadcast %567 : vector<1x256xf32> to vector<4x256xf32>
    %569 = arith.mulf %565, %568 : vector<4x256xf32>
    %570 = arith.addf %544, %569 : vector<4x256xf32>
    %c0_298 = arith.constant 0 : index
    %c5_299 = arith.constant 5 : index
    %c51_300 = arith.constant 51 : index
    %571 = vector.load %arg2[%c0_298, %c5_299, %c51_300] : memref<1x8x336xf32, #tpu.memory_space<vmem>>, vector<1x1x256xf32>
    %572 = vector.shape_cast %571 : vector<1x1x256xf32> to vector<1x256xf32>
    %573 = vector.broadcast %572 : vector<1x256xf32> to vector<4x256xf32>
    %574 = arith.mulf %565, %573 : vector<4x256xf32>
    %575 = arith.addf %549, %574 : vector<4x256xf32>
    %c0_301 = arith.constant 0 : index
    %c44 = arith.constant 44 : index
    %576 = vector.load %arg1[%c0_301, %c44] : memref<4x100xf32, #tpu.memory_space<vmem>>, vector<4x1xf32>
    %577 = vector.shape_cast %576 : vector<4x1xf32> to vector<4x1xf32>
    %578 = vector.broadcast %577 : vector<4x1xf32> to vector<4x256xf32>
    %c0_302 = arith.constant 0 : index
    %c1_303 = arith.constant 1 : index
    %c52_304 = arith.constant 52 : index
    %579 = vector.load %arg2[%c0_302, %c1_303, %c52_304] : memref<1x8x336xf32, #tpu.memory_space<vmem>>, vector<1x1x256xf32>
    %580 = vector.shape_cast %579 : vector<1x1x256xf32> to vector<1x256xf32>
    %581 = vector.broadcast %580 : vector<1x256xf32> to vector<4x256xf32>
    %582 = arith.mulf %578, %581 : vector<4x256xf32>
    %583 = arith.addf %557, %582 : vector<4x256xf32>
    %c0_305 = arith.constant 0 : index
    %c5_306 = arith.constant 5 : index
    %c52_307 = arith.constant 52 : index
    %584 = vector.load %arg2[%c0_305, %c5_306, %c52_307] : memref<1x8x336xf32, #tpu.memory_space<vmem>>, vector<1x1x256xf32>
    %585 = vector.shape_cast %584 : vector<1x1x256xf32> to vector<1x256xf32>
    %586 = vector.broadcast %585 : vector<1x256xf32> to vector<4x256xf32>
    %587 = arith.mulf %578, %586 : vector<4x256xf32>
    %588 = arith.addf %562, %587 : vector<4x256xf32>
    %c0_308 = arith.constant 0 : index
    %c45 = arith.constant 45 : index
    %589 = vector.load %arg1[%c0_308, %c45] : memref<4x100xf32, #tpu.memory_space<vmem>>, vector<4x1xf32>
    %590 = vector.shape_cast %589 : vector<4x1xf32> to vector<4x1xf32>
    %591 = vector.broadcast %590 : vector<4x1xf32> to vector<4x256xf32>
    %c0_309 = arith.constant 0 : index
    %c1_310 = arith.constant 1 : index
    %c64_311 = arith.constant 64 : index
    %592 = vector.load %arg2[%c0_309, %c1_310, %c64_311] : memref<1x8x336xf32, #tpu.memory_space<vmem>>, vector<1x1x256xf32>
    %593 = vector.shape_cast %592 : vector<1x1x256xf32> to vector<1x256xf32>
    %594 = vector.broadcast %593 : vector<1x256xf32> to vector<4x256xf32>
    %595 = arith.mulf %591, %594 : vector<4x256xf32>
    %596 = arith.addf %570, %595 : vector<4x256xf32>
    %c0_312 = arith.constant 0 : index
    %c5_313 = arith.constant 5 : index
    %c64_314 = arith.constant 64 : index
    %597 = vector.load %arg2[%c0_312, %c5_313, %c64_314] : memref<1x8x336xf32, #tpu.memory_space<vmem>>, vector<1x1x256xf32>
    %598 = vector.shape_cast %597 : vector<1x1x256xf32> to vector<1x256xf32>
    %599 = vector.broadcast %598 : vector<1x256xf32> to vector<4x256xf32>
    %600 = arith.mulf %591, %599 : vector<4x256xf32>
    %601 = arith.addf %575, %600 : vector<4x256xf32>
    %c0_315 = arith.constant 0 : index
    %c46 = arith.constant 46 : index
    %602 = vector.load %arg1[%c0_315, %c46] : memref<4x100xf32, #tpu.memory_space<vmem>>, vector<4x1xf32>
    %603 = vector.shape_cast %602 : vector<4x1xf32> to vector<4x1xf32>
    %604 = vector.broadcast %603 : vector<4x1xf32> to vector<4x256xf32>
    %c0_316 = arith.constant 0 : index
    %c1_317 = arith.constant 1 : index
    %c65_318 = arith.constant 65 : index
    %605 = vector.load %arg2[%c0_316, %c1_317, %c65_318] : memref<1x8x336xf32, #tpu.memory_space<vmem>>, vector<1x1x256xf32>
    %606 = vector.shape_cast %605 : vector<1x1x256xf32> to vector<1x256xf32>
    %607 = vector.broadcast %606 : vector<1x256xf32> to vector<4x256xf32>
    %608 = arith.mulf %604, %607 : vector<4x256xf32>
    %609 = arith.addf %583, %608 : vector<4x256xf32>
    %c0_319 = arith.constant 0 : index
    %c5_320 = arith.constant 5 : index
    %c65_321 = arith.constant 65 : index
    %610 = vector.load %arg2[%c0_319, %c5_320, %c65_321] : memref<1x8x336xf32, #tpu.memory_space<vmem>>, vector<1x1x256xf32>
    %611 = vector.shape_cast %610 : vector<1x1x256xf32> to vector<1x256xf32>
    %612 = vector.broadcast %611 : vector<1x256xf32> to vector<4x256xf32>
    %613 = arith.mulf %604, %612 : vector<4x256xf32>
    %614 = arith.addf %588, %613 : vector<4x256xf32>
    %c0_322 = arith.constant 0 : index
    %c47 = arith.constant 47 : index
    %615 = vector.load %arg1[%c0_322, %c47] : memref<4x100xf32, #tpu.memory_space<vmem>>, vector<4x1xf32>
    %616 = vector.shape_cast %615 : vector<4x1xf32> to vector<4x1xf32>
    %617 = vector.broadcast %616 : vector<4x1xf32> to vector<4x256xf32>
    %c0_323 = arith.constant 0 : index
    %c1_324 = arith.constant 1 : index
    %c66_325 = arith.constant 66 : index
    %618 = vector.load %arg2[%c0_323, %c1_324, %c66_325] : memref<1x8x336xf32, #tpu.memory_space<vmem>>, vector<1x1x256xf32>
    %619 = vector.shape_cast %618 : vector<1x1x256xf32> to vector<1x256xf32>
    %620 = vector.broadcast %619 : vector<1x256xf32> to vector<4x256xf32>
    %621 = arith.mulf %617, %620 : vector<4x256xf32>
    %622 = arith.addf %596, %621 : vector<4x256xf32>
    %c0_326 = arith.constant 0 : index
    %c5_327 = arith.constant 5 : index
    %c66_328 = arith.constant 66 : index
    %623 = vector.load %arg2[%c0_326, %c5_327, %c66_328] : memref<1x8x336xf32, #tpu.memory_space<vmem>>, vector<1x1x256xf32>
    %624 = vector.shape_cast %623 : vector<1x1x256xf32> to vector<1x256xf32>
    %625 = vector.broadcast %624 : vector<1x256xf32> to vector<4x256xf32>
    %626 = arith.mulf %617, %625 : vector<4x256xf32>
    %627 = arith.addf %601, %626 : vector<4x256xf32>
    %c0_329 = arith.constant 0 : index
    %c48_330 = arith.constant 48 : index
    %628 = vector.load %arg1[%c0_329, %c48_330] : memref<4x100xf32, #tpu.memory_space<vmem>>, vector<4x1xf32>
    %629 = vector.shape_cast %628 : vector<4x1xf32> to vector<4x1xf32>
    %630 = vector.broadcast %629 : vector<4x1xf32> to vector<4x256xf32>
    %c0_331 = arith.constant 0 : index
    %c1_332 = arith.constant 1 : index
    %c67_333 = arith.constant 67 : index
    %631 = vector.load %arg2[%c0_331, %c1_332, %c67_333] : memref<1x8x336xf32, #tpu.memory_space<vmem>>, vector<1x1x256xf32>
    %632 = vector.shape_cast %631 : vector<1x1x256xf32> to vector<1x256xf32>
    %633 = vector.broadcast %632 : vector<1x256xf32> to vector<4x256xf32>
    %634 = arith.mulf %630, %633 : vector<4x256xf32>
    %635 = arith.addf %609, %634 : vector<4x256xf32>
    %c0_334 = arith.constant 0 : index
    %c5_335 = arith.constant 5 : index
    %c67_336 = arith.constant 67 : index
    %636 = vector.load %arg2[%c0_334, %c5_335, %c67_336] : memref<1x8x336xf32, #tpu.memory_space<vmem>>, vector<1x1x256xf32>
    %637 = vector.shape_cast %636 : vector<1x1x256xf32> to vector<1x256xf32>
    %638 = vector.broadcast %637 : vector<1x256xf32> to vector<4x256xf32>
    %639 = arith.mulf %630, %638 : vector<4x256xf32>
    %640 = arith.addf %614, %639 : vector<4x256xf32>
    %c0_337 = arith.constant 0 : index
    %c49_338 = arith.constant 49 : index
    %641 = vector.load %arg1[%c0_337, %c49_338] : memref<4x100xf32, #tpu.memory_space<vmem>>, vector<4x1xf32>
    %642 = vector.shape_cast %641 : vector<4x1xf32> to vector<4x1xf32>
    %643 = vector.broadcast %642 : vector<4x1xf32> to vector<4x256xf32>
    %c0_339 = arith.constant 0 : index
    %c1_340 = arith.constant 1 : index
    %c68_341 = arith.constant 68 : index
    %644 = vector.load %arg2[%c0_339, %c1_340, %c68_341] : memref<1x8x336xf32, #tpu.memory_space<vmem>>, vector<1x1x256xf32>
    %645 = vector.shape_cast %644 : vector<1x1x256xf32> to vector<1x256xf32>
    %646 = vector.broadcast %645 : vector<1x256xf32> to vector<4x256xf32>
    %647 = arith.mulf %643, %646 : vector<4x256xf32>
    %648 = arith.addf %622, %647 : vector<4x256xf32>
    %c0_342 = arith.constant 0 : index
    %c5_343 = arith.constant 5 : index
    %c68_344 = arith.constant 68 : index
    %649 = vector.load %arg2[%c0_342, %c5_343, %c68_344] : memref<1x8x336xf32, #tpu.memory_space<vmem>>, vector<1x1x256xf32>
    %650 = vector.shape_cast %649 : vector<1x1x256xf32> to vector<1x256xf32>
    %651 = vector.broadcast %650 : vector<1x256xf32> to vector<4x256xf32>
    %652 = arith.mulf %643, %651 : vector<4x256xf32>
    %653 = arith.addf %627, %652 : vector<4x256xf32>
    %c0_345 = arith.constant 0 : index
    %c50_346 = arith.constant 50 : index
    %654 = vector.load %arg1[%c0_345, %c50_346] : memref<4x100xf32, #tpu.memory_space<vmem>>, vector<4x1xf32>
    %655 = vector.shape_cast %654 : vector<4x1xf32> to vector<4x1xf32>
    %656 = vector.broadcast %655 : vector<4x1xf32> to vector<4x256xf32>
    %c0_347 = arith.constant 0 : index
    %c2_348 = arith.constant 2 : index
    %c0_349 = arith.constant 0 : index
    %657 = vector.load %arg2[%c0_347, %c2_348, %c0_349] : memref<1x8x336xf32, #tpu.memory_space<vmem>>, vector<1x1x256xf32>
    %658 = vector.shape_cast %657 : vector<1x1x256xf32> to vector<1x256xf32>
    %659 = vector.broadcast %658 : vector<1x256xf32> to vector<4x256xf32>
    %660 = arith.mulf %656, %659 : vector<4x256xf32>
    %661 = arith.addf %635, %660 : vector<4x256xf32>
    %c0_350 = arith.constant 0 : index
    %c6_351 = arith.constant 6 : index
    %c0_352 = arith.constant 0 : index
    %662 = vector.load %arg2[%c0_350, %c6_351, %c0_352] : memref<1x8x336xf32, #tpu.memory_space<vmem>>, vector<1x1x256xf32>
    %663 = vector.shape_cast %662 : vector<1x1x256xf32> to vector<1x256xf32>
    %664 = vector.broadcast %663 : vector<1x256xf32> to vector<4x256xf32>
    %665 = arith.mulf %656, %664 : vector<4x256xf32>
    %666 = arith.addf %640, %665 : vector<4x256xf32>
    %c0_353 = arith.constant 0 : index
    %c51_354 = arith.constant 51 : index
    %667 = vector.load %arg1[%c0_353, %c51_354] : memref<4x100xf32, #tpu.memory_space<vmem>>, vector<4x1xf32>
    %668 = vector.shape_cast %667 : vector<4x1xf32> to vector<4x1xf32>
    %669 = vector.broadcast %668 : vector<4x1xf32> to vector<4x256xf32>
    %c0_355 = arith.constant 0 : index
    %c2_356 = arith.constant 2 : index
    %c1_357 = arith.constant 1 : index
    %670 = vector.load %arg2[%c0_355, %c2_356, %c1_357] : memref<1x8x336xf32, #tpu.memory_space<vmem>>, vector<1x1x256xf32>
    %671 = vector.shape_cast %670 : vector<1x1x256xf32> to vector<1x256xf32>
    %672 = vector.broadcast %671 : vector<1x256xf32> to vector<4x256xf32>
    %673 = arith.mulf %669, %672 : vector<4x256xf32>
    %674 = arith.addf %648, %673 : vector<4x256xf32>
    %c0_358 = arith.constant 0 : index
    %c6_359 = arith.constant 6 : index
    %c1_360 = arith.constant 1 : index
    %675 = vector.load %arg2[%c0_358, %c6_359, %c1_360] : memref<1x8x336xf32, #tpu.memory_space<vmem>>, vector<1x1x256xf32>
    %676 = vector.shape_cast %675 : vector<1x1x256xf32> to vector<1x256xf32>
    %677 = vector.broadcast %676 : vector<1x256xf32> to vector<4x256xf32>
    %678 = arith.mulf %669, %677 : vector<4x256xf32>
    %679 = arith.addf %653, %678 : vector<4x256xf32>
    %c0_361 = arith.constant 0 : index
    %c52_362 = arith.constant 52 : index
    %680 = vector.load %arg1[%c0_361, %c52_362] : memref<4x100xf32, #tpu.memory_space<vmem>>, vector<4x1xf32>
    %681 = vector.shape_cast %680 : vector<4x1xf32> to vector<4x1xf32>
    %682 = vector.broadcast %681 : vector<4x1xf32> to vector<4x256xf32>
    %c0_363 = arith.constant 0 : index
    %c2_364 = arith.constant 2 : index
    %c2_365 = arith.constant 2 : index
    %683 = vector.load %arg2[%c0_363, %c2_364, %c2_365] : memref<1x8x336xf32, #tpu.memory_space<vmem>>, vector<1x1x256xf32>
    %684 = vector.shape_cast %683 : vector<1x1x256xf32> to vector<1x256xf32>
    %685 = vector.broadcast %684 : vector<1x256xf32> to vector<4x256xf32>
    %686 = arith.mulf %682, %685 : vector<4x256xf32>
    %687 = arith.addf %661, %686 : vector<4x256xf32>
    %c0_366 = arith.constant 0 : index
    %c6_367 = arith.constant 6 : index
    %c2_368 = arith.constant 2 : index
    %688 = vector.load %arg2[%c0_366, %c6_367, %c2_368] : memref<1x8x336xf32, #tpu.memory_space<vmem>>, vector<1x1x256xf32>
    %689 = vector.shape_cast %688 : vector<1x1x256xf32> to vector<1x256xf32>
    %690 = vector.broadcast %689 : vector<1x256xf32> to vector<4x256xf32>
    %691 = arith.mulf %682, %690 : vector<4x256xf32>
    %692 = arith.addf %666, %691 : vector<4x256xf32>
    %c0_369 = arith.constant 0 : index
    %c53 = arith.constant 53 : index
    %693 = vector.load %arg1[%c0_369, %c53] : memref<4x100xf32, #tpu.memory_space<vmem>>, vector<4x1xf32>
    %694 = vector.shape_cast %693 : vector<4x1xf32> to vector<4x1xf32>
    %695 = vector.broadcast %694 : vector<4x1xf32> to vector<4x256xf32>
    %c0_370 = arith.constant 0 : index
    %c2_371 = arith.constant 2 : index
    %c3_372 = arith.constant 3 : index
    %696 = vector.load %arg2[%c0_370, %c2_371, %c3_372] : memref<1x8x336xf32, #tpu.memory_space<vmem>>, vector<1x1x256xf32>
    %697 = vector.shape_cast %696 : vector<1x1x256xf32> to vector<1x256xf32>
    %698 = vector.broadcast %697 : vector<1x256xf32> to vector<4x256xf32>
    %699 = arith.mulf %695, %698 : vector<4x256xf32>
    %700 = arith.addf %674, %699 : vector<4x256xf32>
    %c0_373 = arith.constant 0 : index
    %c6_374 = arith.constant 6 : index
    %c3_375 = arith.constant 3 : index
    %701 = vector.load %arg2[%c0_373, %c6_374, %c3_375] : memref<1x8x336xf32, #tpu.memory_space<vmem>>, vector<1x1x256xf32>
    %702 = vector.shape_cast %701 : vector<1x1x256xf32> to vector<1x256xf32>
    %703 = vector.broadcast %702 : vector<1x256xf32> to vector<4x256xf32>
    %704 = arith.mulf %695, %703 : vector<4x256xf32>
    %705 = arith.addf %679, %704 : vector<4x256xf32>
    %c0_376 = arith.constant 0 : index
    %c54 = arith.constant 54 : index
    %706 = vector.load %arg1[%c0_376, %c54] : memref<4x100xf32, #tpu.memory_space<vmem>>, vector<4x1xf32>
    %707 = vector.shape_cast %706 : vector<4x1xf32> to vector<4x1xf32>
    %708 = vector.broadcast %707 : vector<4x1xf32> to vector<4x256xf32>
    %c0_377 = arith.constant 0 : index
    %c2_378 = arith.constant 2 : index
    %c4_379 = arith.constant 4 : index
    %709 = vector.load %arg2[%c0_377, %c2_378, %c4_379] : memref<1x8x336xf32, #tpu.memory_space<vmem>>, vector<1x1x256xf32>
    %710 = vector.shape_cast %709 : vector<1x1x256xf32> to vector<1x256xf32>
    %711 = vector.broadcast %710 : vector<1x256xf32> to vector<4x256xf32>
    %712 = arith.mulf %708, %711 : vector<4x256xf32>
    %713 = arith.addf %687, %712 : vector<4x256xf32>
    %c0_380 = arith.constant 0 : index
    %c6_381 = arith.constant 6 : index
    %c4_382 = arith.constant 4 : index
    %714 = vector.load %arg2[%c0_380, %c6_381, %c4_382] : memref<1x8x336xf32, #tpu.memory_space<vmem>>, vector<1x1x256xf32>
    %715 = vector.shape_cast %714 : vector<1x1x256xf32> to vector<1x256xf32>
    %716 = vector.broadcast %715 : vector<1x256xf32> to vector<4x256xf32>
    %717 = arith.mulf %708, %716 : vector<4x256xf32>
    %718 = arith.addf %692, %717 : vector<4x256xf32>
    %c0_383 = arith.constant 0 : index
    %c55 = arith.constant 55 : index
    %719 = vector.load %arg1[%c0_383, %c55] : memref<4x100xf32, #tpu.memory_space<vmem>>, vector<4x1xf32>
    %720 = vector.shape_cast %719 : vector<4x1xf32> to vector<4x1xf32>
    %721 = vector.broadcast %720 : vector<4x1xf32> to vector<4x256xf32>
    %c0_384 = arith.constant 0 : index
    %c2_385 = arith.constant 2 : index
    %c16_386 = arith.constant 16 : index
    %722 = vector.load %arg2[%c0_384, %c2_385, %c16_386] : memref<1x8x336xf32, #tpu.memory_space<vmem>>, vector<1x1x256xf32>
    %723 = vector.shape_cast %722 : vector<1x1x256xf32> to vector<1x256xf32>
    %724 = vector.broadcast %723 : vector<1x256xf32> to vector<4x256xf32>
    %725 = arith.mulf %721, %724 : vector<4x256xf32>
    %726 = arith.addf %700, %725 : vector<4x256xf32>
    %c0_387 = arith.constant 0 : index
    %c6_388 = arith.constant 6 : index
    %c16_389 = arith.constant 16 : index
    %727 = vector.load %arg2[%c0_387, %c6_388, %c16_389] : memref<1x8x336xf32, #tpu.memory_space<vmem>>, vector<1x1x256xf32>
    %728 = vector.shape_cast %727 : vector<1x1x256xf32> to vector<1x256xf32>
    %729 = vector.broadcast %728 : vector<1x256xf32> to vector<4x256xf32>
    %730 = arith.mulf %721, %729 : vector<4x256xf32>
    %731 = arith.addf %705, %730 : vector<4x256xf32>
    %c0_390 = arith.constant 0 : index
    %c56 = arith.constant 56 : index
    %732 = vector.load %arg1[%c0_390, %c56] : memref<4x100xf32, #tpu.memory_space<vmem>>, vector<4x1xf32>
    %733 = vector.shape_cast %732 : vector<4x1xf32> to vector<4x1xf32>
    %734 = vector.broadcast %733 : vector<4x1xf32> to vector<4x256xf32>
    %c0_391 = arith.constant 0 : index
    %c2_392 = arith.constant 2 : index
    %c17_393 = arith.constant 17 : index
    %735 = vector.load %arg2[%c0_391, %c2_392, %c17_393] : memref<1x8x336xf32, #tpu.memory_space<vmem>>, vector<1x1x256xf32>
    %736 = vector.shape_cast %735 : vector<1x1x256xf32> to vector<1x256xf32>
    %737 = vector.broadcast %736 : vector<1x256xf32> to vector<4x256xf32>
    %738 = arith.mulf %734, %737 : vector<4x256xf32>
    %739 = arith.addf %713, %738 : vector<4x256xf32>
    %c0_394 = arith.constant 0 : index
    %c6_395 = arith.constant 6 : index
    %c17_396 = arith.constant 17 : index
    %740 = vector.load %arg2[%c0_394, %c6_395, %c17_396] : memref<1x8x336xf32, #tpu.memory_space<vmem>>, vector<1x1x256xf32>
    %741 = vector.shape_cast %740 : vector<1x1x256xf32> to vector<1x256xf32>
    %742 = vector.broadcast %741 : vector<1x256xf32> to vector<4x256xf32>
    %743 = arith.mulf %734, %742 : vector<4x256xf32>
    %744 = arith.addf %718, %743 : vector<4x256xf32>
    %c0_397 = arith.constant 0 : index
    %c57 = arith.constant 57 : index
    %745 = vector.load %arg1[%c0_397, %c57] : memref<4x100xf32, #tpu.memory_space<vmem>>, vector<4x1xf32>
    %746 = vector.shape_cast %745 : vector<4x1xf32> to vector<4x1xf32>
    %747 = vector.broadcast %746 : vector<4x1xf32> to vector<4x256xf32>
    %c0_398 = arith.constant 0 : index
    %c2_399 = arith.constant 2 : index
    %c18_400 = arith.constant 18 : index
    %748 = vector.load %arg2[%c0_398, %c2_399, %c18_400] : memref<1x8x336xf32, #tpu.memory_space<vmem>>, vector<1x1x256xf32>
    %749 = vector.shape_cast %748 : vector<1x1x256xf32> to vector<1x256xf32>
    %750 = vector.broadcast %749 : vector<1x256xf32> to vector<4x256xf32>
    %751 = arith.mulf %747, %750 : vector<4x256xf32>
    %752 = arith.addf %726, %751 : vector<4x256xf32>
    %c0_401 = arith.constant 0 : index
    %c6_402 = arith.constant 6 : index
    %c18_403 = arith.constant 18 : index
    %753 = vector.load %arg2[%c0_401, %c6_402, %c18_403] : memref<1x8x336xf32, #tpu.memory_space<vmem>>, vector<1x1x256xf32>
    %754 = vector.shape_cast %753 : vector<1x1x256xf32> to vector<1x256xf32>
    %755 = vector.broadcast %754 : vector<1x256xf32> to vector<4x256xf32>
    %756 = arith.mulf %747, %755 : vector<4x256xf32>
    %757 = arith.addf %731, %756 : vector<4x256xf32>
    %c0_404 = arith.constant 0 : index
    %c58 = arith.constant 58 : index
    %758 = vector.load %arg1[%c0_404, %c58] : memref<4x100xf32, #tpu.memory_space<vmem>>, vector<4x1xf32>
    %759 = vector.shape_cast %758 : vector<4x1xf32> to vector<4x1xf32>
    %760 = vector.broadcast %759 : vector<4x1xf32> to vector<4x256xf32>
    %c0_405 = arith.constant 0 : index
    %c2_406 = arith.constant 2 : index
    %c19_407 = arith.constant 19 : index
    %761 = vector.load %arg2[%c0_405, %c2_406, %c19_407] : memref<1x8x336xf32, #tpu.memory_space<vmem>>, vector<1x1x256xf32>
    %762 = vector.shape_cast %761 : vector<1x1x256xf32> to vector<1x256xf32>
    %763 = vector.broadcast %762 : vector<1x256xf32> to vector<4x256xf32>
    %764 = arith.mulf %760, %763 : vector<4x256xf32>
    %765 = arith.addf %739, %764 : vector<4x256xf32>
    %c0_408 = arith.constant 0 : index
    %c6_409 = arith.constant 6 : index
    %c19_410 = arith.constant 19 : index
    %766 = vector.load %arg2[%c0_408, %c6_409, %c19_410] : memref<1x8x336xf32, #tpu.memory_space<vmem>>, vector<1x1x256xf32>
    %767 = vector.shape_cast %766 : vector<1x1x256xf32> to vector<1x256xf32>
    %768 = vector.broadcast %767 : vector<1x256xf32> to vector<4x256xf32>
    %769 = arith.mulf %760, %768 : vector<4x256xf32>
    %770 = arith.addf %744, %769 : vector<4x256xf32>
    %c0_411 = arith.constant 0 : index
    %c59 = arith.constant 59 : index
    %771 = vector.load %arg1[%c0_411, %c59] : memref<4x100xf32, #tpu.memory_space<vmem>>, vector<4x1xf32>
    %772 = vector.shape_cast %771 : vector<4x1xf32> to vector<4x1xf32>
    %773 = vector.broadcast %772 : vector<4x1xf32> to vector<4x256xf32>
    %c0_412 = arith.constant 0 : index
    %c2_413 = arith.constant 2 : index
    %c20_414 = arith.constant 20 : index
    %774 = vector.load %arg2[%c0_412, %c2_413, %c20_414] : memref<1x8x336xf32, #tpu.memory_space<vmem>>, vector<1x1x256xf32>
    %775 = vector.shape_cast %774 : vector<1x1x256xf32> to vector<1x256xf32>
    %776 = vector.broadcast %775 : vector<1x256xf32> to vector<4x256xf32>
    %777 = arith.mulf %773, %776 : vector<4x256xf32>
    %778 = arith.addf %752, %777 : vector<4x256xf32>
    %c0_415 = arith.constant 0 : index
    %c6_416 = arith.constant 6 : index
    %c20_417 = arith.constant 20 : index
    %779 = vector.load %arg2[%c0_415, %c6_416, %c20_417] : memref<1x8x336xf32, #tpu.memory_space<vmem>>, vector<1x1x256xf32>
    %780 = vector.shape_cast %779 : vector<1x1x256xf32> to vector<1x256xf32>
    %781 = vector.broadcast %780 : vector<1x256xf32> to vector<4x256xf32>
    %782 = arith.mulf %773, %781 : vector<4x256xf32>
    %783 = arith.addf %757, %782 : vector<4x256xf32>
    %c0_418 = arith.constant 0 : index
    %c60 = arith.constant 60 : index
    %784 = vector.load %arg1[%c0_418, %c60] : memref<4x100xf32, #tpu.memory_space<vmem>>, vector<4x1xf32>
    %785 = vector.shape_cast %784 : vector<4x1xf32> to vector<4x1xf32>
    %786 = vector.broadcast %785 : vector<4x1xf32> to vector<4x256xf32>
    %c0_419 = arith.constant 0 : index
    %c2_420 = arith.constant 2 : index
    %c32_421 = arith.constant 32 : index
    %787 = vector.load %arg2[%c0_419, %c2_420, %c32_421] : memref<1x8x336xf32, #tpu.memory_space<vmem>>, vector<1x1x256xf32>
    %788 = vector.shape_cast %787 : vector<1x1x256xf32> to vector<1x256xf32>
    %789 = vector.broadcast %788 : vector<1x256xf32> to vector<4x256xf32>
    %790 = arith.mulf %786, %789 : vector<4x256xf32>
    %791 = arith.addf %765, %790 : vector<4x256xf32>
    %c0_422 = arith.constant 0 : index
    %c6_423 = arith.constant 6 : index
    %c32_424 = arith.constant 32 : index
    %792 = vector.load %arg2[%c0_422, %c6_423, %c32_424] : memref<1x8x336xf32, #tpu.memory_space<vmem>>, vector<1x1x256xf32>
    %793 = vector.shape_cast %792 : vector<1x1x256xf32> to vector<1x256xf32>
    %794 = vector.broadcast %793 : vector<1x256xf32> to vector<4x256xf32>
    %795 = arith.mulf %786, %794 : vector<4x256xf32>
    %796 = arith.addf %770, %795 : vector<4x256xf32>
    %c0_425 = arith.constant 0 : index
    %c61 = arith.constant 61 : index
    %797 = vector.load %arg1[%c0_425, %c61] : memref<4x100xf32, #tpu.memory_space<vmem>>, vector<4x1xf32>
    %798 = vector.shape_cast %797 : vector<4x1xf32> to vector<4x1xf32>
    %799 = vector.broadcast %798 : vector<4x1xf32> to vector<4x256xf32>
    %c0_426 = arith.constant 0 : index
    %c2_427 = arith.constant 2 : index
    %c33_428 = arith.constant 33 : index
    %800 = vector.load %arg2[%c0_426, %c2_427, %c33_428] : memref<1x8x336xf32, #tpu.memory_space<vmem>>, vector<1x1x256xf32>
    %801 = vector.shape_cast %800 : vector<1x1x256xf32> to vector<1x256xf32>
    %802 = vector.broadcast %801 : vector<1x256xf32> to vector<4x256xf32>
    %803 = arith.mulf %799, %802 : vector<4x256xf32>
    %804 = arith.addf %778, %803 : vector<4x256xf32>
    %c0_429 = arith.constant 0 : index
    %c6_430 = arith.constant 6 : index
    %c33_431 = arith.constant 33 : index
    %805 = vector.load %arg2[%c0_429, %c6_430, %c33_431] : memref<1x8x336xf32, #tpu.memory_space<vmem>>, vector<1x1x256xf32>
    %806 = vector.shape_cast %805 : vector<1x1x256xf32> to vector<1x256xf32>
    %807 = vector.broadcast %806 : vector<1x256xf32> to vector<4x256xf32>
    %808 = arith.mulf %799, %807 : vector<4x256xf32>
    %809 = arith.addf %783, %808 : vector<4x256xf32>
    %c0_432 = arith.constant 0 : index
    %c62 = arith.constant 62 : index
    %810 = vector.load %arg1[%c0_432, %c62] : memref<4x100xf32, #tpu.memory_space<vmem>>, vector<4x1xf32>
    %811 = vector.shape_cast %810 : vector<4x1xf32> to vector<4x1xf32>
    %812 = vector.broadcast %811 : vector<4x1xf32> to vector<4x256xf32>
    %c0_433 = arith.constant 0 : index
    %c2_434 = arith.constant 2 : index
    %c34_435 = arith.constant 34 : index
    %813 = vector.load %arg2[%c0_433, %c2_434, %c34_435] : memref<1x8x336xf32, #tpu.memory_space<vmem>>, vector<1x1x256xf32>
    %814 = vector.shape_cast %813 : vector<1x1x256xf32> to vector<1x256xf32>
    %815 = vector.broadcast %814 : vector<1x256xf32> to vector<4x256xf32>
    %816 = arith.mulf %812, %815 : vector<4x256xf32>
    %817 = arith.addf %791, %816 : vector<4x256xf32>
    %c0_436 = arith.constant 0 : index
    %c6_437 = arith.constant 6 : index
    %c34_438 = arith.constant 34 : index
    %818 = vector.load %arg2[%c0_436, %c6_437, %c34_438] : memref<1x8x336xf32, #tpu.memory_space<vmem>>, vector<1x1x256xf32>
    %819 = vector.shape_cast %818 : vector<1x1x256xf32> to vector<1x256xf32>
    %820 = vector.broadcast %819 : vector<1x256xf32> to vector<4x256xf32>
    %821 = arith.mulf %812, %820 : vector<4x256xf32>
    %822 = arith.addf %796, %821 : vector<4x256xf32>
    %c0_439 = arith.constant 0 : index
    %c63 = arith.constant 63 : index
    %823 = vector.load %arg1[%c0_439, %c63] : memref<4x100xf32, #tpu.memory_space<vmem>>, vector<4x1xf32>
    %824 = vector.shape_cast %823 : vector<4x1xf32> to vector<4x1xf32>
    %825 = vector.broadcast %824 : vector<4x1xf32> to vector<4x256xf32>
    %c0_440 = arith.constant 0 : index
    %c2_441 = arith.constant 2 : index
    %c35_442 = arith.constant 35 : index
    %826 = vector.load %arg2[%c0_440, %c2_441, %c35_442] : memref<1x8x336xf32, #tpu.memory_space<vmem>>, vector<1x1x256xf32>
    %827 = vector.shape_cast %826 : vector<1x1x256xf32> to vector<1x256xf32>
    %828 = vector.broadcast %827 : vector<1x256xf32> to vector<4x256xf32>
    %829 = arith.mulf %825, %828 : vector<4x256xf32>
    %830 = arith.addf %804, %829 : vector<4x256xf32>
    %c0_443 = arith.constant 0 : index
    %c6_444 = arith.constant 6 : index
    %c35_445 = arith.constant 35 : index
    %831 = vector.load %arg2[%c0_443, %c6_444, %c35_445] : memref<1x8x336xf32, #tpu.memory_space<vmem>>, vector<1x1x256xf32>
    %832 = vector.shape_cast %831 : vector<1x1x256xf32> to vector<1x256xf32>
    %833 = vector.broadcast %832 : vector<1x256xf32> to vector<4x256xf32>
    %834 = arith.mulf %825, %833 : vector<4x256xf32>
    %835 = arith.addf %809, %834 : vector<4x256xf32>
    %c0_446 = arith.constant 0 : index
    %c64_447 = arith.constant 64 : index
    %836 = vector.load %arg1[%c0_446, %c64_447] : memref<4x100xf32, #tpu.memory_space<vmem>>, vector<4x1xf32>
    %837 = vector.shape_cast %836 : vector<4x1xf32> to vector<4x1xf32>
    %838 = vector.broadcast %837 : vector<4x1xf32> to vector<4x256xf32>
    %c0_448 = arith.constant 0 : index
    %c2_449 = arith.constant 2 : index
    %c36_450 = arith.constant 36 : index
    %839 = vector.load %arg2[%c0_448, %c2_449, %c36_450] : memref<1x8x336xf32, #tpu.memory_space<vmem>>, vector<1x1x256xf32>
    %840 = vector.shape_cast %839 : vector<1x1x256xf32> to vector<1x256xf32>
    %841 = vector.broadcast %840 : vector<1x256xf32> to vector<4x256xf32>
    %842 = arith.mulf %838, %841 : vector<4x256xf32>
    %843 = arith.addf %817, %842 : vector<4x256xf32>
    %c0_451 = arith.constant 0 : index
    %c6_452 = arith.constant 6 : index
    %c36_453 = arith.constant 36 : index
    %844 = vector.load %arg2[%c0_451, %c6_452, %c36_453] : memref<1x8x336xf32, #tpu.memory_space<vmem>>, vector<1x1x256xf32>
    %845 = vector.shape_cast %844 : vector<1x1x256xf32> to vector<1x256xf32>
    %846 = vector.broadcast %845 : vector<1x256xf32> to vector<4x256xf32>
    %847 = arith.mulf %838, %846 : vector<4x256xf32>
    %848 = arith.addf %822, %847 : vector<4x256xf32>
    %c0_454 = arith.constant 0 : index
    %c65_455 = arith.constant 65 : index
    %849 = vector.load %arg1[%c0_454, %c65_455] : memref<4x100xf32, #tpu.memory_space<vmem>>, vector<4x1xf32>
    %850 = vector.shape_cast %849 : vector<4x1xf32> to vector<4x1xf32>
    %851 = vector.broadcast %850 : vector<4x1xf32> to vector<4x256xf32>
    %c0_456 = arith.constant 0 : index
    %c2_457 = arith.constant 2 : index
    %c48_458 = arith.constant 48 : index
    %852 = vector.load %arg2[%c0_456, %c2_457, %c48_458] : memref<1x8x336xf32, #tpu.memory_space<vmem>>, vector<1x1x256xf32>
    %853 = vector.shape_cast %852 : vector<1x1x256xf32> to vector<1x256xf32>
    %854 = vector.broadcast %853 : vector<1x256xf32> to vector<4x256xf32>
    %855 = arith.mulf %851, %854 : vector<4x256xf32>
    %856 = arith.addf %830, %855 : vector<4x256xf32>
    %c0_459 = arith.constant 0 : index
    %c6_460 = arith.constant 6 : index
    %c48_461 = arith.constant 48 : index
    %857 = vector.load %arg2[%c0_459, %c6_460, %c48_461] : memref<1x8x336xf32, #tpu.memory_space<vmem>>, vector<1x1x256xf32>
    %858 = vector.shape_cast %857 : vector<1x1x256xf32> to vector<1x256xf32>
    %859 = vector.broadcast %858 : vector<1x256xf32> to vector<4x256xf32>
    %860 = arith.mulf %851, %859 : vector<4x256xf32>
    %861 = arith.addf %835, %860 : vector<4x256xf32>
    %c0_462 = arith.constant 0 : index
    %c66_463 = arith.constant 66 : index
    %862 = vector.load %arg1[%c0_462, %c66_463] : memref<4x100xf32, #tpu.memory_space<vmem>>, vector<4x1xf32>
    %863 = vector.shape_cast %862 : vector<4x1xf32> to vector<4x1xf32>
    %864 = vector.broadcast %863 : vector<4x1xf32> to vector<4x256xf32>
    %c0_464 = arith.constant 0 : index
    %c2_465 = arith.constant 2 : index
    %c49_466 = arith.constant 49 : index
    %865 = vector.load %arg2[%c0_464, %c2_465, %c49_466] : memref<1x8x336xf32, #tpu.memory_space<vmem>>, vector<1x1x256xf32>
    %866 = vector.shape_cast %865 : vector<1x1x256xf32> to vector<1x256xf32>
    %867 = vector.broadcast %866 : vector<1x256xf32> to vector<4x256xf32>
    %868 = arith.mulf %864, %867 : vector<4x256xf32>
    %869 = arith.addf %843, %868 : vector<4x256xf32>
    %c0_467 = arith.constant 0 : index
    %c6_468 = arith.constant 6 : index
    %c49_469 = arith.constant 49 : index
    %870 = vector.load %arg2[%c0_467, %c6_468, %c49_469] : memref<1x8x336xf32, #tpu.memory_space<vmem>>, vector<1x1x256xf32>
    %871 = vector.shape_cast %870 : vector<1x1x256xf32> to vector<1x256xf32>
    %872 = vector.broadcast %871 : vector<1x256xf32> to vector<4x256xf32>
    %873 = arith.mulf %864, %872 : vector<4x256xf32>
    %874 = arith.addf %848, %873 : vector<4x256xf32>
    %c0_470 = arith.constant 0 : index
    %c67_471 = arith.constant 67 : index
    %875 = vector.load %arg1[%c0_470, %c67_471] : memref<4x100xf32, #tpu.memory_space<vmem>>, vector<4x1xf32>
    %876 = vector.shape_cast %875 : vector<4x1xf32> to vector<4x1xf32>
    %877 = vector.broadcast %876 : vector<4x1xf32> to vector<4x256xf32>
    %c0_472 = arith.constant 0 : index
    %c2_473 = arith.constant 2 : index
    %c50_474 = arith.constant 50 : index
    %878 = vector.load %arg2[%c0_472, %c2_473, %c50_474] : memref<1x8x336xf32, #tpu.memory_space<vmem>>, vector<1x1x256xf32>
    %879 = vector.shape_cast %878 : vector<1x1x256xf32> to vector<1x256xf32>
    %880 = vector.broadcast %879 : vector<1x256xf32> to vector<4x256xf32>
    %881 = arith.mulf %877, %880 : vector<4x256xf32>
    %882 = arith.addf %856, %881 : vector<4x256xf32>
    %c0_475 = arith.constant 0 : index
    %c6_476 = arith.constant 6 : index
    %c50_477 = arith.constant 50 : index
    %883 = vector.load %arg2[%c0_475, %c6_476, %c50_477] : memref<1x8x336xf32, #tpu.memory_space<vmem>>, vector<1x1x256xf32>
    %884 = vector.shape_cast %883 : vector<1x1x256xf32> to vector<1x256xf32>
    %885 = vector.broadcast %884 : vector<1x256xf32> to vector<4x256xf32>
    %886 = arith.mulf %877, %885 : vector<4x256xf32>
    %887 = arith.addf %861, %886 : vector<4x256xf32>
    %c0_478 = arith.constant 0 : index
    %c68_479 = arith.constant 68 : index
    %888 = vector.load %arg1[%c0_478, %c68_479] : memref<4x100xf32, #tpu.memory_space<vmem>>, vector<4x1xf32>
    %889 = vector.shape_cast %888 : vector<4x1xf32> to vector<4x1xf32>
    %890 = vector.broadcast %889 : vector<4x1xf32> to vector<4x256xf32>
    %c0_480 = arith.constant 0 : index
    %c2_481 = arith.constant 2 : index
    %c51_482 = arith.constant 51 : index
    %891 = vector.load %arg2[%c0_480, %c2_481, %c51_482] : memref<1x8x336xf32, #tpu.memory_space<vmem>>, vector<1x1x256xf32>
    %892 = vector.shape_cast %891 : vector<1x1x256xf32> to vector<1x256xf32>
    %893 = vector.broadcast %892 : vector<1x256xf32> to vector<4x256xf32>
    %894 = arith.mulf %890, %893 : vector<4x256xf32>
    %895 = arith.addf %869, %894 : vector<4x256xf32>
    %c0_483 = arith.constant 0 : index
    %c6_484 = arith.constant 6 : index
    %c51_485 = arith.constant 51 : index
    %896 = vector.load %arg2[%c0_483, %c6_484, %c51_485] : memref<1x8x336xf32, #tpu.memory_space<vmem>>, vector<1x1x256xf32>
    %897 = vector.shape_cast %896 : vector<1x1x256xf32> to vector<1x256xf32>
    %898 = vector.broadcast %897 : vector<1x256xf32> to vector<4x256xf32>
    %899 = arith.mulf %890, %898 : vector<4x256xf32>
    %900 = arith.addf %874, %899 : vector<4x256xf32>
    %c0_486 = arith.constant 0 : index
    %c69 = arith.constant 69 : index
    %901 = vector.load %arg1[%c0_486, %c69] : memref<4x100xf32, #tpu.memory_space<vmem>>, vector<4x1xf32>
    %902 = vector.shape_cast %901 : vector<4x1xf32> to vector<4x1xf32>
    %903 = vector.broadcast %902 : vector<4x1xf32> to vector<4x256xf32>
    %c0_487 = arith.constant 0 : index
    %c2_488 = arith.constant 2 : index
    %c52_489 = arith.constant 52 : index
    %904 = vector.load %arg2[%c0_487, %c2_488, %c52_489] : memref<1x8x336xf32, #tpu.memory_space<vmem>>, vector<1x1x256xf32>
    %905 = vector.shape_cast %904 : vector<1x1x256xf32> to vector<1x256xf32>
    %906 = vector.broadcast %905 : vector<1x256xf32> to vector<4x256xf32>
    %907 = arith.mulf %903, %906 : vector<4x256xf32>
    %908 = arith.addf %882, %907 : vector<4x256xf32>
    %c0_490 = arith.constant 0 : index
    %c6_491 = arith.constant 6 : index
    %c52_492 = arith.constant 52 : index
    %909 = vector.load %arg2[%c0_490, %c6_491, %c52_492] : memref<1x8x336xf32, #tpu.memory_space<vmem>>, vector<1x1x256xf32>
    %910 = vector.shape_cast %909 : vector<1x1x256xf32> to vector<1x256xf32>
    %911 = vector.broadcast %910 : vector<1x256xf32> to vector<4x256xf32>
    %912 = arith.mulf %903, %911 : vector<4x256xf32>
    %913 = arith.addf %887, %912 : vector<4x256xf32>
    %c0_493 = arith.constant 0 : index
    %c70 = arith.constant 70 : index
    %914 = vector.load %arg1[%c0_493, %c70] : memref<4x100xf32, #tpu.memory_space<vmem>>, vector<4x1xf32>
    %915 = vector.shape_cast %914 : vector<4x1xf32> to vector<4x1xf32>
    %916 = vector.broadcast %915 : vector<4x1xf32> to vector<4x256xf32>
    %c0_494 = arith.constant 0 : index
    %c2_495 = arith.constant 2 : index
    %c64_496 = arith.constant 64 : index
    %917 = vector.load %arg2[%c0_494, %c2_495, %c64_496] : memref<1x8x336xf32, #tpu.memory_space<vmem>>, vector<1x1x256xf32>
    %918 = vector.shape_cast %917 : vector<1x1x256xf32> to vector<1x256xf32>
    %919 = vector.broadcast %918 : vector<1x256xf32> to vector<4x256xf32>
    %920 = arith.mulf %916, %919 : vector<4x256xf32>
    %921 = arith.addf %895, %920 : vector<4x256xf32>
    %c0_497 = arith.constant 0 : index
    %c6_498 = arith.constant 6 : index
    %c64_499 = arith.constant 64 : index
    %922 = vector.load %arg2[%c0_497, %c6_498, %c64_499] : memref<1x8x336xf32, #tpu.memory_space<vmem>>, vector<1x1x256xf32>
    %923 = vector.shape_cast %922 : vector<1x1x256xf32> to vector<1x256xf32>
    %924 = vector.broadcast %923 : vector<1x256xf32> to vector<4x256xf32>
    %925 = arith.mulf %916, %924 : vector<4x256xf32>
    %926 = arith.addf %900, %925 : vector<4x256xf32>
    %c0_500 = arith.constant 0 : index
    %c71 = arith.constant 71 : index
    %927 = vector.load %arg1[%c0_500, %c71] : memref<4x100xf32, #tpu.memory_space<vmem>>, vector<4x1xf32>
    %928 = vector.shape_cast %927 : vector<4x1xf32> to vector<4x1xf32>
    %929 = vector.broadcast %928 : vector<4x1xf32> to vector<4x256xf32>
    %c0_501 = arith.constant 0 : index
    %c2_502 = arith.constant 2 : index
    %c65_503 = arith.constant 65 : index
    %930 = vector.load %arg2[%c0_501, %c2_502, %c65_503] : memref<1x8x336xf32, #tpu.memory_space<vmem>>, vector<1x1x256xf32>
    %931 = vector.shape_cast %930 : vector<1x1x256xf32> to vector<1x256xf32>
    %932 = vector.broadcast %931 : vector<1x256xf32> to vector<4x256xf32>
    %933 = arith.mulf %929, %932 : vector<4x256xf32>
    %934 = arith.addf %908, %933 : vector<4x256xf32>
    %c0_504 = arith.constant 0 : index
    %c6_505 = arith.constant 6 : index
    %c65_506 = arith.constant 65 : index
    %935 = vector.load %arg2[%c0_504, %c6_505, %c65_506] : memref<1x8x336xf32, #tpu.memory_space<vmem>>, vector<1x1x256xf32>
    %936 = vector.shape_cast %935 : vector<1x1x256xf32> to vector<1x256xf32>
    %937 = vector.broadcast %936 : vector<1x256xf32> to vector<4x256xf32>
    %938 = arith.mulf %929, %937 : vector<4x256xf32>
    %939 = arith.addf %913, %938 : vector<4x256xf32>
    %c0_507 = arith.constant 0 : index
    %c72 = arith.constant 72 : index
    %940 = vector.load %arg1[%c0_507, %c72] : memref<4x100xf32, #tpu.memory_space<vmem>>, vector<4x1xf32>
    %941 = vector.shape_cast %940 : vector<4x1xf32> to vector<4x1xf32>
    %942 = vector.broadcast %941 : vector<4x1xf32> to vector<4x256xf32>
    %c0_508 = arith.constant 0 : index
    %c2_509 = arith.constant 2 : index
    %c66_510 = arith.constant 66 : index
    %943 = vector.load %arg2[%c0_508, %c2_509, %c66_510] : memref<1x8x336xf32, #tpu.memory_space<vmem>>, vector<1x1x256xf32>
    %944 = vector.shape_cast %943 : vector<1x1x256xf32> to vector<1x256xf32>
    %945 = vector.broadcast %944 : vector<1x256xf32> to vector<4x256xf32>
    %946 = arith.mulf %942, %945 : vector<4x256xf32>
    %947 = arith.addf %921, %946 : vector<4x256xf32>
    %c0_511 = arith.constant 0 : index
    %c6_512 = arith.constant 6 : index
    %c66_513 = arith.constant 66 : index
    %948 = vector.load %arg2[%c0_511, %c6_512, %c66_513] : memref<1x8x336xf32, #tpu.memory_space<vmem>>, vector<1x1x256xf32>
    %949 = vector.shape_cast %948 : vector<1x1x256xf32> to vector<1x256xf32>
    %950 = vector.broadcast %949 : vector<1x256xf32> to vector<4x256xf32>
    %951 = arith.mulf %942, %950 : vector<4x256xf32>
    %952 = arith.addf %926, %951 : vector<4x256xf32>
    %c0_514 = arith.constant 0 : index
    %c73 = arith.constant 73 : index
    %953 = vector.load %arg1[%c0_514, %c73] : memref<4x100xf32, #tpu.memory_space<vmem>>, vector<4x1xf32>
    %954 = vector.shape_cast %953 : vector<4x1xf32> to vector<4x1xf32>
    %955 = vector.broadcast %954 : vector<4x1xf32> to vector<4x256xf32>
    %c0_515 = arith.constant 0 : index
    %c2_516 = arith.constant 2 : index
    %c67_517 = arith.constant 67 : index
    %956 = vector.load %arg2[%c0_515, %c2_516, %c67_517] : memref<1x8x336xf32, #tpu.memory_space<vmem>>, vector<1x1x256xf32>
    %957 = vector.shape_cast %956 : vector<1x1x256xf32> to vector<1x256xf32>
    %958 = vector.broadcast %957 : vector<1x256xf32> to vector<4x256xf32>
    %959 = arith.mulf %955, %958 : vector<4x256xf32>
    %960 = arith.addf %934, %959 : vector<4x256xf32>
    %c0_518 = arith.constant 0 : index
    %c6_519 = arith.constant 6 : index
    %c67_520 = arith.constant 67 : index
    %961 = vector.load %arg2[%c0_518, %c6_519, %c67_520] : memref<1x8x336xf32, #tpu.memory_space<vmem>>, vector<1x1x256xf32>
    %962 = vector.shape_cast %961 : vector<1x1x256xf32> to vector<1x256xf32>
    %963 = vector.broadcast %962 : vector<1x256xf32> to vector<4x256xf32>
    %964 = arith.mulf %955, %963 : vector<4x256xf32>
    %965 = arith.addf %939, %964 : vector<4x256xf32>
    %c0_521 = arith.constant 0 : index
    %c74 = arith.constant 74 : index
    %966 = vector.load %arg1[%c0_521, %c74] : memref<4x100xf32, #tpu.memory_space<vmem>>, vector<4x1xf32>
    %967 = vector.shape_cast %966 : vector<4x1xf32> to vector<4x1xf32>
    %968 = vector.broadcast %967 : vector<4x1xf32> to vector<4x256xf32>
    %c0_522 = arith.constant 0 : index
    %c2_523 = arith.constant 2 : index
    %c68_524 = arith.constant 68 : index
    %969 = vector.load %arg2[%c0_522, %c2_523, %c68_524] : memref<1x8x336xf32, #tpu.memory_space<vmem>>, vector<1x1x256xf32>
    %970 = vector.shape_cast %969 : vector<1x1x256xf32> to vector<1x256xf32>
    %971 = vector.broadcast %970 : vector<1x256xf32> to vector<4x256xf32>
    %972 = arith.mulf %968, %971 : vector<4x256xf32>
    %973 = arith.addf %947, %972 : vector<4x256xf32>
    %c0_525 = arith.constant 0 : index
    %c6_526 = arith.constant 6 : index
    %c68_527 = arith.constant 68 : index
    %974 = vector.load %arg2[%c0_525, %c6_526, %c68_527] : memref<1x8x336xf32, #tpu.memory_space<vmem>>, vector<1x1x256xf32>
    %975 = vector.shape_cast %974 : vector<1x1x256xf32> to vector<1x256xf32>
    %976 = vector.broadcast %975 : vector<1x256xf32> to vector<4x256xf32>
    %977 = arith.mulf %968, %976 : vector<4x256xf32>
    %978 = arith.addf %952, %977 : vector<4x256xf32>
    %c0_528 = arith.constant 0 : index
    %c75 = arith.constant 75 : index
    %979 = vector.load %arg1[%c0_528, %c75] : memref<4x100xf32, #tpu.memory_space<vmem>>, vector<4x1xf32>
    %980 = vector.shape_cast %979 : vector<4x1xf32> to vector<4x1xf32>
    %981 = vector.broadcast %980 : vector<4x1xf32> to vector<4x256xf32>
    %c0_529 = arith.constant 0 : index
    %c3_530 = arith.constant 3 : index
    %c0_531 = arith.constant 0 : index
    %982 = vector.load %arg2[%c0_529, %c3_530, %c0_531] : memref<1x8x336xf32, #tpu.memory_space<vmem>>, vector<1x1x256xf32>
    %983 = vector.shape_cast %982 : vector<1x1x256xf32> to vector<1x256xf32>
    %984 = vector.broadcast %983 : vector<1x256xf32> to vector<4x256xf32>
    %985 = arith.mulf %981, %984 : vector<4x256xf32>
    %986 = arith.addf %960, %985 : vector<4x256xf32>
    %c0_532 = arith.constant 0 : index
    %c7_533 = arith.constant 7 : index
    %c0_534 = arith.constant 0 : index
    %987 = vector.load %arg2[%c0_532, %c7_533, %c0_534] : memref<1x8x336xf32, #tpu.memory_space<vmem>>, vector<1x1x256xf32>
    %988 = vector.shape_cast %987 : vector<1x1x256xf32> to vector<1x256xf32>
    %989 = vector.broadcast %988 : vector<1x256xf32> to vector<4x256xf32>
    %990 = arith.mulf %981, %989 : vector<4x256xf32>
    %991 = arith.addf %965, %990 : vector<4x256xf32>
    %c0_535 = arith.constant 0 : index
    %c76 = arith.constant 76 : index
    %992 = vector.load %arg1[%c0_535, %c76] : memref<4x100xf32, #tpu.memory_space<vmem>>, vector<4x1xf32>
    %993 = vector.shape_cast %992 : vector<4x1xf32> to vector<4x1xf32>
    %994 = vector.broadcast %993 : vector<4x1xf32> to vector<4x256xf32>
    %c0_536 = arith.constant 0 : index
    %c3_537 = arith.constant 3 : index
    %c1_538 = arith.constant 1 : index
    %995 = vector.load %arg2[%c0_536, %c3_537, %c1_538] : memref<1x8x336xf32, #tpu.memory_space<vmem>>, vector<1x1x256xf32>
    %996 = vector.shape_cast %995 : vector<1x1x256xf32> to vector<1x256xf32>
    %997 = vector.broadcast %996 : vector<1x256xf32> to vector<4x256xf32>
    %998 = arith.mulf %994, %997 : vector<4x256xf32>
    %999 = arith.addf %973, %998 : vector<4x256xf32>
    %c0_539 = arith.constant 0 : index
    %c7_540 = arith.constant 7 : index
    %c1_541 = arith.constant 1 : index
    %1000 = vector.load %arg2[%c0_539, %c7_540, %c1_541] : memref<1x8x336xf32, #tpu.memory_space<vmem>>, vector<1x1x256xf32>
    %1001 = vector.shape_cast %1000 : vector<1x1x256xf32> to vector<1x256xf32>
    %1002 = vector.broadcast %1001 : vector<1x256xf32> to vector<4x256xf32>
    %1003 = arith.mulf %994, %1002 : vector<4x256xf32>
    %1004 = arith.addf %978, %1003 : vector<4x256xf32>
    %c0_542 = arith.constant 0 : index
    %c77 = arith.constant 77 : index
    %1005 = vector.load %arg1[%c0_542, %c77] : memref<4x100xf32, #tpu.memory_space<vmem>>, vector<4x1xf32>
    %1006 = vector.shape_cast %1005 : vector<4x1xf32> to vector<4x1xf32>
    %1007 = vector.broadcast %1006 : vector<4x1xf32> to vector<4x256xf32>
    %c0_543 = arith.constant 0 : index
    %c3_544 = arith.constant 3 : index
    %c2_545 = arith.constant 2 : index
    %1008 = vector.load %arg2[%c0_543, %c3_544, %c2_545] : memref<1x8x336xf32, #tpu.memory_space<vmem>>, vector<1x1x256xf32>
    %1009 = vector.shape_cast %1008 : vector<1x1x256xf32> to vector<1x256xf32>
    %1010 = vector.broadcast %1009 : vector<1x256xf32> to vector<4x256xf32>
    %1011 = arith.mulf %1007, %1010 : vector<4x256xf32>
    %1012 = arith.addf %986, %1011 : vector<4x256xf32>
    %c0_546 = arith.constant 0 : index
    %c7_547 = arith.constant 7 : index
    %c2_548 = arith.constant 2 : index
    %1013 = vector.load %arg2[%c0_546, %c7_547, %c2_548] : memref<1x8x336xf32, #tpu.memory_space<vmem>>, vector<1x1x256xf32>
    %1014 = vector.shape_cast %1013 : vector<1x1x256xf32> to vector<1x256xf32>
    %1015 = vector.broadcast %1014 : vector<1x256xf32> to vector<4x256xf32>
    %1016 = arith.mulf %1007, %1015 : vector<4x256xf32>
    %1017 = arith.addf %991, %1016 : vector<4x256xf32>
    %c0_549 = arith.constant 0 : index
    %c78 = arith.constant 78 : index
    %1018 = vector.load %arg1[%c0_549, %c78] : memref<4x100xf32, #tpu.memory_space<vmem>>, vector<4x1xf32>
    %1019 = vector.shape_cast %1018 : vector<4x1xf32> to vector<4x1xf32>
    %1020 = vector.broadcast %1019 : vector<4x1xf32> to vector<4x256xf32>
    %c0_550 = arith.constant 0 : index
    %c3_551 = arith.constant 3 : index
    %c3_552 = arith.constant 3 : index
    %1021 = vector.load %arg2[%c0_550, %c3_551, %c3_552] : memref<1x8x336xf32, #tpu.memory_space<vmem>>, vector<1x1x256xf32>
    %1022 = vector.shape_cast %1021 : vector<1x1x256xf32> to vector<1x256xf32>
    %1023 = vector.broadcast %1022 : vector<1x256xf32> to vector<4x256xf32>
    %1024 = arith.mulf %1020, %1023 : vector<4x256xf32>
    %1025 = arith.addf %999, %1024 : vector<4x256xf32>
    %c0_553 = arith.constant 0 : index
    %c7_554 = arith.constant 7 : index
    %c3_555 = arith.constant 3 : index
    %1026 = vector.load %arg2[%c0_553, %c7_554, %c3_555] : memref<1x8x336xf32, #tpu.memory_space<vmem>>, vector<1x1x256xf32>
    %1027 = vector.shape_cast %1026 : vector<1x1x256xf32> to vector<1x256xf32>
    %1028 = vector.broadcast %1027 : vector<1x256xf32> to vector<4x256xf32>
    %1029 = arith.mulf %1020, %1028 : vector<4x256xf32>
    %1030 = arith.addf %1004, %1029 : vector<4x256xf32>
    %c0_556 = arith.constant 0 : index
    %c79 = arith.constant 79 : index
    %1031 = vector.load %arg1[%c0_556, %c79] : memref<4x100xf32, #tpu.memory_space<vmem>>, vector<4x1xf32>
    %1032 = vector.shape_cast %1031 : vector<4x1xf32> to vector<4x1xf32>
    %1033 = vector.broadcast %1032 : vector<4x1xf32> to vector<4x256xf32>
    %c0_557 = arith.constant 0 : index
    %c3_558 = arith.constant 3 : index
    %c4_559 = arith.constant 4 : index
    %1034 = vector.load %arg2[%c0_557, %c3_558, %c4_559] : memref<1x8x336xf32, #tpu.memory_space<vmem>>, vector<1x1x256xf32>
    %1035 = vector.shape_cast %1034 : vector<1x1x256xf32> to vector<1x256xf32>
    %1036 = vector.broadcast %1035 : vector<1x256xf32> to vector<4x256xf32>
    %1037 = arith.mulf %1033, %1036 : vector<4x256xf32>
    %1038 = arith.addf %1012, %1037 : vector<4x256xf32>
    %c0_560 = arith.constant 0 : index
    %c7_561 = arith.constant 7 : index
    %c4_562 = arith.constant 4 : index
    %1039 = vector.load %arg2[%c0_560, %c7_561, %c4_562] : memref<1x8x336xf32, #tpu.memory_space<vmem>>, vector<1x1x256xf32>
    %1040 = vector.shape_cast %1039 : vector<1x1x256xf32> to vector<1x256xf32>
    %1041 = vector.broadcast %1040 : vector<1x256xf32> to vector<4x256xf32>
    %1042 = arith.mulf %1033, %1041 : vector<4x256xf32>
    %1043 = arith.addf %1017, %1042 : vector<4x256xf32>
    %c0_563 = arith.constant 0 : index
    %c80 = arith.constant 80 : index
    %1044 = vector.load %arg1[%c0_563, %c80] : memref<4x100xf32, #tpu.memory_space<vmem>>, vector<4x1xf32>
    %1045 = vector.shape_cast %1044 : vector<4x1xf32> to vector<4x1xf32>
    %1046 = vector.broadcast %1045 : vector<4x1xf32> to vector<4x256xf32>
    %c0_564 = arith.constant 0 : index
    %c3_565 = arith.constant 3 : index
    %c16_566 = arith.constant 16 : index
    %1047 = vector.load %arg2[%c0_564, %c3_565, %c16_566] : memref<1x8x336xf32, #tpu.memory_space<vmem>>, vector<1x1x256xf32>
    %1048 = vector.shape_cast %1047 : vector<1x1x256xf32> to vector<1x256xf32>
    %1049 = vector.broadcast %1048 : vector<1x256xf32> to vector<4x256xf32>
    %1050 = arith.mulf %1046, %1049 : vector<4x256xf32>
    %1051 = arith.addf %1025, %1050 : vector<4x256xf32>
    %c0_567 = arith.constant 0 : index
    %c7_568 = arith.constant 7 : index
    %c16_569 = arith.constant 16 : index
    %1052 = vector.load %arg2[%c0_567, %c7_568, %c16_569] : memref<1x8x336xf32, #tpu.memory_space<vmem>>, vector<1x1x256xf32>
    %1053 = vector.shape_cast %1052 : vector<1x1x256xf32> to vector<1x256xf32>
    %1054 = vector.broadcast %1053 : vector<1x256xf32> to vector<4x256xf32>
    %1055 = arith.mulf %1046, %1054 : vector<4x256xf32>
    %1056 = arith.addf %1030, %1055 : vector<4x256xf32>
    %c0_570 = arith.constant 0 : index
    %c81 = arith.constant 81 : index
    %1057 = vector.load %arg1[%c0_570, %c81] : memref<4x100xf32, #tpu.memory_space<vmem>>, vector<4x1xf32>
    %1058 = vector.shape_cast %1057 : vector<4x1xf32> to vector<4x1xf32>
    %1059 = vector.broadcast %1058 : vector<4x1xf32> to vector<4x256xf32>
    %c0_571 = arith.constant 0 : index
    %c3_572 = arith.constant 3 : index
    %c17_573 = arith.constant 17 : index
    %1060 = vector.load %arg2[%c0_571, %c3_572, %c17_573] : memref<1x8x336xf32, #tpu.memory_space<vmem>>, vector<1x1x256xf32>
    %1061 = vector.shape_cast %1060 : vector<1x1x256xf32> to vector<1x256xf32>
    %1062 = vector.broadcast %1061 : vector<1x256xf32> to vector<4x256xf32>
    %1063 = arith.mulf %1059, %1062 : vector<4x256xf32>
    %1064 = arith.addf %1038, %1063 : vector<4x256xf32>
    %c0_574 = arith.constant 0 : index
    %c7_575 = arith.constant 7 : index
    %c17_576 = arith.constant 17 : index
    %1065 = vector.load %arg2[%c0_574, %c7_575, %c17_576] : memref<1x8x336xf32, #tpu.memory_space<vmem>>, vector<1x1x256xf32>
    %1066 = vector.shape_cast %1065 : vector<1x1x256xf32> to vector<1x256xf32>
    %1067 = vector.broadcast %1066 : vector<1x256xf32> to vector<4x256xf32>
    %1068 = arith.mulf %1059, %1067 : vector<4x256xf32>
    %1069 = arith.addf %1043, %1068 : vector<4x256xf32>
    %c0_577 = arith.constant 0 : index
    %c82 = arith.constant 82 : index
    %1070 = vector.load %arg1[%c0_577, %c82] : memref<4x100xf32, #tpu.memory_space<vmem>>, vector<4x1xf32>
    %1071 = vector.shape_cast %1070 : vector<4x1xf32> to vector<4x1xf32>
    %1072 = vector.broadcast %1071 : vector<4x1xf32> to vector<4x256xf32>
    %c0_578 = arith.constant 0 : index
    %c3_579 = arith.constant 3 : index
    %c18_580 = arith.constant 18 : index
    %1073 = vector.load %arg2[%c0_578, %c3_579, %c18_580] : memref<1x8x336xf32, #tpu.memory_space<vmem>>, vector<1x1x256xf32>
    %1074 = vector.shape_cast %1073 : vector<1x1x256xf32> to vector<1x256xf32>
    %1075 = vector.broadcast %1074 : vector<1x256xf32> to vector<4x256xf32>
    %1076 = arith.mulf %1072, %1075 : vector<4x256xf32>
    %1077 = arith.addf %1051, %1076 : vector<4x256xf32>
    %c0_581 = arith.constant 0 : index
    %c7_582 = arith.constant 7 : index
    %c18_583 = arith.constant 18 : index
    %1078 = vector.load %arg2[%c0_581, %c7_582, %c18_583] : memref<1x8x336xf32, #tpu.memory_space<vmem>>, vector<1x1x256xf32>
    %1079 = vector.shape_cast %1078 : vector<1x1x256xf32> to vector<1x256xf32>
    %1080 = vector.broadcast %1079 : vector<1x256xf32> to vector<4x256xf32>
    %1081 = arith.mulf %1072, %1080 : vector<4x256xf32>
    %1082 = arith.addf %1056, %1081 : vector<4x256xf32>
    %c0_584 = arith.constant 0 : index
    %c83 = arith.constant 83 : index
    %1083 = vector.load %arg1[%c0_584, %c83] : memref<4x100xf32, #tpu.memory_space<vmem>>, vector<4x1xf32>
    %1084 = vector.shape_cast %1083 : vector<4x1xf32> to vector<4x1xf32>
    %1085 = vector.broadcast %1084 : vector<4x1xf32> to vector<4x256xf32>
    %c0_585 = arith.constant 0 : index
    %c3_586 = arith.constant 3 : index
    %c19_587 = arith.constant 19 : index
    %1086 = vector.load %arg2[%c0_585, %c3_586, %c19_587] : memref<1x8x336xf32, #tpu.memory_space<vmem>>, vector<1x1x256xf32>
    %1087 = vector.shape_cast %1086 : vector<1x1x256xf32> to vector<1x256xf32>
    %1088 = vector.broadcast %1087 : vector<1x256xf32> to vector<4x256xf32>
    %1089 = arith.mulf %1085, %1088 : vector<4x256xf32>
    %1090 = arith.addf %1064, %1089 : vector<4x256xf32>
    %c0_588 = arith.constant 0 : index
    %c7_589 = arith.constant 7 : index
    %c19_590 = arith.constant 19 : index
    %1091 = vector.load %arg2[%c0_588, %c7_589, %c19_590] : memref<1x8x336xf32, #tpu.memory_space<vmem>>, vector<1x1x256xf32>
    %1092 = vector.shape_cast %1091 : vector<1x1x256xf32> to vector<1x256xf32>
    %1093 = vector.broadcast %1092 : vector<1x256xf32> to vector<4x256xf32>
    %1094 = arith.mulf %1085, %1093 : vector<4x256xf32>
    %1095 = arith.addf %1069, %1094 : vector<4x256xf32>
    %c0_591 = arith.constant 0 : index
    %c84 = arith.constant 84 : index
    %1096 = vector.load %arg1[%c0_591, %c84] : memref<4x100xf32, #tpu.memory_space<vmem>>, vector<4x1xf32>
    %1097 = vector.shape_cast %1096 : vector<4x1xf32> to vector<4x1xf32>
    %1098 = vector.broadcast %1097 : vector<4x1xf32> to vector<4x256xf32>
    %c0_592 = arith.constant 0 : index
    %c3_593 = arith.constant 3 : index
    %c20_594 = arith.constant 20 : index
    %1099 = vector.load %arg2[%c0_592, %c3_593, %c20_594] : memref<1x8x336xf32, #tpu.memory_space<vmem>>, vector<1x1x256xf32>
    %1100 = vector.shape_cast %1099 : vector<1x1x256xf32> to vector<1x256xf32>
    %1101 = vector.broadcast %1100 : vector<1x256xf32> to vector<4x256xf32>
    %1102 = arith.mulf %1098, %1101 : vector<4x256xf32>
    %1103 = arith.addf %1077, %1102 : vector<4x256xf32>
    %c0_595 = arith.constant 0 : index
    %c7_596 = arith.constant 7 : index
    %c20_597 = arith.constant 20 : index
    %1104 = vector.load %arg2[%c0_595, %c7_596, %c20_597] : memref<1x8x336xf32, #tpu.memory_space<vmem>>, vector<1x1x256xf32>
    %1105 = vector.shape_cast %1104 : vector<1x1x256xf32> to vector<1x256xf32>
    %1106 = vector.broadcast %1105 : vector<1x256xf32> to vector<4x256xf32>
    %1107 = arith.mulf %1098, %1106 : vector<4x256xf32>
    %1108 = arith.addf %1082, %1107 : vector<4x256xf32>
    %c0_598 = arith.constant 0 : index
    %c85 = arith.constant 85 : index
    %1109 = vector.load %arg1[%c0_598, %c85] : memref<4x100xf32, #tpu.memory_space<vmem>>, vector<4x1xf32>
    %1110 = vector.shape_cast %1109 : vector<4x1xf32> to vector<4x1xf32>
    %1111 = vector.broadcast %1110 : vector<4x1xf32> to vector<4x256xf32>
    %c0_599 = arith.constant 0 : index
    %c3_600 = arith.constant 3 : index
    %c32_601 = arith.constant 32 : index
    %1112 = vector.load %arg2[%c0_599, %c3_600, %c32_601] : memref<1x8x336xf32, #tpu.memory_space<vmem>>, vector<1x1x256xf32>
    %1113 = vector.shape_cast %1112 : vector<1x1x256xf32> to vector<1x256xf32>
    %1114 = vector.broadcast %1113 : vector<1x256xf32> to vector<4x256xf32>
    %1115 = arith.mulf %1111, %1114 : vector<4x256xf32>
    %1116 = arith.addf %1090, %1115 : vector<4x256xf32>
    %c0_602 = arith.constant 0 : index
    %c7_603 = arith.constant 7 : index
    %c32_604 = arith.constant 32 : index
    %1117 = vector.load %arg2[%c0_602, %c7_603, %c32_604] : memref<1x8x336xf32, #tpu.memory_space<vmem>>, vector<1x1x256xf32>
    %1118 = vector.shape_cast %1117 : vector<1x1x256xf32> to vector<1x256xf32>
    %1119 = vector.broadcast %1118 : vector<1x256xf32> to vector<4x256xf32>
    %1120 = arith.mulf %1111, %1119 : vector<4x256xf32>
    %1121 = arith.addf %1095, %1120 : vector<4x256xf32>
    %c0_605 = arith.constant 0 : index
    %c86 = arith.constant 86 : index
    %1122 = vector.load %arg1[%c0_605, %c86] : memref<4x100xf32, #tpu.memory_space<vmem>>, vector<4x1xf32>
    %1123 = vector.shape_cast %1122 : vector<4x1xf32> to vector<4x1xf32>
    %1124 = vector.broadcast %1123 : vector<4x1xf32> to vector<4x256xf32>
    %c0_606 = arith.constant 0 : index
    %c3_607 = arith.constant 3 : index
    %c33_608 = arith.constant 33 : index
    %1125 = vector.load %arg2[%c0_606, %c3_607, %c33_608] : memref<1x8x336xf32, #tpu.memory_space<vmem>>, vector<1x1x256xf32>
    %1126 = vector.shape_cast %1125 : vector<1x1x256xf32> to vector<1x256xf32>
    %1127 = vector.broadcast %1126 : vector<1x256xf32> to vector<4x256xf32>
    %1128 = arith.mulf %1124, %1127 : vector<4x256xf32>
    %1129 = arith.addf %1103, %1128 : vector<4x256xf32>
    %c0_609 = arith.constant 0 : index
    %c7_610 = arith.constant 7 : index
    %c33_611 = arith.constant 33 : index
    %1130 = vector.load %arg2[%c0_609, %c7_610, %c33_611] : memref<1x8x336xf32, #tpu.memory_space<vmem>>, vector<1x1x256xf32>
    %1131 = vector.shape_cast %1130 : vector<1x1x256xf32> to vector<1x256xf32>
    %1132 = vector.broadcast %1131 : vector<1x256xf32> to vector<4x256xf32>
    %1133 = arith.mulf %1124, %1132 : vector<4x256xf32>
    %1134 = arith.addf %1108, %1133 : vector<4x256xf32>
    %c0_612 = arith.constant 0 : index
    %c87 = arith.constant 87 : index
    %1135 = vector.load %arg1[%c0_612, %c87] : memref<4x100xf32, #tpu.memory_space<vmem>>, vector<4x1xf32>
    %1136 = vector.shape_cast %1135 : vector<4x1xf32> to vector<4x1xf32>
    %1137 = vector.broadcast %1136 : vector<4x1xf32> to vector<4x256xf32>
    %c0_613 = arith.constant 0 : index
    %c3_614 = arith.constant 3 : index
    %c34_615 = arith.constant 34 : index
    %1138 = vector.load %arg2[%c0_613, %c3_614, %c34_615] : memref<1x8x336xf32, #tpu.memory_space<vmem>>, vector<1x1x256xf32>
    %1139 = vector.shape_cast %1138 : vector<1x1x256xf32> to vector<1x256xf32>
    %1140 = vector.broadcast %1139 : vector<1x256xf32> to vector<4x256xf32>
    %1141 = arith.mulf %1137, %1140 : vector<4x256xf32>
    %1142 = arith.addf %1116, %1141 : vector<4x256xf32>
    %c0_616 = arith.constant 0 : index
    %c7_617 = arith.constant 7 : index
    %c34_618 = arith.constant 34 : index
    %1143 = vector.load %arg2[%c0_616, %c7_617, %c34_618] : memref<1x8x336xf32, #tpu.memory_space<vmem>>, vector<1x1x256xf32>
    %1144 = vector.shape_cast %1143 : vector<1x1x256xf32> to vector<1x256xf32>
    %1145 = vector.broadcast %1144 : vector<1x256xf32> to vector<4x256xf32>
    %1146 = arith.mulf %1137, %1145 : vector<4x256xf32>
    %1147 = arith.addf %1121, %1146 : vector<4x256xf32>
    %c0_619 = arith.constant 0 : index
    %c88 = arith.constant 88 : index
    %1148 = vector.load %arg1[%c0_619, %c88] : memref<4x100xf32, #tpu.memory_space<vmem>>, vector<4x1xf32>
    %1149 = vector.shape_cast %1148 : vector<4x1xf32> to vector<4x1xf32>
    %1150 = vector.broadcast %1149 : vector<4x1xf32> to vector<4x256xf32>
    %c0_620 = arith.constant 0 : index
    %c3_621 = arith.constant 3 : index
    %c35_622 = arith.constant 35 : index
    %1151 = vector.load %arg2[%c0_620, %c3_621, %c35_622] : memref<1x8x336xf32, #tpu.memory_space<vmem>>, vector<1x1x256xf32>
    %1152 = vector.shape_cast %1151 : vector<1x1x256xf32> to vector<1x256xf32>
    %1153 = vector.broadcast %1152 : vector<1x256xf32> to vector<4x256xf32>
    %1154 = arith.mulf %1150, %1153 : vector<4x256xf32>
    %1155 = arith.addf %1129, %1154 : vector<4x256xf32>
    %c0_623 = arith.constant 0 : index
    %c7_624 = arith.constant 7 : index
    %c35_625 = arith.constant 35 : index
    %1156 = vector.load %arg2[%c0_623, %c7_624, %c35_625] : memref<1x8x336xf32, #tpu.memory_space<vmem>>, vector<1x1x256xf32>
    %1157 = vector.shape_cast %1156 : vector<1x1x256xf32> to vector<1x256xf32>
    %1158 = vector.broadcast %1157 : vector<1x256xf32> to vector<4x256xf32>
    %1159 = arith.mulf %1150, %1158 : vector<4x256xf32>
    %1160 = arith.addf %1134, %1159 : vector<4x256xf32>
    %c0_626 = arith.constant 0 : index
    %c89 = arith.constant 89 : index
    %1161 = vector.load %arg1[%c0_626, %c89] : memref<4x100xf32, #tpu.memory_space<vmem>>, vector<4x1xf32>
    %1162 = vector.shape_cast %1161 : vector<4x1xf32> to vector<4x1xf32>
    %1163 = vector.broadcast %1162 : vector<4x1xf32> to vector<4x256xf32>
    %c0_627 = arith.constant 0 : index
    %c3_628 = arith.constant 3 : index
    %c36_629 = arith.constant 36 : index
    %1164 = vector.load %arg2[%c0_627, %c3_628, %c36_629] : memref<1x8x336xf32, #tpu.memory_space<vmem>>, vector<1x1x256xf32>
    %1165 = vector.shape_cast %1164 : vector<1x1x256xf32> to vector<1x256xf32>
    %1166 = vector.broadcast %1165 : vector<1x256xf32> to vector<4x256xf32>
    %1167 = arith.mulf %1163, %1166 : vector<4x256xf32>
    %1168 = arith.addf %1142, %1167 : vector<4x256xf32>
    %c0_630 = arith.constant 0 : index
    %c7_631 = arith.constant 7 : index
    %c36_632 = arith.constant 36 : index
    %1169 = vector.load %arg2[%c0_630, %c7_631, %c36_632] : memref<1x8x336xf32, #tpu.memory_space<vmem>>, vector<1x1x256xf32>
    %1170 = vector.shape_cast %1169 : vector<1x1x256xf32> to vector<1x256xf32>
    %1171 = vector.broadcast %1170 : vector<1x256xf32> to vector<4x256xf32>
    %1172 = arith.mulf %1163, %1171 : vector<4x256xf32>
    %1173 = arith.addf %1147, %1172 : vector<4x256xf32>
    %c0_633 = arith.constant 0 : index
    %c90 = arith.constant 90 : index
    %1174 = vector.load %arg1[%c0_633, %c90] : memref<4x100xf32, #tpu.memory_space<vmem>>, vector<4x1xf32>
    %1175 = vector.shape_cast %1174 : vector<4x1xf32> to vector<4x1xf32>
    %1176 = vector.broadcast %1175 : vector<4x1xf32> to vector<4x256xf32>
    %c0_634 = arith.constant 0 : index
    %c3_635 = arith.constant 3 : index
    %c48_636 = arith.constant 48 : index
    %1177 = vector.load %arg2[%c0_634, %c3_635, %c48_636] : memref<1x8x336xf32, #tpu.memory_space<vmem>>, vector<1x1x256xf32>
    %1178 = vector.shape_cast %1177 : vector<1x1x256xf32> to vector<1x256xf32>
    %1179 = vector.broadcast %1178 : vector<1x256xf32> to vector<4x256xf32>
    %1180 = arith.mulf %1176, %1179 : vector<4x256xf32>
    %1181 = arith.addf %1155, %1180 : vector<4x256xf32>
    %c0_637 = arith.constant 0 : index
    %c7_638 = arith.constant 7 : index
    %c48_639 = arith.constant 48 : index
    %1182 = vector.load %arg2[%c0_637, %c7_638, %c48_639] : memref<1x8x336xf32, #tpu.memory_space<vmem>>, vector<1x1x256xf32>
    %1183 = vector.shape_cast %1182 : vector<1x1x256xf32> to vector<1x256xf32>
    %1184 = vector.broadcast %1183 : vector<1x256xf32> to vector<4x256xf32>
    %1185 = arith.mulf %1176, %1184 : vector<4x256xf32>
    %1186 = arith.addf %1160, %1185 : vector<4x256xf32>
    %c0_640 = arith.constant 0 : index
    %c91 = arith.constant 91 : index
    %1187 = vector.load %arg1[%c0_640, %c91] : memref<4x100xf32, #tpu.memory_space<vmem>>, vector<4x1xf32>
    %1188 = vector.shape_cast %1187 : vector<4x1xf32> to vector<4x1xf32>
    %1189 = vector.broadcast %1188 : vector<4x1xf32> to vector<4x256xf32>
    %c0_641 = arith.constant 0 : index
    %c3_642 = arith.constant 3 : index
    %c49_643 = arith.constant 49 : index
    %1190 = vector.load %arg2[%c0_641, %c3_642, %c49_643] : memref<1x8x336xf32, #tpu.memory_space<vmem>>, vector<1x1x256xf32>
    %1191 = vector.shape_cast %1190 : vector<1x1x256xf32> to vector<1x256xf32>
    %1192 = vector.broadcast %1191 : vector<1x256xf32> to vector<4x256xf32>
    %1193 = arith.mulf %1189, %1192 : vector<4x256xf32>
    %1194 = arith.addf %1168, %1193 : vector<4x256xf32>
    %c0_644 = arith.constant 0 : index
    %c7_645 = arith.constant 7 : index
    %c49_646 = arith.constant 49 : index
    %1195 = vector.load %arg2[%c0_644, %c7_645, %c49_646] : memref<1x8x336xf32, #tpu.memory_space<vmem>>, vector<1x1x256xf32>
    %1196 = vector.shape_cast %1195 : vector<1x1x256xf32> to vector<1x256xf32>
    %1197 = vector.broadcast %1196 : vector<1x256xf32> to vector<4x256xf32>
    %1198 = arith.mulf %1189, %1197 : vector<4x256xf32>
    %1199 = arith.addf %1173, %1198 : vector<4x256xf32>
    %c0_647 = arith.constant 0 : index
    %c92 = arith.constant 92 : index
    %1200 = vector.load %arg1[%c0_647, %c92] : memref<4x100xf32, #tpu.memory_space<vmem>>, vector<4x1xf32>
    %1201 = vector.shape_cast %1200 : vector<4x1xf32> to vector<4x1xf32>
    %1202 = vector.broadcast %1201 : vector<4x1xf32> to vector<4x256xf32>
    %c0_648 = arith.constant 0 : index
    %c3_649 = arith.constant 3 : index
    %c50_650 = arith.constant 50 : index
    %1203 = vector.load %arg2[%c0_648, %c3_649, %c50_650] : memref<1x8x336xf32, #tpu.memory_space<vmem>>, vector<1x1x256xf32>
    %1204 = vector.shape_cast %1203 : vector<1x1x256xf32> to vector<1x256xf32>
    %1205 = vector.broadcast %1204 : vector<1x256xf32> to vector<4x256xf32>
    %1206 = arith.mulf %1202, %1205 : vector<4x256xf32>
    %1207 = arith.addf %1181, %1206 : vector<4x256xf32>
    %c0_651 = arith.constant 0 : index
    %c7_652 = arith.constant 7 : index
    %c50_653 = arith.constant 50 : index
    %1208 = vector.load %arg2[%c0_651, %c7_652, %c50_653] : memref<1x8x336xf32, #tpu.memory_space<vmem>>, vector<1x1x256xf32>
    %1209 = vector.shape_cast %1208 : vector<1x1x256xf32> to vector<1x256xf32>
    %1210 = vector.broadcast %1209 : vector<1x256xf32> to vector<4x256xf32>
    %1211 = arith.mulf %1202, %1210 : vector<4x256xf32>
    %1212 = arith.addf %1186, %1211 : vector<4x256xf32>
    %c0_654 = arith.constant 0 : index
    %c93 = arith.constant 93 : index
    %1213 = vector.load %arg1[%c0_654, %c93] : memref<4x100xf32, #tpu.memory_space<vmem>>, vector<4x1xf32>
    %1214 = vector.shape_cast %1213 : vector<4x1xf32> to vector<4x1xf32>
    %1215 = vector.broadcast %1214 : vector<4x1xf32> to vector<4x256xf32>
    %c0_655 = arith.constant 0 : index
    %c3_656 = arith.constant 3 : index
    %c51_657 = arith.constant 51 : index
    %1216 = vector.load %arg2[%c0_655, %c3_656, %c51_657] : memref<1x8x336xf32, #tpu.memory_space<vmem>>, vector<1x1x256xf32>
    %1217 = vector.shape_cast %1216 : vector<1x1x256xf32> to vector<1x256xf32>
    %1218 = vector.broadcast %1217 : vector<1x256xf32> to vector<4x256xf32>
    %1219 = arith.mulf %1215, %1218 : vector<4x256xf32>
    %1220 = arith.addf %1194, %1219 : vector<4x256xf32>
    %c0_658 = arith.constant 0 : index
    %c7_659 = arith.constant 7 : index
    %c51_660 = arith.constant 51 : index
    %1221 = vector.load %arg2[%c0_658, %c7_659, %c51_660] : memref<1x8x336xf32, #tpu.memory_space<vmem>>, vector<1x1x256xf32>
    %1222 = vector.shape_cast %1221 : vector<1x1x256xf32> to vector<1x256xf32>
    %1223 = vector.broadcast %1222 : vector<1x256xf32> to vector<4x256xf32>
    %1224 = arith.mulf %1215, %1223 : vector<4x256xf32>
    %1225 = arith.addf %1199, %1224 : vector<4x256xf32>
    %c0_661 = arith.constant 0 : index
    %c94 = arith.constant 94 : index
    %1226 = vector.load %arg1[%c0_661, %c94] : memref<4x100xf32, #tpu.memory_space<vmem>>, vector<4x1xf32>
    %1227 = vector.shape_cast %1226 : vector<4x1xf32> to vector<4x1xf32>
    %1228 = vector.broadcast %1227 : vector<4x1xf32> to vector<4x256xf32>
    %c0_662 = arith.constant 0 : index
    %c3_663 = arith.constant 3 : index
    %c52_664 = arith.constant 52 : index
    %1229 = vector.load %arg2[%c0_662, %c3_663, %c52_664] : memref<1x8x336xf32, #tpu.memory_space<vmem>>, vector<1x1x256xf32>
    %1230 = vector.shape_cast %1229 : vector<1x1x256xf32> to vector<1x256xf32>
    %1231 = vector.broadcast %1230 : vector<1x256xf32> to vector<4x256xf32>
    %1232 = arith.mulf %1228, %1231 : vector<4x256xf32>
    %1233 = arith.addf %1207, %1232 : vector<4x256xf32>
    %c0_665 = arith.constant 0 : index
    %c7_666 = arith.constant 7 : index
    %c52_667 = arith.constant 52 : index
    %1234 = vector.load %arg2[%c0_665, %c7_666, %c52_667] : memref<1x8x336xf32, #tpu.memory_space<vmem>>, vector<1x1x256xf32>
    %1235 = vector.shape_cast %1234 : vector<1x1x256xf32> to vector<1x256xf32>
    %1236 = vector.broadcast %1235 : vector<1x256xf32> to vector<4x256xf32>
    %1237 = arith.mulf %1228, %1236 : vector<4x256xf32>
    %1238 = arith.addf %1212, %1237 : vector<4x256xf32>
    %c0_668 = arith.constant 0 : index
    %c95 = arith.constant 95 : index
    %1239 = vector.load %arg1[%c0_668, %c95] : memref<4x100xf32, #tpu.memory_space<vmem>>, vector<4x1xf32>
    %1240 = vector.shape_cast %1239 : vector<4x1xf32> to vector<4x1xf32>
    %1241 = vector.broadcast %1240 : vector<4x1xf32> to vector<4x256xf32>
    %c0_669 = arith.constant 0 : index
    %c3_670 = arith.constant 3 : index
    %c64_671 = arith.constant 64 : index
    %1242 = vector.load %arg2[%c0_669, %c3_670, %c64_671] : memref<1x8x336xf32, #tpu.memory_space<vmem>>, vector<1x1x256xf32>
    %1243 = vector.shape_cast %1242 : vector<1x1x256xf32> to vector<1x256xf32>
    %1244 = vector.broadcast %1243 : vector<1x256xf32> to vector<4x256xf32>
    %1245 = arith.mulf %1241, %1244 : vector<4x256xf32>
    %1246 = arith.addf %1220, %1245 : vector<4x256xf32>
    %c0_672 = arith.constant 0 : index
    %c7_673 = arith.constant 7 : index
    %c64_674 = arith.constant 64 : index
    %1247 = vector.load %arg2[%c0_672, %c7_673, %c64_674] : memref<1x8x336xf32, #tpu.memory_space<vmem>>, vector<1x1x256xf32>
    %1248 = vector.shape_cast %1247 : vector<1x1x256xf32> to vector<1x256xf32>
    %1249 = vector.broadcast %1248 : vector<1x256xf32> to vector<4x256xf32>
    %1250 = arith.mulf %1241, %1249 : vector<4x256xf32>
    %1251 = arith.addf %1225, %1250 : vector<4x256xf32>
    %c0_675 = arith.constant 0 : index
    %c96 = arith.constant 96 : index
    %1252 = vector.load %arg1[%c0_675, %c96] : memref<4x100xf32, #tpu.memory_space<vmem>>, vector<4x1xf32>
    %1253 = vector.shape_cast %1252 : vector<4x1xf32> to vector<4x1xf32>
    %1254 = vector.broadcast %1253 : vector<4x1xf32> to vector<4x256xf32>
    %c0_676 = arith.constant 0 : index
    %c3_677 = arith.constant 3 : index
    %c65_678 = arith.constant 65 : index
    %1255 = vector.load %arg2[%c0_676, %c3_677, %c65_678] : memref<1x8x336xf32, #tpu.memory_space<vmem>>, vector<1x1x256xf32>
    %1256 = vector.shape_cast %1255 : vector<1x1x256xf32> to vector<1x256xf32>
    %1257 = vector.broadcast %1256 : vector<1x256xf32> to vector<4x256xf32>
    %1258 = arith.mulf %1254, %1257 : vector<4x256xf32>
    %1259 = arith.addf %1233, %1258 : vector<4x256xf32>
    %c0_679 = arith.constant 0 : index
    %c7_680 = arith.constant 7 : index
    %c65_681 = arith.constant 65 : index
    %1260 = vector.load %arg2[%c0_679, %c7_680, %c65_681] : memref<1x8x336xf32, #tpu.memory_space<vmem>>, vector<1x1x256xf32>
    %1261 = vector.shape_cast %1260 : vector<1x1x256xf32> to vector<1x256xf32>
    %1262 = vector.broadcast %1261 : vector<1x256xf32> to vector<4x256xf32>
    %1263 = arith.mulf %1254, %1262 : vector<4x256xf32>
    %1264 = arith.addf %1238, %1263 : vector<4x256xf32>
    %c0_682 = arith.constant 0 : index
    %c97 = arith.constant 97 : index
    %1265 = vector.load %arg1[%c0_682, %c97] : memref<4x100xf32, #tpu.memory_space<vmem>>, vector<4x1xf32>
    %1266 = vector.shape_cast %1265 : vector<4x1xf32> to vector<4x1xf32>
    %1267 = vector.broadcast %1266 : vector<4x1xf32> to vector<4x256xf32>
    %c0_683 = arith.constant 0 : index
    %c3_684 = arith.constant 3 : index
    %c66_685 = arith.constant 66 : index
    %1268 = vector.load %arg2[%c0_683, %c3_684, %c66_685] : memref<1x8x336xf32, #tpu.memory_space<vmem>>, vector<1x1x256xf32>
    %1269 = vector.shape_cast %1268 : vector<1x1x256xf32> to vector<1x256xf32>
    %1270 = vector.broadcast %1269 : vector<1x256xf32> to vector<4x256xf32>
    %1271 = arith.mulf %1267, %1270 : vector<4x256xf32>
    %1272 = arith.addf %1246, %1271 : vector<4x256xf32>
    %c0_686 = arith.constant 0 : index
    %c7_687 = arith.constant 7 : index
    %c66_688 = arith.constant 66 : index
    %1273 = vector.load %arg2[%c0_686, %c7_687, %c66_688] : memref<1x8x336xf32, #tpu.memory_space<vmem>>, vector<1x1x256xf32>
    %1274 = vector.shape_cast %1273 : vector<1x1x256xf32> to vector<1x256xf32>
    %1275 = vector.broadcast %1274 : vector<1x256xf32> to vector<4x256xf32>
    %1276 = arith.mulf %1267, %1275 : vector<4x256xf32>
    %1277 = arith.addf %1251, %1276 : vector<4x256xf32>
    %c0_689 = arith.constant 0 : index
    %c98 = arith.constant 98 : index
    %1278 = vector.load %arg1[%c0_689, %c98] : memref<4x100xf32, #tpu.memory_space<vmem>>, vector<4x1xf32>
    %1279 = vector.shape_cast %1278 : vector<4x1xf32> to vector<4x1xf32>
    %1280 = vector.broadcast %1279 : vector<4x1xf32> to vector<4x256xf32>
    %c0_690 = arith.constant 0 : index
    %c3_691 = arith.constant 3 : index
    %c67_692 = arith.constant 67 : index
    %1281 = vector.load %arg2[%c0_690, %c3_691, %c67_692] : memref<1x8x336xf32, #tpu.memory_space<vmem>>, vector<1x1x256xf32>
    %1282 = vector.shape_cast %1281 : vector<1x1x256xf32> to vector<1x256xf32>
    %1283 = vector.broadcast %1282 : vector<1x256xf32> to vector<4x256xf32>
    %1284 = arith.mulf %1280, %1283 : vector<4x256xf32>
    %1285 = arith.addf %1259, %1284 : vector<4x256xf32>
    %c0_693 = arith.constant 0 : index
    %c7_694 = arith.constant 7 : index
    %c67_695 = arith.constant 67 : index
    %1286 = vector.load %arg2[%c0_693, %c7_694, %c67_695] : memref<1x8x336xf32, #tpu.memory_space<vmem>>, vector<1x1x256xf32>
    %1287 = vector.shape_cast %1286 : vector<1x1x256xf32> to vector<1x256xf32>
    %1288 = vector.broadcast %1287 : vector<1x256xf32> to vector<4x256xf32>
    %1289 = arith.mulf %1280, %1288 : vector<4x256xf32>
    %1290 = arith.addf %1264, %1289 : vector<4x256xf32>
    %c0_696 = arith.constant 0 : index
    %c99 = arith.constant 99 : index
    %1291 = vector.load %arg1[%c0_696, %c99] : memref<4x100xf32, #tpu.memory_space<vmem>>, vector<4x1xf32>
    %1292 = vector.shape_cast %1291 : vector<4x1xf32> to vector<4x1xf32>
    %1293 = vector.broadcast %1292 : vector<4x1xf32> to vector<4x256xf32>
    %c0_697 = arith.constant 0 : index
    %c3_698 = arith.constant 3 : index
    %c68_699 = arith.constant 68 : index
    %1294 = vector.load %arg2[%c0_697, %c3_698, %c68_699] : memref<1x8x336xf32, #tpu.memory_space<vmem>>, vector<1x1x256xf32>
    %1295 = vector.shape_cast %1294 : vector<1x1x256xf32> to vector<1x256xf32>
    %1296 = vector.broadcast %1295 : vector<1x256xf32> to vector<4x256xf32>
    %1297 = arith.mulf %1293, %1296 : vector<4x256xf32>
    %1298 = arith.addf %1272, %1297 : vector<4x256xf32>
    %c0_700 = arith.constant 0 : index
    %c7_701 = arith.constant 7 : index
    %c68_702 = arith.constant 68 : index
    %1299 = vector.load %arg2[%c0_700, %c7_701, %c68_702] : memref<1x8x336xf32, #tpu.memory_space<vmem>>, vector<1x1x256xf32>
    %1300 = vector.shape_cast %1299 : vector<1x1x256xf32> to vector<1x256xf32>
    %1301 = vector.broadcast %1300 : vector<1x256xf32> to vector<4x256xf32>
    %1302 = arith.mulf %1293, %1301 : vector<4x256xf32>
    %1303 = arith.addf %1277, %1302 : vector<4x256xf32>
    %1304 = arith.addf %1285, %1298 : vector<4x256xf32>
    %1305 = arith.addf %1290, %1303 : vector<4x256xf32>
    %1306 = tpu.concatenate %1304, %1305 in 0 : vector<4x256xf32>, vector<4x256xf32> -> vector<8x256xf32>
    %c0_703 = arith.constant 0 : index
    %c0_704 = arith.constant 0 : index
    %c0_705 = arith.constant 0 : index
    %1307 = vector.load %arg3[%c0_703, %c0_704, %c0_705] : memref<1x8x256xf32, #tpu.memory_space<vmem>>, vector<1x8x256xf32>
    %1308 = vector.shape_cast %1307 : vector<1x8x256xf32> to vector<8x256xf32>
    %1309 = vector.shape_cast %1306 : vector<8x256xf32> to vector<1x8x256xf32>
    tpu.vector_store %arg3[%c0_703, %c0_704, %c0_705], %1309 {strides = array<i32>} : memref<1x8x256xf32, #tpu.memory_space<vmem>>, vector<1x8x256xf32>,
    return
  }
  func.func @transform_0(%arg0: i32) -> (i32, i32) {
    %c0_i32 = arith.constant 0 : i32
    %c0_i32_0 = arith.constant 0 : i32
    %c0_i32_1 = arith.constant 0 : i32
    return %c0_i32, %c0_i32_0 : i32, i32
  }
  func.func @transform_1(%arg0: i32) -> (i32, i32, i32) {
    %c0_i32 = arith.constant 0 : i32
    %c0_i32_0 = arith.constant 0 : i32
    %c0_i32_1 = arith.constant 0 : i32
    return %arg0, %c0_i32, %c0_i32_0 : i32, i32, i32
  }
  func.func @transform_2(%arg0: i32) -> (i32, i32, i32) {
    %c0_i32 = arith.constant 0 : i32
    %c0_i32_0 = arith.constant 0 : i32
    %c0_i32_1 = arith.constant 0 : i32
    return %arg0, %c0_i32, %c0_i32_0 : i32, i32, i32
  }
}

</mosaic_0001>

<bundles_post_ra>
// kernel: tpu_custom_call.1
= control target key start
LH: loop header
LB: loop body
LE: loop exit
PB: predicated region body
PF: predicated region fallthrough
CT: control target
= control target key end

     0   :  { %7 = vsyncpa [#allocation3], 0  ;;  %s8334_s0 = inlined_call_operand.hbm [shape: f32[4,100], index: 0, kind: input, shape index: {}]   ;;  %s8335_s1 = inlined_call_operand.hbm [shape: f32[1,8,336], index: 1, kind: input, shape index: {}]   ;;  %s8336_s2 = inlined_call_operand.hbm [shape: f32[1,8,256], index: 2, kind: output, shape index: {}]  }
   0x1   :  { %8 = vsyncpa [#allocation6], 0 }
   0x2   :  { %9 = vsyncpa [#allocation4], 0  ;;  %s15_s11 = sshll.u32 %s8334_s0, 4  ;;  %s4635_s12 = smov [#allocation2]   ;;  %s16_s11 = int_to_ptr.hbm [resolvable:$true] %s15_s11 }
   0x3   :  { %s17_s13 = sshll.u32 %s4635_s12, 4  ;;  %s26_s16 = sshll.u32 %s8335_s1, 4  ;;  %s18_s13 = int_to_ptr.vmem [resolvable:$true] %s17_s13  ;;  %s27_s16 = int_to_ptr.hbm [resolvable:$true] %s26_s16 }
   0x4   :  { %20 = dma.hbm_to_vmem [thread:$0]  %s16_s11, 64, %s18_s13, [#allocation3]  }
   0x5   :  { %s4636_s17 = smov [#allocation5]  }
   0x6   :  { %s28_s18 = sshll.u32 %s4636_s17, 4  ;;  %s29_s18 = int_to_ptr.vmem [resolvable:$true] %s28_s18 }
   0x7   :  { %31 = dma.hbm_to_vmem [thread:$0]  %s27_s16, 384, %s29_s18, [#allocation6]  }
   0x8   :  { %4629 = dma.done.wait [#allocation3], 64  }
   0x9   :  { %4630 = vsyncadd [#allocation3], 4294967232 }
   0xa   :  { %4631 = dma.done.wait [#allocation6], 384  }
   0xb   :  { %4632 = vsyncadd [#allocation6], 4294966912  ;;  %v4637_v0 = vmov 2   ;;  %v4638_v1 = vmov 0   ;;  %v4639_v2 = vmov 4   ;;  %v4640_v4 = vmov 3  }
   0xc   :  { %4451 = vset.pattern.permute.xlu1 %v4637_v0  ;;  %4449 = vset.pattern.permute.xlu0 %v4638_v1  ;;  %v4788_v3 = vld [vmem:[#allocation2] sm:$0xf]  ;;  %v4641_v5 = vmov 1   ;;  %v4642_v6 = vmov 6   ;;  %v4643_v7 = vmov 5   ;;  %v4644_v8 = vmov 8  }
   0xd   :  { %4453 = vset.pattern.permute.xlu2 %v4639_v2  ;;  %100 = vperm.xlu1 %4451, %v4788_v3   ;;  %v4645_v9 = vmov 7   ;;  %v71_v10 = vld [vmem:[#allocation5] ss:$8 sm:$0x7]  ;;  %s4646_s0 = smov 126   ;;  %s4647_s1 = smov 124  }
   0xe   :  { %43 = vperm.xlu0 %4449, %v4788_v3   ;;  %185 = vperm.xlu2 %4453, %v4788_v3   ;;  %v85_v11 = vld [vmem:[#allocation5 + $0x4] ss:$8 sm:$0x7]  ;;  %v4799_v12 = vperm.slane %v71_v10, 1  ;;  %v4801_v13 = vperm.slane %v71_v10, 0  ;;  %v4811_v19 = vperm.slane %v71_v10, 2 }
   0xf   :  { %v4803_v14 = vperm.slane %v85_v11, 2  ;;  %v4813_v20 = vperm.slane %v85_v11, 0  ;;  %v4821_v25 = vperm.slane %v85_v11, 1  ;;  %s4648_s19 = smov 113   ;;  %s4649_s20 = smov 111   ;;  %v4650_v46 = vmov 9  }
  0x10   :  { %8618 = vst [vmem:[#allocation11_spill] sm:$0xff] %v4799_v12  ;;  %s4651_s21 = smov 109   ;;  %s4654_s22 = smov 96   ;;  %vm115_vm0 = vcmask 1031168   ;;  %vm8606_vm1 = vcmask 924672   ;;  %vm286_vm2 = vcmask 908288  }
  0x11   :  { %8619 = vst [vmem:[#allocation12_spill] sm:$0xff] %v4801_v13  ;;  %s4657_s23 = smov 94   ;;  %s4660_s24 = smov 92   ;;  %vm371_vm3 = vcmask 891904   ;;  %vm456_vm4 = vcmask 785408   ;;  %vm541_vm5 = vcmask 769024  }
  0x12   :  { %8620 = vst [vmem:[#allocation13_spill] sm:$0xff] %v4803_v14  ;;  %s4662_s25 = smov 81   ;;  %s4664_s26 = smov 79   ;;  %vm8605_vm6 = vcmask 662528   ;;  %vm712_vm7 = vcmask 646144   ;;  %vm8576_vm8 = vcmask 629760  }
  0x13   :  { %8621 = vst [vmem:[#allocation14_spill] sm:$0xff] %v4811_v19  ;;  %s4667_s27 = smov 77   ;;  %s4670_s28 = smov 64   ;;  %vm8570_vm9 = vcmask 523264   ;;  %vm8572_vm10 = vcmask 506880   ;;  %vm8573_vm11 = vcmask 1039360  }
  0x14   :  { %8622 = vst [vmem:[#allocation15_spill] sm:$0xff] %v4821_v25  ;;  %s4673_s29 = smov 62   ;;  %s4676_s30 = smov 60   ;;  %vm8547_vm12 = vcmask 1022976   ;;  %vm8548_vm13 = vcmask 916480   ;;  %vm8549_vm14 = vcmask 900096  }
  0x15   :  { %4452 = vset.pattern.permute.xlu1 %v4640_v4  ;;  %s4679_s3 = smov 1   ;;  %s4680_s4 = smov 127   ;;  %vm8550_vm15 = vcmask 793600  }
  0x16   :  { %4450 = vset.pattern.permute.xlu0 %v4641_v5  ;;  %141 = vperm.xlu1 %4452, %v4788_v3   ;;  %s4683_s5 = smov 125   ;;  %s4686_s6 = smov 112  }
  0x17   :  { %68 = vperm.xlu0 %4450, %v4788_v3   ;;  %4455 = vset.pattern.permute.xlu2 %v4642_v6  ;;  %s4689_s7 = smov 110   ;;  %s4692_s8 = smov 108  }
  0x18   :  { %271 = vperm.xlu2 %4455, %v4788_v3   ;;  %s4694_s9 = smov 97   ;;  %s4696_s10 = smov 95  }
  0x19   :  { %s4699_s11 = smov 93   ;;  %s4702_s12 = smov 80  }
  0x1a   :  { %s4705_s13 = smov 78   ;;  %s4708_s14 = smov 76  }
  0x1b   :  { %s4710_s15 = smov 65   ;;  %s4712_s16 = smov 63  }
  0x1c   :  { %s4715_s17 = smov 61   ;;  %s4766_s18 = smov [#allocation7]  }
  0x1f   :  { %4454 = vset.pattern.permute.xlu0 %v4643_v7 }
  0x20   :  { %226 = vperm.xlu0 %4454, %v4788_v3   ;;  %4457 = vset.pattern.permute.xlu2 %v4644_v8 }
  0x21   :  { %356 = vperm.xlu2 %4457, %v4788_v3  }
  0x28   :  { %4456 = vset.pattern.permute.xlu0 %v4645_v9 }
  0x29   :  { %312 = vperm.xlu0 %4456, %v4788_v3  }
  0x31   :  { %4458 = vset.pattern.permute.xlu0 %v4650_v46 }
  0x68   :  { %v186_v30 = vpop.permute.xlu2 %185 }
  0x69   :  { %v188_v31 = vmul.f32 %v186_v30, %v4801_v13  ;;  %v189_v35 = vmul.f32 %v186_v30, %v4799_v12  ;;  %v207_v37 = vmul.f32 %v186_v30, %v4813_v20  ;;  %v208_v40 = vmul.f32 %v186_v30, %v4821_v25 }
  0x6a   :  { %v190_v41 = vmul.f32 %v186_v30, %v4811_v19  ;;  %v209_v44 = vmul.f32 %v186_v30, %v4803_v14 }
  0x72   :  { %v272_v42 = vpop.permute.xlu2 %271 }
  0x73   :  { %v274_v43 = vmul.f32 %v272_v42, %v4801_v13  ;;  %v293_v49 = vmul.f32 %v272_v42, %v4813_v20  ;;  %v276_v56 = vmul.f32 %v272_v42, %v4811_v19  ;;  %v275_v57 = vmul.f32 %v272_v42, %v4799_v12 }
  0x74   :  { %v295_v58 = vmul.f32 %v272_v42, %v4803_v14  ;;  %v294_v59 = vmul.f32 %v272_v42, %v4821_v25 }
  0x7b   :  { %v357_v54 = vpop.permute.xlu2 %356 }
  0x7c   :  { %v359_v55 = vmul.f32 %v357_v54, %v4801_v13  ;;  %v378_v60 = vmul.f32 %v357_v54, %v4813_v20  ;;  %v361_v1 = vmul.f32 %v357_v54, %v4811_v19  ;;  %v380_v4 = vmul.f32 %v357_v54, %v4803_v14 }
  0x7d   :  { %v360_v5 = vmul.f32 %v357_v54, %v4799_v12  ;;  %v379_v7 = vmul.f32 %v357_v54, %v4821_v25 }
  0x7f   :  { %v101_v15 = vpop.permute.xlu1 %100 }
  0x80   :  { %v104_v16 = vmul.f32 %v101_v15, %v4799_v12  ;;  %v103_v17 = vmul.f32 %v101_v15, %v4801_v13  ;;  %v124_v18 = vmul.f32 %v101_v15, %v4803_v14  ;;  %v105_v22 = vmul.f32 %v101_v15, %v4811_v19  ;;  %v4825_v28 = vpop.permute.xlu0 %43 }
  0x81   :  { %v122_v23 = vmul.f32 %v101_v15, %v4813_v20  ;;  %v123_v26 = vmul.f32 %v101_v15, %v4821_v25  ;;  %8623 = vst [vmem:[#allocation16_spill] sm:$0xff] %v4825_v28 }
  0x82   :  { %111 = vrot.lane.b32.xlu2 %v104_v16, %s4646_s0  ;;  %109 = vrot.lane.b32.xlu1 %v103_v17, %s4646_s0 }
  0x83   :  { %132 = vrot.lane.b32.xlu0 %v124_v18, %s4646_s0 }
  0x88   :  { %v142_v21 = vpop.permute.xlu1 %141 }
  0x89   :  { %v145_v24 = vmul.f32 %v142_v21, %v4799_v12  ;;  %v146_v27 = vmul.f32 %v142_v21, %v4811_v19  ;;  %v165_v29 = vmul.f32 %v142_v21, %v4821_v25  ;;  %v166_v32 = vmul.f32 %v142_v21, %v4803_v14  ;;  %v4836_v34 = vpop.permute.xlu0 %68 }
  0x8a   :  { %113 = vrot.lane.b32.xlu2 %v105_v22, %s4646_s0  ;;  %128 = vrot.lane.b32.xlu1 %v122_v23, %s4646_s0  ;;  %v144_v33 = vmul.f32 %v142_v21, %v4801_v13  ;;  %v164_v36 = vmul.f32 %v142_v21, %v4813_v20 }
  0x8b   :  { %152 = vrot.lane.b32.xlu0 %v145_v24, %s4646_s0 }
  0x92   :  { %130 = vrot.lane.b32.xlu2 %v123_v26, %s4646_s0  ;;  %154 = vrot.lane.b32.xlu1 %v146_v27, %s4646_s0  ;;  %v227_v38 = vpop.permute.xlu0 %226 }
  0x93   :  { %172 = vrot.lane.b32.xlu0 %v165_v29, %s4646_s0  ;;  %v251_v39 = vmul.f32 %v227_v38, %v4821_v25  ;;  %v229_v45 = vmul.f32 %v227_v38, %v4801_v13  ;;  %v230_v47 = vmul.f32 %v227_v38, %v4799_v12  ;;  %v231_v48 = vmul.f32 %v227_v38, %v4811_v19 }
  0x94   :  { %v250_v52 = vmul.f32 %v227_v38, %v4813_v20  ;;  %v252_v53 = vmul.f32 %v227_v38, %v4803_v14  ;;  %v4652_v29 = vmov 10  }
  0x95   :  { %4459 = vset.pattern.permute.xlu2 %v4652_v29 }
  0x9a   :  { %174 = vrot.lane.b32.xlu1 %v166_v32, %s4646_s0  ;;  %150 = vrot.lane.b32.xlu2 %v144_v33, %s4646_s0 }
  0x9b   :  { %194 = vrot.lane.b32.xlu0 %v188_v31, %s4647_s1  ;;  %v313_v50 = vpop.permute.xlu0 %312 }
  0x9c   :  { %v336_v51 = vmul.f32 %v313_v50, %v4821_v25  ;;  %v316_v61 = vmul.f32 %v313_v50, %v4799_v12  ;;  %v315_v62 = vmul.f32 %v313_v50, %v4801_v13  ;;  %v335_v63 = vmul.f32 %v313_v50, %v4813_v20 }
  0x9d   :  { %v317_v0 = vmul.f32 %v313_v50, %v4811_v19  ;;  %v337_v2 = vmul.f32 %v313_v50, %v4803_v14  ;;  %v4653_v50 = vmov 11  }
  0xa2   :  { %196 = vrot.lane.b32.xlu1 %v189_v35, %s4647_s1  ;;  %170 = vrot.lane.b32.xlu2 %v164_v36, %s4646_s0 }
  0xa3   :  { %213 = vrot.lane.b32.xlu0 %v207_v37, %s4647_s1 }
  0xaa   :  { %215 = vrot.lane.b32.xlu1 %v208_v40, %s4647_s1  ;;  %198 = vrot.lane.b32.xlu2 %v190_v41, %s4647_s1 }
  0xab   :  { %258 = vrot.lane.b32.xlu0 %v251_v39, %s4648_s19 }
  0xb2   :  { %217 = vrot.lane.b32.xlu2 %v209_v44, %s4647_s1  ;;  %235 = vrot.lane.b32.xlu1 %v229_v45, %s4648_s19 }
  0xb3   :  { %280 = vrot.lane.b32.xlu0 %v274_v43, %s4649_s20 }
  0xba   :  { %237 = vrot.lane.b32.xlu2 %v230_v47, %s4648_s19  ;;  %239 = vrot.lane.b32.xlu1 %v231_v48, %s4648_s19 }
  0xbb   :  { %299 = vrot.lane.b32.xlu0 %v293_v49, %s4649_s20 }
  0xc2   :  { %256 = vrot.lane.b32.xlu2 %v250_v52, %s4648_s19  ;;  %260 = vrot.lane.b32.xlu1 %v252_v53, %s4648_s19 }
  0xc3   :  { %343 = vrot.lane.b32.xlu0 %v336_v51, %s4649_s20 }
  0xca   :  { %284 = vrot.lane.b32.xlu2 %v276_v56, %s4649_s20  ;;  %282 = vrot.lane.b32.xlu1 %v275_v57, %s4649_s20 }
  0xcb   :  { %365 = vrot.lane.b32.xlu0 %v359_v55, %s4651_s21 }
  0xd2   :  { %303 = vrot.lane.b32.xlu2 %v295_v58, %s4649_s20  ;;  %301 = vrot.lane.b32.xlu1 %v294_v59, %s4649_s20 }
  0xd3   :  { %384 = vrot.lane.b32.xlu0 %v378_v60, %s4651_s21  ;;  %v4655_v60 = vmov 12  }
  0xda   :  { %323 = vrot.lane.b32.xlu2 %v316_v61, %s4649_s20  ;;  %321 = vrot.lane.b32.xlu1 %v315_v62, %s4649_s20 }
  0xdb   :  { %397 = vperm.xlu0 %4458, %v4788_v3  }
  0xdc   :  { %v4910_v15 = vpop.permute.xlu2 %111 }
  0xdd   :  { %8629 = vst [vmem:[#allocation22_spill] sm:$0xff] %v4910_v15  ;;  %v4684_v15 = vmov 30  }
  0xe2   :  { %341 = vrot.lane.b32.xlu2 %v335_v63, %s4649_s20  ;;  %325 = vrot.lane.b32.xlu1 %v317_v0, %s4649_s20 }
  0xe3   :  { %4460 = vset.pattern.permute.xlu0 %v4653_v50 }
  0xe4   :  { %v4914_v17 = vpop.permute.xlu2 %113 }
  0xe5   :  { %8631 = vst [vmem:[#allocation24_spill] sm:$0xff] %v4914_v17 }
  0xea   :  { %369 = vrot.lane.b32.xlu2 %v361_v1, %s4651_s21  ;;  %345 = vrot.lane.b32.xlu1 %v337_v2, %s4649_s20 }
  0xec   :  { %v4918_v21 = vpop.permute.xlu2 %130 }
  0xed   :  { %8633 = vst [vmem:[#allocation26_spill] sm:$0xff] %v4918_v21 }
  0xf2   :  { %388 = vrot.lane.b32.xlu2 %v380_v4, %s4651_s21  ;;  %367 = vrot.lane.b32.xlu1 %v360_v5, %s4651_s21 }
  0xf4   :  { %v4922_v23 = vpop.permute.xlu2 %150 }
  0xf5   :  { %v4898_v6 = vpop.permute.xlu0 %132  ;;  %8635 = vst [vmem:[#allocation28_spill] sm:$0xff] %v4922_v23 }
  0xf6   :  { %8624 = vst [vmem:[#allocation17_spill] sm:$0xff] %v4898_v6 }
  0xfa   :  { %386 = vrot.lane.b32.xlu1 %v379_v7, %s4651_s21 }
  0xfc   :  { %v4928_v27 = vpop.permute.xlu2 %170 }
  0xfd   :  { %v4902_v8 = vpop.permute.xlu0 %152 }
  0xfe   :  { %8625 = vst [vmem:[#allocation18_spill] sm:$0xff] %v4902_v8  ;;  %v4720_v8 = vmov 54  }
 0x104   :  { %v4932_v31 = vpop.permute.xlu2 %198 }
 0x105   :  { %v4904_v9 = vpop.permute.xlu0 %172  ;;  %8639 = vst [vmem:[#allocation32_spill] sm:$0xff] %v4932_v31 }
 0x106   :  { %8626 = vst [vmem:[#allocation19_spill] sm:$0xff] %v4904_v9 }
 0x10c   :  { %v4940_v37 = vpop.permute.xlu2 %217 }
 0x10d   :  { %v4906_v10 = vpop.permute.xlu0 %194  ;;  %8640 = vst [vmem:[#allocation33_spill] sm:$0xff] %v4940_v37 }
 0x10e   :  { %8627 = vst [vmem:[#allocation20_spill] sm:$0xff] %v4906_v10 }
 0x114   :  { %v4946_v40 = vpop.permute.xlu2 %237 }
 0x115   :  { %v4908_v11 = vpop.permute.xlu0 %213  ;;  %8641 = vst [vmem:[#allocation34_spill] sm:$0xff] %v4946_v40 }
 0x116   :  { %8628 = vst [vmem:[#allocation21_spill] sm:$0xff] %v4908_v11  ;;  %v1130_v11 = vld [vmem:[#allocation5 + $0x1] ss:$8 sm:$0x7] }
 0x11c   :  { %v4951_v42 = vpop.permute.xlu2 %256 }
 0x11d   :  { %v4912_v16 = vpop.permute.xlu0 %258 }
 0x11e   :  { %8630 = vst [vmem:[#allocation23_spill] sm:$0xff] %v4912_v16 }
 0x124   :  { %v4953_v43 = vpop.permute.xlu2 %284 }
 0x125   :  { %v4916_v18 = vpop.permute.xlu0 %280  ;;  %8642 = vst [vmem:[#allocation35_spill] sm:$0xff] %v4953_v43 }
 0x126   :  { %8632 = vst [vmem:[#allocation25_spill] sm:$0xff] %v4916_v18 }
 0x12c   :  { %v4955_v44 = vpop.permute.xlu2 %303 }
 0x12d   :  { %v4920_v22 = vpop.permute.xlu0 %299  ;;  %8643 = vst [vmem:[#allocation36_spill] sm:$0xff] %v4955_v44 }
 0x12e   :  { %8634 = vst [vmem:[#allocation27_spill] sm:$0xff] %v4920_v22  ;;  %v1105_v22 = vld [vmem:[#allocation5 + $0x5] ss:$8 sm:$0x3] }
 0x134   :  { %v4957_v45 = vpop.permute.xlu2 %323 }
 0x135   :  { %v4924_v24 = vpop.permute.xlu0 %343  ;;  %8644 = vst [vmem:[#allocation37_spill] sm:$0xff] %v4957_v45 }
 0x136   :  { %8636 = vst [vmem:[#allocation29_spill] sm:$0xff] %v4924_v24 }
 0x13c   :  { %v4959_v46 = vpop.permute.xlu2 %341 }
 0x13d   :  { %v4926_v26 = vpop.permute.xlu0 %365 }
 0x13e   :  { %8637 = vst [vmem:[#allocation30_spill] sm:$0xff] %v4926_v26 }
 0x144   :  { %v4961_v47 = vpop.permute.xlu2 %369 }
 0x145   :  { %v4930_v30 = vpop.permute.xlu0 %384  ;;  %8645 = vst [vmem:[#allocation38_spill] sm:$0xff] %v4961_v47 }
 0x146   :  { %8638 = vst [vmem:[#allocation31_spill] sm:$0xff] %v4930_v30 }
 0x14c   :  { %v4963_v48 = vpop.permute.xlu2 %388 }
 0x14d   :  { %v398_v32 = vpop.permute.xlu0 %397  ;;  %8646 = vst [vmem:[#allocation39_spill] sm:$0xff] %v4963_v48 }
 0x14e   :  { %v421_v33 = vmul.f32 %v398_v32, %v4821_v25  ;;  %v401_v35 = vmul.f32 %v398_v32, %v4799_v12  ;;  %v400_v36 = vmul.f32 %v398_v32, %v4801_v13  ;;  %v420_v38 = vmul.f32 %v398_v32, %v4813_v20 }
 0x14f   :  { %v402_v39 = vmul.f32 %v398_v32, %v4811_v19  ;;  %v422_v41 = vmul.f32 %v398_v32, %v4803_v14 }
 0x150   :  { %428 = vrot.lane.b32.xlu0 %v421_v33, %s4651_s21  ;;  %408 = vrot.lane.b32.xlu2 %v401_v35, %s4651_s21  ;;  %v4656_v35 = vmov 13  }
 0x151   :  { %406 = vrot.lane.b32.xlu1 %v400_v36, %s4651_s21 }
 0x158   :  { %426 = vrot.lane.b32.xlu2 %v420_v38, %s4651_s21 }
 0x159   :  { %410 = vrot.lane.b32.xlu1 %v402_v39, %s4651_s21 }
 0x160   :  { %441 = vperm.xlu2 %4459, %v4788_v3  }
 0x161   :  { %430 = vrot.lane.b32.xlu1 %v422_v41, %s4651_s21 }
 0x168   :  { %4461 = vset.pattern.permute.xlu2 %v4655_v60 }
 0x1aa   :  { %v4965_v49 = vpop.permute.xlu2 %408 }
 0x1ab   :  { %8647 = vst [vmem:[#allocation40_spill] sm:$0xff] %v4965_v49  ;;  %v5912_v49 = vld [vmem:[#allocation2] sm:$0xf] }
 0x1b2   :  { %v4967_v51 = vpop.permute.xlu2 %426 }
 0x1ba   :  { %v442_v52 = vpop.permute.xlu2 %441 }
 0x1bb   :  { %v446_v53 = vmul.f32 %v442_v52, %v4811_v19  ;;  %v444_v54 = vmul.f32 %v442_v52, %v4801_v13  ;;  %v445_v55 = vmul.f32 %v442_v52, %v4799_v12  ;;  %v465_v56 = vmul.f32 %v442_v52, %v4803_v14 }
 0x1bc   :  { %v463_v57 = vmul.f32 %v442_v52, %v4813_v20  ;;  %v464_v58 = vmul.f32 %v442_v52, %v4821_v25 }
 0x1bd   :  { %454 = vrot.lane.b32.xlu2 %v446_v53, %s4654_s22  ;;  %450 = vrot.lane.b32.xlu0 %v444_v54, %s4654_s22 }
 0x1be   :  { %452 = vrot.lane.b32.xlu1 %v445_v55, %s4654_s22 }
 0x1c2   :  { %v4982_v59 = vpop.permute.xlu0 %428 }
 0x1c3   :  { %8648 = vst [vmem:[#allocation41_spill] sm:$0xff] %v4982_v59 }
 0x1c5   :  { %473 = vrot.lane.b32.xlu2 %v465_v56, %s4654_s22  ;;  %469 = vrot.lane.b32.xlu0 %v463_v57, %s4654_s22  ;;  %v4658_v56 = vmov 14  }
 0x1c6   :  { %471 = vrot.lane.b32.xlu1 %v464_v58, %s4654_s22 }
 0x1cd   :  { %482 = vperm.xlu0 %4460, %v4788_v3  }
 0x1d5   :  { %4462 = vset.pattern.permute.xlu0 %v4656_v35 }
 0x217   :  { %v5001_v29 = vpop.permute.xlu2 %454 }
 0x218   :  { %8651 = vst [vmem:[#allocation44_spill] sm:$0xff] %v5001_v29 }
 0x21f   :  { %v5003_v32 = vpop.permute.xlu2 %473 }
 0x220   :  { %8652 = vst [vmem:[#allocation45_spill] sm:$0xff] %v5003_v32 }
 0x22f   :  { %v4984_v61 = vpop.permute.xlu0 %450 }
 0x230   :  { %8649 = vst [vmem:[#allocation42_spill] sm:$0xff] %v4984_v61 }
 0x237   :  { %v4986_v62 = vpop.permute.xlu0 %469 }
 0x238   :  { %8650 = vst [vmem:[#allocation43_spill] sm:$0xff] %v4986_v62 }
 0x23f   :  { %v483_v63 = vpop.permute.xlu0 %482 }
 0x240   :  { %v506_v0 = vmul.f32 %v483_v63, %v4821_v25  ;;  %v486_v1 = vmul.f32 %v483_v63, %v4799_v12  ;;  %v485_v2 = vmul.f32 %v483_v63, %v4801_v13  ;;  %v505_v4 = vmul.f32 %v483_v63, %v4813_v20 }
 0x241   :  { %v487_v5 = vmul.f32 %v483_v63, %v4811_v19  ;;  %v507_v7 = vmul.f32 %v483_v63, %v4803_v14 }
 0x242   :  { %513 = vrot.lane.b32.xlu0 %v506_v0, %s4654_s22  ;;  %493 = vrot.lane.b32.xlu2 %v486_v1, %s4654_s22 }
 0x243   :  { %491 = vrot.lane.b32.xlu1 %v485_v2, %s4654_s22 }
 0x24a   :  { %511 = vrot.lane.b32.xlu2 %v505_v4, %s4654_s22 }
 0x24b   :  { %495 = vrot.lane.b32.xlu1 %v487_v5, %s4654_s22 }
 0x252   :  { %526 = vperm.xlu2 %4461, %v4788_v3  }
 0x253   :  { %515 = vrot.lane.b32.xlu1 %v507_v7, %s4654_s22 }
 0x25a   :  { %4463 = vset.pattern.permute.xlu2 %v4658_v56 }
 0x29c   :  { %v5005_v33 = vpop.permute.xlu2 %493 }
 0x29d   :  { %8653 = vst [vmem:[#allocation46_spill] sm:$0xff] %v5005_v33 }
 0x2a4   :  { %v5007_v36 = vpop.permute.xlu2 %511 }
 0x2ac   :  { %v527_v38 = vpop.permute.xlu2 %526 }
 0x2ad   :  { %v531_v39 = vmul.f32 %v527_v38, %v4811_v19  ;;  %v529_v41 = vmul.f32 %v527_v38, %v4801_v13  ;;  %v530_v50 = vmul.f32 %v527_v38, %v4799_v12  ;;  %v550_v52 = vmul.f32 %v527_v38, %v4803_v14 }
 0x2ae   :  { %v548_v53 = vmul.f32 %v527_v38, %v4813_v20  ;;  %v549_v54 = vmul.f32 %v527_v38, %v4821_v25 }
 0x2af   :  { %539 = vrot.lane.b32.xlu2 %v531_v39, %s4657_s23  ;;  %535 = vrot.lane.b32.xlu0 %v529_v41, %s4657_s23  ;;  %v4659_v39 = vmov 15  }
 0x2b0   :  { %537 = vrot.lane.b32.xlu1 %v530_v50, %s4657_s23 }
 0x2b4   :  { %v5022_v55 = vpop.permute.xlu0 %513 }
 0x2b5   :  { %8654 = vst [vmem:[#allocation47_spill] sm:$0xff] %v5022_v55 }
 0x2b7   :  { %558 = vrot.lane.b32.xlu2 %v550_v52, %s4657_s23  ;;  %554 = vrot.lane.b32.xlu0 %v548_v53, %s4657_s23 }
 0x2b8   :  { %556 = vrot.lane.b32.xlu1 %v549_v54, %s4657_s23 }
 0x2bf   :  { %567 = vperm.xlu0 %4462, %v4788_v3  }
 0x2c7   :  { %4464 = vset.pattern.permute.xlu0 %v4659_v39 }
 0x309   :  { %v5041_v7 = vpop.permute.xlu2 %539 }
 0x30a   :  { %8657 = vst [vmem:[#allocation50_spill] sm:$0xff] %v5041_v7 }
 0x311   :  { %v5043_v35 = vpop.permute.xlu2 %558 }
 0x312   :  { %8658 = vst [vmem:[#allocation51_spill] sm:$0xff] %v5043_v35 }
 0x321   :  { %v5024_v57 = vpop.permute.xlu0 %535 }
 0x322   :  { %8655 = vst [vmem:[#allocation48_spill] sm:$0xff] %v5024_v57 }
 0x329   :  { %v5026_v58 = vpop.permute.xlu0 %554 }
 0x32a   :  { %8656 = vst [vmem:[#allocation49_spill] sm:$0xff] %v5026_v58 }
 0x331   :  { %v568_v60 = vpop.permute.xlu0 %567 }
 0x332   :  { %v591_v63 = vmul.f32 %v568_v60, %v4821_v25  ;;  %v571_v0 = vmul.f32 %v568_v60, %v4799_v12  ;;  %v570_v1 = vmul.f32 %v568_v60, %v4801_v13  ;;  %v590_v2 = vmul.f32 %v568_v60, %v4813_v20 }
 0x333   :  { %v572_v4 = vmul.f32 %v568_v60, %v4811_v19  ;;  %v592_v5 = vmul.f32 %v568_v60, %v4803_v14 }
 0x334   :  { %598 = vrot.lane.b32.xlu0 %v591_v63, %s4657_s23  ;;  %578 = vrot.lane.b32.xlu2 %v571_v0, %s4657_s23 }
 0x335   :  { %576 = vrot.lane.b32.xlu1 %v570_v1, %s4657_s23  ;;  %v4661_v1 = vmov 16  }
 0x33c   :  { %596 = vrot.lane.b32.xlu2 %v590_v2, %s4657_s23 }
 0x33d   :  { %580 = vrot.lane.b32.xlu1 %v572_v4, %s4657_s23 }
 0x344   :  { %611 = vperm.xlu2 %4463, %v4788_v3  }
 0x345   :  { %600 = vrot.lane.b32.xlu1 %v592_v5, %s4657_s23 }
 0x34c   :  { %4465 = vset.pattern.permute.xlu2 %v4661_v1 }
 0x38e   :  { %v5045_v38 = vpop.permute.xlu2 %578 }
 0x38f   :  { %8659 = vst [vmem:[#allocation52_spill] sm:$0xff] %v5045_v38  ;;  %v4713_v38 = vmov 48  }
 0x396   :  { %v5047_v41 = vpop.permute.xlu2 %596 }
 0x39e   :  { %v612_v50 = vpop.permute.xlu2 %611 }
 0x39f   :  { %v616_v52 = vmul.f32 %v612_v50, %v4811_v19  ;;  %v614_v53 = vmul.f32 %v612_v50, %v4801_v13  ;;  %v615_v54 = vmul.f32 %v612_v50, %v4799_v12  ;;  %v635_v56 = vmul.f32 %v612_v50, %v4803_v14 }
 0x3a0   :  { %v633_v60 = vmul.f32 %v612_v50, %v4813_v20  ;;  %v634_v63 = vmul.f32 %v612_v50, %v4821_v25 }
 0x3a1   :  { %624 = vrot.lane.b32.xlu2 %v616_v52, %s4660_s24  ;;  %620 = vrot.lane.b32.xlu0 %v614_v53, %s4660_s24 }
 0x3a2   :  { %622 = vrot.lane.b32.xlu1 %v615_v54, %s4660_s24 }
 0x3a6   :  { %v5062_v0 = vpop.permute.xlu0 %598 }
 0x3a7   :  { %8660 = vst [vmem:[#allocation53_spill] sm:$0xff] %v5062_v0 }
 0x3a9   :  { %643 = vrot.lane.b32.xlu2 %v635_v56, %s4660_s24  ;;  %639 = vrot.lane.b32.xlu0 %v633_v60, %s4660_s24 }
 0x3aa   :  { %641 = vrot.lane.b32.xlu1 %v634_v63, %s4660_s24 }
 0x3b1   :  { %652 = vperm.xlu0 %4464, %v4788_v3  }
 0x3fb   :  { %v5081_v60 = vpop.permute.xlu2 %624 }
 0x3fc   :  { %8663 = vst [vmem:[#allocation56_spill] sm:$0xff] %v5081_v60 }
 0x403   :  { %v5083_v63 = vpop.permute.xlu2 %643 }
 0x404   :  { %8664 = vst [vmem:[#allocation57_spill] sm:$0xff] %v5083_v63 }
 0x413   :  { %v5064_v2 = vpop.permute.xlu0 %620 }
 0x414   :  { %8661 = vst [vmem:[#allocation54_spill] sm:$0xff] %v5064_v2 }
 0x41b   :  { %v5066_v4 = vpop.permute.xlu0 %639 }
 0x41c   :  { %8662 = vst [vmem:[#allocation55_spill] sm:$0xff] %v5066_v4  ;;  %v5212_v4 = vpop.permute.xlu1 %109 }
 0x41d   :  { %8684 = vst [vmem:[#allocation77_spill] sm:$0xff] %v5212_v4 }
 0x423   :  { %v653_v5 = vpop.permute.xlu0 %652 }
 0x424   :  { %v677_v39 = vmul.f32 %v653_v5, %v4821_v25  ;;  %v656_v50 = vmul.f32 %v653_v5, %v4799_v12  ;;  %v655_v52 = vmul.f32 %v653_v5, %v4801_v13  ;;  %v676_v53 = vmul.f32 %v653_v5, %v4813_v20 }
 0x425   :  { %v657_v54 = vmul.f32 %v653_v5, %v4811_v19  ;;  %v678_v56 = vmul.f32 %v653_v5, %v4803_v14 }
 0x426   :  { %684 = vrot.lane.b32.xlu0 %v677_v39, %s4662_s25  ;;  %663 = vrot.lane.b32.xlu2 %v656_v50, %s4662_s25  ;;  %v4663_v39 = vmov 17  }
 0x427   :  { %661 = vrot.lane.b32.xlu1 %v655_v52, %s4662_s25  ;;  %4466 = vset.pattern.permute.xlu0 %v4663_v39 }
 0x42e   :  { %682 = vrot.lane.b32.xlu2 %v676_v53, %s4662_s25 }
 0x42f   :  { %665 = vrot.lane.b32.xlu1 %v657_v54, %s4662_s25 }
 0x436   :  { %697 = vperm.xlu2 %4465, %v4788_v3  }
 0x437   :  { %686 = vrot.lane.b32.xlu1 %v678_v56, %s4662_s25 }
 0x480   :  { %v5085_v1 = vpop.permute.xlu2 %663 }
 0x481   :  { %8665 = vst [vmem:[#allocation58_spill] sm:$0xff] %v5085_v1 }
 0x488   :  { %v5087_v50 = vpop.permute.xlu2 %682 }
 0x490   :  { %v698_v52 = vpop.permute.xlu2 %697 }
 0x491   :  { %v702_v53 = vmul.f32 %v698_v52, %v4811_v19  ;;  %v700_v54 = vmul.f32 %v698_v52, %v4801_v13  ;;  %v701_v5 = vmul.f32 %v698_v52, %v4799_v12  ;;  %v721_v56 = vmul.f32 %v698_v52, %v4803_v14 }
 0x492   :  { %v719_v39 = vmul.f32 %v698_v52, %v4813_v20  ;;  %v720_v63 = vmul.f32 %v698_v52, %v4821_v25 }
 0x493   :  { %710 = vrot.lane.b32.xlu2 %v702_v53, %s4664_s26  ;;  %706 = vrot.lane.b32.xlu0 %v700_v54, %s4664_s26  ;;  %v4665_v53 = vmov 18  }
 0x494   :  { %708 = vrot.lane.b32.xlu1 %v701_v5, %s4664_s26  ;;  %4467 = vset.pattern.permute.xlu2 %v4665_v53 }
 0x498   :  { %v5102_v35 = vpop.permute.xlu0 %684 }
 0x499   :  { %8666 = vst [vmem:[#allocation59_spill] sm:$0xff] %v5102_v35 }
 0x49b   :  { %729 = vrot.lane.b32.xlu2 %v721_v56, %s4664_s26  ;;  %725 = vrot.lane.b32.xlu0 %v719_v39, %s4664_s26 }
 0x49c   :  { %727 = vrot.lane.b32.xlu1 %v720_v63, %s4664_s26 }
 0x4a3   :  { %738 = vperm.xlu0 %4466, %v4788_v3  }
 0x4ed   :  { %v5121_v44 = vpop.permute.xlu2 %710 }
 0x4ee   :  { %8669 = vst [vmem:[#allocation62_spill] sm:$0xff] %v5121_v44 }
 0x505   :  { %v5104_v54 = vpop.permute.xlu0 %706 }
 0x506   :  { %8667 = vst [vmem:[#allocation60_spill] sm:$0xff] %v5104_v54 }
 0x50d   :  { %v5106_v5 = vpop.permute.xlu0 %725 }
 0x50e   :  { %8668 = vst [vmem:[#allocation61_spill] sm:$0xff] %v5106_v5 }
 0x515   :  { %v739_v32 = vpop.permute.xlu0 %738 }
 0x516   :  { %v762_v48 = vmul.f32 %v739_v32, %v4821_v25  ;;  %v742_v52 = vmul.f32 %v739_v32, %v4799_v12  ;;  %v741_v56 = vmul.f32 %v739_v32, %v4801_v13  ;;  %v761_v63 = vmul.f32 %v739_v32, %v4813_v20 }
 0x517   :  { %v743_v39 = vmul.f32 %v739_v32, %v4811_v19  ;;  %v763_v53 = vmul.f32 %v739_v32, %v4803_v14 }
 0x518   :  { %769 = vrot.lane.b32.xlu0 %v762_v48, %s4664_s26  ;;  %749 = vrot.lane.b32.xlu2 %v742_v52, %s4664_s26  ;;  %v5123_v48 = vpop.permute.xlu2 %729 }
 0x519   :  { %747 = vrot.lane.b32.xlu1 %v741_v56, %s4664_s26  ;;  %8670 = vst [vmem:[#allocation63_spill] sm:$0xff] %v5123_v48  ;;  %v4666_v56 = vmov 19  }
 0x51a   :  { %4468 = vset.pattern.permute.xlu0 %v4666_v56 }
 0x520   :  { %767 = vrot.lane.b32.xlu2 %v761_v63, %s4664_s26 }
 0x521   :  { %751 = vrot.lane.b32.xlu1 %v743_v39, %s4664_s26 }
 0x528   :  { %782 = vperm.xlu2 %4467, %v4788_v3  }
 0x529   :  { %771 = vrot.lane.b32.xlu1 %v763_v53, %s4664_s26 }
 0x572   :  { %v5125_v52 = vpop.permute.xlu2 %749 }
 0x573   :  { %8671 = vst [vmem:[#allocation64_spill] sm:$0xff] %v5125_v52 }
 0x57a   :  { %v5127_v37 = vpop.permute.xlu2 %767 }
 0x582   :  { %v783_v6 = vpop.permute.xlu2 %782 }
 0x583   :  { %v787_v63 = vmul.f32 %v783_v6, %v4811_v19  ;;  %v785_v39 = vmul.f32 %v783_v6, %v4801_v13  ;;  %v786_v32 = vmul.f32 %v783_v6, %v4799_v12  ;;  %v806_v53 = vmul.f32 %v783_v6, %v4803_v14 }
 0x584   :  { %v804_v56 = vmul.f32 %v783_v6, %v4813_v20  ;;  %v805_v48 = vmul.f32 %v783_v6, %v4821_v25 }
 0x585   :  { %795 = vrot.lane.b32.xlu2 %v787_v63, %s4667_s27  ;;  %791 = vrot.lane.b32.xlu0 %v785_v39, %s4667_s27  ;;  %v4668_v63 = vmov 20  }
 0x586   :  { %793 = vrot.lane.b32.xlu1 %v786_v32, %s4667_s27  ;;  %4469 = vset.pattern.permute.xlu2 %v4668_v63 }
 0x58a   :  { %v5142_v44 = vpop.permute.xlu0 %769 }
 0x58b   :  { %8672 = vst [vmem:[#allocation65_spill] sm:$0xff] %v5142_v44 }
 0x58d   :  { %814 = vrot.lane.b32.xlu2 %v806_v53, %s4667_s27  ;;  %810 = vrot.lane.b32.xlu0 %v804_v56, %s4667_s27 }
 0x58e   :  { %812 = vrot.lane.b32.xlu1 %v805_v48, %s4667_s27 }
 0x595   :  { %823 = vperm.xlu0 %4468, %v4788_v3  }
 0x5f7   :  { %v5144_v39 = vpop.permute.xlu0 %791 }
 0x5f8   :  { %8673 = vst [vmem:[#allocation66_spill] sm:$0xff] %v5144_v39 }
 0x5ff   :  { %v5146_v32 = vpop.permute.xlu0 %810 }
 0x600   :  { %8674 = vst [vmem:[#allocation67_spill] sm:$0xff] %v5146_v32  ;;  %v5161_v32 = vpop.permute.xlu2 %795 }
 0x601   :  { %8675 = vst [vmem:[#allocation68_spill] sm:$0xff] %v5161_v32 }
 0x607   :  { %v824_v60 = vpop.permute.xlu0 %823 }
 0x608   :  { %v847_v7 = vmul.f32 %v824_v60, %v4821_v25  ;;  %v827_v6 = vmul.f32 %v824_v60, %v4799_v12  ;;  %v826_v53 = vmul.f32 %v824_v60, %v4801_v13  ;;  %v846_v48 = vmul.f32 %v824_v60, %v4813_v20 }
 0x609   :  { %v828_v56 = vmul.f32 %v824_v60, %v4811_v19  ;;  %v848_v63 = vmul.f32 %v824_v60, %v4803_v14 }
 0x60a   :  { %854 = vrot.lane.b32.xlu0 %v847_v7, %s4667_s27  ;;  %834 = vrot.lane.b32.xlu2 %v827_v6, %s4667_s27  ;;  %v5163_v7 = vpop.permute.xlu2 %814 }
 0x60b   :  { %832 = vrot.lane.b32.xlu1 %v826_v53, %s4667_s27  ;;  %8676 = vst [vmem:[#allocation69_spill] sm:$0xff] %v5163_v7  ;;  %v4669_v53 = vmov 21  }
 0x60c   :  { %4470 = vset.pattern.permute.xlu0 %v4669_v53 }
 0x612   :  { %852 = vrot.lane.b32.xlu2 %v846_v48, %s4667_s27 }
 0x613   :  { %836 = vrot.lane.b32.xlu1 %v828_v56, %s4667_s27 }
 0x61a   :  { %867 = vperm.xlu2 %4469, %v4788_v3  }
 0x61b   :  { %856 = vrot.lane.b32.xlu1 %v848_v63, %s4667_s27 }
 0x664   :  { %v5165_v6 = vpop.permute.xlu2 %834 }
 0x665   :  { %8677 = vst [vmem:[#allocation70_spill] sm:$0xff] %v5165_v6 }
 0x66c   :  { %v5167_v39 = vpop.permute.xlu2 %852 }
 0x674   :  { %v868_v29 = vpop.permute.xlu2 %867 }
 0x675   :  { %v872_v48 = vmul.f32 %v868_v29, %v4811_v19  ;;  %v870_v56 = vmul.f32 %v868_v29, %v4801_v13  ;;  %v871_v60 = vmul.f32 %v868_v29, %v4799_v12  ;;  %v891_v63 = vmul.f32 %v868_v29, %v4803_v14 }
 0x676   :  { %v889_v53 = vmul.f32 %v868_v29, %v4813_v20  ;;  %v890_v7 = vmul.f32 %v868_v29, %v4821_v25 }
 0x677   :  { %880 = vrot.lane.b32.xlu2 %v872_v48, %s4670_s28  ;;  %876 = vrot.lane.b32.xlu0 %v870_v56, %s4670_s28  ;;  %v4671_v48 = vmov 22  }
 0x678   :  { %878 = vrot.lane.b32.xlu1 %v871_v60, %s4670_s28  ;;  %4471 = vset.pattern.permute.xlu2 %v4671_v48 }
 0x67c   :  { %v5182_v32 = vpop.permute.xlu0 %854 }
 0x67d   :  { %8678 = vst [vmem:[#allocation71_spill] sm:$0xff] %v5182_v32 }
 0x67f   :  { %899 = vrot.lane.b32.xlu2 %v891_v63, %s4670_s28  ;;  %895 = vrot.lane.b32.xlu0 %v889_v53, %s4670_s28 }
 0x680   :  { %897 = vrot.lane.b32.xlu1 %v890_v7, %s4670_s28 }
 0x687   :  { %908 = vperm.xlu0 %4470, %v4788_v3  }
 0x6e9   :  { %v5184_v56 = vpop.permute.xlu0 %876 }
 0x6ea   :  { %8679 = vst [vmem:[#allocation72_spill] sm:$0xff] %v5184_v56 }
 0x6f1   :  { %v5186_v60 = vpop.permute.xlu0 %895 }
 0x6f2   :  { %8680 = vst [vmem:[#allocation73_spill] sm:$0xff] %v5186_v60  ;;  %v5201_v60 = vpop.permute.xlu2 %880 }
 0x6f3   :  { %8681 = vst [vmem:[#allocation74_spill] sm:$0xff] %v5201_v60  ;;  %v5222_v60 = vpop.permute.xlu1 %128 }
 0x6f4   :  { %8685 = vst [vmem:[#allocation78_spill] sm:$0xff] %v5222_v60 }
 0x6f9   :  { %v909_v5 = vpop.permute.xlu0 %908 }
 0x6fa   :  { %v932_v54 = vmul.f32 %v909_v5, %v4821_v25  ;;  %v912_v29 = vmul.f32 %v909_v5, %v4799_v12  ;;  %v911_v63 = vmul.f32 %v909_v5, %v4801_v13  ;;  %v931_v7 = vmul.f32 %v909_v5, %v4813_v20 }
 0x6fb   :  { %v913_v53 = vmul.f32 %v909_v5, %v4811_v19  ;;  %v933_v48 = vmul.f32 %v909_v5, %v4803_v14  ;;  %v5232_v43 = vpop.permute.xlu1 %154 }
 0x6fc   :  { %939 = vrot.lane.b32.xlu0 %v932_v54, %s4670_s28  ;;  %919 = vrot.lane.b32.xlu2 %v912_v29, %s4670_s28  ;;  %v5203_v54 = vpop.permute.xlu2 %899  ;;  %8689 = vst [vmem:[#allocation82_spill] sm:$0xff] %v5232_v43 }
 0x6fd   :  { %917 = vrot.lane.b32.xlu1 %v911_v63, %s4670_s28  ;;  %8682 = vst [vmem:[#allocation75_spill] sm:$0xff] %v5203_v54  ;;  %v4672_v63 = vmov 23  }
 0x6fe   :  { %4472 = vset.pattern.permute.xlu0 %v4672_v63 }
 0x704   :  { %937 = vrot.lane.b32.xlu2 %v931_v7, %s4670_s28 }
 0x705   :  { %921 = vrot.lane.b32.xlu1 %v913_v53, %s4670_s28 }
 0x70c   :  { %952 = vperm.xlu2 %4471, %v4788_v3  }
 0x70d   :  { %941 = vrot.lane.b32.xlu1 %v933_v48, %s4670_s28 }
 0x756   :  { %v5205_v29 = vpop.permute.xlu2 %919 }
 0x757   :  { %8683 = vst [vmem:[#allocation76_spill] sm:$0xff] %v5205_v29 }
 0x75e   :  { %v5207_v56 = vpop.permute.xlu2 %937 }
 0x766   :  { %v953_v47 = vpop.permute.xlu2 %952 }
 0x767   :  { %v957_v7 = vmul.f32 %v953_v47, %v4811_v19  ;;  %v955_v53 = vmul.f32 %v953_v47, %v4801_v13  ;;  %v956_v5 = vmul.f32 %v953_v47, %v4799_v12  ;;  %v976_v48 = vmul.f32 %v953_v47, %v4803_v14 }
 0x768   :  { %v974_v63 = vmul.f32 %v953_v47, %v4813_v20  ;;  %v975_v54 = vmul.f32 %v953_v47, %v4821_v25 }
 0x769   :  { %965 = vrot.lane.b32.xlu2 %v957_v7, %s4673_s29  ;;  %961 = vrot.lane.b32.xlu0 %v955_v53, %s4673_s29  ;;  %v4674_v53 = vmov 24  }
 0x76a   :  { %963 = vrot.lane.b32.xlu1 %v956_v5, %s4673_s29  ;;  %4473 = vset.pattern.permute.xlu2 %v4674_v53  ;;  %v5241_v53 = vpop.permute.xlu1 %174 }
 0x76b   :  { %8690 = vst [vmem:[#allocation83_spill] sm:$0xff] %v5241_v53  ;;  %v4675_v53 = vmov 25  }
 0x76e   :  { %v5226_v7 = vpop.permute.xlu0 %939 }
 0x76f   :  { %8686 = vst [vmem:[#allocation79_spill] sm:$0xff] %v5226_v7 }
 0x771   :  { %984 = vrot.lane.b32.xlu2 %v976_v48, %s4673_s29  ;;  %980 = vrot.lane.b32.xlu0 %v974_v63, %s4673_s29 }
 0x772   :  { %982 = vrot.lane.b32.xlu1 %v975_v54, %s4673_s29  ;;  %v5248_v57 = vpop.permute.xlu1 %196 }
 0x773   :  { %8691 = vst [vmem:[#allocation84_spill] sm:$0xff] %v5248_v57 }
 0x779   :  { %993 = vperm.xlu0 %4472, %v4788_v3  }
 0x77a   :  { %v5262_v61 = vpop.permute.xlu1 %215 }
 0x77b   :  { %8695 = vst [vmem:[#allocation88_spill] sm:$0xff] %v5262_v61 }
 0x781   :  { %4474 = vset.pattern.permute.xlu0 %v4675_v53 }
 0x7db   :  { %v5228_v5 = vpop.permute.xlu0 %961 }
 0x7dc   :  { %8687 = vst [vmem:[#allocation80_spill] sm:$0xff] %v5228_v5 }
 0x7e3   :  { %v5230_v2 = vpop.permute.xlu0 %980 }
 0x7e4   :  { %8688 = vst [vmem:[#allocation81_spill] sm:$0xff] %v5230_v2 }
 0x7eb   :  { %v994_v47 = vpop.permute.xlu0 %993 }
 0x7ec   :  { %v1017_v48 = vmul.f32 %v994_v47, %v4821_v25  ;;  %v997_v63 = vmul.f32 %v994_v47, %v4799_v12  ;;  %v996_v58 = vmul.f32 %v994_v47, %v4801_v13  ;;  %v1016_v54 = vmul.f32 %v994_v47, %v4813_v20 }
 0x7ed   :  { %v998_v2 = vmul.f32 %v994_v47, %v4811_v19  ;;  %v1018_v5 = vmul.f32 %v994_v47, %v4803_v14 }
 0x7ee   :  { %1024 = vrot.lane.b32.xlu0 %v1017_v48, %s4673_s29  ;;  %1004 = vrot.lane.b32.xlu2 %v997_v63, %s4673_s29  ;;  %v5251_v48 = vpop.permute.xlu2 %965 }
 0x7ef   :  { %1002 = vrot.lane.b32.xlu1 %v996_v58, %s4673_s29  ;;  %8692 = vst [vmem:[#allocation85_spill] sm:$0xff] %v5251_v48  ;;  %v5272_v48 = vpop.permute.xlu1 %235 }
 0x7f0   :  { %8696 = vst [vmem:[#allocation89_spill] sm:$0xff] %v5272_v48  ;;  %v4717_v48 = vmov 50  }
 0x7f6   :  { %1022 = vrot.lane.b32.xlu2 %v1016_v54, %s4673_s29  ;;  %v5253_v58 = vpop.permute.xlu2 %984 }
 0x7f7   :  { %1006 = vrot.lane.b32.xlu1 %v998_v2, %s4673_s29  ;;  %8693 = vst [vmem:[#allocation86_spill] sm:$0xff] %v5253_v58 }
 0x7fe   :  { %1037 = vperm.xlu2 %4473, %v4788_v3  }
 0x7ff   :  { %1026 = vrot.lane.b32.xlu1 %v1018_v5, %s4673_s29 }
 0x848   :  { %v5255_v63 = vpop.permute.xlu2 %1004 }
 0x849   :  { %8694 = vst [vmem:[#allocation87_spill] sm:$0xff] %v5255_v63 }
 0x850   :  { %v5257_v31 = vpop.permute.xlu2 %1022 }
 0x858   :  { %v1038_v54 = vpop.permute.xlu2 %1037 }
 0x859   :  { %v1042_v2 = vmul.f32 %v1038_v54, %v4811_v19  ;;  %v1040_v47 = vmul.f32 %v1038_v54, %v4801_v13  ;;  %v1041_v62 = vmul.f32 %v1038_v54, %v4799_v12  ;;  %v1061_v5 = vmul.f32 %v1038_v54, %v4803_v14 }
 0x85a   :  { %v1059_v53 = vmul.f32 %v1038_v54, %v4813_v20  ;;  %v1060_v58 = vmul.f32 %v1038_v54, %v4821_v25  ;;  %v1082_v54 = vld [vmem:[#allocation5 + $0x1] ss:$8 sm:$0x3]  ;;  %v4690_v19 = vmov 34  }
 0x85b   :  { %1050 = vrot.lane.b32.xlu2 %v1042_v2, %s4676_s30  ;;  %1046 = vrot.lane.b32.xlu0 %v1040_v47, %s4676_s30  ;;  %v4677_v2 = vmov 26   ;;  %v1085_v25 = vperm.slane %v1082_v54, 1  ;;  %v1084_v17 = vperm.slane %v1082_v54, 0 }
 0x85c   :  { %1048 = vrot.lane.b32.xlu1 %v1041_v62, %s4676_s30 }
 0x860   :  { %v5277_v62 = vpop.permute.xlu0 %1024 }
 0x861   :  { %8697 = vst [vmem:[#allocation90_spill] sm:$0xff] %v5277_v62 }
 0x863   :  { %1069 = vrot.lane.b32.xlu2 %v1061_v5, %s4676_s30  ;;  %1065 = vrot.lane.b32.xlu0 %v1059_v53, %s4676_s30  ;;  %v5283_v5 = vpop.permute.xlu1 %239  ;;  %v4678_v53 = vmov 27  }
 0x864   :  { %1067 = vrot.lane.b32.xlu1 %v1060_v58, %s4676_s30  ;;  %8700 = vst [vmem:[#allocation93_spill] sm:$0xff] %v5283_v5  ;;  %4476 = vset.pattern.permute.xlu2 %v4678_v53 }
 0x86b   :  { %1078 = vperm.xlu0 %4474, %v4788_v3  }
 0x873   :  { %4475 = vset.pattern.permute.xlu0 %v4677_v2  ;;  %v5287_v2 = vpop.permute.xlu1 %260 }
 0x874   :  { %1127 = vperm.xlu0 %4475, %v4788_v3   ;;  %v1157_v3 = vld [vmem:[#allocation5 + $0x5] ss:$8 sm:$0x7]  ;;  %8701 = vst [vmem:[#allocation94_spill] sm:$0xff] %v5287_v2 }
 0x875   :  { %v5289_v18 = vperm.slane %v1157_v3, 1  ;;  %v5315_v2 = vperm.slane %v1157_v3, 2 }
 0x8cd   :  { %v5279_v47 = vpop.permute.xlu0 %1046 }
 0x8ce   :  { %8698 = vst [vmem:[#allocation91_spill] sm:$0xff] %v5279_v47  ;;  %v1107_v47 = vperm.slane %v1105_v22, 0 }
 0x8d5   :  { %v5281_v14 = vpop.permute.xlu0 %1065 }
 0x8d6   :  { %8699 = vst [vmem:[#allocation92_spill] sm:$0xff] %v5281_v14  ;;  %v1108_v14 = vperm.slane %v1105_v22, 1  ;;  %v5299_v22 = vpop.permute.xlu1 %282 }
 0x8d7   :  { %8702 = vst [vmem:[#allocation95_spill] sm:$0xff] %v5299_v22 }
 0x8dd   :  { %v1079_v58 = vpop.permute.xlu0 %1078 }
 0x8de   :  { %v1089_v30 = vmul.f32 %v1085_v25, %v1079_v58  ;;  %v1088_v26 = vmul.f32 %v1084_v17, %v1079_v58  ;;  %v1112_v61 = vmul.f32 %v1108_v14, %v1079_v58  ;;  %v1111_v54 = vmul.f32 %v1107_v47, %v1079_v58  ;;  %v5309_v58 = vpop.permute.xlu1 %301 }
 0x8df   :  { %v5294_v17 = vperm.slane %v1130_v11, 1  ;;  %v5307_v47 = vperm.slane %v1130_v11, 2  ;;  %8703 = vst [vmem:[#allocation96_spill] sm:$0xff] %v5309_v58 }
 0x8e0   :  { %1094 = vrot.lane.b32.xlu2 %v1089_v30, %s4679_s3  ;;  %1092 = vrot.lane.b32.xlu1 %v1088_v26, %s4679_s3  ;;  %v5296_v26 = vperm.slane %v1130_v11, 0  ;;  %v5324_v11 = vpop.permute.xlu2 %1050 }
 0x8e1   :  { %8705 = vst [vmem:[#allocation98_spill] sm:$0xff] %v5324_v11 }
 0x8e6   :  { %v1128_v53 = vpop.permute.xlu0 %1127  ;;  %v5318_v22 = vpop.permute.xlu1 %321 }
 0x8e7   :  { %v1166_v25 = vmul.f32 %v5289_v18, %v1128_v53  ;;  %v1139_v30 = vmul.f32 %v5294_v17, %v1128_v53  ;;  %v1138_v14 = vmul.f32 %v5296_v26, %v1128_v53  ;;  %8704 = vst [vmem:[#allocation97_spill] sm:$0xff] %v5318_v22 }
 0x8e8   :  { %1117 = vrot.lane.b32.xlu2 %v1112_v61, %s4679_s3  ;;  %1115 = vrot.lane.b32.xlu1 %v1111_v54, %s4679_s3  ;;  %v5305_v61 = vperm.slane %v1157_v3, 0  ;;  %v5326_v58 = vpop.permute.xlu2 %1069 }
 0x8e9   :  { %1173 = vrot.lane.b32.xlu0 %v1166_v25, %s4680_s4  ;;  %v1140_v25 = vmul.f32 %v5307_v47, %v1128_v53  ;;  %8706 = vst [vmem:[#allocation99_spill] sm:$0xff] %v5326_v58 }
 0x8ea   :  { %v1165_v54 = vmul.f32 %v5305_v61, %v1128_v53 }
 0x8f0   :  { %1146 = vrot.lane.b32.xlu2 %v1139_v30, %s4680_s4  ;;  %1144 = vrot.lane.b32.xlu1 %v1138_v14, %s4680_s4  ;;  %v1167_v30 = vmul.f32 %v5315_v2, %v1128_v53  ;;  %v5320_v14 = vld [vmem:[#allocation2] sm:$0xf] }
 0x8f8   :  { %1171 = vrot.lane.b32.xlu2 %v1165_v54, %s4680_s4  ;;  %1148 = vrot.lane.b32.xlu1 %v1140_v25, %s4680_s4  ;;  %v4681_v25 = vmov 28  }
 0x8f9   :  { %4477 = vset.pattern.permute.xlu0 %v4681_v25 }
 0x900   :  { %1184 = vperm.xlu2 %4476, %v5320_v14   ;;  %1175 = vrot.lane.b32.xlu1 %v1167_v30, %s4680_s4  ;;  %v5338_v30 = vpop.permute.xlu1 %325 }
 0x901   :  { %8711 = vst [vmem:[#allocation104_spill] sm:$0xff] %v5338_v30  ;;  %v4687_v30 = vmov 32  }
 0x93a   :  { %v5328_v10 = vpop.permute.xlu2 %1094 }
 0x93b   :  { %8707 = vst [vmem:[#allocation100_spill] sm:$0xff] %v5328_v10 }
 0x942   :  { %v5330_v54 = vpop.permute.xlu2 %1117 }
 0x943   :  { %8708 = vst [vmem:[#allocation101_spill] sm:$0xff] %v5330_v54 }
 0x94a   :  { %v5332_v3 = vpop.permute.xlu2 %1146 }
 0x94b   :  { %8709 = vst [vmem:[#allocation102_spill] sm:$0xff] %v5332_v3  ;;  %v5349_v3 = vpop.permute.xlu1 %345 }
 0x94c   :  { %8712 = vst [vmem:[#allocation105_spill] sm:$0xff] %v5349_v3 }
 0x952   :  { %v5334_v53 = vpop.permute.xlu2 %1171 }
 0x953   :  { %8710 = vst [vmem:[#allocation103_spill] sm:$0xff] %v5334_v53  ;;  %v5362_v3 = vpop.permute.xlu1 %367 }
 0x954   :  { %8715 = vst [vmem:[#allocation108_spill] sm:$0xff] %v5362_v3 }
 0x95a   :  { %v1185_v57 = vpop.permute.xlu2 %1184 }
 0x95b   :  { %v1189_v28 = vmul.f32 %v1185_v57, %v5307_v47  ;;  %v1187_v60 = vmul.f32 %v1185_v57, %v5296_v26  ;;  %v1188_v11 = vmul.f32 %v1185_v57, %v5294_v17  ;;  %v1209_v58 = vmul.f32 %v1185_v57, %v5315_v2 }
 0x95c   :  { %v1207_v25 = vmul.f32 %v1185_v57, %v5305_v61  ;;  %v1208_v54 = vmul.f32 %v1185_v57, %v5289_v18 }
 0x95d   :  { %1197 = vrot.lane.b32.xlu2 %v1189_v28, %s4680_s4  ;;  %1193 = vrot.lane.b32.xlu0 %v1187_v60, %s4680_s4  ;;  %v5353_v28 = vpop.permute.xlu0 %1173  ;;  %v4682_v60 = vmov 29  }
 0x95e   :  { %1195 = vrot.lane.b32.xlu1 %v1188_v11, %s4680_s4  ;;  %8713 = vst [vmem:[#allocation106_spill] sm:$0xff] %v5353_v28  ;;  %4478 = vset.pattern.permute.xlu2 %v4682_v60  ;;  %v5370_v28 = vpop.permute.xlu1 %386 }
 0x95f   :  { %8716 = vst [vmem:[#allocation109_spill] sm:$0xff] %v5370_v28 }
 0x965   :  { %1217 = vrot.lane.b32.xlu2 %v1209_v58, %s4680_s4  ;;  %1213 = vrot.lane.b32.xlu0 %v1207_v25, %s4680_s4 }
 0x966   :  { %1215 = vrot.lane.b32.xlu1 %v1208_v54, %s4680_s4  ;;  %v5375_v3 = vpop.permute.xlu1 %406 }
 0x967   :  { %8717 = vst [vmem:[#allocation110_spill] sm:$0xff] %v5375_v3 }
 0x96d   :  { %1228 = vperm.xlu0 %4477, %v5320_v14  }
 0x96e   :  { %v5389_v10 = vpop.permute.xlu1 %410 }
 0x96f   :  { %8722 = vst [vmem:[#allocation115_spill] sm:$0xff] %v5389_v10 }
 0x975   :  { %4479 = vset.pattern.permute.xlu0 %v4684_v15 }
 0x9cf   :  { %v5355_v11 = vpop.permute.xlu0 %1193 }
 0x9d0   :  { %8714 = vst [vmem:[#allocation107_spill] sm:$0xff] %v5355_v11 }
 0x9d7   :  { %v5357_v53 = vpop.permute.xlu0 %1213 }
 0x9df   :  { %v1229_v21 = vpop.permute.xlu0 %1228 }
 0x9e0   :  { %v1251_v57 = vmul.f32 %v1229_v21, %v5289_v18  ;;  %v1232_v58 = vmul.f32 %v1229_v21, %v5294_v17  ;;  %v1231_v25 = vmul.f32 %v1229_v21, %v5296_v26  ;;  %v1250_v54 = vmul.f32 %v1229_v21, %v5305_v61 }
 0x9e1   :  { %v1233_v60 = vmul.f32 %v1229_v21, %v5307_v47  ;;  %v1252_v4 = vmul.f32 %v1229_v21, %v5315_v2 }
 0x9e2   :  { %1258 = vrot.lane.b32.xlu0 %v1251_v57, %s4683_s5  ;;  %1239 = vrot.lane.b32.xlu2 %v1232_v58, %s4683_s5  ;;  %v5378_v57 = vpop.permute.xlu2 %1197 }
 0x9e3   :  { %1237 = vrot.lane.b32.xlu1 %v1231_v25, %s4683_s5  ;;  %8718 = vst [vmem:[#allocation111_spill] sm:$0xff] %v5378_v57 }
 0x9ea   :  { %1256 = vrot.lane.b32.xlu2 %v1250_v54, %s4683_s5  ;;  %v5380_v58 = vpop.permute.xlu2 %1217 }
 0x9eb   :  { %1241 = vrot.lane.b32.xlu1 %v1233_v60, %s4683_s5  ;;  %8719 = vst [vmem:[#allocation112_spill] sm:$0xff] %v5380_v58 }
 0x9f2   :  { %1269 = vperm.xlu2 %4478, %v5320_v14  }
 0x9f3   :  { %1260 = vrot.lane.b32.xlu1 %v1252_v4, %s4683_s5 }
 0xa3c   :  { %v5382_v25 = vpop.permute.xlu2 %1239 }
 0xa3d   :  { %8720 = vst [vmem:[#allocation113_spill] sm:$0xff] %v5382_v25  ;;  %v5399_v25 = vpop.permute.xlu1 %430 }
 0xa3e   :  { %8723 = vst [vmem:[#allocation116_spill] sm:$0xff] %v5399_v25 }
 0xa44   :  { %v5384_v54 = vpop.permute.xlu2 %1256 }
 0xa45   :  { %8721 = vst [vmem:[#allocation114_spill] sm:$0xff] %v5384_v54  ;;  %v5412_v25 = vpop.permute.xlu1 %452 }
 0xa46   :  { %8726 = vst [vmem:[#allocation119_spill] sm:$0xff] %v5412_v25 }
 0xa4c   :  { %v1270_v28 = vpop.permute.xlu2 %1269 }
 0xa4d   :  { %v1274_v60 = vmul.f32 %v1270_v28, %v5307_v47  ;;  %v1272_v21 = vmul.f32 %v1270_v28, %v5296_v26  ;;  %v1273_v12 = vmul.f32 %v1270_v28, %v5294_v17  ;;  %v1294_v4 = vmul.f32 %v1270_v28, %v5315_v2 }
 0xa4e   :  { %v1292_v15 = vmul.f32 %v1270_v28, %v5305_v61  ;;  %v1293_v58 = vmul.f32 %v1270_v28, %v5289_v18 }
 0xa4f   :  { %1282 = vrot.lane.b32.xlu2 %v1274_v60, %s4683_s5  ;;  %1278 = vrot.lane.b32.xlu0 %v1272_v21, %s4683_s5  ;;  %v4685_v21 = vmov 31  }
 0xa50   :  { %1280 = vrot.lane.b32.xlu1 %v1273_v12, %s4683_s5  ;;  %4480 = vset.pattern.permute.xlu2 %v4685_v21 }
 0xa54   :  { %v5403_v60 = vpop.permute.xlu0 %1258 }
 0xa55   :  { %8724 = vst [vmem:[#allocation117_spill] sm:$0xff] %v5403_v60  ;;  %v5420_v60 = vpop.permute.xlu1 %471 }
 0xa56   :  { %8727 = vst [vmem:[#allocation120_spill] sm:$0xff] %v5420_v60 }
 0xa57   :  { %1302 = vrot.lane.b32.xlu2 %v1294_v4, %s4683_s5  ;;  %1298 = vrot.lane.b32.xlu0 %v1292_v15, %s4683_s5 }
 0xa58   :  { %1300 = vrot.lane.b32.xlu1 %v1293_v58, %s4683_s5 }
 0xa5d   :  { %v5425_v25 = vpop.permute.xlu1 %491 }
 0xa5e   :  { %8728 = vst [vmem:[#allocation121_spill] sm:$0xff] %v5425_v25 }
 0xa5f   :  { %1313 = vperm.xlu0 %4479, %v5320_v14  }
 0xa65   :  { %v5439_v43 = vpop.permute.xlu1 %495 }
 0xa66   :  { %8733 = vst [vmem:[#allocation126_spill] sm:$0xff] %v5439_v43 }
 0xa67   :  { %4481 = vset.pattern.permute.xlu0 %v4687_v30 }
 0xac1   :  { %v5405_v12 = vpop.permute.xlu0 %1278 }
 0xac2   :  { %8725 = vst [vmem:[#allocation118_spill] sm:$0xff] %v5405_v12 }
 0xac9   :  { %v5407_v54 = vpop.permute.xlu0 %1298 }
 0xad1   :  { %v1314_v57 = vpop.permute.xlu0 %1313 }
 0xad2   :  { %v1336_v28 = vmul.f32 %v1314_v57, %v5289_v18  ;;  %v1317_v4 = vmul.f32 %v1314_v57, %v5294_v17  ;;  %v1316_v15 = vmul.f32 %v1314_v57, %v5296_v26  ;;  %v1335_v58 = vmul.f32 %v1314_v57, %v5305_v61 }
 0xad3   :  { %v1318_v21 = vmul.f32 %v1314_v57, %v5307_v47  ;;  %v1337_v10 = vmul.f32 %v1314_v57, %v5315_v2 }
 0xad4   :  { %1343 = vrot.lane.b32.xlu0 %v1336_v28, %s4686_s6  ;;  %1324 = vrot.lane.b32.xlu2 %v1317_v4, %s4686_s6  ;;  %v5428_v28 = vpop.permute.xlu2 %1282 }
 0xad5   :  { %1322 = vrot.lane.b32.xlu1 %v1316_v15, %s4686_s6  ;;  %8729 = vst [vmem:[#allocation122_spill] sm:$0xff] %v5428_v28 }
 0xadc   :  { %1341 = vrot.lane.b32.xlu2 %v1335_v58, %s4686_s6  ;;  %v5430_v4 = vpop.permute.xlu2 %1302 }
 0xadd   :  { %1326 = vrot.lane.b32.xlu1 %v1318_v21, %s4686_s6  ;;  %8730 = vst [vmem:[#allocation123_spill] sm:$0xff] %v5430_v4 }
 0xae4   :  { %1354 = vperm.xlu2 %4480, %v5320_v14  }
 0xae5   :  { %1345 = vrot.lane.b32.xlu1 %v1337_v10, %s4686_s6 }
 0xb2e   :  { %v5432_v15 = vpop.permute.xlu2 %1324 }
 0xb2f   :  { %8731 = vst [vmem:[#allocation124_spill] sm:$0xff] %v5432_v15  ;;  %v5449_v15 = vpop.permute.xlu1 %515 }
 0xb30   :  { %8734 = vst [vmem:[#allocation127_spill] sm:$0xff] %v5449_v15 }
 0xb36   :  { %v5434_v58 = vpop.permute.xlu2 %1341 }
 0xb37   :  { %8732 = vst [vmem:[#allocation125_spill] sm:$0xff] %v5434_v58  ;;  %v5462_v15 = vpop.permute.xlu1 %537 }
 0xb38   :  { %8737 = vst [vmem:[#allocation130_spill] sm:$0xff] %v5462_v15 }
 0xb3e   :  { %v1355_v60 = vpop.permute.xlu2 %1354 }
 0xb3f   :  { %v1359_v21 = vmul.f32 %v1355_v60, %v5307_v47  ;;  %v1357_v57 = vmul.f32 %v1355_v60, %v5296_v26  ;;  %v1358_v5 = vmul.f32 %v1355_v60, %v5294_v17  ;;  %v1379_v10 = vmul.f32 %v1355_v60, %v5315_v2 }
 0xb40   :  { %v1377_v30 = vmul.f32 %v1355_v60, %v5305_v61  ;;  %v1378_v4 = vmul.f32 %v1355_v60, %v5289_v18 }
 0xb41   :  { %1367 = vrot.lane.b32.xlu2 %v1359_v21, %s4686_s6  ;;  %1363 = vrot.lane.b32.xlu0 %v1357_v57, %s4686_s6  ;;  %v4688_v57 = vmov 33  }
 0xb42   :  { %1365 = vrot.lane.b32.xlu1 %v1358_v5, %s4686_s6  ;;  %4482 = vset.pattern.permute.xlu2 %v4688_v57 }
 0xb46   :  { %v5453_v21 = vpop.permute.xlu0 %1343 }
 0xb47   :  { %8735 = vst [vmem:[#allocation128_spill] sm:$0xff] %v5453_v21  ;;  %v5470_v21 = vpop.permute.xlu1 %556 }
 0xb48   :  { %8738 = vst [vmem:[#allocation131_spill] sm:$0xff] %v5470_v21 }
 0xb49   :  { %1387 = vrot.lane.b32.xlu2 %v1379_v10, %s4686_s6  ;;  %1383 = vrot.lane.b32.xlu0 %v1377_v30, %s4686_s6 }
 0xb4a   :  { %1385 = vrot.lane.b32.xlu1 %v1378_v4, %s4686_s6 }
 0xb4f   :  { %v5475_v15 = vpop.permute.xlu1 %576 }
 0xb50   :  { %8739 = vst [vmem:[#allocation132_spill] sm:$0xff] %v5475_v15 }
 0xb51   :  { %1398 = vperm.xlu0 %4481, %v5320_v14  }
 0xb57   :  { %v5489_v12 = vpop.permute.xlu1 %580 }
 0xb58   :  { %8744 = vst [vmem:[#allocation137_spill] sm:$0xff] %v5489_v12 }
 0xb59   :  { %4483 = vset.pattern.permute.xlu0 %v4690_v19 }
 0xbb3   :  { %v5455_v5 = vpop.permute.xlu0 %1363 }
 0xbb4   :  { %8736 = vst [vmem:[#allocation129_spill] sm:$0xff] %v5455_v5 }
 0xbbb   :  { %v5457_v58 = vpop.permute.xlu0 %1383 }
 0xbc3   :  { %v1399_v28 = vpop.permute.xlu0 %1398 }
 0xbc4   :  { %v1421_v60 = vmul.f32 %v1399_v28, %v5289_v18  ;;  %v1402_v10 = vmul.f32 %v1399_v28, %v5294_v17  ;;  %v1401_v30 = vmul.f32 %v1399_v28, %v5296_v26  ;;  %v1420_v4 = vmul.f32 %v1399_v28, %v5305_v61 }
 0xbc5   :  { %v1403_v57 = vmul.f32 %v1399_v28, %v5307_v47  ;;  %v1422_v43 = vmul.f32 %v1399_v28, %v5315_v2 }
 0xbc6   :  { %1428 = vrot.lane.b32.xlu0 %v1421_v60, %s4689_s7  ;;  %1409 = vrot.lane.b32.xlu2 %v1402_v10, %s4689_s7  ;;  %v5478_v60 = vpop.permute.xlu2 %1367 }
 0xbc7   :  { %1407 = vrot.lane.b32.xlu1 %v1401_v30, %s4689_s7  ;;  %8740 = vst [vmem:[#allocation133_spill] sm:$0xff] %v5478_v60 }
 0xbce   :  { %1426 = vrot.lane.b32.xlu2 %v1420_v4, %s4689_s7  ;;  %v5480_v10 = vpop.permute.xlu2 %1387 }
 0xbcf   :  { %1411 = vrot.lane.b32.xlu1 %v1403_v57, %s4689_s7  ;;  %8741 = vst [vmem:[#allocation134_spill] sm:$0xff] %v5480_v10 }
 0xbd6   :  { %1439 = vperm.xlu2 %4482, %v5320_v14  }
 0xbd7   :  { %1430 = vrot.lane.b32.xlu1 %v1422_v43, %s4689_s7 }
 0xc20   :  { %v5482_v30 = vpop.permute.xlu2 %1409 }
 0xc21   :  { %8742 = vst [vmem:[#allocation135_spill] sm:$0xff] %v5482_v30  ;;  %v5499_v30 = vpop.permute.xlu1 %600 }
 0xc22   :  { %8745 = vst [vmem:[#allocation138_spill] sm:$0xff] %v5499_v30 }
 0xc28   :  { %v5484_v4 = vpop.permute.xlu2 %1426 }
 0xc29   :  { %8743 = vst [vmem:[#allocation136_spill] sm:$0xff] %v5484_v4  ;;  %v5512_v30 = vpop.permute.xlu1 %622 }
 0xc2a   :  { %8748 = vst [vmem:[#allocation141_spill] sm:$0xff] %v5512_v30 }
 0xc30   :  { %v1440_v21 = vpop.permute.xlu2 %1439 }
 0xc31   :  { %v1444_v57 = vmul.f32 %v1440_v21, %v5307_v47  ;;  %v1442_v28 = vmul.f32 %v1440_v21, %v5296_v26  ;;  %v1443_v5 = vmul.f32 %v1440_v21, %v5294_v17  ;;  %v1464_v43 = vmul.f32 %v1440_v21, %v5315_v2 }
 0xc32   :  { %v1462_v19 = vmul.f32 %v1440_v21, %v5305_v61  ;;  %v1463_v10 = vmul.f32 %v1440_v21, %v5289_v18 }
 0xc33   :  { %1452 = vrot.lane.b32.xlu2 %v1444_v57, %s4689_s7  ;;  %1448 = vrot.lane.b32.xlu0 %v1442_v28, %s4689_s7  ;;  %v4691_v28 = vmov 35  }
 0xc34   :  { %1450 = vrot.lane.b32.xlu1 %v1443_v5, %s4689_s7  ;;  %4484 = vset.pattern.permute.xlu2 %v4691_v28 }
 0xc38   :  { %v5503_v57 = vpop.permute.xlu0 %1428 }
 0xc39   :  { %8746 = vst [vmem:[#allocation139_spill] sm:$0xff] %v5503_v57  ;;  %v5520_v57 = vpop.permute.xlu1 %641 }
 0xc3a   :  { %8749 = vst [vmem:[#allocation142_spill] sm:$0xff] %v5520_v57 }
 0xc3b   :  { %1472 = vrot.lane.b32.xlu2 %v1464_v43, %s4689_s7  ;;  %1468 = vrot.lane.b32.xlu0 %v1462_v19, %s4689_s7 }
 0xc3c   :  { %1470 = vrot.lane.b32.xlu1 %v1463_v10, %s4689_s7 }
 0xc41   :  { %v5525_v30 = vpop.permute.xlu1 %661 }
 0xc42   :  { %8750 = vst [vmem:[#allocation143_spill] sm:$0xff] %v5525_v30 }
 0xc43   :  { %1483 = vperm.xlu0 %4483, %v5320_v14  }
 0xc49   :  { %v5539_v63 = vpop.permute.xlu1 %665 }
 0xc4a   :  { %8755 = vst [vmem:[#allocation148_spill] sm:$0xff] %v5539_v63 }
 0xca5   :  { %v5505_v5 = vpop.permute.xlu0 %1448 }
 0xca6   :  { %8747 = vst [vmem:[#allocation140_spill] sm:$0xff] %v5505_v5  ;;  %v4693_v5 = vmov 36  }
 0xca7   :  { %4485 = vset.pattern.permute.xlu0 %v4693_v5 }
 0xcad   :  { %v5507_v4 = vpop.permute.xlu0 %1468 }
 0xcb5   :  { %v1484_v60 = vpop.permute.xlu0 %1483 }
 0xcb6   :  { %v1506_v21 = vmul.f32 %v1484_v60, %v5289_v18  ;;  %v1487_v43 = vmul.f32 %v1484_v60, %v5294_v17  ;;  %v1486_v19 = vmul.f32 %v1484_v60, %v5296_v26  ;;  %v1505_v10 = vmul.f32 %v1484_v60, %v5305_v61 }
 0xcb7   :  { %v1488_v28 = vmul.f32 %v1484_v60, %v5307_v47  ;;  %v1507_v12 = vmul.f32 %v1484_v60, %v5315_v2 }
 0xcb8   :  { %1513 = vrot.lane.b32.xlu0 %v1506_v21, %s4692_s8  ;;  %1494 = vrot.lane.b32.xlu2 %v1487_v43, %s4692_s8  ;;  %v5528_v21 = vpop.permute.xlu2 %1452 }
 0xcb9   :  { %1492 = vrot.lane.b32.xlu1 %v1486_v19, %s4692_s8  ;;  %8751 = vst [vmem:[#allocation144_spill] sm:$0xff] %v5528_v21 }
 0xcc0   :  { %1511 = vrot.lane.b32.xlu2 %v1505_v10, %s4692_s8  ;;  %v5530_v43 = vpop.permute.xlu2 %1472 }
 0xcc1   :  { %1496 = vrot.lane.b32.xlu1 %v1488_v28, %s4692_s8  ;;  %8752 = vst [vmem:[#allocation145_spill] sm:$0xff] %v5530_v43 }
 0xcc8   :  { %1524 = vperm.xlu2 %4484, %v5320_v14  }
 0xcc9   :  { %1515 = vrot.lane.b32.xlu1 %v1507_v12, %s4692_s8 }
 0xd12   :  { %v5532_v19 = vpop.permute.xlu2 %1494 }
 0xd13   :  { %8753 = vst [vmem:[#allocation146_spill] sm:$0xff] %v5532_v19  ;;  %v5549_v19 = vpop.permute.xlu1 %686 }
 0xd14   :  { %8756 = vst [vmem:[#allocation149_spill] sm:$0xff] %v5549_v19 }
 0xd1a   :  { %v5534_v10 = vpop.permute.xlu2 %1511 }
 0xd1b   :  { %8754 = vst [vmem:[#allocation147_spill] sm:$0xff] %v5534_v10  ;;  %v5562_v19 = vpop.permute.xlu1 %708 }
 0xd1c   :  { %8759 = vst [vmem:[#allocation152_spill] sm:$0xff] %v5562_v19 }
 0xd22   :  { %v1525_v57 = vpop.permute.xlu2 %1524 }
 0xd23   :  { %v1529_v28 = vmul.f32 %v1525_v57, %v5307_v47  ;;  %v1527_v60 = vmul.f32 %v1525_v57, %v5296_v26  ;;  %v1528_v11 = vmul.f32 %v1525_v57, %v5294_v17  ;;  %v1550_v12 = vmul.f32 %v1525_v57, %v5315_v2 }
 0xd24   :  { %v1548_v5 = vmul.f32 %v1525_v57, %v5305_v61  ;;  %v1549_v43 = vmul.f32 %v1525_v57, %v5289_v18 }
 0xd25   :  { %1537 = vrot.lane.b32.xlu2 %v1529_v28, %s4694_s9  ;;  %1533 = vrot.lane.b32.xlu0 %v1527_v60, %s4694_s9  ;;  %v4695_v60 = vmov 37  }
 0xd26   :  { %1535 = vrot.lane.b32.xlu1 %v1528_v11, %s4694_s9  ;;  %4486 = vset.pattern.permute.xlu2 %v4695_v60 }
 0xd2a   :  { %v5553_v28 = vpop.permute.xlu0 %1513 }
 0xd2b   :  { %8757 = vst [vmem:[#allocation150_spill] sm:$0xff] %v5553_v28  ;;  %v5570_v28 = vpop.permute.xlu1 %727 }
 0xd2c   :  { %8760 = vst [vmem:[#allocation153_spill] sm:$0xff] %v5570_v28 }
 0xd2d   :  { %1558 = vrot.lane.b32.xlu2 %v1550_v12, %s4694_s9  ;;  %1554 = vrot.lane.b32.xlu0 %v1548_v5, %s4694_s9 }
 0xd2e   :  { %1556 = vrot.lane.b32.xlu1 %v1549_v43, %s4694_s9 }
 0xd33   :  { %v5575_v19 = vpop.permute.xlu1 %747 }
 0xd34   :  { %8761 = vst [vmem:[#allocation154_spill] sm:$0xff] %v5575_v19 }
 0xd35   :  { %1569 = vperm.xlu0 %4485, %v5320_v14  }
 0xd3b   :  { %v5589_v6 = vpop.permute.xlu1 %751 }
 0xd3c   :  { %8766 = vst [vmem:[#allocation159_spill] sm:$0xff] %v5589_v6 }
 0xd97   :  { %v5555_v11 = vpop.permute.xlu0 %1533 }
 0xd98   :  { %8758 = vst [vmem:[#allocation151_spill] sm:$0xff] %v5555_v11  ;;  %v4697_v11 = vmov 38  }
 0xd99   :  { %4487 = vset.pattern.permute.xlu0 %v4697_v11 }
 0xd9f   :  { %v5557_v10 = vpop.permute.xlu0 %1554 }
 0xda7   :  { %v1570_v21 = vpop.permute.xlu0 %1569 }
 0xda8   :  { %v1592_v57 = vmul.f32 %v1570_v21, %v5289_v18  ;;  %v1573_v12 = vmul.f32 %v1570_v21, %v5294_v17  ;;  %v1572_v5 = vmul.f32 %v1570_v21, %v5296_v26  ;;  %v1591_v43 = vmul.f32 %v1570_v21, %v5305_v61 }
 0xda9   :  { %v1574_v60 = vmul.f32 %v1570_v21, %v5307_v47  ;;  %v1593_v63 = vmul.f32 %v1570_v21, %v5315_v2 }
 0xdaa   :  { %1599 = vrot.lane.b32.xlu0 %v1592_v57, %s4696_s10  ;;  %1580 = vrot.lane.b32.xlu2 %v1573_v12, %s4696_s10  ;;  %v5578_v57 = vpop.permute.xlu2 %1537 }
 0xdab   :  { %1578 = vrot.lane.b32.xlu1 %v1572_v5, %s4696_s10  ;;  %8762 = vst [vmem:[#allocation155_spill] sm:$0xff] %v5578_v57 }
 0xdb2   :  { %1597 = vrot.lane.b32.xlu2 %v1591_v43, %s4696_s10  ;;  %v5580_v12 = vpop.permute.xlu2 %1558 }
 0xdb3   :  { %1582 = vrot.lane.b32.xlu1 %v1574_v60, %s4696_s10  ;;  %8763 = vst [vmem:[#allocation156_spill] sm:$0xff] %v5580_v12 }
 0xdba   :  { %1610 = vperm.xlu2 %4486, %v5320_v14  }
 0xdbb   :  { %1601 = vrot.lane.b32.xlu1 %v1593_v63, %s4696_s10 }
 0xe04   :  { %v5582_v5 = vpop.permute.xlu2 %1580 }
 0xe05   :  { %8764 = vst [vmem:[#allocation157_spill] sm:$0xff] %v5582_v5  ;;  %v5599_v5 = vpop.permute.xlu1 %771 }
 0xe06   :  { %8767 = vst [vmem:[#allocation160_spill] sm:$0xff] %v5599_v5 }
 0xe0c   :  { %v5584_v43 = vpop.permute.xlu2 %1597 }
 0xe0d   :  { %8765 = vst [vmem:[#allocation158_spill] sm:$0xff] %v5584_v43  ;;  %v5612_v5 = vpop.permute.xlu1 %793 }
 0xe0e   :  { %8770 = vst [vmem:[#allocation163_spill] sm:$0xff] %v5612_v5 }
 0xe14   :  { %v1611_v28 = vpop.permute.xlu2 %1610 }
 0xe15   :  { %v1615_v60 = vmul.f32 %v1611_v28, %v5307_v47  ;;  %v1613_v21 = vmul.f32 %v1611_v28, %v5296_v26  ;;  %v1614_v29 = vmul.f32 %v1611_v28, %v5294_v17  ;;  %v1635_v63 = vmul.f32 %v1611_v28, %v5315_v2 }
 0xe16   :  { %v1633_v11 = vmul.f32 %v1611_v28, %v5305_v61  ;;  %v1634_v12 = vmul.f32 %v1611_v28, %v5289_v18 }
 0xe17   :  { %1623 = vrot.lane.b32.xlu2 %v1615_v60, %s4696_s10  ;;  %1619 = vrot.lane.b32.xlu0 %v1613_v21, %s4696_s10  ;;  %v4698_v21 = vmov 39  }
 0xe18   :  { %1621 = vrot.lane.b32.xlu1 %v1614_v29, %s4696_s10  ;;  %4488 = vset.pattern.permute.xlu2 %v4698_v21 }
 0xe1c   :  { %v5603_v60 = vpop.permute.xlu0 %1599 }
 0xe1d   :  { %8768 = vst [vmem:[#allocation161_spill] sm:$0xff] %v5603_v60  ;;  %v5620_v60 = vpop.permute.xlu1 %812 }
 0xe1e   :  { %8771 = vst [vmem:[#allocation164_spill] sm:$0xff] %v5620_v60 }
 0xe1f   :  { %1643 = vrot.lane.b32.xlu2 %v1635_v63, %s4696_s10  ;;  %1639 = vrot.lane.b32.xlu0 %v1633_v11, %s4696_s10 }
 0xe20   :  { %1641 = vrot.lane.b32.xlu1 %v1634_v12, %s4696_s10 }
 0xe25   :  { %v5625_v5 = vpop.permute.xlu1 %832 }
 0xe26   :  { %8772 = vst [vmem:[#allocation165_spill] sm:$0xff] %v5625_v5 }
 0xe27   :  { %1654 = vperm.xlu0 %4487, %v5320_v14  }
 0xe2d   :  { %v5639_v5 = vpop.permute.xlu1 %836 }
 0xe2e   :  { %8777 = vst [vmem:[#allocation170_spill] sm:$0xff] %v5639_v5 }
 0xe89   :  { %v5605_v29 = vpop.permute.xlu0 %1619 }
 0xe8a   :  { %8769 = vst [vmem:[#allocation162_spill] sm:$0xff] %v5605_v29  ;;  %v4700_v29 = vmov 40  }
 0xe8b   :  { %4489 = vset.pattern.permute.xlu0 %v4700_v29 }
 0xe91   :  { %v5607_v43 = vpop.permute.xlu0 %1639 }
 0xe99   :  { %v1655_v57 = vpop.permute.xlu0 %1654 }
 0xe9a   :  { %v1677_v28 = vmul.f32 %v1655_v57, %v5289_v18  ;;  %v1658_v63 = vmul.f32 %v1655_v57, %v5294_v17  ;;  %v1657_v11 = vmul.f32 %v1655_v57, %v5296_v26  ;;  %v1676_v12 = vmul.f32 %v1655_v57, %v5305_v61 }
 0xe9b   :  { %v1659_v21 = vmul.f32 %v1655_v57, %v5307_v47  ;;  %v1678_v6 = vmul.f32 %v1655_v57, %v5315_v2 }
 0xe9c   :  { %1684 = vrot.lane.b32.xlu0 %v1677_v28, %s4699_s11  ;;  %1665 = vrot.lane.b32.xlu2 %v1658_v63, %s4699_s11  ;;  %v5628_v28 = vpop.permute.xlu2 %1623 }
 0xe9d   :  { %1663 = vrot.lane.b32.xlu1 %v1657_v11, %s4699_s11  ;;  %8773 = vst [vmem:[#allocation166_spill] sm:$0xff] %v5628_v28 }
 0xea4   :  { %1682 = vrot.lane.b32.xlu2 %v1676_v12, %s4699_s11  ;;  %v5630_v63 = vpop.permute.xlu2 %1643 }
 0xea5   :  { %1667 = vrot.lane.b32.xlu1 %v1659_v21, %s4699_s11  ;;  %8774 = vst [vmem:[#allocation167_spill] sm:$0xff] %v5630_v63 }
 0xeac   :  { %1695 = vperm.xlu2 %4488, %v5320_v14  }
 0xead   :  { %1686 = vrot.lane.b32.xlu1 %v1678_v6, %s4699_s11 }
 0xef6   :  { %v5632_v11 = vpop.permute.xlu2 %1665 }
 0xef7   :  { %8775 = vst [vmem:[#allocation168_spill] sm:$0xff] %v5632_v11  ;;  %v5649_v11 = vpop.permute.xlu1 %856 }
 0xef8   :  { %8778 = vst [vmem:[#allocation171_spill] sm:$0xff] %v5649_v11 }
 0xefe   :  { %v5634_v12 = vpop.permute.xlu2 %1682 }
 0xeff   :  { %8776 = vst [vmem:[#allocation169_spill] sm:$0xff] %v5634_v12  ;;  %v5662_v11 = vpop.permute.xlu1 %878 }
 0xf00   :  { %8781 = vst [vmem:[#allocation174_spill] sm:$0xff] %v5662_v11 }
 0xf06   :  { %v1696_v60 = vpop.permute.xlu2 %1695 }
 0xf07   :  { %v1700_v21 = vmul.f32 %v1696_v60, %v5307_v47  ;;  %v1698_v57 = vmul.f32 %v1696_v60, %v5296_v26  ;;  %v1699_v19 = vmul.f32 %v1696_v60, %v5294_v17  ;;  %v1720_v6 = vmul.f32 %v1696_v60, %v5315_v2 }
 0xf08   :  { %v1718_v29 = vmul.f32 %v1696_v60, %v5305_v61  ;;  %v1719_v63 = vmul.f32 %v1696_v60, %v5289_v18 }
 0xf09   :  { %1708 = vrot.lane.b32.xlu2 %v1700_v21, %s4699_s11  ;;  %1704 = vrot.lane.b32.xlu0 %v1698_v57, %s4699_s11  ;;  %v4701_v57 = vmov 41  }
 0xf0a   :  { %1706 = vrot.lane.b32.xlu1 %v1699_v19, %s4699_s11  ;;  %4490 = vset.pattern.permute.xlu2 %v4701_v57 }
 0xf0e   :  { %v5653_v21 = vpop.permute.xlu0 %1684 }
 0xf0f   :  { %8779 = vst [vmem:[#allocation172_spill] sm:$0xff] %v5653_v21  ;;  %v5670_v21 = vpop.permute.xlu1 %897 }
 0xf10   :  { %8782 = vst [vmem:[#allocation175_spill] sm:$0xff] %v5670_v21 }
 0xf11   :  { %1728 = vrot.lane.b32.xlu2 %v1720_v6, %s4699_s11  ;;  %1724 = vrot.lane.b32.xlu0 %v1718_v29, %s4699_s11 }
 0xf12   :  { %1726 = vrot.lane.b32.xlu1 %v1719_v63, %s4699_s11 }
 0xf17   :  { %v5675_v11 = vpop.permute.xlu1 %917 }
 0xf18   :  { %8783 = vst [vmem:[#allocation176_spill] sm:$0xff] %v5675_v11 }
 0xf19   :  { %1739 = vperm.xlu0 %4489, %v5320_v14  }
 0xf1f   :  { %v5689_v11 = vpop.permute.xlu1 %921 }
 0xf20   :  { %8788 = vst [vmem:[#allocation181_spill] sm:$0xff] %v5689_v11 }
 0xf7b   :  { %v5655_v19 = vpop.permute.xlu0 %1704 }
 0xf7c   :  { %8780 = vst [vmem:[#allocation173_spill] sm:$0xff] %v5655_v19  ;;  %v4703_v19 = vmov 42  }
 0xf7d   :  { %4491 = vset.pattern.permute.xlu0 %v4703_v19 }
 0xf83   :  { %v5657_v12 = vpop.permute.xlu0 %1724 }
 0xf8b   :  { %v1740_v28 = vpop.permute.xlu0 %1739 }
 0xf8c   :  { %v1762_v60 = vmul.f32 %v1740_v28, %v5289_v18  ;;  %v1743_v6 = vmul.f32 %v1740_v28, %v5294_v17  ;;  %v1742_v29 = vmul.f32 %v1740_v28, %v5296_v26  ;;  %v1761_v63 = vmul.f32 %v1740_v28, %v5305_v61 }
 0xf8d   :  { %v1744_v57 = vmul.f32 %v1740_v28, %v5307_v47  ;;  %v1763_v5 = vmul.f32 %v1740_v28, %v5315_v2 }
 0xf8e   :  { %1769 = vrot.lane.b32.xlu0 %v1762_v60, %s4702_s12  ;;  %1750 = vrot.lane.b32.xlu2 %v1743_v6, %s4702_s12  ;;  %v5678_v60 = vpop.permute.xlu2 %1708 }
 0xf8f   :  { %1748 = vrot.lane.b32.xlu1 %v1742_v29, %s4702_s12  ;;  %8784 = vst [vmem:[#allocation177_spill] sm:$0xff] %v5678_v60 }
 0xf96   :  { %1767 = vrot.lane.b32.xlu2 %v1761_v63, %s4702_s12  ;;  %v5680_v6 = vpop.permute.xlu2 %1728 }
 0xf97   :  { %1752 = vrot.lane.b32.xlu1 %v1744_v57, %s4702_s12  ;;  %8785 = vst [vmem:[#allocation178_spill] sm:$0xff] %v5680_v6 }
 0xf9e   :  { %1780 = vperm.xlu2 %4490, %v5320_v14  }
 0xf9f   :  { %1771 = vrot.lane.b32.xlu1 %v1763_v5, %s4702_s12 }
 0xfe8   :  { %v5682_v29 = vpop.permute.xlu2 %1750 }
 0xfe9   :  { %8786 = vst [vmem:[#allocation179_spill] sm:$0xff] %v5682_v29  ;;  %v5699_v29 = vpop.permute.xlu1 %941 }
 0xfea   :  { %8789 = vst [vmem:[#allocation182_spill] sm:$0xff] %v5699_v29 }
 0xff0   :  { %v5684_v63 = vpop.permute.xlu2 %1767 }
 0xff1   :  { %8787 = vst [vmem:[#allocation180_spill] sm:$0xff] %v5684_v63  ;;  %v5712_v29 = vpop.permute.xlu1 %963 }
 0xff2   :  { %8792 = vst [vmem:[#allocation185_spill] sm:$0xff] %v5712_v29 }
 0xff8   :  { %v1781_v21 = vpop.permute.xlu2 %1780 }
 0xff9   :  { %v1785_v57 = vmul.f32 %v1781_v21, %v5307_v47  ;;  %v1783_v28 = vmul.f32 %v1781_v21, %v5296_v26  ;;  %v1784_v52 = vmul.f32 %v1781_v21, %v5294_v17  ;;  %v1805_v5 = vmul.f32 %v1781_v21, %v5315_v2 }
 0xffa   :  { %v1803_v19 = vmul.f32 %v1781_v21, %v5305_v61  ;;  %v1804_v6 = vmul.f32 %v1781_v21, %v5289_v18 }
 0xffb   :  { %1793 = vrot.lane.b32.xlu2 %v1785_v57, %s4702_s12  ;;  %1789 = vrot.lane.b32.xlu0 %v1783_v28, %s4702_s12  ;;  %v4704_v28 = vmov 43  }
 0xffc   :  { %1791 = vrot.lane.b32.xlu1 %v1784_v52, %s4702_s12  ;;  %4492 = vset.pattern.permute.xlu2 %v4704_v28 }
0x1000   :  { %v5703_v57 = vpop.permute.xlu0 %1769 }
0x1001   :  { %8790 = vst [vmem:[#allocation183_spill] sm:$0xff] %v5703_v57  ;;  %v5720_v57 = vpop.permute.xlu1 %982 }
0x1002   :  { %8793 = vst [vmem:[#allocation186_spill] sm:$0xff] %v5720_v57 }
0x1003   :  { %1813 = vrot.lane.b32.xlu2 %v1805_v5, %s4702_s12  ;;  %1809 = vrot.lane.b32.xlu0 %v1803_v19, %s4702_s12 }
0x1004   :  { %1811 = vrot.lane.b32.xlu1 %v1804_v6, %s4702_s12 }
0x1009   :  { %v5725_v29 = vpop.permute.xlu1 %1002 }
0x100a   :  { %8794 = vst [vmem:[#allocation187_spill] sm:$0xff] %v5725_v29 }
0x100b   :  { %1824 = vperm.xlu0 %4491, %v5320_v14  }
0x1011   :  { %v5739_v29 = vpop.permute.xlu1 %1006 }
0x1012   :  { %8799 = vst [vmem:[#allocation192_spill] sm:$0xff] %v5739_v29 }
0x106d   :  { %v5705_v52 = vpop.permute.xlu0 %1789 }
0x106e   :  { %8791 = vst [vmem:[#allocation184_spill] sm:$0xff] %v5705_v52  ;;  %v4706_v52 = vmov 44  }
0x106f   :  { %4493 = vset.pattern.permute.xlu0 %v4706_v52 }
0x1075   :  { %v5707_v63 = vpop.permute.xlu0 %1809 }
0x107d   :  { %v1825_v60 = vpop.permute.xlu0 %1824 }
0x107e   :  { %v1847_v21 = vmul.f32 %v1825_v60, %v5289_v18  ;;  %v1828_v5 = vmul.f32 %v1825_v60, %v5294_v17  ;;  %v1827_v19 = vmul.f32 %v1825_v60, %v5296_v26  ;;  %v1846_v6 = vmul.f32 %v1825_v60, %v5305_v61 }
0x107f   :  { %v1829_v28 = vmul.f32 %v1825_v60, %v5307_v47  ;;  %v1848_v11 = vmul.f32 %v1825_v60, %v5315_v2 }
0x1080   :  { %1854 = vrot.lane.b32.xlu0 %v1847_v21, %s4705_s13  ;;  %1835 = vrot.lane.b32.xlu2 %v1828_v5, %s4705_s13  ;;  %v5728_v21 = vpop.permute.xlu2 %1793 }
0x1081   :  { %1833 = vrot.lane.b32.xlu1 %v1827_v19, %s4705_s13  ;;  %8795 = vst [vmem:[#allocation188_spill] sm:$0xff] %v5728_v21 }
0x1088   :  { %1852 = vrot.lane.b32.xlu2 %v1846_v6, %s4705_s13  ;;  %v5730_v5 = vpop.permute.xlu2 %1813 }
0x1089   :  { %1837 = vrot.lane.b32.xlu1 %v1829_v28, %s4705_s13  ;;  %8796 = vst [vmem:[#allocation189_spill] sm:$0xff] %v5730_v5 }
0x1090   :  { %1865 = vperm.xlu2 %4492, %v5320_v14  }
0x1091   :  { %1856 = vrot.lane.b32.xlu1 %v1848_v11, %s4705_s13 }
0x10da   :  { %v5732_v19 = vpop.permute.xlu2 %1835 }
0x10db   :  { %8797 = vst [vmem:[#allocation190_spill] sm:$0xff] %v5732_v19  ;;  %v5749_v19 = vpop.permute.xlu1 %1026 }
0x10dc   :  { %8800 = vst [vmem:[#allocation193_spill] sm:$0xff] %v5749_v19 }
0x10e2   :  { %v5734_v6 = vpop.permute.xlu2 %1852 }
0x10e3   :  { %8798 = vst [vmem:[#allocation191_spill] sm:$0xff] %v5734_v6  ;;  %v5762_v19 = vpop.permute.xlu1 %1048 }
0x10e4   :  { %8803 = vst [vmem:[#allocation196_spill] sm:$0xff] %v5762_v19 }
0x10ea   :  { %v1866_v57 = vpop.permute.xlu2 %1865 }
0x10eb   :  { %v1870_v28 = vmul.f32 %v1866_v57, %v5307_v47  ;;  %v1868_v60 = vmul.f32 %v1866_v57, %v5296_v26  ;;  %v1869_v30 = vmul.f32 %v1866_v57, %v5294_v17  ;;  %v1890_v11 = vmul.f32 %v1866_v57, %v5315_v2 }
0x10ec   :  { %v1888_v52 = vmul.f32 %v1866_v57, %v5305_v61  ;;  %v1889_v5 = vmul.f32 %v1866_v57, %v5289_v18 }
0x10ed   :  { %1878 = vrot.lane.b32.xlu2 %v1870_v28, %s4705_s13  ;;  %1874 = vrot.lane.b32.xlu0 %v1868_v60, %s4705_s13  ;;  %v4707_v60 = vmov 45  }
0x10ee   :  { %1876 = vrot.lane.b32.xlu1 %v1869_v30, %s4705_s13  ;;  %4494 = vset.pattern.permute.xlu2 %v4707_v60 }
0x10f2   :  { %v5753_v28 = vpop.permute.xlu0 %1854 }
0x10f3   :  { %8801 = vst [vmem:[#allocation194_spill] sm:$0xff] %v5753_v28  ;;  %v5770_v28 = vpop.permute.xlu1 %1067 }
0x10f4   :  { %8804 = vst [vmem:[#allocation197_spill] sm:$0xff] %v5770_v28 }
0x10f5   :  { %1898 = vrot.lane.b32.xlu2 %v1890_v11, %s4705_s13  ;;  %1894 = vrot.lane.b32.xlu0 %v1888_v52, %s4705_s13 }
0x10f6   :  { %1896 = vrot.lane.b32.xlu1 %v1889_v5, %s4705_s13 }
0x10fb   :  { %v5775_v19 = vpop.permute.xlu1 %1092 }
0x10fc   :  { %8805 = vst [vmem:[#allocation198_spill] sm:$0xff] %v5775_v19 }
0x10fd   :  { %1909 = vperm.xlu0 %4493, %v5320_v14  }
0x1103   :  { %v5789_v19 = vpop.permute.xlu1 %1115 }
0x1104   :  { %8810 = vst [vmem:[#allocation203_spill] sm:$0xff] %v5789_v19 }
0x115f   :  { %v5755_v30 = vpop.permute.xlu0 %1874 }
0x1160   :  { %8802 = vst [vmem:[#allocation195_spill] sm:$0xff] %v5755_v30  ;;  %v4709_v30 = vmov 46  }
0x1161   :  { %4495 = vset.pattern.permute.xlu0 %v4709_v30 }
0x1167   :  { %v5757_v6 = vpop.permute.xlu0 %1894 }
0x116f   :  { %v1910_v21 = vpop.permute.xlu0 %1909 }
0x1170   :  { %v1932_v57 = vmul.f32 %v1910_v21, %v5289_v18  ;;  %v1913_v11 = vmul.f32 %v1910_v21, %v5294_v17  ;;  %v1912_v52 = vmul.f32 %v1910_v21, %v5296_v26  ;;  %v1931_v5 = vmul.f32 %v1910_v21, %v5305_v61 }
0x1171   :  { %v1914_v60 = vmul.f32 %v1910_v21, %v5307_v47  ;;  %v1933_v29 = vmul.f32 %v1910_v21, %v5315_v2 }
0x1172   :  { %1939 = vrot.lane.b32.xlu0 %v1932_v57, %s4708_s14  ;;  %1920 = vrot.lane.b32.xlu2 %v1913_v11, %s4708_s14  ;;  %v5778_v57 = vpop.permute.xlu2 %1878 }
0x1173   :  { %1918 = vrot.lane.b32.xlu1 %v1912_v52, %s4708_s14  ;;  %8806 = vst [vmem:[#allocation199_spill] sm:$0xff] %v5778_v57 }
0x117a   :  { %1937 = vrot.lane.b32.xlu2 %v1931_v5, %s4708_s14  ;;  %v5780_v11 = vpop.permute.xlu2 %1898 }
0x117b   :  { %1922 = vrot.lane.b32.xlu1 %v1914_v60, %s4708_s14  ;;  %8807 = vst [vmem:[#allocation200_spill] sm:$0xff] %v5780_v11 }
0x1182   :  { %1950 = vperm.xlu2 %4494, %v5320_v14  }
0x1183   :  { %1941 = vrot.lane.b32.xlu1 %v1933_v29, %s4708_s14 }
0x11cc   :  { %v5782_v52 = vpop.permute.xlu2 %1920 }
0x11cd   :  { %8808 = vst [vmem:[#allocation201_spill] sm:$0xff] %v5782_v52  ;;  %v5799_v52 = vpop.permute.xlu1 %1144 }
0x11ce   :  { %8811 = vst [vmem:[#allocation204_spill] sm:$0xff] %v5799_v52 }
0x11d4   :  { %v5784_v5 = vpop.permute.xlu2 %1937 }
0x11d5   :  { %8809 = vst [vmem:[#allocation202_spill] sm:$0xff] %v5784_v5  ;;  %v5812_v52 = vpop.permute.xlu1 %1148 }
0x11d6   :  { %8814 = vst [vmem:[#allocation207_spill] sm:$0xff] %v5812_v52 }
0x11dc   :  { %v1951_v28 = vpop.permute.xlu2 %1950 }
0x11dd   :  { %v1955_v60 = vmul.f32 %v1951_v28, %v5307_v47  ;;  %v1953_v21 = vmul.f32 %v1951_v28, %v5296_v26  ;;  %v1954_v1 = vmul.f32 %v1951_v28, %v5294_v17  ;;  %v1976_v29 = vmul.f32 %v1951_v28, %v5315_v2 }
0x11de   :  { %v1974_v30 = vmul.f32 %v1951_v28, %v5305_v61  ;;  %v1975_v11 = vmul.f32 %v1951_v28, %v5289_v18 }
0x11df   :  { %1963 = vrot.lane.b32.xlu2 %v1955_v60, %s4710_s15  ;;  %1959 = vrot.lane.b32.xlu0 %v1953_v21, %s4710_s15  ;;  %v4711_v21 = vmov 47  }
0x11e0   :  { %1961 = vrot.lane.b32.xlu1 %v1954_v1, %s4710_s15  ;;  %4496 = vset.pattern.permute.xlu2 %v4711_v21 }
0x11e4   :  { %v5803_v60 = vpop.permute.xlu0 %1939 }
0x11e5   :  { %8812 = vst [vmem:[#allocation205_spill] sm:$0xff] %v5803_v60  ;;  %v5820_v60 = vpop.permute.xlu1 %1175 }
0x11e6   :  { %8815 = vst [vmem:[#allocation208_spill] sm:$0xff] %v5820_v60 }
0x11e7   :  { %1984 = vrot.lane.b32.xlu2 %v1976_v29, %s4710_s15  ;;  %1980 = vrot.lane.b32.xlu0 %v1974_v30, %s4710_s15 }
0x11e8   :  { %1982 = vrot.lane.b32.xlu1 %v1975_v11, %s4710_s15 }
0x11ed   :  { %v5825_v52 = vpop.permute.xlu1 %1195 }
0x11ee   :  { %8816 = vst [vmem:[#allocation209_spill] sm:$0xff] %v5825_v52 }
0x11ef   :  { %1995 = vperm.xlu0 %4495, %v5320_v14  }
0x11f7   :  { %4497 = vset.pattern.permute.xlu0 %v4713_v38 }
0x1239   :  { %v5834_v15 = vpop.permute.xlu2 %1963 }
0x123a   :  { %8820 = vst [vmem:[#allocation213_spill] sm:$0xff] %v5834_v15 }
0x1241   :  { %v5838_v60 = vpop.permute.xlu2 %1984 }
0x1242   :  { %8822 = vst [vmem:[#allocation215_spill] sm:$0xff] %v5838_v60 }
0x1251   :  { %v5805_v1 = vpop.permute.xlu0 %1959 }
0x1252   :  { %8813 = vst [vmem:[#allocation206_spill] sm:$0xff] %v5805_v1 }
0x1259   :  { %v5807_v5 = vpop.permute.xlu0 %1980 }
0x1261   :  { %v1996_v57 = vpop.permute.xlu0 %1995 }
0x1262   :  { %v2018_v28 = vmul.f32 %v1996_v57, %v5289_v18  ;;  %v1999_v29 = vmul.f32 %v1996_v57, %v5294_v17  ;;  %v1998_v30 = vmul.f32 %v1996_v57, %v5296_v26  ;;  %v2017_v11 = vmul.f32 %v1996_v57, %v5305_v61 }
0x1263   :  { %v2000_v21 = vmul.f32 %v1996_v57, %v5307_v47  ;;  %v2019_v1 = vmul.f32 %v1996_v57, %v5315_v2 }
0x1264   :  { %2025 = vrot.lane.b32.xlu0 %v2018_v28, %s4712_s16  ;;  %2006 = vrot.lane.b32.xlu2 %v1999_v29, %s4712_s16  ;;  %v5828_v28 = vpop.permute.xlu1 %1215 }
0x1265   :  { %2004 = vrot.lane.b32.xlu1 %v1998_v30, %s4712_s16  ;;  %8817 = vst [vmem:[#allocation210_spill] sm:$0xff] %v5828_v28 }
0x126c   :  { %2023 = vrot.lane.b32.xlu2 %v2017_v11, %s4712_s16  ;;  %v5830_v29 = vpop.permute.xlu1 %1237 }
0x126d   :  { %2008 = vrot.lane.b32.xlu1 %v2000_v21, %s4712_s16  ;;  %8818 = vst [vmem:[#allocation211_spill] sm:$0xff] %v5830_v29 }
0x1274   :  { %2036 = vperm.xlu2 %4496, %v5320_v14   ;;  %v5832_v30 = vpop.permute.xlu1 %1241 }
0x1275   :  { %2027 = vrot.lane.b32.xlu1 %v2019_v1, %s4712_s16  ;;  %8819 = vst [vmem:[#allocation212_spill] sm:$0xff] %v5832_v30 }
0x127c   :  { %v5836_v11 = vpop.permute.xlu1 %1260 }
0x127d   :  { %8821 = vst [vmem:[#allocation214_spill] sm:$0xff] %v5836_v11 }
0x1284   :  { %v5840_v21 = vpop.permute.xlu1 %1280 }
0x1285   :  { %8823 = vst [vmem:[#allocation216_spill] sm:$0xff] %v5840_v21 }
0x128c   :  { %v5844_v52 = vpop.permute.xlu1 %1300 }
0x128d   :  { %8825 = vst [vmem:[#allocation218_spill] sm:$0xff] %v5844_v52 }
0x1294   :  { %v5848_v25 = vpop.permute.xlu1 %1322 }
0x1295   :  { %8827 = vst [vmem:[#allocation220_spill] sm:$0xff] %v5848_v25 }
0x129c   :  { %v5856_v38 = vpop.permute.xlu1 %1326 }
0x129d   :  { %8828 = vst [vmem:[#allocation221_spill] sm:$0xff] %v5856_v38 }
0x12a4   :  { %v5864_v25 = vpop.permute.xlu1 %1345 }
0x12a5   :  { %8829 = vst [vmem:[#allocation222_spill] sm:$0xff] %v5864_v25 }
0x12be   :  { %v5842_v57 = vpop.permute.xlu2 %2006 }
0x12bf   :  { %8824 = vst [vmem:[#allocation217_spill] sm:$0xff] %v5842_v57 }
0x12c6   :  { %v5846_v1 = vpop.permute.xlu2 %2023 }
0x12c7   :  { %8826 = vst [vmem:[#allocation219_spill] sm:$0xff] %v5846_v1 }
0x12ce   :  { %v2037_v29 = vpop.permute.xlu2 %2036 }
0x12cf   :  { %v2041_v30 = vmul.f32 %v2037_v29, %v5307_v47  ;;  %v2039_v15 = vmul.f32 %v2037_v29, %v5296_v26  ;;  %v2040_v11 = vmul.f32 %v2037_v29, %v5294_v17  ;;  %v2061_v60 = vmul.f32 %v2037_v29, %v5315_v2 }
0x12d0   :  { %v2059_v57 = vmul.f32 %v2037_v29, %v5305_v61  ;;  %v2060_v1 = vmul.f32 %v2037_v29, %v5289_v18 }
0x12d1   :  { %2049 = vrot.lane.b32.xlu2 %v2041_v30, %s4712_s16  ;;  %2045 = vrot.lane.b32.xlu0 %v2039_v15, %s4712_s16  ;;  %v5867_v15 = vpop.permute.xlu1 %1365 }
0x12d2   :  { %2047 = vrot.lane.b32.xlu1 %v2040_v11, %s4712_s16  ;;  %8830 = vst [vmem:[#allocation223_spill] sm:$0xff] %v5867_v15  ;;  %v4714_v15 = vmov 49  }
0x12d3   :  { %4498 = vset.pattern.permute.xlu2 %v4714_v15 }
0x12d6   :  { %v5885_v25 = vpop.permute.xlu0 %2025 }
0x12d7   :  { %8839 = vst [vmem:[#allocation232_spill] sm:$0xff] %v5885_v25 }
0x12d9   :  { %2069 = vrot.lane.b32.xlu2 %v2061_v60, %s4712_s16  ;;  %2065 = vrot.lane.b32.xlu0 %v2059_v57, %s4712_s16  ;;  %v5869_v30 = vpop.permute.xlu1 %1385 }
0x12da   :  { %2067 = vrot.lane.b32.xlu1 %v2060_v1, %s4712_s16  ;;  %8831 = vst [vmem:[#allocation224_spill] sm:$0xff] %v5869_v30 }
0x12e1   :  { %2080 = vperm.xlu0 %4497, %v5320_v14   ;;  %v5871_v11 = vpop.permute.xlu1 %1407 }
0x12e2   :  { %8832 = vst [vmem:[#allocation225_spill] sm:$0xff] %v5871_v11 }
0x12e9   :  { %v5873_v38 = vpop.permute.xlu1 %1411  ;;  %4499 = vset.pattern.permute.xlu0 %v4717_v48 }
0x12ea   :  { %8833 = vst [vmem:[#allocation226_spill] sm:$0xff] %v5873_v38 }
0x12f1   :  { %v5875_v21 = vpop.permute.xlu1 %1430 }
0x12f2   :  { %8834 = vst [vmem:[#allocation227_spill] sm:$0xff] %v5875_v21 }
0x12f9   :  { %v5877_v29 = vpop.permute.xlu1 %1450 }
0x12fa   :  { %8835 = vst [vmem:[#allocation228_spill] sm:$0xff] %v5877_v29 }
0x1301   :  { %v5879_v60 = vpop.permute.xlu1 %1470 }
0x1302   :  { %8836 = vst [vmem:[#allocation229_spill] sm:$0xff] %v5879_v60 }
0x1309   :  { %v5881_v57 = vpop.permute.xlu1 %1492 }
0x130a   :  { %8837 = vst [vmem:[#allocation230_spill] sm:$0xff] %v5881_v57 }
0x1311   :  { %v5883_v1 = vpop.permute.xlu1 %1496 }
0x1312   :  { %8838 = vst [vmem:[#allocation231_spill] sm:$0xff] %v5883_v1 }
0x1319   :  { %v5887_v14 = vpop.permute.xlu1 %1515 }
0x131a   :  { %8840 = vst [vmem:[#allocation233_spill] sm:$0xff] %v5887_v14 }
0x1321   :  { %v5891_v11 = vpop.permute.xlu1 %1535 }
0x1322   :  { %8842 = vst [vmem:[#allocation235_spill] sm:$0xff] %v5891_v11 }
0x1329   :  { %v5895_v21 = vpop.permute.xlu1 %1556 }
0x132a   :  { %8844 = vst [vmem:[#allocation237_spill] sm:$0xff] %v5895_v21 }
0x1331   :  { %v5902_v15 = vpop.permute.xlu1 %1578 }
0x1332   :  { %8845 = vst [vmem:[#allocation238_spill] sm:$0xff] %v5902_v15 }
0x1343   :  { %v5889_v33 = vpop.permute.xlu0 %2045 }
0x1344   :  { %8841 = vst [vmem:[#allocation234_spill] sm:$0xff] %v5889_v33  ;;  %v5909_v33 = vpop.permute.xlu1 %1582 }
0x1345   :  { %8846 = vst [vmem:[#allocation239_spill] sm:$0xff] %v5909_v33  ;;  %v5928_v33 = vpop.permute.xlu2 %2049 }
0x1346   :  { %8853 = vst [vmem:[#allocation246_spill] sm:$0xff] %v5928_v33 }
0x134b   :  { %v5893_v38 = vpop.permute.xlu0 %2065 }
0x134c   :  { %8843 = vst [vmem:[#allocation236_spill] sm:$0xff] %v5893_v38 }
0x134d   :  { %v5932_v22 = vpop.permute.xlu2 %2069 }
0x134e   :  { %8855 = vst [vmem:[#allocation248_spill] sm:$0xff] %v5932_v22 }
0x1353   :  { %v2081_v29 = vpop.permute.xlu0 %2080 }
0x1354   :  { %v2103_v3 = vmul.f32 %v2081_v29, %v5289_v18  ;;  %v2084_v57 = vmul.f32 %v2081_v29, %v5294_v17  ;;  %v2083_v1 = vmul.f32 %v2081_v29, %v5296_v26  ;;  %v2102_v14 = vmul.f32 %v2081_v29, %v5305_v61 }
0x1355   :  { %v2085_v25 = vmul.f32 %v2081_v29, %v5307_v47  ;;  %v2104_v11 = vmul.f32 %v2081_v29, %v5315_v2 }
0x1356   :  { %2110 = vrot.lane.b32.xlu0 %v2103_v3, %s4715_s17  ;;  %2091 = vrot.lane.b32.xlu2 %v2084_v57, %s4715_s17  ;;  %v5916_v3 = vpop.permute.xlu1 %1601 }
0x1357   :  { %2089 = vrot.lane.b32.xlu1 %v2083_v1, %s4715_s17  ;;  %8847 = vst [vmem:[#allocation240_spill] sm:$0xff] %v5916_v3 }
0x135e   :  { %2108 = vrot.lane.b32.xlu2 %v2102_v14, %s4715_s17  ;;  %v5918_v57 = vpop.permute.xlu1 %1621 }
0x135f   :  { %2093 = vrot.lane.b32.xlu1 %v2085_v25, %s4715_s17  ;;  %8848 = vst [vmem:[#allocation241_spill] sm:$0xff] %v5918_v57  ;;  %v4716_v57 = vmov 51  }
0x1360   :  { %4500 = vset.pattern.permute.xlu1 %v4716_v57 }
0x1366   :  { %2121 = vperm.xlu2 %4498, %v5912_v49   ;;  %v5920_v1 = vpop.permute.xlu1 %1641 }
0x1367   :  { %2112 = vrot.lane.b32.xlu1 %v2104_v11, %s4715_s17  ;;  %8849 = vst [vmem:[#allocation242_spill] sm:$0xff] %v5920_v1 }
0x136e   :  { %v5922_v15 = vpop.permute.xlu1 %1663 }
0x136f   :  { %8850 = vst [vmem:[#allocation243_spill] sm:$0xff] %v5922_v15  ;;  %v4718_v15 = vmov 52  }
0x1370   :  { %4501 = vset.pattern.permute.xlu2 %v4718_v15 }
0x1376   :  { %v5924_v14 = vpop.permute.xlu1 %1667 }
0x1377   :  { %8851 = vst [vmem:[#allocation244_spill] sm:$0xff] %v5924_v14 }
0x137e   :  { %v5926_v25 = vpop.permute.xlu1 %1686 }
0x137f   :  { %8852 = vst [vmem:[#allocation245_spill] sm:$0xff] %v5926_v25 }
0x1386   :  { %v5930_v29 = vpop.permute.xlu1 %1706 }
0x1387   :  { %8854 = vst [vmem:[#allocation247_spill] sm:$0xff] %v5930_v29 }
0x138e   :  { %v5934_v45 = vpop.permute.xlu1 %1726 }
0x138f   :  { %8856 = vst [vmem:[#allocation249_spill] sm:$0xff] %v5934_v45 }
0x1396   :  { %v5938_v3 = vpop.permute.xlu1 %1748 }
0x1397   :  { %8858 = vst [vmem:[#allocation251_spill] sm:$0xff] %v5938_v3  ;;  %v2208_v3 = vld [vmem:[#allocation5 + $0x6] ss:$8 sm:$0x7] }
0x139e   :  { %v5942_v25 = vpop.permute.xlu1 %1752 }
0x139f   :  { %8860 = vst [vmem:[#allocation253_spill] sm:$0xff] %v5942_v25 }
0x13a6   :  { %v5950_v48 = vpop.permute.xlu1 %1771 }
0x13a7   :  { %8861 = vst [vmem:[#allocation254_spill] sm:$0xff] %v5950_v48  ;;  %v2194_v48 = vld [vmem:[#allocation5 + $0x2] ss:$8 sm:$0x7] }
0x13b0   :  { %v5936_v11 = vpop.permute.xlu2 %2091 }
0x13b1   :  { %8857 = vst [vmem:[#allocation250_spill] sm:$0xff] %v5936_v11 }
0x13b8   :  { %v5940_v14 = vpop.permute.xlu2 %2108 }
0x13b9   :  { %8859 = vst [vmem:[#allocation252_spill] sm:$0xff] %v5940_v14  ;;  %v5985_v14 = vperm.slane %v2194_v48, 1 }
0x13bb   :  { %8874 = vst [vmem:[#allocation267_spill] sm:$0xff] %v5985_v14 }
0x13c0   :  { %v2122_v33 = vpop.permute.xlu2 %2121 }
0x13c1   :  { %v2126_v29 = vmul.f32 %v2122_v33, %v5307_v47  ;;  %v2124_v22 = vmul.f32 %v2122_v33, %v5296_v26  ;;  %v2125_v40 = vmul.f32 %v2122_v33, %v5294_v17  ;;  %v2146_v15 = vmul.f32 %v2122_v33, %v5315_v2  ;;  %v5958_v17 = vpop.permute.xlu1 %1791 }
0x13c2   :  { %v2144_v57 = vmul.f32 %v2122_v33, %v5305_v61  ;;  %v2145_v11 = vmul.f32 %v2122_v33, %v5289_v18  ;;  %8862 = vst [vmem:[#allocation255_spill] sm:$0xff] %v5958_v17 }
0x13c3   :  { %2134 = vrot.lane.b32.xlu2 %v2126_v29, %s4715_s17  ;;  %2130 = vrot.lane.b32.xlu0 %v2124_v22, %s4715_s17 }
0x13c4   :  { %2132 = vrot.lane.b32.xlu1 %v2125_v40, %s4715_s17 }
0x13c9   :  { %v5963_v40 = vpop.permute.xlu1 %1811 }
0x13ca   :  { %8863 = vst [vmem:[#allocation256_spill] sm:$0xff] %v5963_v40 }
0x13cb   :  { %2154 = vrot.lane.b32.xlu2 %v2146_v15, %s4715_s17  ;;  %2150 = vrot.lane.b32.xlu0 %v2144_v57, %s4715_s17 }
0x13cc   :  { %2152 = vrot.lane.b32.xlu1 %v2145_v11, %s4715_s17  ;;  %v4719_v11 = vmov 53  }
0x13d1   :  { %v5965_v2 = vpop.permute.xlu1 %1833 }
0x13d2   :  { %8864 = vst [vmem:[#allocation257_spill] sm:$0xff] %v5965_v2 }
0x13d3   :  { %2223 = vperm.xlu2 %4501, %v5912_v49   ;;  %2165 = vperm.xlu0 %4499, %v5912_v49  }
0x13d4   :  { %2191 = vperm.xlu1 %4500, %v5912_v49  }
0x13d9   :  { %v5967_v26 = vpop.permute.xlu1 %1837 }
0x13da   :  { %8865 = vst [vmem:[#allocation258_spill] sm:$0xff] %v5967_v26  ;;  %v5989_v26 = vperm.slane %v2194_v48, 0 }
0x13db   :  { %4503 = vset.pattern.permute.xlu2 %v4720_v8 }
0x13dc   :  { %4502 = vset.pattern.permute.xlu1 %v4719_v11  ;;  %8876 = vst [vmem:[#allocation269_spill] sm:$0xff] %v5989_v26 }
0x13e1   :  { %v5969_v18 = vpop.permute.xlu1 %1856 }
0x13e2   :  { %8866 = vst [vmem:[#allocation259_spill] sm:$0xff] %v5969_v18  ;;  %v5987_v18 = vperm.slane %v2194_v48, 2  ;;  %v6001_v48 = vperm.slane %v2208_v3, 2 }
0x13e4   :  { %8875 = vst [vmem:[#allocation268_spill] sm:$0xff] %v5987_v18 }
0x13e5   :  { %8879 = vst [vmem:[#allocation272_spill] sm:$0xff] %v6001_v48 }
0x13e9   :  { %v5971_v33 = vpop.permute.xlu1 %1876 }
0x13ea   :  { %8867 = vst [vmem:[#allocation260_spill] sm:$0xff] %v5971_v33 }
0x13f1   :  { %v5973_v22 = vpop.permute.xlu1 %1896 }
0x13f2   :  { %8868 = vst [vmem:[#allocation261_spill] sm:$0xff] %v5973_v22 }
0x13f9   :  { %v5975_v61 = vpop.permute.xlu1 %1918 }
0x13fa   :  { %8869 = vst [vmem:[#allocation262_spill] sm:$0xff] %v5975_v61 }
0x1401   :  { %v5977_v47 = vpop.permute.xlu1 %1922 }
0x1402   :  { %8870 = vst [vmem:[#allocation263_spill] sm:$0xff] %v5977_v47 }
0x1409   :  { %v5981_v15 = vpop.permute.xlu1 %1941 }
0x140a   :  { %8872 = vst [vmem:[#allocation265_spill] sm:$0xff] %v5981_v15  ;;  %v5999_v15 = vperm.slane %v2208_v3, 1 }
0x140c   :  { %8878 = vst [vmem:[#allocation271_spill] sm:$0xff] %v5999_v15 }
0x1411   :  { %v5991_v25 = vpop.permute.xlu1 %1961 }
0x1412   :  { %8877 = vst [vmem:[#allocation270_spill] sm:$0xff] %v5991_v25 }
0x141d   :  { %v5979_v29 = vpop.permute.xlu2 %2134 }
0x141e   :  { %8871 = vst [vmem:[#allocation264_spill] sm:$0xff] %v5979_v29  ;;  %v6005_v29 = vpop.permute.xlu1 %1982 }
0x141f   :  { %8881 = vst [vmem:[#allocation274_spill] sm:$0xff] %v6005_v29 }
0x1425   :  { %v5983_v57 = vpop.permute.xlu2 %2154 }
0x1426   :  { %8873 = vst [vmem:[#allocation266_spill] sm:$0xff] %v5983_v57  ;;  %v6003_v57 = vperm.slane %v2208_v3, 0 }
0x1428   :  { %8880 = vst [vmem:[#allocation273_spill] sm:$0xff] %v6003_v57 }
0x142d   :  { %v2224_v61 = vpop.permute.xlu2 %2223 }
0x142e   :  { %v2227_v47 = vmul.f32 %v2224_v61, %v5985_v14  ;;  %v2228_v2 = vmul.f32 %v2224_v61, %v5987_v18  ;;  %v2226_v11 = vmul.f32 %v2224_v61, %v5989_v26  ;;  %v2245_v25 = vmul.f32 %v2224_v61, %v5999_v15 }
0x142f   :  { %v2246_v33 = vmul.f32 %v2224_v61, %v6001_v48  ;;  %v2244_v17 = vmul.f32 %v2224_v61, %v6003_v57 }
0x1430   :  { %2234 = vrot.lane.b32.xlu2 %v2227_v47, %s4646_s0  ;;  %2236 = vrot.lane.b32.xlu0 %v2228_v2, %s4646_s0  ;;  %v6013_v2 = vpop.permute.xlu1 %2004 }
0x1431   :  { %2232 = vrot.lane.b32.xlu1 %v2226_v11, %s4646_s0  ;;  %8882 = vst [vmem:[#allocation275_spill] sm:$0xff] %v6013_v2 }
0x1438   :  { %2252 = vrot.lane.b32.xlu2 %v2245_v25, %s4646_s0  ;;  %2254 = vrot.lane.b32.xlu0 %v2246_v33, %s4646_s0  ;;  %v6016_v3 = vpop.permute.xlu1 %2008 }
0x1439   :  { %2250 = vrot.lane.b32.xlu1 %v2244_v17, %s4646_s0  ;;  %8883 = vst [vmem:[#allocation276_spill] sm:$0xff] %v6016_v3 }
0x1440   :  { %v6018_v47 = vpop.permute.xlu1 %2027 }
0x1441   :  { %2263 = vperm.xlu1 %4502, %v5912_v49   ;;  %8884 = vst [vmem:[#allocation277_spill] sm:$0xff] %v6018_v47 }
0x1448   :  { %v6020_v11 = vpop.permute.xlu1 %2047 }
0x1449   :  { %8885 = vst [vmem:[#allocation278_spill] sm:$0xff] %v6020_v11 }
0x1450   :  { %v6022_v13 = vpop.permute.xlu1 %2067 }
0x1451   :  { %8886 = vst [vmem:[#allocation279_spill] sm:$0xff] %v6022_v13 }
0x1458   :  { %v6024_v23 = vpop.permute.xlu1 %2089 }
0x1459   :  { %8887 = vst [vmem:[#allocation280_spill] sm:$0xff] %v6024_v23 }
0x1460   :  { %v6026_v61 = vpop.permute.xlu1 %2093 }
0x1461   :  { %8888 = vst [vmem:[#allocation281_spill] sm:$0xff] %v6026_v61 }
0x1468   :  { %v6028_v25 = vpop.permute.xlu1 %2112 }
0x1469   :  { %8889 = vst [vmem:[#allocation282_spill] sm:$0xff] %v6028_v25 }
0x1470   :  { %v6030_v33 = vpop.permute.xlu1 %2132 }
0x1471   :  { %8890 = vst [vmem:[#allocation283_spill] sm:$0xff] %v6030_v33 }
0x1478   :  { %v6032_v17 = vpop.permute.xlu1 %2152 }
0x1479   :  { %8891 = vst [vmem:[#allocation284_spill] sm:$0xff] %v6032_v17 }
0x1480   :  { %v6034_v2 = vpop.permute.xlu1 %2191 }
0x1481   :  { %8892 = vst [vmem:[#allocation285_spill] sm:$0xff] %v6034_v2 }
0x14a3   :  { %v6036_v3 = vpop.permute.xlu1 %2232 }
0x14a4   :  { %8893 = vst [vmem:[#allocation286_spill] sm:$0xff] %v6036_v3 }
0x14ab   :  { %v6038_v47 = vpop.permute.xlu1 %2250 }
0x14ac   :  { %8894 = vst [vmem:[#allocation287_spill] sm:$0xff] %v6038_v47  ;;  %v6053_v47 = vpop.permute.xlu2 %2234 }
0x14ad   :  { %8895 = vst [vmem:[#allocation288_spill] sm:$0xff] %v6053_v47  ;;  %v6074_v47 = vpop.permute.xlu0 %2110 }
0x14ae   :  { %8899 = vst [vmem:[#allocation292_spill] sm:$0xff] %v6074_v47 }
0x14b3   :  { %v2264_v11 = vpop.permute.xlu1 %2263 }
0x14b4   :  { %v2268_v38 = vmul.f32 %v2264_v11, %v5987_v18  ;;  %v2267_v23 = vmul.f32 %v2264_v11, %v5985_v14  ;;  %v2266_v61 = vmul.f32 %v2264_v11, %v5989_v26  ;;  %v2288_v25 = vmul.f32 %v2264_v11, %v6001_v48 }
0x14b5   :  { %v2287_v8 = vmul.f32 %v2264_v11, %v5999_v15  ;;  %v2286_v3 = vmul.f32 %v2264_v11, %v6003_v57 }
0x14b6   :  { %2276 = vrot.lane.b32.xlu1 %v2268_v38, %s4646_s0  ;;  %2274 = vrot.lane.b32.xlu0 %v2267_v23, %s4646_s0  ;;  %v6055_v38 = vpop.permute.xlu2 %2252 }
0x14b7   :  { %2272 = vrot.lane.b32.xlu2 %v2266_v61, %s4646_s0  ;;  %8896 = vst [vmem:[#allocation289_spill] sm:$0xff] %v6055_v38  ;;  %v4721_v61 = vmov 55  }
0x14b8   :  { %4504 = vset.pattern.permute.xlu0 %v4721_v61 }
0x14be   :  { %2296 = vrot.lane.b32.xlu1 %v2288_v25, %s4646_s0  ;;  %2294 = vrot.lane.b32.xlu0 %v2287_v8, %s4646_s0 }
0x14bf   :  { %2292 = vrot.lane.b32.xlu2 %v2286_v3, %s4646_s0  ;;  %s4304_s0 = sshll.u32 %s4766_s18, 4  ;;  %s4305_s0 = int_to_ptr.vmem [resolvable:$true] %s4304_s0 }
0x14c7   :  { %2307 = vperm.xlu2 %4503, %v5912_v49  }
0x1511   :  { %v6057_v23 = vpop.permute.xlu2 %2272 }
0x1512   :  { %8897 = vst [vmem:[#allocation290_spill] sm:$0xff] %v6057_v23 }
0x1519   :  { %v6059_v33 = vpop.permute.xlu2 %2292 }
0x151a   :  { %8898 = vst [vmem:[#allocation291_spill] sm:$0xff] %v6059_v33 }
0x1521   :  { %v2308_v2 = vpop.permute.xlu2 %2307 }
0x1522   :  { %v2312_v11 = vmul.f32 %v2308_v2, %v5987_v18  ;;  %v2311_v25 = vmul.f32 %v2308_v2, %v5985_v14  ;;  %v2310_v8 = vmul.f32 %v2308_v2, %v5989_v26  ;;  %v2330_v3 = vmul.f32 %v2308_v2, %v6001_v48 }
0x1523   :  { %v2329_v38 = vmul.f32 %v2308_v2, %v5999_v15  ;;  %v2328_v61 = vmul.f32 %v2308_v2, %v6003_v57 }
0x1524   :  { %2320 = vrot.lane.b32.xlu2 %v2312_v11, %s4647_s1  ;;  %2318 = vrot.lane.b32.xlu1 %v2311_v25, %s4647_s1  ;;  %v6076_v11 = vpop.permute.xlu0 %2130 }
0x1525   :  { %2316 = vrot.lane.b32.xlu0 %v2310_v8, %s4647_s1  ;;  %8900 = vst [vmem:[#allocation293_spill] sm:$0xff] %v6076_v11 }
0x152c   :  { %2338 = vrot.lane.b32.xlu2 %v2330_v3, %s4647_s1  ;;  %2336 = vrot.lane.b32.xlu1 %v2329_v38, %s4647_s1  ;;  %v6078_v25 = vpop.permute.xlu0 %2150  ;;  %v4722_v38 = vmov 56  }
0x152d   :  { %2334 = vrot.lane.b32.xlu0 %v2328_v61, %s4647_s1  ;;  %8901 = vst [vmem:[#allocation294_spill] sm:$0xff] %v6078_v25  ;;  %4505 = vset.pattern.permute.xlu2 %v4722_v38 }
0x1534   :  { %v6080_v8 = vpop.permute.xlu0 %2165 }
0x1535   :  { %2347 = vperm.xlu0 %4504, %v5912_v49   ;;  %8902 = vst [vmem:[#allocation295_spill] sm:$0xff] %v6080_v8 }
0x153c   :  { %v6082_v23 = vpop.permute.xlu0 %2236 }
0x153d   :  { %8903 = vst [vmem:[#allocation296_spill] sm:$0xff] %v6082_v23 }
0x1544   :  { %v6084_v33 = vpop.permute.xlu0 %2254 }
0x1545   :  { %8904 = vst [vmem:[#allocation297_spill] sm:$0xff] %v6084_v33 }
0x154c   :  { %v6086_v2 = vpop.permute.xlu0 %2274 }
0x154d   :  { %8905 = vst [vmem:[#allocation298_spill] sm:$0xff] %v6086_v2 }
0x1554   :  { %v6088_v3 = vpop.permute.xlu0 %2294 }
0x1555   :  { %8906 = vst [vmem:[#allocation299_spill] sm:$0xff] %v6088_v3 }
0x1597   :  { %v6090_v61 = vpop.permute.xlu0 %2316 }
0x1598   :  { %8907 = vst [vmem:[#allocation300_spill] sm:$0xff] %v6090_v61 }
0x159f   :  { %v6092_v17 = vpop.permute.xlu0 %2334 }
0x15a0   :  { %8908 = vst [vmem:[#allocation301_spill] sm:$0xff] %v6092_v17  ;;  %v6107_v17 = vpop.permute.xlu2 %2320 }
0x15a1   :  { %8909 = vst [vmem:[#allocation302_spill] sm:$0xff] %v6107_v17 }
0x15a7   :  { %v2348_v47 = vpop.permute.xlu0 %2347 }
0x15a8   :  { %v2371_v11 = vmul.f32 %v2348_v47, %v5999_v15  ;;  %v2351_v25 = vmul.f32 %v2348_v47, %v5985_v14  ;;  %v2350_v8 = vmul.f32 %v2348_v47, %v5989_v26  ;;  %v2370_v33 = vmul.f32 %v2348_v47, %v6003_v57 }
0x15a9   :  { %v2352_v38 = vmul.f32 %v2348_v47, %v5987_v18  ;;  %v2372_v23 = vmul.f32 %v2348_v47, %v6001_v48 }
0x15aa   :  { %2378 = vrot.lane.b32.xlu0 %v2371_v11, %s4648_s19  ;;  %2358 = vrot.lane.b32.xlu2 %v2351_v25, %s4648_s19  ;;  %v6109_v11 = vpop.permute.xlu2 %2338 }
0x15ab   :  { %2356 = vrot.lane.b32.xlu1 %v2350_v8, %s4648_s19  ;;  %8910 = vst [vmem:[#allocation303_spill] sm:$0xff] %v6109_v11  ;;  %v4723_v8 = vmov 57  }
0x15ac   :  { %4506 = vset.pattern.permute.xlu0 %v4723_v8 }
0x15b2   :  { %2376 = vrot.lane.b32.xlu2 %v2370_v33, %s4648_s19 }
0x15b3   :  { %2360 = vrot.lane.b32.xlu1 %v2352_v38, %s4648_s19 }
0x15ba   :  { %2391 = vperm.xlu2 %4505, %v5912_v49  }
0x15bb   :  { %2380 = vrot.lane.b32.xlu1 %v2372_v23, %s4648_s19 }
0x1604   :  { %v6111_v25 = vpop.permute.xlu2 %2358 }
0x1605   :  { %8911 = vst [vmem:[#allocation304_spill] sm:$0xff] %v6111_v25 }
0x160c   :  { %v6113_v61 = vpop.permute.xlu2 %2376 }
0x160d   :  { %8912 = vst [vmem:[#allocation305_spill] sm:$0xff] %v6113_v61 }
0x1614   :  { %v2392_v2 = vpop.permute.xlu2 %2391 }
0x1615   :  { %v2396_v33 = vmul.f32 %v2392_v2, %v5987_v18  ;;  %v2394_v38 = vmul.f32 %v2392_v2, %v5989_v26  ;;  %v2395_v47 = vmul.f32 %v2392_v2, %v5985_v14  ;;  %v2414_v23 = vmul.f32 %v2392_v2, %v6001_v48 }
0x1616   :  { %v2412_v11 = vmul.f32 %v2392_v2, %v6003_v57  ;;  %v2413_v8 = vmul.f32 %v2392_v2, %v5999_v15 }
0x1617   :  { %2404 = vrot.lane.b32.xlu2 %v2396_v33, %s4649_s20  ;;  %2400 = vrot.lane.b32.xlu0 %v2394_v38, %s4649_s20  ;;  %v4724_v33 = vmov 58  }
0x1618   :  { %2402 = vrot.lane.b32.xlu1 %v2395_v47, %s4649_s20  ;;  %4507 = vset.pattern.permute.xlu2 %v4724_v33 }
0x161c   :  { %v6128_v17 = vpop.permute.xlu0 %2378 }
0x161d   :  { %8913 = vst [vmem:[#allocation306_spill] sm:$0xff] %v6128_v17 }
0x161f   :  { %2422 = vrot.lane.b32.xlu2 %v2414_v23, %s4649_s20  ;;  %2418 = vrot.lane.b32.xlu0 %v2412_v11, %s4649_s20 }
0x1620   :  { %2420 = vrot.lane.b32.xlu1 %v2413_v8, %s4649_s20 }
0x1627   :  { %2431 = vperm.xlu0 %4506, %v5912_v49  }
0x1689   :  { %v6130_v38 = vpop.permute.xlu0 %2400 }
0x168a   :  { %8914 = vst [vmem:[#allocation307_spill] sm:$0xff] %v6130_v38 }
0x1691   :  { %v6132_v47 = vpop.permute.xlu0 %2418 }
0x1692   :  { %8915 = vst [vmem:[#allocation308_spill] sm:$0xff] %v6132_v47  ;;  %v6147_v47 = vpop.permute.xlu2 %2404 }
0x1693   :  { %8916 = vst [vmem:[#allocation309_spill] sm:$0xff] %v6147_v47 }
0x1699   :  { %v2432_v25 = vpop.permute.xlu0 %2431 }
0x169a   :  { %v2455_v61 = vmul.f32 %v2432_v25, %v5999_v15  ;;  %v2435_v2 = vmul.f32 %v2432_v25, %v5985_v14  ;;  %v2434_v23 = vmul.f32 %v2432_v25, %v5989_v26  ;;  %v2454_v11 = vmul.f32 %v2432_v25, %v6003_v57 }
0x169b   :  { %v2436_v8 = vmul.f32 %v2432_v25, %v5987_v18  ;;  %v2456_v33 = vmul.f32 %v2432_v25, %v6001_v48 }
0x169c   :  { %2462 = vrot.lane.b32.xlu0 %v2455_v61, %s4649_s20  ;;  %2442 = vrot.lane.b32.xlu2 %v2435_v2, %s4649_s20  ;;  %v6149_v61 = vpop.permute.xlu2 %2422 }
0x169d   :  { %2440 = vrot.lane.b32.xlu1 %v2434_v23, %s4649_s20  ;;  %8917 = vst [vmem:[#allocation310_spill] sm:$0xff] %v6149_v61  ;;  %v4725_v23 = vmov 59  }
0x169e   :  { %4508 = vset.pattern.permute.xlu0 %v4725_v23 }
0x16a4   :  { %2460 = vrot.lane.b32.xlu2 %v2454_v11, %s4649_s20 }
0x16a5   :  { %2444 = vrot.lane.b32.xlu1 %v2436_v8, %s4649_s20 }
0x16ac   :  { %2475 = vperm.xlu2 %4507, %v5912_v49  }
0x16ad   :  { %2464 = vrot.lane.b32.xlu1 %v2456_v33, %s4649_s20  ;;  %s4306_s20 = sshll.u32 %s8336_s2, 4  ;;  %s4307_s20 = int_to_ptr.hbm [resolvable:$true] %s4306_s20 }
0x16f6   :  { %v6151_v2 = vpop.permute.xlu2 %2442 }
0x16f7   :  { %8918 = vst [vmem:[#allocation311_spill] sm:$0xff] %v6151_v2 }
0x16fe   :  { %v6153_v38 = vpop.permute.xlu2 %2460 }
0x16ff   :  { %8919 = vst [vmem:[#allocation312_spill] sm:$0xff] %v6153_v38 }
0x1706   :  { %v2476_v17 = vpop.permute.xlu2 %2475 }
0x1707   :  { %v2480_v11 = vmul.f32 %v2476_v17, %v5987_v18  ;;  %v2478_v8 = vmul.f32 %v2476_v17, %v5989_v26  ;;  %v2479_v25 = vmul.f32 %v2476_v17, %v5985_v14  ;;  %v2498_v33 = vmul.f32 %v2476_v17, %v6001_v48 }
0x1708   :  { %v2496_v61 = vmul.f32 %v2476_v17, %v6003_v57  ;;  %v2497_v23 = vmul.f32 %v2476_v17, %v5999_v15 }
0x1709   :  { %2488 = vrot.lane.b32.xlu2 %v2480_v11, %s4651_s21  ;;  %2484 = vrot.lane.b32.xlu0 %v2478_v8, %s4651_s21  ;;  %v4726_v11 = vmov 60  }
0x170a   :  { %2486 = vrot.lane.b32.xlu1 %v2479_v25, %s4651_s21  ;;  %4509 = vset.pattern.permute.xlu2 %v4726_v11 }
0x170e   :  { %v6168_v47 = vpop.permute.xlu0 %2462 }
0x170f   :  { %8920 = vst [vmem:[#allocation313_spill] sm:$0xff] %v6168_v47 }
0x1711   :  { %2506 = vrot.lane.b32.xlu2 %v2498_v33, %s4651_s21  ;;  %2502 = vrot.lane.b32.xlu0 %v2496_v61, %s4651_s21 }
0x1712   :  { %2504 = vrot.lane.b32.xlu1 %v2497_v23, %s4651_s21 }
0x1719   :  { %2515 = vperm.xlu0 %4508, %v5912_v49  }
0x177b   :  { %v6170_v8 = vpop.permute.xlu0 %2484 }
0x177c   :  { %8921 = vst [vmem:[#allocation314_spill] sm:$0xff] %v6170_v8 }
0x1783   :  { %v6172_v25 = vpop.permute.xlu0 %2502 }
0x1784   :  { %8922 = vst [vmem:[#allocation315_spill] sm:$0xff] %v6172_v25  ;;  %v6187_v25 = vpop.permute.xlu2 %2488 }
0x1785   :  { %8923 = vst [vmem:[#allocation316_spill] sm:$0xff] %v6187_v25 }
0x178b   :  { %v2516_v2 = vpop.permute.xlu0 %2515 }
0x178c   :  { %v2539_v38 = vmul.f32 %v2516_v2, %v5999_v15  ;;  %v2519_v17 = vmul.f32 %v2516_v2, %v5985_v14  ;;  %v2518_v33 = vmul.f32 %v2516_v2, %v5989_v26  ;;  %v2538_v61 = vmul.f32 %v2516_v2, %v6003_v57 }
0x178d   :  { %v2520_v23 = vmul.f32 %v2516_v2, %v5987_v18  ;;  %v2540_v11 = vmul.f32 %v2516_v2, %v6001_v48 }
0x178e   :  { %2546 = vrot.lane.b32.xlu0 %v2539_v38, %s4651_s21  ;;  %2526 = vrot.lane.b32.xlu2 %v2519_v17, %s4651_s21  ;;  %v6189_v38 = vpop.permute.xlu2 %2506 }
0x178f   :  { %2524 = vrot.lane.b32.xlu1 %v2518_v33, %s4651_s21  ;;  %8924 = vst [vmem:[#allocation317_spill] sm:$0xff] %v6189_v38  ;;  %v4727_v33 = vmov 61  }
0x1790   :  { %4510 = vset.pattern.permute.xlu0 %v4727_v33 }
0x1796   :  { %2544 = vrot.lane.b32.xlu2 %v2538_v61, %s4651_s21 }
0x1797   :  { %2528 = vrot.lane.b32.xlu1 %v2520_v23, %s4651_s21 }
0x179e   :  { %2559 = vperm.xlu2 %4509, %v5912_v49  }
0x179f   :  { %2548 = vrot.lane.b32.xlu1 %v2540_v11, %s4651_s21 }
0x17e8   :  { %v6191_v17 = vpop.permute.xlu2 %2526 }
0x17e9   :  { %8925 = vst [vmem:[#allocation318_spill] sm:$0xff] %v6191_v17 }
0x17f0   :  { %v6193_v8 = vpop.permute.xlu2 %2544 }
0x17f1   :  { %8926 = vst [vmem:[#allocation319_spill] sm:$0xff] %v6193_v8 }
0x17f8   :  { %v2560_v47 = vpop.permute.xlu2 %2559 }
0x17f9   :  { %v2564_v61 = vmul.f32 %v2560_v47, %v5987_v18  ;;  %v2562_v23 = vmul.f32 %v2560_v47, %v5989_v26  ;;  %v2563_v2 = vmul.f32 %v2560_v47, %v5985_v14  ;;  %v2582_v11 = vmul.f32 %v2560_v47, %v6001_v48 }
0x17fa   :  { %v2580_v38 = vmul.f32 %v2560_v47, %v6003_v57  ;;  %v2581_v33 = vmul.f32 %v2560_v47, %v5999_v15 }
0x17fb   :  { %2572 = vrot.lane.b32.xlu2 %v2564_v61, %s4654_s22  ;;  %2568 = vrot.lane.b32.xlu0 %v2562_v23, %s4654_s22  ;;  %v4728_v61 = vmov 62  }
0x17fc   :  { %2570 = vrot.lane.b32.xlu1 %v2563_v2, %s4654_s22  ;;  %4511 = vset.pattern.permute.xlu2 %v4728_v61 }
0x1800   :  { %v6208_v25 = vpop.permute.xlu0 %2546 }
0x1801   :  { %8927 = vst [vmem:[#allocation320_spill] sm:$0xff] %v6208_v25 }
0x1803   :  { %2590 = vrot.lane.b32.xlu2 %v2582_v11, %s4654_s22  ;;  %2586 = vrot.lane.b32.xlu0 %v2580_v38, %s4654_s22 }
0x1804   :  { %2588 = vrot.lane.b32.xlu1 %v2581_v33, %s4654_s22 }
0x180b   :  { %2599 = vperm.xlu0 %4510, %v5912_v49  }
0x186d   :  { %v6210_v23 = vpop.permute.xlu0 %2568 }
0x186e   :  { %8928 = vst [vmem:[#allocation321_spill] sm:$0xff] %v6210_v23 }
0x1875   :  { %v6212_v2 = vpop.permute.xlu0 %2586 }
0x1876   :  { %8929 = vst [vmem:[#allocation322_spill] sm:$0xff] %v6212_v2  ;;  %v6227_v2 = vpop.permute.xlu2 %2572 }
0x1877   :  { %8930 = vst [vmem:[#allocation323_spill] sm:$0xff] %v6227_v2 }
0x187d   :  { %v2600_v17 = vpop.permute.xlu0 %2599 }
0x187e   :  { %v2623_v8 = vmul.f32 %v2600_v17, %v5999_v15  ;;  %v2603_v47 = vmul.f32 %v2600_v17, %v5985_v14  ;;  %v2602_v11 = vmul.f32 %v2600_v17, %v5989_v26  ;;  %v2622_v38 = vmul.f32 %v2600_v17, %v6003_v57 }
0x187f   :  { %v2604_v33 = vmul.f32 %v2600_v17, %v5987_v18  ;;  %v2624_v61 = vmul.f32 %v2600_v17, %v6001_v48 }
0x1880   :  { %2630 = vrot.lane.b32.xlu0 %v2623_v8, %s4654_s22  ;;  %2610 = vrot.lane.b32.xlu2 %v2603_v47, %s4654_s22  ;;  %v6229_v8 = vpop.permute.xlu2 %2590 }
0x1881   :  { %2608 = vrot.lane.b32.xlu1 %v2602_v11, %s4654_s22  ;;  %8931 = vst [vmem:[#allocation324_spill] sm:$0xff] %v6229_v8  ;;  %v4729_v11 = vmov 63  }
0x1882   :  { %4512 = vset.pattern.permute.xlu0 %v4729_v11 }
0x1888   :  { %2628 = vrot.lane.b32.xlu2 %v2622_v38, %s4654_s22 }
0x1889   :  { %2612 = vrot.lane.b32.xlu1 %v2604_v33, %s4654_s22 }
0x1890   :  { %2643 = vperm.xlu2 %4511, %v5912_v49  }
0x1891   :  { %2632 = vrot.lane.b32.xlu1 %v2624_v61, %s4654_s22 }
0x18da   :  { %v6231_v47 = vpop.permute.xlu2 %2610 }
0x18db   :  { %8932 = vst [vmem:[#allocation325_spill] sm:$0xff] %v6231_v47 }
0x18e2   :  { %v6233_v23 = vpop.permute.xlu2 %2628 }
0x18e3   :  { %8933 = vst [vmem:[#allocation326_spill] sm:$0xff] %v6233_v23 }
0x18ea   :  { %v2644_v25 = vpop.permute.xlu2 %2643 }
0x18eb   :  { %v2648_v38 = vmul.f32 %v2644_v25, %v5987_v18  ;;  %v2646_v33 = vmul.f32 %v2644_v25, %v5989_v26  ;;  %v2647_v17 = vmul.f32 %v2644_v25, %v5985_v14  ;;  %v2666_v61 = vmul.f32 %v2644_v25, %v6001_v48 }
0x18ec   :  { %v2664_v8 = vmul.f32 %v2644_v25, %v6003_v57  ;;  %v2665_v11 = vmul.f32 %v2644_v25, %v5999_v15 }
0x18ed   :  { %2656 = vrot.lane.b32.xlu2 %v2648_v38, %s4657_s23  ;;  %2652 = vrot.lane.b32.xlu0 %v2646_v33, %s4657_s23  ;;  %v4730_v38 = vmov 64  }
0x18ee   :  { %2654 = vrot.lane.b32.xlu1 %v2647_v17, %s4657_s23  ;;  %4513 = vset.pattern.permute.xlu2 %v4730_v38 }
0x18f2   :  { %v6248_v2 = vpop.permute.xlu0 %2630 }
0x18f3   :  { %8934 = vst [vmem:[#allocation327_spill] sm:$0xff] %v6248_v2 }
0x18f5   :  { %2674 = vrot.lane.b32.xlu2 %v2666_v61, %s4657_s23  ;;  %2670 = vrot.lane.b32.xlu0 %v2664_v8, %s4657_s23 }
0x18f6   :  { %2672 = vrot.lane.b32.xlu1 %v2665_v11, %s4657_s23 }
0x18fd   :  { %2683 = vperm.xlu0 %4512, %v5912_v49  }
0x195f   :  { %v6250_v33 = vpop.permute.xlu0 %2652 }
0x1960   :  { %8935 = vst [vmem:[#allocation328_spill] sm:$0xff] %v6250_v33 }
0x1967   :  { %v6252_v17 = vpop.permute.xlu0 %2670 }
0x1968   :  { %8936 = vst [vmem:[#allocation329_spill] sm:$0xff] %v6252_v17  ;;  %v6267_v17 = vpop.permute.xlu2 %2656 }
0x1969   :  { %8937 = vst [vmem:[#allocation330_spill] sm:$0xff] %v6267_v17 }
0x196f   :  { %v2684_v47 = vpop.permute.xlu0 %2683 }
0x1970   :  { %v2707_v23 = vmul.f32 %v2684_v47, %v5999_v15  ;;  %v2687_v25 = vmul.f32 %v2684_v47, %v5985_v14  ;;  %v2686_v61 = vmul.f32 %v2684_v47, %v5989_v26  ;;  %v2706_v8 = vmul.f32 %v2684_v47, %v6003_v57 }
0x1971   :  { %v2688_v11 = vmul.f32 %v2684_v47, %v5987_v18  ;;  %v2708_v38 = vmul.f32 %v2684_v47, %v6001_v48 }
0x1972   :  { %2714 = vrot.lane.b32.xlu0 %v2707_v23, %s4657_s23  ;;  %2694 = vrot.lane.b32.xlu2 %v2687_v25, %s4657_s23  ;;  %v6269_v23 = vpop.permute.xlu2 %2674 }
0x1973   :  { %2692 = vrot.lane.b32.xlu1 %v2686_v61, %s4657_s23  ;;  %8938 = vst [vmem:[#allocation331_spill] sm:$0xff] %v6269_v23  ;;  %v4731_v61 = vmov 65  }
0x1974   :  { %4514 = vset.pattern.permute.xlu0 %v4731_v61 }
0x197a   :  { %2712 = vrot.lane.b32.xlu2 %v2706_v8, %s4657_s23 }
0x197b   :  { %2696 = vrot.lane.b32.xlu1 %v2688_v11, %s4657_s23 }
0x1982   :  { %2727 = vperm.xlu2 %4513, %v5912_v49  }
0x1983   :  { %2716 = vrot.lane.b32.xlu1 %v2708_v38, %s4657_s23 }
0x19cc   :  { %v6271_v25 = vpop.permute.xlu2 %2694 }
0x19cd   :  { %8939 = vst [vmem:[#allocation332_spill] sm:$0xff] %v6271_v25 }
0x19d4   :  { %v6273_v33 = vpop.permute.xlu2 %2712 }
0x19d5   :  { %8940 = vst [vmem:[#allocation333_spill] sm:$0xff] %v6273_v33 }
0x19dc   :  { %v2728_v2 = vpop.permute.xlu2 %2727 }
0x19dd   :  { %v2732_v8 = vmul.f32 %v2728_v2, %v5987_v18  ;;  %v2730_v11 = vmul.f32 %v2728_v2, %v5989_v26  ;;  %v2731_v47 = vmul.f32 %v2728_v2, %v5985_v14  ;;  %v2750_v38 = vmul.f32 %v2728_v2, %v6001_v48 }
0x19de   :  { %v2748_v23 = vmul.f32 %v2728_v2, %v6003_v57  ;;  %v2749_v61 = vmul.f32 %v2728_v2, %v5999_v15 }
0x19df   :  { %2740 = vrot.lane.b32.xlu2 %v2732_v8, %s4660_s24  ;;  %2736 = vrot.lane.b32.xlu0 %v2730_v11, %s4660_s24  ;;  %v4732_v8 = vmov 66  }
0x19e0   :  { %2738 = vrot.lane.b32.xlu1 %v2731_v47, %s4660_s24  ;;  %4515 = vset.pattern.permute.xlu2 %v4732_v8 }
0x19e4   :  { %v6288_v17 = vpop.permute.xlu0 %2714 }
0x19e5   :  { %8941 = vst [vmem:[#allocation334_spill] sm:$0xff] %v6288_v17 }
0x19e7   :  { %2758 = vrot.lane.b32.xlu2 %v2750_v38, %s4660_s24  ;;  %2754 = vrot.lane.b32.xlu0 %v2748_v23, %s4660_s24 }
0x19e8   :  { %2756 = vrot.lane.b32.xlu1 %v2749_v61, %s4660_s24 }
0x19ef   :  { %2767 = vperm.xlu0 %4514, %v5912_v49  }
0x1a51   :  { %v6290_v11 = vpop.permute.xlu0 %2736 }
0x1a52   :  { %8942 = vst [vmem:[#allocation335_spill] sm:$0xff] %v6290_v11 }
0x1a59   :  { %v6292_v47 = vpop.permute.xlu0 %2754 }
0x1a5a   :  { %8943 = vst [vmem:[#allocation336_spill] sm:$0xff] %v6292_v47  ;;  %v6307_v47 = vpop.permute.xlu2 %2740 }
0x1a5b   :  { %8944 = vst [vmem:[#allocation337_spill] sm:$0xff] %v6307_v47 }
0x1a61   :  { %v2768_v25 = vpop.permute.xlu0 %2767 }
0x1a62   :  { %v2791_v33 = vmul.f32 %v2768_v25, %v5999_v15  ;;  %v2771_v2 = vmul.f32 %v2768_v25, %v5985_v14  ;;  %v2770_v38 = vmul.f32 %v2768_v25, %v5989_v26  ;;  %v2790_v23 = vmul.f32 %v2768_v25, %v6003_v57 }
0x1a63   :  { %v2772_v61 = vmul.f32 %v2768_v25, %v5987_v18  ;;  %v2792_v8 = vmul.f32 %v2768_v25, %v6001_v48 }
0x1a64   :  { %2798 = vrot.lane.b32.xlu0 %v2791_v33, %s4662_s25  ;;  %2778 = vrot.lane.b32.xlu2 %v2771_v2, %s4662_s25  ;;  %v6309_v33 = vpop.permute.xlu2 %2758 }
0x1a65   :  { %2776 = vrot.lane.b32.xlu1 %v2770_v38, %s4662_s25  ;;  %8945 = vst [vmem:[#allocation338_spill] sm:$0xff] %v6309_v33  ;;  %v4733_v38 = vmov 67  }
0x1a66   :  { %4516 = vset.pattern.permute.xlu0 %v4733_v38 }
0x1a6c   :  { %2796 = vrot.lane.b32.xlu2 %v2790_v23, %s4662_s25 }
0x1a6d   :  { %2780 = vrot.lane.b32.xlu1 %v2772_v61, %s4662_s25 }
0x1a74   :  { %2811 = vperm.xlu2 %4515, %v5912_v49  }
0x1a75   :  { %2800 = vrot.lane.b32.xlu1 %v2792_v8, %s4662_s25 }
0x1abe   :  { %v6311_v2 = vpop.permute.xlu2 %2778 }
0x1abf   :  { %8946 = vst [vmem:[#allocation339_spill] sm:$0xff] %v6311_v2 }
0x1ac6   :  { %v6313_v11 = vpop.permute.xlu2 %2796 }
0x1ac7   :  { %8947 = vst [vmem:[#allocation340_spill] sm:$0xff] %v6313_v11 }
0x1ace   :  { %v2812_v17 = vpop.permute.xlu2 %2811 }
0x1acf   :  { %v2816_v23 = vmul.f32 %v2812_v17, %v5987_v18  ;;  %v2814_v61 = vmul.f32 %v2812_v17, %v5989_v26  ;;  %v2815_v25 = vmul.f32 %v2812_v17, %v5985_v14  ;;  %v2834_v8 = vmul.f32 %v2812_v17, %v6001_v48 }
0x1ad0   :  { %v2832_v33 = vmul.f32 %v2812_v17, %v6003_v57  ;;  %v2833_v38 = vmul.f32 %v2812_v17, %v5999_v15 }
0x1ad1   :  { %2824 = vrot.lane.b32.xlu2 %v2816_v23, %s4664_s26  ;;  %2820 = vrot.lane.b32.xlu0 %v2814_v61, %s4664_s26  ;;  %v4734_v23 = vmov 68  }
0x1ad2   :  { %2822 = vrot.lane.b32.xlu1 %v2815_v25, %s4664_s26  ;;  %4517 = vset.pattern.permute.xlu2 %v4734_v23 }
0x1ad6   :  { %v6328_v47 = vpop.permute.xlu0 %2798 }
0x1ad7   :  { %8948 = vst [vmem:[#allocation341_spill] sm:$0xff] %v6328_v47 }
0x1ad9   :  { %2842 = vrot.lane.b32.xlu2 %v2834_v8, %s4664_s26  ;;  %2838 = vrot.lane.b32.xlu0 %v2832_v33, %s4664_s26 }
0x1ada   :  { %2840 = vrot.lane.b32.xlu1 %v2833_v38, %s4664_s26 }
0x1ae1   :  { %2851 = vperm.xlu0 %4516, %v5912_v49  }
0x1b43   :  { %v6330_v61 = vpop.permute.xlu0 %2820 }
0x1b44   :  { %8949 = vst [vmem:[#allocation342_spill] sm:$0xff] %v6330_v61 }
0x1b4b   :  { %v6332_v25 = vpop.permute.xlu0 %2838 }
0x1b4c   :  { %8950 = vst [vmem:[#allocation343_spill] sm:$0xff] %v6332_v25  ;;  %v6347_v25 = vpop.permute.xlu2 %2824 }
0x1b4d   :  { %8951 = vst [vmem:[#allocation344_spill] sm:$0xff] %v6347_v25 }
0x1b53   :  { %v2852_v2 = vpop.permute.xlu0 %2851 }
0x1b54   :  { %v2875_v11 = vmul.f32 %v2852_v2, %v5999_v15  ;;  %v2855_v17 = vmul.f32 %v2852_v2, %v5985_v14  ;;  %v2854_v8 = vmul.f32 %v2852_v2, %v5989_v26  ;;  %v2874_v33 = vmul.f32 %v2852_v2, %v6003_v57 }
0x1b55   :  { %v2856_v38 = vmul.f32 %v2852_v2, %v5987_v18  ;;  %v2876_v23 = vmul.f32 %v2852_v2, %v6001_v48 }
0x1b56   :  { %2882 = vrot.lane.b32.xlu0 %v2875_v11, %s4664_s26  ;;  %2862 = vrot.lane.b32.xlu2 %v2855_v17, %s4664_s26  ;;  %v6349_v11 = vpop.permute.xlu2 %2842 }
0x1b57   :  { %2860 = vrot.lane.b32.xlu1 %v2854_v8, %s4664_s26  ;;  %8952 = vst [vmem:[#allocation345_spill] sm:$0xff] %v6349_v11  ;;  %v4735_v8 = vmov 69  }
0x1b58   :  { %4518 = vset.pattern.permute.xlu0 %v4735_v8 }
0x1b5e   :  { %2880 = vrot.lane.b32.xlu2 %v2874_v33, %s4664_s26 }
0x1b5f   :  { %2864 = vrot.lane.b32.xlu1 %v2856_v38, %s4664_s26 }
0x1b66   :  { %2895 = vperm.xlu2 %4517, %v5912_v49  }
0x1b67   :  { %2884 = vrot.lane.b32.xlu1 %v2876_v23, %s4664_s26 }
0x1bb0   :  { %v6351_v17 = vpop.permute.xlu2 %2862 }
0x1bb1   :  { %8953 = vst [vmem:[#allocation346_spill] sm:$0xff] %v6351_v17 }
0x1bb8   :  { %v6353_v61 = vpop.permute.xlu2 %2880 }
0x1bb9   :  { %8954 = vst [vmem:[#allocation347_spill] sm:$0xff] %v6353_v61 }
0x1bc0   :  { %v2896_v47 = vpop.permute.xlu2 %2895 }
0x1bc1   :  { %v2900_v33 = vmul.f32 %v2896_v47, %v5987_v18  ;;  %v2898_v38 = vmul.f32 %v2896_v47, %v5989_v26  ;;  %v2899_v2 = vmul.f32 %v2896_v47, %v5985_v14  ;;  %v2918_v23 = vmul.f32 %v2896_v47, %v6001_v48 }
0x1bc2   :  { %v2916_v11 = vmul.f32 %v2896_v47, %v6003_v57  ;;  %v2917_v8 = vmul.f32 %v2896_v47, %v5999_v15 }
0x1bc3   :  { %2908 = vrot.lane.b32.xlu2 %v2900_v33, %s4667_s27  ;;  %2904 = vrot.lane.b32.xlu0 %v2898_v38, %s4667_s27  ;;  %v4736_v33 = vmov 70  }
0x1bc4   :  { %2906 = vrot.lane.b32.xlu1 %v2899_v2, %s4667_s27  ;;  %4519 = vset.pattern.permute.xlu2 %v4736_v33 }
0x1bc8   :  { %v6368_v25 = vpop.permute.xlu0 %2882 }
0x1bc9   :  { %8955 = vst [vmem:[#allocation348_spill] sm:$0xff] %v6368_v25 }
0x1bcb   :  { %2926 = vrot.lane.b32.xlu2 %v2918_v23, %s4667_s27  ;;  %2922 = vrot.lane.b32.xlu0 %v2916_v11, %s4667_s27 }
0x1bcc   :  { %2924 = vrot.lane.b32.xlu1 %v2917_v8, %s4667_s27 }
0x1bd3   :  { %2935 = vperm.xlu0 %4518, %v5912_v49  }
0x1c35   :  { %v6370_v38 = vpop.permute.xlu0 %2904 }
0x1c36   :  { %8956 = vst [vmem:[#allocation349_spill] sm:$0xff] %v6370_v38 }
0x1c3d   :  { %v6372_v2 = vpop.permute.xlu0 %2922 }
0x1c3e   :  { %8957 = vst [vmem:[#allocation350_spill] sm:$0xff] %v6372_v2  ;;  %v6387_v2 = vpop.permute.xlu2 %2908 }
0x1c3f   :  { %8958 = vst [vmem:[#allocation351_spill] sm:$0xff] %v6387_v2 }
0x1c45   :  { %v2936_v17 = vpop.permute.xlu0 %2935 }
0x1c46   :  { %v2959_v61 = vmul.f32 %v2936_v17, %v5999_v15  ;;  %v2939_v47 = vmul.f32 %v2936_v17, %v5985_v14  ;;  %v2938_v23 = vmul.f32 %v2936_v17, %v5989_v26  ;;  %v2958_v11 = vmul.f32 %v2936_v17, %v6003_v57 }
0x1c47   :  { %v2940_v8 = vmul.f32 %v2936_v17, %v5987_v18  ;;  %v2960_v33 = vmul.f32 %v2936_v17, %v6001_v48 }
0x1c48   :  { %2966 = vrot.lane.b32.xlu0 %v2959_v61, %s4667_s27  ;;  %2946 = vrot.lane.b32.xlu2 %v2939_v47, %s4667_s27  ;;  %v6389_v61 = vpop.permute.xlu2 %2926 }
0x1c49   :  { %2944 = vrot.lane.b32.xlu1 %v2938_v23, %s4667_s27  ;;  %8959 = vst [vmem:[#allocation352_spill] sm:$0xff] %v6389_v61  ;;  %v4737_v23 = vmov 71  }
0x1c4a   :  { %4520 = vset.pattern.permute.xlu0 %v4737_v23 }
0x1c50   :  { %2964 = vrot.lane.b32.xlu2 %v2958_v11, %s4667_s27 }
0x1c51   :  { %2948 = vrot.lane.b32.xlu1 %v2940_v8, %s4667_s27 }
0x1c58   :  { %2979 = vperm.xlu2 %4519, %v5912_v49  }
0x1c59   :  { %2968 = vrot.lane.b32.xlu1 %v2960_v33, %s4667_s27 }
0x1ca2   :  { %v6391_v47 = vpop.permute.xlu2 %2946 }
0x1ca3   :  { %8960 = vst [vmem:[#allocation353_spill] sm:$0xff] %v6391_v47 }
0x1caa   :  { %v6393_v38 = vpop.permute.xlu2 %2964 }
0x1cab   :  { %8961 = vst [vmem:[#allocation354_spill] sm:$0xff] %v6393_v38 }
0x1cb2   :  { %v2980_v25 = vpop.permute.xlu2 %2979 }
0x1cb3   :  { %v2984_v11 = vmul.f32 %v2980_v25, %v5987_v18  ;;  %v2982_v8 = vmul.f32 %v2980_v25, %v5989_v26  ;;  %v2983_v17 = vmul.f32 %v2980_v25, %v5985_v14  ;;  %v3002_v33 = vmul.f32 %v2980_v25, %v6001_v48 }
0x1cb4   :  { %v3000_v61 = vmul.f32 %v2980_v25, %v6003_v57  ;;  %v3001_v23 = vmul.f32 %v2980_v25, %v5999_v15 }
0x1cb5   :  { %2992 = vrot.lane.b32.xlu2 %v2984_v11, %s4670_s28  ;;  %2988 = vrot.lane.b32.xlu0 %v2982_v8, %s4670_s28  ;;  %v4738_v11 = vmov 72  }
0x1cb6   :  { %2990 = vrot.lane.b32.xlu1 %v2983_v17, %s4670_s28  ;;  %4521 = vset.pattern.permute.xlu2 %v4738_v11 }
0x1cba   :  { %v6408_v2 = vpop.permute.xlu0 %2966 }
0x1cbb   :  { %8962 = vst [vmem:[#allocation355_spill] sm:$0xff] %v6408_v2 }
0x1cbd   :  { %3010 = vrot.lane.b32.xlu2 %v3002_v33, %s4670_s28  ;;  %3006 = vrot.lane.b32.xlu0 %v3000_v61, %s4670_s28 }
0x1cbe   :  { %3008 = vrot.lane.b32.xlu1 %v3001_v23, %s4670_s28 }
0x1cc5   :  { %3019 = vperm.xlu0 %4520, %v5912_v49  }
0x1d27   :  { %v6410_v8 = vpop.permute.xlu0 %2988 }
0x1d28   :  { %8963 = vst [vmem:[#allocation356_spill] sm:$0xff] %v6410_v8 }
0x1d2f   :  { %v6412_v17 = vpop.permute.xlu0 %3006 }
0x1d30   :  { %8964 = vst [vmem:[#allocation357_spill] sm:$0xff] %v6412_v17  ;;  %v6427_v17 = vpop.permute.xlu2 %2992 }
0x1d31   :  { %8965 = vst [vmem:[#allocation358_spill] sm:$0xff] %v6427_v17 }
0x1d37   :  { %v3020_v47 = vpop.permute.xlu0 %3019 }
0x1d38   :  { %v3043_v38 = vmul.f32 %v3020_v47, %v5999_v15  ;;  %v3023_v25 = vmul.f32 %v3020_v47, %v5985_v14  ;;  %v3022_v33 = vmul.f32 %v3020_v47, %v5989_v26  ;;  %v3042_v61 = vmul.f32 %v3020_v47, %v6003_v57 }
0x1d39   :  { %v3024_v23 = vmul.f32 %v3020_v47, %v5987_v18  ;;  %v3044_v11 = vmul.f32 %v3020_v47, %v6001_v48 }
0x1d3a   :  { %3050 = vrot.lane.b32.xlu0 %v3043_v38, %s4670_s28  ;;  %3030 = vrot.lane.b32.xlu2 %v3023_v25, %s4670_s28  ;;  %v6429_v38 = vpop.permute.xlu2 %3010 }
0x1d3b   :  { %3028 = vrot.lane.b32.xlu1 %v3022_v33, %s4670_s28  ;;  %8966 = vst [vmem:[#allocation359_spill] sm:$0xff] %v6429_v38  ;;  %v4739_v33 = vmov 73  }
0x1d3c   :  { %4522 = vset.pattern.permute.xlu0 %v4739_v33 }
0x1d42   :  { %3048 = vrot.lane.b32.xlu2 %v3042_v61, %s4670_s28 }
0x1d43   :  { %3032 = vrot.lane.b32.xlu1 %v3024_v23, %s4670_s28 }
0x1d4a   :  { %3063 = vperm.xlu2 %4521, %v5912_v49  }
0x1d4b   :  { %3052 = vrot.lane.b32.xlu1 %v3044_v11, %s4670_s28 }
0x1d94   :  { %v6431_v25 = vpop.permute.xlu2 %3030 }
0x1d95   :  { %8967 = vst [vmem:[#allocation360_spill] sm:$0xff] %v6431_v25 }
0x1d9c   :  { %v6433_v8 = vpop.permute.xlu2 %3048 }
0x1d9d   :  { %8968 = vst [vmem:[#allocation361_spill] sm:$0xff] %v6433_v8 }
0x1da4   :  { %v3064_v2 = vpop.permute.xlu2 %3063 }
0x1da5   :  { %v3068_v61 = vmul.f32 %v3064_v2, %v5987_v18  ;;  %v3066_v23 = vmul.f32 %v3064_v2, %v5989_v26  ;;  %v3067_v47 = vmul.f32 %v3064_v2, %v5985_v14  ;;  %v3086_v11 = vmul.f32 %v3064_v2, %v6001_v48 }
0x1da6   :  { %v3084_v38 = vmul.f32 %v3064_v2, %v6003_v57  ;;  %v3085_v33 = vmul.f32 %v3064_v2, %v5999_v15 }
0x1da7   :  { %3076 = vrot.lane.b32.xlu2 %v3068_v61, %s4673_s29  ;;  %3072 = vrot.lane.b32.xlu0 %v3066_v23, %s4673_s29  ;;  %v4740_v61 = vmov 74  }
0x1da8   :  { %3074 = vrot.lane.b32.xlu1 %v3067_v47, %s4673_s29  ;;  %4523 = vset.pattern.permute.xlu2 %v4740_v61 }
0x1dac   :  { %v6448_v17 = vpop.permute.xlu0 %3050 }
0x1dad   :  { %8969 = vst [vmem:[#allocation362_spill] sm:$0xff] %v6448_v17  ;;  %v4741_v17 = vmov 75  }
0x1daf   :  { %3094 = vrot.lane.b32.xlu2 %v3086_v11, %s4673_s29  ;;  %3090 = vrot.lane.b32.xlu0 %v3084_v38, %s4673_s29  ;;  %v6457_v38 = vpop.permute.xlu1 %2276 }
0x1db0   :  { %3092 = vrot.lane.b32.xlu1 %v3085_v33, %s4673_s29  ;;  %8972 = vst [vmem:[#allocation365_spill] sm:$0xff] %v6457_v38 }
0x1db7   :  { %3103 = vperm.xlu0 %4522, %v5912_v49  }
0x1dbf   :  { %4524 = vset.pattern.permute.xlu0 %v4741_v17 }
0x1e19   :  { %v6450_v23 = vpop.permute.xlu0 %3072 }
0x1e1a   :  { %8970 = vst [vmem:[#allocation363_spill] sm:$0xff] %v6450_v23 }
0x1e21   :  { %v6452_v47 = vpop.permute.xlu0 %3090 }
0x1e22   :  { %8971 = vst [vmem:[#allocation364_spill] sm:$0xff] %v6452_v47  ;;  %v6465_v47 = vpop.permute.xlu1 %2296 }
0x1e23   :  { %8973 = vst [vmem:[#allocation366_spill] sm:$0xff] %v6465_v47 }
0x1e29   :  { %v3104_v25 = vpop.permute.xlu0 %3103 }
0x1e2a   :  { %v3127_v8 = vmul.f32 %v3104_v25, %v5999_v15  ;;  %v3107_v2 = vmul.f32 %v3104_v25, %v5985_v14  ;;  %v3106_v11 = vmul.f32 %v3104_v25, %v5989_v26  ;;  %v3126_v33 = vmul.f32 %v3104_v25, %v6003_v57  ;;  %v6470_v38 = vpop.permute.xlu1 %2318 }
0x1e2b   :  { %v3108_v61 = vmul.f32 %v3104_v25, %v5987_v18  ;;  %v3128_v23 = vmul.f32 %v3104_v25, %v6001_v48  ;;  %8974 = vst [vmem:[#allocation367_spill] sm:$0xff] %v6470_v38 }
0x1e2c   :  { %3134 = vrot.lane.b32.xlu0 %v3127_v8, %s4673_s29  ;;  %3114 = vrot.lane.b32.xlu2 %v3107_v2, %s4673_s29  ;;  %v6473_v8 = vpop.permute.xlu2 %3076 }
0x1e2d   :  { %3112 = vrot.lane.b32.xlu1 %v3106_v11, %s4673_s29  ;;  %8975 = vst [vmem:[#allocation368_spill] sm:$0xff] %v6473_v8 }
0x1e34   :  { %3132 = vrot.lane.b32.xlu2 %v3126_v33, %s4673_s29  ;;  %v6475_v2 = vpop.permute.xlu2 %3094 }
0x1e35   :  { %3116 = vrot.lane.b32.xlu1 %v3108_v61, %s4673_s29  ;;  %8976 = vst [vmem:[#allocation369_spill] sm:$0xff] %v6475_v2 }
0x1e3c   :  { %3147 = vperm.xlu2 %4523, %v5912_v49  }
0x1e3d   :  { %3136 = vrot.lane.b32.xlu1 %v3128_v23, %s4673_s29  ;;  %v6486_v23 = vpop.permute.xlu1 %2336 }
0x1e3e   :  { %8979 = vst [vmem:[#allocation372_spill] sm:$0xff] %v6486_v23 }
0x1e45   :  { %v6494_v38 = vpop.permute.xlu1 %2356 }
0x1e46   :  { %8980 = vst [vmem:[#allocation373_spill] sm:$0xff] %v6494_v38 }
0x1e86   :  { %v6477_v11 = vpop.permute.xlu2 %3114 }
0x1e87   :  { %8977 = vst [vmem:[#allocation370_spill] sm:$0xff] %v6477_v11 }
0x1e8e   :  { %v6479_v33 = vpop.permute.xlu2 %3132 }
0x1e8f   :  { %8978 = vst [vmem:[#allocation371_spill] sm:$0xff] %v6479_v33 }
0x1e96   :  { %v3148_v47 = vpop.permute.xlu2 %3147 }
0x1e97   :  { %v3152_v61 = vmul.f32 %v3148_v47, %v5987_v18  ;;  %v3150_v25 = vmul.f32 %v3148_v47, %v5989_v26  ;;  %v3151_v49 = vmul.f32 %v3148_v47, %v5985_v14  ;;  %v3170_v2 = vmul.f32 %v3148_v47, %v6001_v48  ;;  %v3213_v26 = vld [vmem:[#allocation5 + $0x7] ss:$8 sm:$0x3] }
0x1e98   :  { %v3168_v17 = vmul.f32 %v3148_v47, %v6003_v57  ;;  %v3169_v8 = vmul.f32 %v3148_v47, %v5999_v15  ;;  %v4743_v18 = vmov 77  }
0x1e99   :  { %3160 = vrot.lane.b32.xlu2 %v3152_v61, %s4676_s30  ;;  %3156 = vrot.lane.b32.xlu0 %v3150_v25, %s4676_s30  ;;  %v6497_v61 = vld [vmem:[#allocation2] sm:$0xf]  ;;  %v4742_v25 = vmov 76  }
0x1e9a   :  { %3158 = vrot.lane.b32.xlu1 %v3151_v49, %s4676_s30  ;;  %v6501_v49 = vpop.permute.xlu1 %2360  ;;  %4526 = vset.pattern.permute.xlu2 %v4743_v18  ;;  %v3238_v18 = vld [vmem:[#allocation5 + $0x3] ss:$8 sm:$0x7] }
0x1e9b   :  { %8981 = vst [vmem:[#allocation374_spill] sm:$0xff] %v6501_v49 }
0x1ea1   :  { %3178 = vrot.lane.b32.xlu2 %v3170_v2, %s4676_s30  ;;  %3174 = vrot.lane.b32.xlu0 %v3168_v17, %s4676_s30  ;;  %v6509_v17 = vpop.permute.xlu0 %3134 }
0x1ea2   :  { %3176 = vrot.lane.b32.xlu1 %v3169_v8, %s4676_s30  ;;  %v6503_v48 = vpop.permute.xlu1 %2380  ;;  %8985 = vst [vmem:[#allocation378_spill] sm:$0xff] %v6509_v17 }
0x1ea3   :  { %8982 = vst [vmem:[#allocation375_spill] sm:$0xff] %v6503_v48 }
0x1ea9   :  { %3187 = vperm.xlu0 %4524, %v6497_v61  }
0x1eaa   :  { %v6505_v47 = vpop.permute.xlu1 %2402 }
0x1eab   :  { %8983 = vst [vmem:[#allocation376_spill] sm:$0xff] %v6505_v47 }
0x1eb1   :  { %4525 = vset.pattern.permute.xlu0 %v4742_v25  ;;  %v3191_v25 = vld [vmem:[#allocation5 + $0x3] ss:$8 sm:$0x3] }
0x1eb2   :  { %3235 = vperm.xlu0 %4525, %v6497_v61   ;;  %v6507_v2 = vpop.permute.xlu1 %2420  ;;  %v3194_v48 = vperm.slane %v3191_v25, 1  ;;  %v3193_v11 = vperm.slane %v3191_v25, 0 }
0x1eb3   :  { %8984 = vst [vmem:[#allocation377_spill] sm:$0xff] %v6507_v2 }
0x1eba   :  { %v6511_v15 = vpop.permute.xlu1 %2440 }
0x1ebb   :  { %8986 = vst [vmem:[#allocation379_spill] sm:$0xff] %v6511_v15 }
0x1ec2   :  { %v6515_v23 = vpop.permute.xlu1 %2444 }
0x1ec3   :  { %8988 = vst [vmem:[#allocation381_spill] sm:$0xff] %v6515_v23  ;;  %v3216_v23 = vperm.slane %v3213_v26, 1 }
0x1eca   :  { %v6519_v49 = vpop.permute.xlu1 %2464 }
0x1ecb   :  { %8990 = vst [vmem:[#allocation383_spill] sm:$0xff] %v6519_v49 }
0x1ed2   :  { %v6523_v15 = vpop.permute.xlu1 %2486 }
0x1ed3   :  { %8991 = vst [vmem:[#allocation384_spill] sm:$0xff] %v6523_v15 }
0x1f0b   :  { %v6513_v8 = vpop.permute.xlu0 %3156 }
0x1f0c   :  { %8987 = vst [vmem:[#allocation380_spill] sm:$0xff] %v6513_v8  ;;  %v3264_v8 = vld [vmem:[#allocation5 + $0x7] ss:$8 sm:$0x7] }
0x1f0d   :  { %v6525_v33 = vperm.slane %v3264_v8, 1 }
0x1f0f   :  { %8992 = vst [vmem:[#allocation385_spill] sm:$0xff] %v6525_v33 }
0x1f13   :  { %v6517_v14 = vpop.permute.xlu0 %3174 }
0x1f14   :  { %8989 = vst [vmem:[#allocation382_spill] sm:$0xff] %v6517_v14  ;;  %v3215_v14 = vperm.slane %v3213_v26, 0 }
0x1f1b   :  { %v3188_v47 = vpop.permute.xlu0 %3187 }
0x1f1c   :  { %v3198_v38 = vmul.f32 %v3194_v48, %v3188_v47  ;;  %v3197_v2 = vmul.f32 %v3193_v11, %v3188_v47  ;;  %v3220_v49 = vmul.f32 %v3216_v23, %v3188_v47  ;;  %v3219_v3 = vmul.f32 %v3215_v14, %v3188_v47  ;;  %v6535_v11 = vpop.permute.xlu1 %2504 }
0x1f1d   :  { %v6530_v48 = vperm.slane %v3238_v18, 1  ;;  %8995 = vst [vmem:[#allocation388_spill] sm:$0xff] %v6535_v11  ;;  %v6541_v14 = vperm.slane %v3264_v8, 0  ;;  %v6543_v23 = vperm.slane %v3238_v18, 2 }
0x1f1e   :  { %3203 = vrot.lane.b32.xlu2 %v3198_v38, %s4679_s3  ;;  %3201 = vrot.lane.b32.xlu1 %v3197_v2, %s4679_s3  ;;  %v6532_v38 = vperm.slane %v3238_v18, 0 }
0x1f1f   :  { %8993 = vst [vmem:[#allocation386_spill] sm:$0xff] %v6530_v48 }
0x1f20   :  { %8994 = vst [vmem:[#allocation387_spill] sm:$0xff] %v6532_v38 }
0x1f21   :  { %8996 = vst [vmem:[#allocation389_spill] sm:$0xff] %v6541_v14 }
0x1f22   :  { %8997 = vst [vmem:[#allocation390_spill] sm:$0xff] %v6543_v23 }
0x1f24   :  { %v3236_v17 = vpop.permute.xlu0 %3235 }
0x1f25   :  { %v3273_v25 = vmul.f32 %v6525_v33, %v3236_v17  ;;  %v3247_v26 = vmul.f32 %v6530_v48, %v3236_v17  ;;  %v3246_v2 = vmul.f32 %v6532_v38, %v3236_v17  ;;  %v3248_v47 = vmul.f32 %v6543_v23, %v3236_v17 }
0x1f26   :  { %3225 = vrot.lane.b32.xlu2 %v3220_v49, %s4679_s3  ;;  %3223 = vrot.lane.b32.xlu1 %v3219_v3, %s4679_s3  ;;  %v6545_v3 = vpop.permute.xlu1 %2524  ;;  %v3272_v49 = vmul.f32 %v6541_v14, %v3236_v17 }
0x1f27   :  { %3280 = vrot.lane.b32.xlu0 %v3273_v25, %s4680_s4  ;;  %8998 = vst [vmem:[#allocation391_spill] sm:$0xff] %v6545_v3  ;;  %v6551_v25 = vperm.slane %v3264_v8, 2 }
0x1f29   :  { %8999 = vst [vmem:[#allocation392_spill] sm:$0xff] %v6551_v25 }
0x1f2e   :  { %3254 = vrot.lane.b32.xlu2 %v3247_v26, %s4680_s4  ;;  %3252 = vrot.lane.b32.xlu1 %v3246_v2, %s4680_s4  ;;  %v6553_v11 = vpop.permute.xlu1 %2528  ;;  %v3274_v26 = vmul.f32 %v6551_v25, %v3236_v17 }
0x1f2f   :  { %9000 = vst [vmem:[#allocation393_spill] sm:$0xff] %v6553_v11 }
0x1f36   :  { %3278 = vrot.lane.b32.xlu2 %v3272_v49, %s4680_s4  ;;  %3256 = vrot.lane.b32.xlu1 %v3248_v47, %s4680_s4  ;;  %v6558_v18 = vpop.permute.xlu1 %2548  ;;  %v6566_v49 = vpop.permute.xlu2 %3160 }
0x1f37   :  { %9001 = vst [vmem:[#allocation394_spill] sm:$0xff] %v6558_v18 }
0x1f38   :  { %9005 = vst [vmem:[#allocation398_spill] sm:$0xff] %v6566_v49 }
0x1f3e   :  { %3291 = vperm.xlu2 %4526, %v6497_v61   ;;  %3282 = vrot.lane.b32.xlu1 %v3274_v26, %s4680_s4  ;;  %v6560_v2 = vpop.permute.xlu1 %2570  ;;  %v6570_v47 = vpop.permute.xlu2 %3178 }
0x1f3f   :  { %9002 = vst [vmem:[#allocation395_spill] sm:$0xff] %v6560_v2 }
0x1f40   :  { %9007 = vst [vmem:[#allocation400_spill] sm:$0xff] %v6570_v47 }
0x1f46   :  { %v6562_v15 = vpop.permute.xlu1 %2588 }
0x1f47   :  { %9003 = vst [vmem:[#allocation396_spill] sm:$0xff] %v6562_v15  ;;  %v4744_v15 = vmov 78  }
0x1f48   :  { %4527 = vset.pattern.permute.xlu0 %v4744_v15 }
0x1f4e   :  { %v6564_v3 = vpop.permute.xlu1 %2608 }
0x1f4f   :  { %9004 = vst [vmem:[#allocation397_spill] sm:$0xff] %v6564_v3 }
0x1f56   :  { %v6568_v8 = vpop.permute.xlu1 %2612 }
0x1f57   :  { %9006 = vst [vmem:[#allocation399_spill] sm:$0xff] %v6568_v8 }
0x1f5e   :  { %v6572_v11 = vpop.permute.xlu1 %2632 }
0x1f5f   :  { %9008 = vst [vmem:[#allocation401_spill] sm:$0xff] %v6572_v11 }
0x1f66   :  { %v6576_v57 = vpop.permute.xlu1 %2654 }
0x1f67   :  { %9010 = vst [vmem:[#allocation403_spill] sm:$0xff] %v6576_v57 }
0x1f6e   :  { %v6580_v18 = vpop.permute.xlu1 %2672 }
0x1f6f   :  { %9012 = vst [vmem:[#allocation405_spill] sm:$0xff] %v6580_v18 }
0x1f76   :  { %v6584_v3 = vpop.permute.xlu1 %2692 }
0x1f77   :  { %9014 = vst [vmem:[#allocation407_spill] sm:$0xff] %v6584_v3 }
0x1f78   :  { %v6574_v17 = vpop.permute.xlu2 %3203 }
0x1f79   :  { %9009 = vst [vmem:[#allocation402_spill] sm:$0xff] %v6574_v17 }
0x1f7e   :  { %v6588_v8 = vpop.permute.xlu1 %2696 }
0x1f7f   :  { %9016 = vst [vmem:[#allocation409_spill] sm:$0xff] %v6588_v8 }
0x1f80   :  { %v6578_v26 = vpop.permute.xlu2 %3225 }
0x1f81   :  { %9011 = vst [vmem:[#allocation404_spill] sm:$0xff] %v6578_v26 }
0x1f88   :  { %v6582_v2 = vpop.permute.xlu2 %3254 }
0x1f89   :  { %9013 = vst [vmem:[#allocation406_spill] sm:$0xff] %v6582_v2  ;;  %v6598_v2 = vpop.permute.xlu1 %2716 }
0x1f8a   :  { %9017 = vst [vmem:[#allocation410_spill] sm:$0xff] %v6598_v2 }
0x1f90   :  { %v6586_v49 = vpop.permute.xlu2 %3278 }
0x1f91   :  { %9015 = vst [vmem:[#allocation408_spill] sm:$0xff] %v6586_v49  ;;  %v6604_v18 = vpop.permute.xlu1 %2738 }
0x1f92   :  { %9018 = vst [vmem:[#allocation411_spill] sm:$0xff] %v6604_v18 }
0x1f98   :  { %v3292_v47 = vpop.permute.xlu2 %3291 }
0x1f99   :  { %v3296_v11 = vmul.f32 %v3292_v47, %v6543_v23  ;;  %v3294_v17 = vmul.f32 %v3292_v47, %v6532_v38  ;;  %v3295_v57 = vmul.f32 %v3292_v47, %v6530_v48  ;;  %v3316_v15 = vmul.f32 %v3292_v47, %v6551_v25  ;;  %v6625_v18 = vpop.permute.xlu0 %3280 }
0x1f9a   :  { %v3314_v26 = vmul.f32 %v3292_v47, %v6541_v14  ;;  %v3315_v49 = vmul.f32 %v3292_v47, %v6525_v33  ;;  %9028 = vst [vmem:[#allocation421_spill] sm:$0xff] %v6625_v18 }
0x1f9b   :  { %3304 = vrot.lane.b32.xlu2 %v3296_v11, %s4680_s4  ;;  %3300 = vrot.lane.b32.xlu0 %v3294_v17, %s4680_s4  ;;  %v6607_v11 = vpop.permute.xlu1 %2756 }
0x1f9c   :  { %3302 = vrot.lane.b32.xlu1 %v3295_v57, %s4680_s4  ;;  %9019 = vst [vmem:[#allocation412_spill] sm:$0xff] %v6607_v11  ;;  %v4745_v11 = vmov 79  }
0x1f9d   :  { %4528 = vset.pattern.permute.xlu2 %v4745_v11 }
0x1fa3   :  { %3324 = vrot.lane.b32.xlu2 %v3316_v15, %s4680_s4  ;;  %3320 = vrot.lane.b32.xlu0 %v3314_v26, %s4680_s4  ;;  %v6609_v57 = vpop.permute.xlu1 %2776 }
0x1fa4   :  { %3322 = vrot.lane.b32.xlu1 %v3315_v49, %s4680_s4  ;;  %9020 = vst [vmem:[#allocation413_spill] sm:$0xff] %v6609_v57 }
0x1fab   :  { %3335 = vperm.xlu0 %4527, %v6497_v61   ;;  %v6611_v17 = vpop.permute.xlu1 %2780 }
0x1fac   :  { %9021 = vst [vmem:[#allocation414_spill] sm:$0xff] %v6611_v17 }
0x1fb3   :  { %v6613_v8 = vpop.permute.xlu1 %2800 }
0x1fb4   :  { %9022 = vst [vmem:[#allocation415_spill] sm:$0xff] %v6613_v8 }
0x1fbb   :  { %v6615_v2 = vpop.permute.xlu1 %2822 }
0x1fbc   :  { %9023 = vst [vmem:[#allocation416_spill] sm:$0xff] %v6615_v2 }
0x1fc3   :  { %v6617_v47 = vpop.permute.xlu1 %2840 }
0x1fc4   :  { %9024 = vst [vmem:[#allocation417_spill] sm:$0xff] %v6617_v47 }
0x1fcb   :  { %v6619_v15 = vpop.permute.xlu1 %2860 }
0x1fcc   :  { %9025 = vst [vmem:[#allocation418_spill] sm:$0xff] %v6619_v15 }
0x1fd3   :  { %v6621_v26 = vpop.permute.xlu1 %2864 }
0x1fd4   :  { %9026 = vst [vmem:[#allocation419_spill] sm:$0xff] %v6621_v26 }
0x1fdb   :  { %v6623_v49 = vpop.permute.xlu1 %2884 }
0x1fdc   :  { %9027 = vst [vmem:[#allocation420_spill] sm:$0xff] %v6623_v49 }
0x1fe3   :  { %v6627_v3 = vpop.permute.xlu1 %2906 }
0x1fe4   :  { %9029 = vst [vmem:[#allocation422_spill] sm:$0xff] %v6627_v3 }
0x1feb   :  { %v6631_v17 = vpop.permute.xlu1 %2924 }
0x1fec   :  { %9031 = vst [vmem:[#allocation424_spill] sm:$0xff] %v6631_v17 }
0x1ff3   :  { %v6635_v2 = vpop.permute.xlu1 %2944 }
0x1ff4   :  { %9033 = vst [vmem:[#allocation426_spill] sm:$0xff] %v6635_v2 }
0x1ffb   :  { %v6643_v11 = vpop.permute.xlu1 %2948 }
0x1ffc   :  { %9034 = vst [vmem:[#allocation427_spill] sm:$0xff] %v6643_v11 }
0x2003   :  { %v6649_v3 = vpop.permute.xlu1 %2968 }
0x2004   :  { %9035 = vst [vmem:[#allocation428_spill] sm:$0xff] %v6649_v3 }
0x200d   :  { %v6629_v57 = vpop.permute.xlu0 %3300 }
0x200e   :  { %9030 = vst [vmem:[#allocation423_spill] sm:$0xff] %v6629_v57 }
0x2015   :  { %v6633_v8 = vpop.permute.xlu0 %3320 }
0x2016   :  { %9032 = vst [vmem:[#allocation425_spill] sm:$0xff] %v6633_v8 }
0x201d   :  { %v3336_v47 = vpop.permute.xlu0 %3335 }
0x201e   :  { %v3357_v15 = vmul.f32 %v3336_v47, %v6525_v33  ;;  %v3339_v26 = vmul.f32 %v3336_v47, %v6530_v48  ;;  %v3338_v49 = vmul.f32 %v3336_v47, %v6532_v38  ;;  %v3356_v18 = vmul.f32 %v3336_v47, %v6541_v14 }
0x201f   :  { %v3340_v17 = vmul.f32 %v3336_v47, %v6543_v23  ;;  %v3358_v57 = vmul.f32 %v3336_v47, %v6551_v25 }
0x2020   :  { %3364 = vrot.lane.b32.xlu0 %v3357_v15, %s4683_s5  ;;  %3346 = vrot.lane.b32.xlu2 %v3339_v26, %s4683_s5  ;;  %v6654_v15 = vpop.permute.xlu1 %2990 }
0x2021   :  { %3344 = vrot.lane.b32.xlu1 %v3338_v49, %s4683_s5  ;;  %9036 = vst [vmem:[#allocation429_spill] sm:$0xff] %v6654_v15 }
0x2028   :  { %3362 = vrot.lane.b32.xlu2 %v3356_v18, %s4683_s5  ;;  %v6656_v26 = vpop.permute.xlu1 %3008 }
0x2029   :  { %3348 = vrot.lane.b32.xlu1 %v3340_v17, %s4683_s5  ;;  %9037 = vst [vmem:[#allocation430_spill] sm:$0xff] %v6656_v26  ;;  %v6666_v17 = vpop.permute.xlu2 %3304  ;;  %v4746_v26 = vmov 80  }
0x202a   :  { %9042 = vst [vmem:[#allocation435_spill] sm:$0xff] %v6666_v17  ;;  %4529 = vset.pattern.permute.xlu0 %v4746_v26 }
0x2030   :  { %3375 = vperm.xlu2 %4528, %v6497_v61   ;;  %v6658_v49 = vpop.permute.xlu1 %3028 }
0x2031   :  { %3366 = vrot.lane.b32.xlu1 %v3358_v57, %s4683_s5  ;;  %9038 = vst [vmem:[#allocation431_spill] sm:$0xff] %v6658_v49  ;;  %v6670_v47 = vpop.permute.xlu2 %3324 }
0x2032   :  { %9044 = vst [vmem:[#allocation437_spill] sm:$0xff] %v6670_v47 }
0x2038   :  { %v6660_v11 = vpop.permute.xlu1 %3032 }
0x2039   :  { %9039 = vst [vmem:[#allocation432_spill] sm:$0xff] %v6660_v11 }
0x2040   :  { %v6662_v2 = vpop.permute.xlu1 %3052 }
0x2041   :  { %9040 = vst [vmem:[#allocation433_spill] sm:$0xff] %v6662_v2 }
0x2048   :  { %v6664_v18 = vpop.permute.xlu1 %3074 }
0x2049   :  { %9041 = vst [vmem:[#allocation434_spill] sm:$0xff] %v6664_v18 }
0x2050   :  { %v6668_v3 = vpop.permute.xlu1 %3092 }
0x2051   :  { %9043 = vst [vmem:[#allocation436_spill] sm:$0xff] %v6668_v3 }
0x2058   :  { %v6672_v8 = vpop.permute.xlu1 %3112 }
0x2060   :  { %v6676_v15 = vpop.permute.xlu1 %3116 }
0x2068   :  { %v6680_v11 = vpop.permute.xlu1 %3136 }
0x2069   :  { %9047 = vst [vmem:[#allocation440_spill] sm:$0xff] %v6680_v11 }
0x2070   :  { %v6688_v47 = vpop.permute.xlu1 %3158 }
0x2071   :  { %9048 = vst [vmem:[#allocation441_spill] sm:$0xff] %v6688_v47 }
0x207a   :  { %v6674_v57 = vpop.permute.xlu2 %3346 }
0x207b   :  { %9045 = vst [vmem:[#allocation438_spill] sm:$0xff] %v6674_v57 }
0x2082   :  { %v6678_v49 = vpop.permute.xlu2 %3362 }
0x2083   :  { %9046 = vst [vmem:[#allocation439_spill] sm:$0xff] %v6678_v49  ;;  %v6696_v49 = vpop.permute.xlu1 %3176 }
0x2084   :  { %9049 = vst [vmem:[#allocation442_spill] sm:$0xff] %v6696_v49  ;;  %v347_v49 = vsel %vm286_vm2, %v4959_v46, %v4924_v24  ;;  %v602_v46 = vsel %vm541_vm5, %v5047_v41, %v5062_v0  ;;  %v9143_v0 = vld [vmem:[#allocation206_spill] sm:$0xff] }
0x208a   :  { %v3376_v2 = vpop.permute.xlu2 %3375 }
0x208b   :  { %v3380_v18 = vmul.f32 %v3376_v2, %v6543_v23  ;;  %v3378_v17 = vmul.f32 %v3376_v2, %v6532_v38  ;;  %v3379_v3 = vmul.f32 %v3376_v2, %v6530_v48  ;;  %v3400_v26 = vmul.f32 %v3376_v2, %v6551_v25 }
0x208c   :  { %v3398_v57 = vmul.f32 %v3376_v2, %v6541_v14  ;;  %v3399_v11 = vmul.f32 %v3376_v2, %v6525_v33  ;;  %v176_v2 = vsel %vm115_vm0, %v4928_v27, %v4904_v9  ;;  %v432_v27 = vsel %vm371_vm3, %v4967_v51, %v4982_v59  ;;  %v9147_v59 = vld [vmem:[#allocation293_spill] sm:$0xff] }
0x208d   :  { %3388 = vrot.lane.b32.xlu2 %v3380_v18, %s4683_s5  ;;  %3384 = vrot.lane.b32.xlu0 %v3378_v17, %s4683_s5  ;;  %v6699_v18 = vpop.permute.xlu1 %3201  ;;  %v773_v51 = vsel %vm712_vm7, %v5127_v37, %v5142_v44  ;;  %v1028_v37 = vsel %vm8572_vm10, %v5257_v31, %v5277_v62  ;;  %v1389_v31 = vsel %vm8548_vm13, %v5457_v58, %v5869_v30  ;;  %vm8552_vm13 = vcmask 760832   ;;  %v9118_v30 = vld [vmem:[#allocation107_spill] sm:$0xff]  ;;  %v9131_v62 = vld [vmem:[#allocation241_spill] sm:$0xff]  ;;  %v9138_v44 = vld [vmem:[#allocation184_spill] sm:$0xff] }
0x208e   :  { %3386 = vrot.lane.b32.xlu1 %v3379_v3, %s4683_s5 }
0x2095   :  { %3408 = vrot.lane.b32.xlu2 %v3400_v26, %s4683_s5  ;;  %3404 = vrot.lane.b32.xlu0 %v3398_v57, %s4683_s5  ;;  %v6701_v3 = vpop.permute.xlu1 %3223  ;;  %v93_v57 = vmul.f32 %v4813_v20, %v4836_v34  ;;  %v517_v20 = vsel %vm456_vm4, %v5007_v36, %v5022_v55  ;;  %v858_v36 = vsel %vm8576_vm8, %v5167_v39, %v5182_v32  ;;  %v9135_v32 = vld [vmem:[#allocation173_spill] sm:$0xff]  ;;  %v9145_v55 = vld [vmem:[#allocation234_spill] sm:$0xff] }
0x2096   :  { %3406 = vrot.lane.b32.xlu1 %v3399_v11, %s4683_s5  ;;  %9050 = vst [vmem:[#allocation443_spill] sm:$0xff] %v6701_v3  ;;  %v262_v11 = vsel %vm8606_vm1, %v4951_v42, %v4912_v16  ;;  %v1219_v39 = vsel %vm8573_vm11, %v5357_v53, %v5828_v28  ;;  %v9122_v28 = vld [vmem:[#allocation223_spill] sm:$0xff] }
0x2097   :  { %v181_v26 = vadd.f32 %v176_v2, %v93_v57  ;;  %v688_v57 = vsel %vm8605_vm6, %v5087_v50, %v5102_v35  ;;  %v943_v50 = vsel %vm8570_vm9, %v5207_v56, %v5226_v7  ;;  %v1304_v56 = vsel %vm8547_vm12, %v5407_v54, %v5844_v52  ;;  %v9120_v52 = vld [vmem:[#allocation216_spill] sm:$0xff]  ;;  %v9132_v7 = vld [vmem:[#allocation162_spill] sm:$0xff]  ;;  %v9141_v35 = vld [vmem:[#allocation195_spill] sm:$0xff] }
0x2098   :  { %vm8551_vm12 = vcmask 777216  }
0x2099   :  { %v1645_v58 = vsel %vm8551_vm12, %v5607_v43, %v5920_v1  ;;  %vm8607_vm12 = vcmask 531456   ;;  %v9114_v1 = vld [vmem:[#allocation176_spill] sm:$0xff] }
0x209d   :  { %3419 = vperm.xlu0 %4529, %v6497_v61   ;;  %v6703_v17 = vpop.permute.xlu1 %3252 }
0x209e   :  { %9051 = vst [vmem:[#allocation444_spill] sm:$0xff] %v6703_v17  ;;  %v267_v17 = vadd.f32 %v262_v11, %v181_v26 }
0x20a0   :  { %v352_v9 = vadd.f32 %v347_v49, %v267_v17 }
0x20a2   :  { %v437_v42 = vadd.f32 %v432_v27, %v352_v9 }
0x20a4   :  { %v522_v2 = vadd.f32 %v517_v20, %v437_v42 }
0x20a5   :  { %v6716_v47 = vpop.permute.xlu1 %3256 }
0x20a6   :  { %9052 = vst [vmem:[#allocation445_spill] sm:$0xff] %v6716_v47  ;;  %v607_v11 = vadd.f32 %v602_v46, %v522_v2  ;;  %v9156_v47 = vld [vmem:[#allocation379_spill] sm:$0xff] }
0x20a8   :  { %v693_v49 = vadd.f32 %v688_v57, %v607_v11  ;;  %v1474_v57 = vsel %vm8549_vm14, %v5507_v4, %v5879_v60  ;;  %v1560_v11 = vsel %vm8550_vm15, %v5557_v10, %v5895_v21  ;;  %v1730_v4 = vsel %vm8552_vm13, %v5657_v12, %v5934_v45  ;;  %v9112_v45 = vld [vmem:[#allocation165_spill] sm:$0xff]  ;;  %v9116_v21 = vld [vmem:[#allocation187_spill] sm:$0xff] }
0x20a9   :  { %vm8553_vm14 = vcmask 654336   ;;  %vm1839_vm15 = vcmask 637952   ;;  %v1986_v12 = vsel %vm8607_vm12, %v5807_v5, %v6005_v29  ;;  %vm2010_vm13 = vcmask 515072   ;;  %v9106_v29 = vld [vmem:[#allocation132_spill] sm:$0xff]  ;;  %v9117_v60 = vld [vmem:[#allocation209_spill] sm:$0xff] }
0x20aa   :  { %v778_v41 = vadd.f32 %v773_v51, %v693_v49  ;;  %v1815_v10 = vsel %vm8553_vm14, %v5707_v63, %v5963_v40  ;;  %vm8554_vm14 = vcmask 498688   ;;  %v9110_v40 = vld [vmem:[#allocation154_spill] sm:$0xff] }
0x20ac   :  { %v863_v17 = vadd.f32 %v858_v36, %v778_v41 }
0x20ad   :  { %v6733_v9 = vpop.permute.xlu1 %3282 }
0x20ae   :  { %9053 = vst [vmem:[#allocation446_spill] sm:$0xff] %v6733_v9  ;;  %v948_v26 = vadd.f32 %v943_v50, %v863_v17  ;;  %v1900_v50 = vsel %vm1839_vm15, %v5757_v6, %v5973_v22  ;;  %v9108_v22 = vld [vmem:[#allocation143_spill] sm:$0xff] }
0x20b0   :  { %v1033_v27 = vadd.f32 %v1028_v37, %v948_v26  ;;  %v9057_v26 = vld [vmem:[#allocation236_spill] sm:$0xff] }
0x20b1   :  { %v2071_v63 = vsel %vm2010_vm13, %v9057_v26, %v6022_v13  ;;  %v9070_v26 = vld [vmem:[#allocation319_spill] sm:$0xff]  ;;  %v9105_v13 = vld [vmem:[#allocation52_spill] sm:$0xff] }
0x20b2   :  { %v1123_v42 = vadd.f32 %v5789_v19, %v1033_v27  ;;  %v9125_v19 = vld [vmem:[#allocation228_spill] sm:$0xff] }
0x20b4   :  { %v1224_v46 = vadd.f32 %v1219_v39, %v1123_v42  ;;  %v9058_v39 = vld [vmem:[#allocation284_spill] sm:$0xff]  ;;  %v9059_v42 = vld [vmem:[#allocation294_spill] sm:$0xff] }
0x20b5   :  { %v6744_v20 = vpop.permute.xlu1 %3302  ;;  %v2156_v6 = vsel %vm8554_vm14, %v9059_v42, %v9058_v39  ;;  %v9071_v42 = vld [vmem:[#allocation327_spill] sm:$0xff]  ;;  %vm9090_vm14 = vcmask 1022976  }
0x20b6   :  { %9054 = vst [vmem:[#allocation447_spill] sm:$0xff] %v6744_v20  ;;  %v1309_v2 = vadd.f32 %v1304_v56, %v1224_v46  ;;  %v9060_v46 = vld [vmem:[#allocation285_spill] sm:$0xff] }
0x20b8   :  { %v1394_v53 = vadd.f32 %v1389_v31, %v1309_v2  ;;  %v9061_v31 = vld [vmem:[#allocation273_spill] sm:$0xff] }
0x20b9   :  { %v2216_v2 = vmul.f32 %v9061_v31, %v9060_v46 }
0x20ba   :  { %v1479_v51 = vadd.f32 %v1474_v57, %v1394_v53  ;;  %v9062_v53 = vld [vmem:[#allocation299_spill] sm:$0xff] }
0x20bc   :  { %v1565_v49 = vadd.f32 %v1560_v11, %v1479_v51  ;;  %v9063_v11 = vld [vmem:[#allocation291_spill] sm:$0xff] }
0x20bd   :  { %v6762_v54 = vpop.permute.xlu1 %3322  ;;  %v2298_v5 = vsel %vm115_vm0, %v9063_v11, %v9062_v53  ;;  %v9103_v53 = vld [vmem:[#allocation46_spill] sm:$0xff] }
0x20be   :  { %9055 = vst [vmem:[#allocation448_spill] sm:$0xff] %v6762_v54  ;;  %v1650_v36 = vadd.f32 %v1645_v58, %v1565_v49  ;;  %v9065_v49 = vld [vmem:[#allocation306_spill] sm:$0xff] }
0x20c0   :  { %v1735_v41 = vadd.f32 %v1730_v4, %v1650_v36  ;;  %v9066_v4 = vld [vmem:[#allocation305_spill] sm:$0xff] }
0x20c1   :  { %v2382_v36 = vsel %vm8606_vm1, %v9066_v4, %v9065_v49 }
0x20c2   :  { %v1820_v17 = vadd.f32 %v1815_v10, %v1735_v41  ;;  %v9067_v41 = vld [vmem:[#allocation313_spill] sm:$0xff] }
0x20c4   :  { %v1905_v37 = vadd.f32 %v1900_v50, %v1820_v17  ;;  %v9068_v50 = vld [vmem:[#allocation312_spill] sm:$0xff] }
0x20c5   :  { %v6776_v43 = vpop.permute.xlu1 %3344  ;;  %v2466_v17 = vsel %vm286_vm2, %v9068_v50, %v9067_v41 }
0x20c6   :  { %9056 = vst [vmem:[#allocation449_spill] sm:$0xff] %v6776_v43  ;;  %v1991_v27 = vadd.f32 %v1986_v12, %v1905_v37  ;;  %v9069_v37 = vld [vmem:[#allocation320_spill] sm:$0xff]  ;;  %v9164_v43 = vld [vmem:[#allocation339_spill] sm:$0xff] }
0x20c8   :  { %v2076_v56 = vadd.f32 %v2071_v63, %v1991_v27  ;;  %v2550_v63 = vsel %vm371_vm3, %v9070_v26, %v9069_v37 }
0x20ca   :  { %v2161_v57 = vadd.f32 %v2156_v6, %v2076_v56  ;;  %v9072_v6 = vld [vmem:[#allocation326_spill] sm:$0xff] }
0x20cb   :  { %v2634_v56 = vsel %vm456_vm4, %v9072_v6, %v9071_v42  ;;  %v9082_v42 = vld [vmem:[#allocation354_spill] sm:$0xff] }
0x20cc   :  { %v2219_v51 = vadd.f32 %v2216_v2, %v2161_v57  ;;  %v9073_v2 = vld [vmem:[#allocation334_spill] sm:$0xff]  ;;  %v9074_v57 = vld [vmem:[#allocation333_spill] sm:$0xff] }
0x20cd   :  { %v6792_v58 = vpop.permute.xlu1 %3348  ;;  %v2718_v11 = vsel %vm541_vm5, %v9074_v57, %v9073_v2 }
0x20ce   :  { %9064 = vst [vmem:[#allocation236_spill] sm:$0xff] %v6792_v58  ;;  %v2303_v10 = vadd.f32 %v2298_v5, %v2219_v51  ;;  %v6809_v5 = vpop.permute.xlu0 %3364  ;;  %v9154_v58 = vld [vmem:[#allocation373_spill] sm:$0xff] }
0x20cf   :  { %9075 = vst [vmem:[#allocation294_spill] sm:$0xff] %v6809_v5  ;;  %v9166_v5 = vld [vmem:[#allocation346_spill] sm:$0xff] }
0x20d0   :  { %v2387_v12 = vadd.f32 %v2382_v36, %v2303_v10  ;;  %v9077_v36 = vld [vmem:[#allocation341_spill] sm:$0xff]  ;;  %v9078_v10 = vld [vmem:[#allocation340_spill] sm:$0xff] }
0x20d1   :  { %v2802_v50 = vsel %vm8605_vm6, %v9078_v10, %v9077_v36  ;;  %v9087_v36 = vld [vmem:[#allocation371_spill] sm:$0xff] }
0x20d2   :  { %v2471_v27 = vadd.f32 %v2466_v17, %v2387_v12  ;;  %v9079_v17 = vld [vmem:[#allocation348_spill] sm:$0xff]  ;;  %v9080_v12 = vld [vmem:[#allocation347_spill] sm:$0xff] }
0x20d3   :  { %v2886_v9 = vsel %vm712_vm7, %v9080_v12, %v9079_v17  ;;  %v9102_v17 = vld [vmem:[#allocation110_spill] sm:$0xff] }
0x20d4   :  { %v2555_v31 = vadd.f32 %v2550_v63, %v2471_v27  ;;  %v4747_v63 = vmov 81   ;;  %v9081_v27 = vld [vmem:[#allocation355_spill] sm:$0xff] }
0x20d5   :  { %v6811_v4 = vpop.permute.xlu1 %3366  ;;  %4530 = vset.pattern.permute.xlu2 %v4747_v63  ;;  %v2970_v57 = vsel %vm8576_vm8, %v9082_v42, %v9081_v27  ;;  %v9088_v63 = vld [vmem:[#allocation425_spill] sm:$0xff] }
0x20d6   :  { %v2639_v51 = vadd.f32 %v2634_v56, %v2555_v31  ;;  %9076 = vst [vmem:[#allocation285_spill] sm:$0xff] %v6811_v4  ;;  %v9083_v56 = vld [vmem:[#allocation362_spill] sm:$0xff]  ;;  %v9084_v31 = vld [vmem:[#allocation361_spill] sm:$0xff]  ;;  %v3326_v42 = vsel %vm8573_vm11, %v9088_v63, %v6762_v54 }
0x20d7   :  { %v3054_v4 = vsel %vm8570_vm9, %v9084_v31, %v9083_v56  ;;  %v9098_v54 = vld [vmem:[#allocation89_spill] sm:$0xff] }
0x20d8   :  { %v2723_v26 = vadd.f32 %v2718_v11, %v2639_v51  ;;  %v9086_v51 = vld [vmem:[#allocation378_spill] sm:$0xff] }
0x20da   :  { %v2807_v6 = vadd.f32 %v2802_v50, %v2723_v26  ;;  %v3138_v50 = vsel %vm8572_vm10, %v9087_v36, %v9086_v51  ;;  %v9099_v51 = vld [vmem:[#allocation37_spill] sm:$0xff] }
0x20dc   :  { %v2891_v2 = vadd.f32 %v2886_v9, %v2807_v6 }
0x20de   :  { %v2975_v10 = vadd.f32 %v2970_v57, %v2891_v2 }
0x20e0   :  { %v3059_v26 = vadd.f32 %v3054_v4, %v2975_v10 }
0x20e2   :  { %v3143_v12 = vadd.f32 %v3138_v50, %v3059_v26 }
0x20e4   :  { %v3231_v9 = vadd.f32 %v6701_v3, %v3143_v12 }
0x20e6   :  { %v3331_v27 = vadd.f32 %v3326_v42, %v3231_v9  ;;  %v4748_v9 = vmov 82  }
0x20e7   :  { %v6855_v12 = vpop.permute.xlu2 %3388  ;;  %4531 = vset.pattern.permute.xlu0 %v4748_v9  ;;  %v9095_v9 = vld [vmem:[#allocation28_spill] sm:$0xff] }
0x20ef   :  { %v6857_v63 = vpop.permute.xlu2 %3408 }
0x20f0   :  { %9091 = vst [vmem:[#allocation305_spill] sm:$0xff] %v6857_v63 }
0x20ff   :  { %v6825_v37 = vpop.permute.xlu0 %3384 }
0x2100   :  { %v6827_v11 = vpop.permute.xlu1 %3386 }
0x2101   :  { %9085 = vst [vmem:[#allocation273_spill] sm:$0xff] %v6827_v11 }
0x2107   :  { %v3405_v6 = vpop.permute.xlu0 %3404 }
0x2108   :  { %v6836_v31 = vpop.permute.xlu1 %3406 }
0x2109   :  { %9089 = vst [vmem:[#allocation291_spill] sm:$0xff] %v6836_v31  ;;  %v3410_v2 = vsel %vm9090_vm14, %v3405_v6, %v6836_v31  ;;  %v9097_v31 = vld [vmem:[#allocation34_spill] sm:$0xff] }
0x210a   :  { %v6840_v57 = vadd.f32 %v3410_v2, %v3331_v27  ;;  %v242_v3 = vsel %vm8606_vm1, %v9098_v54, %v9097_v31  ;;  %v582_v54 = vsel %vm541_vm5, %v9106_v29, %v9105_v13 }
0x210f   :  { %v3420_v56 = vpop.permute.xlu0 %3419 }
0x2110   :  { %v3441_v36 = vmul.f32 %v3420_v56, %v6525_v33  ;;  %v3423_v4 = vmul.f32 %v3420_v56, %v6530_v48  ;;  %v3422_v10 = vmul.f32 %v3420_v56, %v6532_v38  ;;  %v3440_v50 = vmul.f32 %v3420_v56, %v6541_v14 }
0x2111   :  { %v3424_v26 = vmul.f32 %v3420_v56, %v6543_v23  ;;  %v3442_v27 = vmul.f32 %v3420_v56, %v6551_v25 }
0x2112   :  { %3448 = vrot.lane.b32.xlu0 %v3441_v36, %s4686_s6  ;;  %3430 = vrot.lane.b32.xlu2 %v3423_v4, %s4686_s6 }
0x2113   :  { %3428 = vrot.lane.b32.xlu1 %v3422_v10, %s4686_s6 }
0x211a   :  { %3446 = vrot.lane.b32.xlu2 %v3440_v50, %s4686_s6 }
0x211b   :  { %3432 = vrot.lane.b32.xlu1 %v3424_v26, %s4686_s6 }
0x2122   :  { %3459 = vperm.xlu2 %4530, %v6497_v61  }
0x2123   :  { %3450 = vrot.lane.b32.xlu1 %v3442_v27, %s4686_s6  ;;  %v9094_v27 = vld [vmem:[#allocation18_spill] sm:$0xff] }
0x216c   :  { %v6859_v42 = vpop.permute.xlu2 %3430 }
0x216d   :  { %9092 = vst [vmem:[#allocation312_spill] sm:$0xff] %v6859_v42  ;;  %v9159_v42 = vld [vmem:[#allocation325_spill] sm:$0xff] }
0x2174   :  { %v6861_v6 = vpop.permute.xlu2 %3446 }
0x2175   :  { %9093 = vst [vmem:[#allocation319_spill] sm:$0xff] %v6861_v6  ;;  %v9162_v6 = vld [vmem:[#allocation407_spill] sm:$0xff] }
0x217c   :  { %v3460_v2 = vpop.permute.xlu2 %3459 }
0x217d   :  { %v3464_v36 = vmul.f32 %v3460_v2, %v6543_v23  ;;  %v3462_v4 = vmul.f32 %v3460_v2, %v6532_v38  ;;  %v3463_v56 = vmul.f32 %v3460_v2, %v6530_v48  ;;  %v3484_v10 = vmul.f32 %v3460_v2, %v6551_v25 }
0x217e   :  { %v3482_v50 = vmul.f32 %v3460_v2, %v6541_v14  ;;  %v3483_v26 = vmul.f32 %v3460_v2, %v6525_v33 }
0x217f   :  { %3472 = vrot.lane.b32.xlu2 %v3464_v36, %s4686_s6  ;;  %3468 = vrot.lane.b32.xlu0 %v3462_v4, %s4686_s6  ;;  %v156_v36 = vsel %vm115_vm0, %v9095_v9, %v9094_v27  ;;  %v9096_v4 = vld [vmem:[#allocation12_spill] sm:$0xff]  ;;  %v9104_v9 = vld [vmem:[#allocation121_spill] sm:$0xff] }
0x2180   :  { %3470 = vrot.lane.b32.xlu1 %v3463_v56, %s4686_s6  ;;  %v79_v56 = vmul.f32 %v9096_v4, %v4836_v34  ;;  %v497_v39 = vsel %vm456_vm4, %v9104_v9, %v9103_v53 }
0x2182   :  { %v161_v2 = vadd.f32 %v156_v36, %v79_v56  ;;  %v9107_v56 = vld [vmem:[#allocation58_spill] sm:$0xff] }
0x2184   :  { %v247_v63 = vadd.f32 %v242_v3, %v161_v2  ;;  %v9109_v2 = vld [vmem:[#allocation64_spill] sm:$0xff] }
0x2187   :  { %3492 = vrot.lane.b32.xlu2 %v3484_v10, %s4686_s6  ;;  %3488 = vrot.lane.b32.xlu0 %v3482_v50, %s4686_s6  ;;  %v9100_v10 = vld [vmem:[#allocation97_spill] sm:$0xff] }
0x2188   :  { %3490 = vrot.lane.b32.xlu1 %v3483_v26, %s4686_s6  ;;  %v327_v50 = vsel %vm286_vm2, %v9100_v10, %v9099_v51  ;;  %v9101_v26 = vld [vmem:[#allocation40_spill] sm:$0xff]  ;;  %v668_v10 = vsel %vm8605_vm6, %v9108_v22, %v9107_v56 }
0x2189   :  { %v412_v41 = vsel %vm371_vm3, %v9102_v17, %v9101_v26  ;;  %v332_v49 = vadd.f32 %v327_v50, %v247_v63  ;;  %v753_v17 = vsel %vm712_vm7, %v9110_v40, %v9109_v2  ;;  %v9111_v50 = vld [vmem:[#allocation70_spill] sm:$0xff]  ;;  %v1199_v40 = vsel %vm8573_vm11, %v9118_v30, %v9117_v60 }
0x218a   :  { %v838_v9 = vsel %vm8576_vm8, %v9112_v45, %v9111_v50  ;;  %v9121_v45 = vld [vmem:[#allocation118_spill] sm:$0xff]  ;;  %vm9130_vm11 = vcmask 793600   ;;  %vm9133_vm8 = vcmask 777216  }
0x218b   :  { %v417_v4 = vadd.f32 %v412_v41, %v332_v49  ;;  %v9113_v41 = vld [vmem:[#allocation76_spill] sm:$0xff] }
0x218c   :  { %v923_v29 = vsel %vm8570_vm9, %v9114_v1, %v9113_v41  ;;  %v9123_v1 = vld [vmem:[#allocation129_spill] sm:$0xff]  ;;  %vm9124_vm9 = vcmask 916480  }
0x218d   :  { %v502_v36 = vadd.f32 %v497_v39, %v417_v4  ;;  %v9115_v4 = vld [vmem:[#allocation87_spill] sm:$0xff] }
0x218e   :  { %v1008_v22 = vsel %vm8572_vm10, %v9116_v21, %v9115_v4  ;;  %v9126_v21 = vld [vmem:[#allocation140_spill] sm:$0xff]  ;;  %vm9127_vm10 = vcmask 900096  }
0x218f   :  { %3503 = vperm.xlu0 %4531, %v6497_v61   ;;  %v587_v3 = vadd.f32 %v582_v54, %v502_v36 }
0x2191   :  { %v673_v63 = vadd.f32 %v668_v10, %v587_v3  ;;  %v9119_v10 = vld [vmem:[#allocation198_spill] sm:$0xff] }
0x2193   :  { %v758_v49 = vadd.f32 %v753_v17, %v673_v63  ;;  %v1284_v17 = vsel %vm9090_vm14, %v9121_v45, %v9120_v52  ;;  %v1625_v45 = vsel %vm9133_vm8, %v9132_v7, %v9131_v62  ;;  %vm9136_vm14 = vcmask 760832  }
0x2194   :  { %vm9148_vm8 = vcmask 498688  }
0x2195   :  { %v843_v39 = vadd.f32 %v838_v9, %v758_v49  ;;  %v1369_v9 = vsel %vm9124_vm9, %v9123_v1, %v9122_v28  ;;  %vm9139_vm9 = vcmask 654336  }
0x2197   :  { %v928_v54 = vadd.f32 %v923_v29, %v843_v39  ;;  %v1454_v29 = vsel %vm9127_vm10, %v9126_v21, %v9125_v19  ;;  %vm9170_vm10 = vcmask 629760  }
0x2199   :  { %v1013_v36 = vadd.f32 %v1008_v22, %v928_v54  ;;  %v9128_v22 = vld [vmem:[#allocation235_spill] sm:$0xff] }
0x219a   :  { %v9129_v54 = vld [vmem:[#allocation151_spill] sm:$0xff] }
0x219b   :  { %v1101_v3 = vadd.f32 %v9119_v10, %v1013_v36  ;;  %v1540_v30 = vsel %vm9130_vm11, %v9129_v54, %v9128_v22  ;;  %vm9173_vm11 = vcmask 523264  }
0x219d   :  { %v1204_v63 = vadd.f32 %v1199_v40, %v1101_v3  ;;  %v9134_v3 = vld [vmem:[#allocation247_spill] sm:$0xff] }
0x219e   :  { %v1710_v1 = vsel %vm9136_vm14, %v9135_v32, %v9134_v3  ;;  %vm9175_vm14 = vcmask 506880  }
0x219f   :  { %v1289_v49 = vadd.f32 %v1284_v17, %v1204_v63  ;;  %v9137_v63 = vld [vmem:[#allocation255_spill] sm:$0xff] }
0x21a0   :  { %v1795_v21 = vsel %vm9139_vm9, %v9138_v44, %v9137_v63  ;;  %vm9179_vm9 = vcmask 1039360  }
0x21a1   :  { %v1374_v39 = vadd.f32 %v1369_v9, %v1289_v49  ;;  %v9140_v49 = vld [vmem:[#allocation260_spill] sm:$0xff] }
0x21a2   :  { %v1880_v54 = vsel %vm1839_vm15, %v9141_v35, %v9140_v49 }
0x21a3   :  { %v1459_v36 = vadd.f32 %v1454_v29, %v1374_v39  ;;  %v9142_v39 = vld [vmem:[#allocation270_spill] sm:$0xff] }
0x21a4   :  { %v1966_v7 = vsel %vm8607_vm12, %v9143_v0, %v9142_v39 }
0x21a5   :  { %v1545_v40 = vadd.f32 %v1540_v30, %v1459_v36  ;;  %v9144_v36 = vld [vmem:[#allocation278_spill] sm:$0xff] }
0x21a6   :  { %v2051_v32 = vsel %vm2010_vm13, %v9145_v55, %v9144_v36 }
0x21a7   :  { %v1630_v17 = vadd.f32 %v1625_v45, %v1545_v40  ;;  %v9146_v40 = vld [vmem:[#allocation283_spill] sm:$0xff] }
0x21a8   :  { %v2136_v44 = vsel %vm9148_vm8, %v9147_v59, %v9146_v40  ;;  %vm9180_vm8 = vcmask 1022976  }
0x21a9   :  { %v1715_v9 = vadd.f32 %v1710_v1, %v1630_v17  ;;  %v9149_v17 = vld [vmem:[#allocation269_spill] sm:$0xff] }
0x21aa   :  { %v2202_v24 = vmul.f32 %v9149_v17, %v9060_v46  ;;  %v9158_v17 = vld [vmem:[#allocation391_spill] sm:$0xff] }
0x21ab   :  { %v1800_v29 = vadd.f32 %v1795_v21, %v1715_v9  ;;  %v9150_v21 = vld [vmem:[#allocation298_spill] sm:$0xff] }
0x21ac   :  { %v9151_v9 = vld [vmem:[#allocation290_spill] sm:$0xff] }
0x21ad   :  { %v1885_v30 = vadd.f32 %v1880_v54, %v1800_v29  ;;  %v2278_v16 = vsel %vm115_vm0, %v9151_v9, %v9150_v21  ;;  %v6953_v54 = vpop.permute.xlu1 %3428  ;;  %v9153_v29 = vld [vmem:[#allocation304_spill] sm:$0xff]  ;;  %v9160_v9 = vld [vmem:[#allocation397_spill] sm:$0xff] }
0x21ae   :  { %9152 = vst [vmem:[#allocation326_spill] sm:$0xff] %v6953_v54  ;;  %v2362_v55 = vsel %vm8606_vm1, %v9154_v58, %v9153_v29  ;;  %v9161_v54 = vld [vmem:[#allocation332_spill] sm:$0xff] }
0x21af   :  { %v1971_v45 = vadd.f32 %v1966_v7, %v1885_v30  ;;  %v9155_v30 = vld [vmem:[#allocation311_spill] sm:$0xff]  ;;  %v2698_v58 = vsel %vm541_vm5, %v9162_v6, %v9161_v54 }
0x21b0   :  { %v2446_v59 = vsel %vm286_vm2, %v9156_v47, %v9155_v30  ;;  %v9165_v47 = vld [vmem:[#allocation413_spill] sm:$0xff]  ;;  %v9172_v6 = vld [vmem:[#allocation431_spill] sm:$0xff] }
0x21b1   :  { %v2056_v1 = vadd.f32 %v2051_v32, %v1971_v45  ;;  %v9157_v45 = vld [vmem:[#allocation318_spill] sm:$0xff] }
0x21b3   :  { %v2141_v35 = vadd.f32 %v2136_v44, %v2056_v1  ;;  %v2530_v44 = vsel %vm371_vm3, %v9158_v17, %v9157_v45  ;;  %v9167_v17 = vld [vmem:[#allocation418_spill] sm:$0xff]  ;;  %v9168_v45 = vld [vmem:[#allocation353_spill] sm:$0xff] }
0x21b5   :  { %v2205_v0 = vadd.f32 %v2202_v24, %v2141_v35  ;;  %v2614_v24 = vsel %vm456_vm4, %v9160_v9, %v9159_v42  ;;  %v9169_v9 = vld [vmem:[#allocation426_spill] sm:$0xff]  ;;  %v9171_v42 = vld [vmem:[#allocation360_spill] sm:$0xff] }
0x21b7   :  { %v2283_v7 = vadd.f32 %v2278_v16, %v2205_v0  ;;  %v6970_v0 = vpop.permute.xlu1 %3432 }
0x21b8   :  { %9163 = vst [vmem:[#allocation333_spill] sm:$0xff] %v6970_v0  ;;  %v9174_v0 = vld [vmem:[#allocation370_spill] sm:$0xff] }
0x21b9   :  { %v2367_v32 = vadd.f32 %v2362_v55, %v2283_v7  ;;  %v2782_v55 = vsel %vm8605_vm6, %v9165_v47, %v9164_v43  ;;  %v3118_v47 = vsel %vm9175_vm14, %v6672_v8, %v9174_v0 }
0x21bb   :  { %v2451_v1 = vadd.f32 %v2446_v59, %v2367_v32  ;;  %v2866_v59 = vsel %vm712_vm7, %v9167_v17, %v9166_v5 }
0x21bd   :  { %v2535_v35 = vadd.f32 %v2530_v44, %v2451_v1  ;;  %v2950_v44 = vsel %vm9170_vm10, %v9169_v9, %v9168_v45  ;;  %v3390_v9 = vsel %vm9180_vm8, %v6825_v37, %v6827_v11  ;;  %vm9181_vm10 = vcmask 916480   ;;  %v9210_v11 = vld [vmem:[#allocation133_spill] sm:$0xff] }
0x21be   :  { %vm9186_vm14 = vmmov %vm9181_vm10 }
0x21bf   :  { %v2619_v16 = vadd.f32 %v2614_v24, %v2535_v35  ;;  %v3034_v24 = vsel %vm9173_vm11, %v9172_v6, %v9171_v42  ;;  %v6989_v43 = vpop.permute.xlu1 %3450  ;;  %vm9182_vm11 = vmmov %vm9181_vm10 }
0x21c0   :  { %9177 = vst [vmem:[#allocation347_spill] sm:$0xff] %v6989_v43 }
0x21c1   :  { %v2703_v7 = vadd.f32 %v2698_v58, %v2619_v16  ;;  %v6987_v58 = vpop.permute.xlu0 %3448 }
0x21c2   :  { %9176 = vst [vmem:[#allocation340_spill] sm:$0xff] %v6987_v58 }
0x21c3   :  { %v2787_v32 = vadd.f32 %v2782_v55, %v2703_v7  ;;  %v9178_v7 = vld [vmem:[#allocation423_spill] sm:$0xff] }
0x21c4   :  { %v3306_v17 = vsel %vm9179_vm9, %v9178_v7, %v6744_v20  ;;  %vm9190_vm9 = vcmask 900096  }
0x21c5   :  { %v2871_v1 = vadd.f32 %v2866_v59, %v2787_v32  ;;  %v4749_v32 = vmov 83   ;;  %vm9196_vm8 = vmmov %vm9190_vm9 }
0x21c6   :  { %4532 = vset.pattern.permute.xlu2 %v4749_v32 }
0x21c7   :  { %v2955_v35 = vadd.f32 %v2950_v44, %v2871_v1 }
0x21c9   :  { %v3039_v16 = vadd.f32 %v3034_v24, %v2955_v35 }
0x21cb   :  { %v3123_v55 = vadd.f32 %v3118_v47, %v3039_v16 }
0x21cd   :  { %v3209_v59 = vadd.f32 %v6699_v18, %v3123_v55 }
0x21cf   :  { %v3311_v44 = vadd.f32 %v3306_v17, %v3209_v59 }
0x21d1   :  { %v3395_v1 = vadd.f32 %v3390_v9, %v3311_v44 }
0x21d9   :  { %v6998_v6 = vpop.permute.xlu2 %3472 }
0x21f1   :  { %v3469_v8 = vpop.permute.xlu0 %3468 }
0x21f2   :  { %v3471_v24 = vpop.permute.xlu1 %3470 }
0x21f3   :  { %v3474_v35 = vsel %vm9181_vm10, %v3469_v8, %v3471_v24  ;;  %v7003_v47 = vsel %vm9182_vm11, %v3471_v24, %v6998_v6  ;;  %v7027_v24 = vpop.permute.xlu2 %3492  ;;  %vm9216_vm10 = vcmask 629760   ;;  %vm9218_vm11 = vcmask 523264  }
0x21f4   :  { %9183 = vst [vmem:[#allocation354_spill] sm:$0xff] %v7003_v47  ;;  %v7005_v16 = vadd.f32 %v3474_v35, %v3395_v1 }
0x21f5   :  { %9188 = vst [vmem:[#allocation18_spill] sm:$0xff] %v7027_v24  ;;  %v9194_v24 = vld [vmem:[#allocation93_spill] sm:$0xff] }
0x21f6   :  { %9184 = vst [vmem:[#allocation361_spill] sm:$0xff] %v7005_v16 }
0x21f9   :  { %v3489_v55 = vpop.permute.xlu0 %3488 }
0x21fa   :  { %v7007_v7 = vpop.permute.xlu1 %3490 }
0x21fb   :  { %9185 = vst [vmem:[#allocation371_spill] sm:$0xff] %v7007_v7  ;;  %v3494_v37 = vsel %vm9186_vm14, %v3489_v55, %v7007_v7  ;;  %v4750_v55 = vmov 84   ;;  %vm8604_vm14 = vcmask 7168  }
0x21fc   :  { %v7012_v17 = vadd.f32 %v3494_v37, %v6840_v57  ;;  %4533 = vset.pattern.permute.xlu0 %v4750_v55 }
0x21fe   :  { %9187 = vst [vmem:[#allocation425_spill] sm:$0xff] %v7012_v17  ;;  %v9204_v17 = vld [vmem:[#allocation181_spill] sm:$0xff] }
0x2201   :  { %v3504_v59 = vpop.permute.xlu0 %3503 }
0x2202   :  { %v3525_v32 = vmul.f32 %v3504_v59, %v6525_v33  ;;  %v3507_v9 = vmul.f32 %v3504_v59, %v6530_v48  ;;  %v3506_v44 = vmul.f32 %v3504_v59, %v6532_v38  ;;  %v3524_v8 = vmul.f32 %v3504_v59, %v6541_v14 }
0x2203   :  { %v3508_v1 = vmul.f32 %v3504_v59, %v6543_v23  ;;  %v3526_v57 = vmul.f32 %v3504_v59, %v6551_v25 }
0x2204   :  { %3532 = vrot.lane.b32.xlu0 %v3525_v32, %s4689_s7  ;;  %3514 = vrot.lane.b32.xlu2 %v3507_v9, %s4689_s7 }
0x2205   :  { %3512 = vrot.lane.b32.xlu1 %v3506_v44, %s4689_s7 }
0x220c   :  { %3530 = vrot.lane.b32.xlu2 %v3524_v8, %s4689_s7 }
0x220d   :  { %3516 = vrot.lane.b32.xlu1 %v3508_v1, %s4689_s7 }
0x2214   :  { %3543 = vperm.xlu2 %4532, %v6497_v61  }
0x2215   :  { %3534 = vrot.lane.b32.xlu1 %v3526_v57, %s4689_s7 }
0x225e   :  { %v3515_v35 = vpop.permute.xlu2 %3514 }
0x2266   :  { %v7029_v37 = vpop.permute.xlu2 %3530 }
0x2267   :  { %9189 = vst [vmem:[#allocation28_spill] sm:$0xff] %v7029_v37 }
0x226e   :  { %v3544_v32 = vpop.permute.xlu2 %3543 }
0x226f   :  { %v3548_v9 = vmul.f32 %v3544_v32, %v6543_v23  ;;  %v3546_v44 = vmul.f32 %v3544_v32, %v6532_v38  ;;  %v3547_v8 = vmul.f32 %v3544_v32, %v6530_v48  ;;  %v3568_v1 = vmul.f32 %v3544_v32, %v6551_v25  ;;  %v9195_v25 = vld [vmem:[#allocation104_spill] sm:$0xff]  ;;  %v9202_v48 = vld [vmem:[#allocation159_spill] sm:$0xff] }
0x2270   :  { %v3566_v57 = vmul.f32 %v3544_v32, %v6541_v14  ;;  %v3567_v43 = vmul.f32 %v3544_v32, %v6525_v33  ;;  %v9198_v32 = vld [vmem:[#allocation115_spill] sm:$0xff]  ;;  %v9200_v14 = vld [vmem:[#allocation137_spill] sm:$0xff]  ;;  %v9201_v38 = vld [vmem:[#allocation148_spill] sm:$0xff] }
0x2271   :  { %3556 = vrot.lane.b32.xlu2 %v3548_v9, %s4689_s7  ;;  %3552 = vrot.lane.b32.xlu0 %v3546_v44, %s4689_s7  ;;  %v9192_v9 = vld [vmem:[#allocation14_spill] sm:$0xff] }
0x2272   :  { %3554 = vrot.lane.b32.xlu1 %v3547_v8, %s4689_s7  ;;  %v81_v7 = vmul.f32 %v9192_v9, %v4836_v34  ;;  %v9193_v44 = vld [vmem:[#allocation82_spill] sm:$0xff] }
0x2273   :  { %v9203_v33 = vld [vmem:[#allocation170_spill] sm:$0xff] }
0x2274   :  { %v163_v8 = vadd.f32 %v9193_v44, %v81_v7 }
0x2276   :  { %v249_v37 = vadd.f32 %v9194_v24, %v163_v8 }
0x2277   :  { %v3513_v59 = vpop.permute.xlu1 %3512 }
0x2278   :  { %v7040_v55 = vsel %vm9190_vm9, %v3513_v59, %v3515_v35  ;;  %v334_v23 = vadd.f32 %v9195_v25, %v249_v37  ;;  %v9205_v37 = vld [vmem:[#allocation192_spill] sm:$0xff]  ;;  %vm9220_vm9 = vcmask 506880  }
0x2279   :  { %9191 = vst [vmem:[#allocation12_spill] sm:$0xff] %v7040_v55  ;;  %3576 = vrot.lane.b32.xlu2 %v3568_v1, %s4689_s7  ;;  %3572 = vrot.lane.b32.xlu0 %v3566_v57, %s4689_s7  ;;  %v9199_v57 = vld [vmem:[#allocation126_spill] sm:$0xff] }
0x227a   :  { %3574 = vrot.lane.b32.xlu1 %v3567_v43, %s4689_s7  ;;  %v419_v1 = vadd.f32 %v9198_v32, %v334_v23  ;;  %v9207_v23 = vld [vmem:[#allocation11_spill] sm:$0xff] }
0x227c   :  { %v504_v55 = vadd.f32 %v9199_v57, %v419_v1  ;;  %v80_v1 = vmul.f32 %v9207_v23, %v4836_v34 }
0x227e   :  { %v589_v9 = vadd.f32 %v9200_v14, %v504_v55  ;;  %v9208_v55 = vld [vmem:[#allocation111_spill] sm:$0xff] }
0x227f   :  { %v3517_v58 = vpop.permute.xlu1 %3516 }
0x2280   :  { %v7052_v59 = vsel %vm9196_vm8, %v3515_v35, %v3517_v58  ;;  %v675_v43 = vadd.f32 %v9201_v38, %v589_v9  ;;  %v9206_v58 = vld [vmem:[#allocation100_spill] sm:$0xff]  ;;  %v243_v9 = vsel %vm8606_vm1, %v9097_v31, %v9194_v24  ;;  %v498_v31 = vsel %vm456_vm4, %v9103_v53, %v9199_v57 }
0x2281   :  { %9197 = vst [vmem:[#allocation34_spill] sm:$0xff] %v7052_v59  ;;  %3587 = vperm.xlu0 %4533, %v6497_v61   ;;  %v157_v61 = vsel %vm115_vm0, %v9094_v27, %v9193_v44  ;;  %v413_v27 = vsel %vm371_vm3, %v9101_v26, %v9198_v32  ;;  %v669_v26 = vsel %vm8605_vm6, %v9107_v56, %v9201_v38  ;;  %vm9224_vm8 = vcmask 1039360  }
0x2282   :  { %v760_v7 = vadd.f32 %v9202_v48, %v675_v43  ;;  %v162_v43 = vadd.f32 %v157_v61, %v80_v1  ;;  %v9213_v1 = vld [vmem:[#allocation166_spill] sm:$0xff]  ;;  %v754_v53 = vsel %vm712_vm7, %v9109_v2, %v9202_v48  ;;  %v924_v38 = vsel %vm9218_vm11, %v9113_v41, %v9204_v17  ;;  %v9223_v41 = vld [vmem:[#allocation264_spill] sm:$0xff] }
0x2283   :  { %v1009_v48 = vsel %vm9220_vm9, %v9115_v4, %v9205_v37  ;;  %vm9227_vm11 = vcmask 916480   ;;  %vm9229_vm9 = vcmask 900096  }
0x2284   :  { %v845_v8 = vadd.f32 %v9203_v33, %v760_v7  ;;  %v9209_v7 = vld [vmem:[#allocation122_spill] sm:$0xff] }
0x2286   :  { %v930_v16 = vadd.f32 %v9204_v17, %v845_v8 }
0x2288   :  { %v1015_v47 = vadd.f32 %v9205_v37, %v930_v16  ;;  %v248_v16 = vadd.f32 %v243_v9, %v162_v43 }
0x228a   :  { %v1103_v35 = vadd.f32 %v9206_v58, %v1015_v47  ;;  %v328_v47 = vsel %vm286_vm2, %v9099_v51, %v9195_v25  ;;  %v583_v25 = vsel %vm541_vm5, %v9105_v13, %v9200_v14  ;;  %v839_v13 = vsel %vm9216_vm10, %v9111_v50, %v9203_v33  ;;  %v9222_v33 = vld [vmem:[#allocation268_spill] sm:$0xff] }
0x228b   :  { %v333_v44 = vadd.f32 %v328_v47, %v248_v16  ;;  %v9217_v16 = vld [vmem:[#allocation199_spill] sm:$0xff]  ;;  %v2204_v50 = vmul.f32 %v9222_v33, %v9060_v46  ;;  %vm9225_vm10 = vcmask 1022976  }
0x228c   :  { %v1206_v59 = vadd.f32 %v9208_v55, %v1103_v35  ;;  %v9211_v35 = vld [vmem:[#allocation144_spill] sm:$0xff]  ;;  %v1285_v4 = vsel %vm9225_vm10, %v9120_v52, %v9209_v7  ;;  %vm9233_vm10 = vcmask 777216   ;;  %v9239_v33 = vld [vmem:[#allocation419_spill] sm:$0xff] }
0x228d   :  { %v418_v24 = vadd.f32 %v413_v27, %v333_v44  ;;  %v9219_v44 = vld [vmem:[#allocation213_spill] sm:$0xff] }
0x228e   :  { %v1291_v8 = vadd.f32 %v9209_v7, %v1206_v59  ;;  %v9212_v59 = vld [vmem:[#allocation155_spill] sm:$0xff] }
0x228f   :  { %v503_v51 = vadd.f32 %v498_v31, %v418_v24  ;;  %v9221_v31 = vld [vmem:[#allocation246_spill] sm:$0xff] }
0x2290   :  { %v1376_v20 = vadd.f32 %v9210_v11, %v1291_v8  ;;  %v9215_v8 = vld [vmem:[#allocation188_spill] sm:$0xff] }
0x2291   :  { %v588_v32 = vadd.f32 %v583_v25, %v503_v51  ;;  %v1200_v51 = vsel %vm9224_vm8, %v9117_v60, %v9208_v55  ;;  %v1455_v60 = vsel %vm9229_vm9, %v9125_v19, %v9211_v35  ;;  %vm9231_vm8 = vcmask 793600  }
0x2292   :  { %v1461_v23 = vadd.f32 %v9211_v35, %v1376_v20  ;;  %v9214_v20 = vld [vmem:[#allocation177_spill] sm:$0xff]  ;;  %v1541_v52 = vsel %vm9231_vm8, %v9128_v22, %v9212_v59  ;;  %vm9237_vm9 = vcmask 654336   ;;  %vm9242_vm8 = vcmask 498688  }
0x2293   :  { %v674_v57 = vadd.f32 %v669_v26, %v588_v32  ;;  %v9226_v32 = vld [vmem:[#allocation365_spill] sm:$0xff]  ;;  %v1796_v22 = vsel %vm9237_vm9, %v9137_v63, %v9215_v8  ;;  %v2052_v63 = vsel %vm2010_vm13, %v9144_v36, %v9221_v31  ;;  %vm9251_vm9 = vcmask 506880  }
0x2294   :  { %v1547_v61 = vadd.f32 %v9212_v59, %v1461_v23  ;;  %v2279_v36 = vsel %vm115_vm0, %v9150_v21, %v9226_v32 }
0x2295   :  { %v759_v14 = vadd.f32 %v754_v53, %v674_v57  ;;  %v9228_v53 = vld [vmem:[#allocation374_spill] sm:$0xff] }
0x2296   :  { %v1632_v9 = vadd.f32 %v9213_v1, %v1547_v61  ;;  %v1097_v61 = vsel %vm8604_vm14, %v9119_v10, %v9206_v58  ;;  %v1370_v10 = vsel %vm9227_vm11, %v9122_v28, %v9210_v11  ;;  %v1626_v28 = vsel %vm9233_vm10, %v9131_v62, %v9213_v1 }
0x2297   :  { %v844_v56 = vadd.f32 %v839_v13, %v759_v14  ;;  %v9232_v14 = vld [vmem:[#allocation393_spill] sm:$0xff]  ;;  %vm9235_vm11 = vcmask 760832   ;;  %v1881_v62 = vsel %vm1839_vm15, %v9140_v49, %v9217_v16  ;;  %v2137_v49 = vsel %vm9242_vm8, %v9146_v40, %v9223_v41 }
0x2298   :  { %v1717_v43 = vadd.f32 %v9214_v20, %v1632_v9  ;;  %v1711_v19 = vsel %vm9235_vm11, %v9134_v3, %v9214_v20  ;;  %v1967_v3 = vsel %vm8607_vm12, %v9142_v39, %v9219_v44  ;;  %v2363_v40 = vsel %vm8606_vm1, %v9153_v29, %v9228_v53  ;;  %v9247_v29 = vld [vmem:[#allocation325_spill] sm:$0xff] }
0x2299   :  { %v929_v2 = vadd.f32 %v924_v38, %v844_v56  ;;  %v9234_v38 = vld [vmem:[#allocation399_spill] sm:$0xff]  ;;  %vm9249_vm10 = vcmask 629760   ;;  %vm9250_vm11 = vcmask 523264   ;;  %vm9255_vm8 = vcmask 1039360  }
0x229a   :  { %v1802_v47 = vadd.f32 %v9215_v8, %v1717_v43 }
0x229b   :  { %v1014_v25 = vadd.f32 %v1009_v48, %v929_v2  ;;  %v9238_v2 = vld [vmem:[#allocation414_spill] sm:$0xff] }
0x229c   :  { %v1887_v27 = vadd.f32 %v9217_v16, %v1802_v47  ;;  %v9230_v47 = vld [vmem:[#allocation381_spill] sm:$0xff] }
0x229d   :  { %v1102_v9 = vadd.f32 %v1097_v61, %v1014_v25  ;;  %v9240_v61 = vld [vmem:[#allocation427_spill] sm:$0xff] }
0x229e   :  { %v1973_v23 = vadd.f32 %v9219_v44, %v1887_v27 }
0x229f   :  { %v1205_v37 = vadd.f32 %v1200_v51, %v1102_v9  ;;  %v9243_v9 = vld [vmem:[#allocation267_spill] sm:$0xff] }
0x22a0   :  { %v2058_v24 = vadd.f32 %v9221_v31, %v1973_v23  ;;  %v9236_v23 = vld [vmem:[#allocation409_spill] sm:$0xff] }
0x22a1   :  { %v1290_v58 = vadd.f32 %v1285_v4, %v1205_v37  ;;  %v9244_v4 = vld [vmem:[#allocation402_spill] sm:$0xff] }
0x22a2   :  { %v2143_v17 = vadd.f32 %v9223_v41, %v2058_v24 }
0x22a3   :  { %v1375_v55 = vadd.f32 %v1370_v10, %v1290_v58 }
0x22a4   :  { %v2207_v26 = vadd.f32 %v2204_v50, %v2143_v17  ;;  %v9241_v17 = vld [vmem:[#allocation432_spill] sm:$0xff] }
0x22a5   :  { %v1460_v7 = vadd.f32 %v1455_v60, %v1375_v55 }
0x22a6   :  { %v2285_v43 = vadd.f32 %v9226_v32, %v2207_v26  ;;  %v2203_v26 = vmul.f32 %v9243_v9, %v9060_v46 }
0x22a7   :  { %v1546_v11 = vadd.f32 %v1541_v52, %v1460_v7 }
0x22a8   :  { %v2369_v57 = vadd.f32 %v9228_v53, %v2285_v43  ;;  %v9245_v43 = vld [vmem:[#allocation435_spill] sm:$0xff]  ;;  %v2615_v53 = vsel %vm456_vm4, %v9247_v29, %v9234_v38  ;;  %v9271_v29 = vld [vmem:[#allocation77_spill] sm:$0xff] }
0x22a9   :  { %v1631_v35 = vadd.f32 %v1626_v28, %v1546_v11 }
0x22aa   :  { %v2453_v13 = vadd.f32 %v9230_v47, %v2369_v57  ;;  %v2447_v57 = vsel %vm286_vm2, %v9155_v30, %v9230_v47  ;;  %v2699_v30 = vsel %vm541_vm5, %v9161_v54, %v9236_v23  ;;  %v3035_v54 = vsel %vm9250_vm11, %v9171_v42, %v9241_v17 }
0x22ab   :  { %v1716_v59 = vadd.f32 %v1711_v19, %v1631_v35  ;;  %vm9259_vm11 = vcmask 900096  }
0x22ac   :  { %v2537_v27 = vadd.f32 %v9232_v14, %v2453_v13  ;;  %v9246_v13 = vld [vmem:[#allocation318_spill] sm:$0xff] }
0x22ad   :  { %v1801_v1 = vadd.f32 %v1796_v22, %v1716_v59  ;;  %v2531_v21 = vsel %vm371_vm3, %v9246_v13, %v9232_v14  ;;  %v2867_v14 = vsel %vm712_vm7, %v9166_v5, %v9239_v33  ;;  %v3205_v5 = vsel %vm8604_vm14, %v6699_v18, %v9244_v4  ;;  %v7207_v22 = vpop.permute.xlu0 %3532  ;;  %v9258_v18 = vld [vmem:[#allocation354_spill] sm:$0xff] }
0x22ae   :  { %v2621_v56 = vadd.f32 %v9234_v38, %v2537_v27  ;;  %v2951_v38 = vsel %vm9249_vm10, %v9168_v45, %v9240_v61  ;;  %9252 = vst [vmem:[#allocation89_spill] sm:$0xff] %v7207_v22  ;;  %v9254_v45 = vld [vmem:[#allocation447_spill] sm:$0xff]  ;;  %vm9257_vm10 = vcmask 1022976   ;;  %vm9317_vm14 = vcmask 523264  }
0x22af   :  { %v1886_v20 = vadd.f32 %v1881_v62, %v1801_v1  ;;  %v9256_v62 = vld [vmem:[#allocation273_spill] sm:$0xff]  ;;  %v57_v13 = vld [vmem:[#allocation5 + $0x4] ss:$8 sm:$0x3] }
0x22b0   :  { %v2705_v48 = vadd.f32 %v9236_v23, %v2621_v56  ;;  %v3119_v23 = vsel %vm9251_vm9, %v9174_v0, %v6676_v15  ;;  %v3391_v1 = vsel %vm9257_vm10, %v9256_v62, %v6855_v12  ;;  %v4751_v0 = vmov 85   ;;  %vm9260_vm9 = vmmov %vm9259_vm11  ;;  %v9282_v62 = vld [vmem:[#allocation27_spill] sm:$0xff] }
0x22b1   :  { %v1972_v8 = vadd.f32 %v1967_v3, %v1886_v20  ;;  %4534 = vset.pattern.permute.xlu2 %v4751_v0  ;;  %vm200_vm10 = vcmask 1014784  }
0x22b2   :  { %v2789_v24 = vadd.f32 %v9238_v2, %v2705_v48 }
0x22b3   :  { %v2057_v16 = vadd.f32 %v2052_v63, %v1972_v8  ;;  %v9261_v63 = vld [vmem:[#allocation361_spill] sm:$0xff] }
0x22b4   :  { %v2873_v50 = vadd.f32 %v9239_v33, %v2789_v24  ;;  %v3307_v24 = vsel %vm9255_vm8, %v9254_v45, %v9245_v43  ;;  %vm9262_vm8 = vmmov %vm9260_vm9  ;;  %v9280_v45 = vld [vmem:[#allocation25_spill] sm:$0xff] }
0x22b5   :  { %v2142_v44 = vadd.f32 %v2137_v49, %v2057_v16  ;;  %v9263_v16 = vld [vmem:[#allocation425_spill] sm:$0xff] }
0x22b6   :  { %v2957_v25 = vadd.f32 %v9240_v61, %v2873_v50 }
0x22b7   :  { %v2206_v31 = vadd.f32 %v2203_v26, %v2142_v44 }
0x22b8   :  { %v3041_v51 = vadd.f32 %v9241_v17, %v2957_v25 }
0x22b9   :  { %v2284_v41 = vadd.f32 %v2279_v36, %v2206_v31  ;;  %v9266_v36 = vld [vmem:[#allocation387_spill] sm:$0xff] }
0x22ba   :  { %v3125_v39 = vadd.f32 %v6676_v15, %v3041_v51 }
0x22bb   :  { %v2368_v60 = vadd.f32 %v2363_v40, %v2284_v41  ;;  %v9268_v40 = vld [vmem:[#allocation390_spill] sm:$0xff] }
0x22bc   :  { %v3211_v37 = vadd.f32 %v9244_v4, %v3125_v39  ;;  %v9264_v39 = vld [vmem:[#allocation385_spill] sm:$0xff]  ;;  %v9265_v4 = vld [vmem:[#allocation386_spill] sm:$0xff] }
0x22bd   :  { %v2452_v52 = vadd.f32 %v2447_v57, %v2368_v60  ;;  %v7243_v60 = vld [vmem:[#allocation2] sm:$0xf] }
0x22be   :  { %v3313_v10 = vadd.f32 %v9245_v43, %v3211_v37  ;;  %v9267_v43 = vld [vmem:[#allocation389_spill] sm:$0xff] }
0x22bf   :  { %v2536_v27 = vadd.f32 %v2531_v21, %v2452_v52  ;;  %v9270_v52 = vld [vmem:[#allocation22_spill] sm:$0xff] }
0x22c0   :  { %v3397_v58 = vadd.f32 %v6855_v12, %v3313_v10 }
0x22c1   :  { %v2620_v47 = vadd.f32 %v2615_v53, %v2536_v27  ;;  %v116_v53 = vsel %vm115_vm0, %v9271_v29, %v9270_v52  ;;  %v9272_v27 = vld [vmem:[#allocation26_spill] sm:$0xff]  ;;  %v9294_v29 = vld [vmem:[#allocation48_spill] sm:$0xff] }
0x22c2   :  { %v3481_v55 = vadd.f32 %v6998_v6, %v3397_v58  ;;  %v9248_v6 = vld [vmem:[#allocation339_spill] sm:$0xff]  ;;  %v9269_v58 = vld [vmem:[#allocation392_spill] sm:$0xff] }
0x22c3   :  { %v2783_v28 = vsel %vm8605_vm6, %v9248_v6, %v9238_v2  ;;  %v2704_v11 = vadd.f32 %v2699_v30, %v2620_v47  ;;  %v7209_v2 = vpop.permute.xlu1 %3534  ;;  %v9273_v30 = vld [vmem:[#allocation78_spill] sm:$0xff]  ;;  %v9274_v6 = vld [vmem:[#allocation16_spill] sm:$0xff]  ;;  %vm9320_vm6 = vmmov %vm9317_vm14 }
0x22c4   :  { %9253 = vst [vmem:[#allocation37_spill] sm:$0xff] %v7209_v2  ;;  %v134_v47 = vsel %vm115_vm0, %v9273_v30, %v9272_v27  ;;  %v9295_v30 = vld [vmem:[#allocation131_spill] sm:$0xff] }
0x22c5   :  { %v2788_v56 = vadd.f32 %v2783_v28, %v2704_v11 }
0x22c7   :  { %v2872_v19 = vadd.f32 %v2867_v14, %v2788_v56  ;;  %v9275_v14 = vld [vmem:[#allocation84_spill] sm:$0xff] }
0x22c8   :  { %v9276_v56 = vld [vmem:[#allocation20_spill] sm:$0xff] }
0x22c9   :  { %v2956_v35 = vadd.f32 %v2951_v38, %v2872_v19  ;;  %v201_v38 = vsel %vm200_vm10, %v9276_v56, %v9275_v14  ;;  %v9277_v19 = vld [vmem:[#allocation88_spill] sm:$0xff] }
0x22cb   :  { %v3557_v32 = vpop.permute.xlu2 %3556  ;;  %v3040_v48 = vadd.f32 %v3035_v54, %v2956_v35  ;;  %v9278_v54 = vld [vmem:[#allocation21_spill] sm:$0xff] }
0x22cc   :  { %v7181_v7 = vadd.f32 %v3557_v32, %v3481_v55  ;;  %v46_v55 = vld [vmem:[#allocation5] ss:$8 sm:$0x3]  ;;  %v219_v35 = vsel %vm200_vm10, %v9278_v54, %v9277_v19 }
0x22cd   :  { %v3124_v59 = vadd.f32 %v3119_v23, %v3040_v48  ;;  %v48_v21 = vperm.slane %v46_v55, 0 }
0x22cf   :  { %v3210_v42 = vadd.f32 %v3205_v5, %v3124_v59  ;;  %v52_v28 = vmul.f32 %v48_v21, %v9274_v6  ;;  %v49_v5 = vperm.slane %v46_v55, 1  ;;  %v9279_v59 = vld [vmem:[#allocation95_spill] sm:$0xff] }
0x22d1   :  { %v3312_v15 = vadd.f32 %v3307_v24, %v3210_v42  ;;  %v120_v23 = vadd.f32 %v116_v53, %v52_v28  ;;  %v287_v24 = vsel %vm286_vm2, %v9280_v45, %v9279_v59  ;;  %v9281_v42 = vld [vmem:[#allocation96_spill] sm:$0xff]  ;;  %v9301_v45 = vld [vmem:[#allocation55_spill] sm:$0xff] }
0x22d3   :  { %v3396_v33 = vadd.f32 %v3391_v1, %v3312_v15  ;;  %v305_v1 = vsel %vm286_vm2, %v9282_v62, %v9281_v42  ;;  %v205_v15 = vadd.f32 %v201_v38, %v120_v23  ;;  %v9299_v23 = vld [vmem:[#allocation54_spill] sm:$0xff] }
0x22d4   :  { %v9302_v62 = vld [vmem:[#allocation38_spill] sm:$0xff] }
0x22d5   :  { %v3480_v3 = vadd.f32 %v9258_v18, %v3396_v33  ;;  %v9283_v33 = vld [vmem:[#allocation108_spill] sm:$0xff] }
0x22e3   :  { %v3553_v50 = vpop.permute.xlu0 %3552 }
0x22e4   :  { %v3555_v20 = vpop.permute.xlu1 %3554 }
0x22e5   :  { %v3558_v61 = vsel %vm9259_vm11, %v3553_v50, %v3555_v20  ;;  %v3559_v25 = vsel %vm9260_vm9, %v3555_v20, %v3557_v32  ;;  %v59_v32 = vperm.slane %v57_v13, 0  ;;  %v9284_v50 = vld [vmem:[#allocation30_spill] sm:$0xff]  ;;  %v9286_v20 = vld [vmem:[#allocation31_spill] sm:$0xff]  ;;  %vm8610_vm11 = vcmask 752640  }
0x22e6   :  { %v7221_v8 = vadd.f32 %v3558_v61, %v9261_v63  ;;  %v7223_v17 = vadd.f32 %v3559_v25, %v3480_v3  ;;  %v372_v18 = vsel %vm371_vm3, %v9284_v50, %v9283_v33  ;;  %v9285_v3 = vld [vmem:[#allocation109_spill] sm:$0xff]  ;;  %v9287_v25 = vld [vmem:[#allocation24_spill] sm:$0xff]  ;;  %vm9310_vm9 = vcmask 629760  }
0x22e7   :  { %v63_v11 = vmul.f32 %v59_v32, %v9274_v6  ;;  %v390_v61 = vsel %vm371_vm3, %v9286_v20, %v9285_v3  ;;  %v117_v63 = vsel %vm115_vm0, %v9270_v52, %v9287_v25  ;;  %v9293_v52 = vld [vmem:[#allocation130_spill] sm:$0xff]  ;;  %v9306_v25 = vld [vmem:[#allocation61_spill] sm:$0xff] }
0x22e8   :  { %v542_v53 = vsel %vm541_vm5, %v9294_v29, %v9293_v52 }
0x22e9   :  { %v138_v48 = vadd.f32 %v134_v47, %v63_v11  ;;  %v9296_v47 = vld [vmem:[#allocation49_spill] sm:$0xff]  ;;  %v9297_v11 = vld [vmem:[#allocation35_spill] sm:$0xff] }
0x22ea   :  { %v560_v28 = vsel %vm541_vm5, %v9296_v47, %v9295_v30  ;;  %v288_v56 = vsel %vm286_vm2, %v9279_v59, %v9297_v11  ;;  %v9304_v59 = vld [vmem:[#allocation60_spill] sm:$0xff] }
0x22eb   :  { %v3573_v51 = vpop.permute.xlu0 %3572  ;;  %v223_v0 = vadd.f32 %v219_v35, %v138_v48 }
0x22ec   :  { %v7225_v49 = vpop.permute.xlu1 %3574 }
0x22ed   :  { %v3578_v12 = vsel %vm9262_vm8, %v3573_v51, %v7225_v49  ;;  %v291_v51 = vadd.f32 %v287_v24, %v205_v15  ;;  %vm9313_vm8 = vmmov %vm9310_vm9 }
0x22ee   :  { %v7230_v9 = vadd.f32 %v3578_v12, %v9263_v16  ;;  %v309_v12 = vadd.f32 %v305_v1, %v223_v0  ;;  %v53_v16 = vmul.f32 %v49_v5, %v9274_v6  ;;  %v9300_v5 = vld [vmem:[#allocation142_spill] sm:$0xff]  ;;  %v373_v1 = vsel %vm371_vm3, %v9283_v33, %v9302_v62  ;;  %v9323_v62 = vld [vmem:[#allocation80_spill] sm:$0xff] }
0x22ef   :  { %v376_v13 = vadd.f32 %v372_v18, %v291_v51  ;;  %v645_v24 = vsel %vm8610_vm11, %v9301_v45, %v9300_v5  ;;  %v9303_v18 = vld [vmem:[#allocation152_spill] sm:$0xff]  ;;  %v9309_v33 = vld [vmem:[#allocation66_spill] sm:$0xff] }
0x22f0   :  { %v394_v21 = vadd.f32 %v390_v61, %v309_v12  ;;  %v121_v32 = vadd.f32 %v117_v63, %v53_v16  ;;  %v713_v20 = vsel %vm712_vm7, %v9304_v59, %v9303_v18  ;;  %v9305_v61 = vld [vmem:[#allocation153_spill] sm:$0xff]  ;;  %v9307_v51 = vld [vmem:[#allocation44_spill] sm:$0xff]  ;;  %v9328_v59 = vld [vmem:[#allocation62_spill] sm:$0xff] }
0x22f1   :  { %v731_v63 = vsel %vm712_vm7, %v9306_v25, %v9305_v61 }
0x22f3   :  { %v3588_v26 = vpop.permute.xlu0 %3587 }
0x22f4   :  { %v3609_v44 = vmul.f32 %v3588_v26, %v9264_v39  ;;  %v3591_v37 = vmul.f32 %v3588_v26, %v9265_v4  ;;  %v3590_v31 = vmul.f32 %v3588_v26, %v9266_v36  ;;  %v3608_v10 = vmul.f32 %v3588_v26, %v9267_v43 }
0x22f5   :  { %v3592_v41 = vmul.f32 %v3588_v26, %v9268_v40  ;;  %v3610_v57 = vmul.f32 %v3588_v26, %v9269_v58  ;;  %v9288_v26 = vld [vmem:[#allocation119_spill] sm:$0xff] }
0x22f6   :  { %3616 = vrot.lane.b32.xlu0 %v3609_v44, %s4692_s8  ;;  %3598 = vrot.lane.b32.xlu2 %v3591_v37, %s4692_s8  ;;  %v9289_v44 = vld [vmem:[#allocation42_spill] sm:$0xff]  ;;  %v458_v12 = vsel %vm456_vm4, %v9288_v26, %v9307_v51 }
0x22f7   :  { %3596 = vrot.lane.b32.xlu1 %v3590_v31, %s4692_s8  ;;  %v457_v37 = vsel %vm456_vm4, %v9289_v44, %v9288_v26  ;;  %v9290_v31 = vld [vmem:[#allocation120_spill] sm:$0xff] }
0x22f8   :  { %v461_v38 = vadd.f32 %v457_v37, %v376_v13  ;;  %v9316_v26 = vld [vmem:[#allocation72_spill] sm:$0xff] }
0x22fa   :  { %v546_v15 = vadd.f32 %v542_v53, %v461_v38  ;;  %v9319_v38 = vld [vmem:[#allocation73_spill] sm:$0xff] }
0x22fe   :  { %3614 = vrot.lane.b32.xlu2 %v3608_v10, %s4692_s8  ;;  %v9291_v10 = vld [vmem:[#allocation43_spill] sm:$0xff] }
0x22ff   :  { %3600 = vrot.lane.b32.xlu1 %v3592_v41, %s4692_s8  ;;  %v475_v41 = vsel %vm456_vm4, %v9291_v10, %v9290_v31  ;;  %v9308_v10 = vld [vmem:[#allocation163_spill] sm:$0xff] }
0x2300   :  { %v479_v54 = vadd.f32 %v475_v41, %v394_v21  ;;  %v798_v41 = vsel %vm9310_vm9, %v9309_v33, %v9308_v10  ;;  %v9314_v21 = vld [vmem:[#allocation50_spill] sm:$0xff]  ;;  %vm8608_vm9 = vcmask 490496  }
0x2302   :  { %v564_v0 = vadd.f32 %v560_v28, %v479_v54  ;;  %v9315_v28 = vld [vmem:[#allocation174_spill] sm:$0xff] }
0x2303   :  { %v883_v11 = vsel %vm9317_vm14, %v9316_v26, %v9315_v28  ;;  %v9339_v26 = vld [vmem:[#allocation204_spill] sm:$0xff] }
0x2304   :  { %v649_v44 = vadd.f32 %v645_v24, %v564_v0  ;;  %v9326_v0 = vld [vmem:[#allocation81_spill] sm:$0xff] }
0x2306   :  { %3627 = vperm.xlu2 %4534, %v7243_v60   ;;  %v735_v53 = vadd.f32 %v731_v63, %v649_v44  ;;  %v9331_v44 = vld [vmem:[#allocation197_spill] sm:$0xff] }
0x2307   :  { %3618 = vrot.lane.b32.xlu1 %v3610_v57, %s4692_s8  ;;  %v9292_v57 = vld [vmem:[#allocation32_spill] sm:$0xff] }
0x2308   :  { %v202_v55 = vsel %vm200_vm10, %v9275_v14, %v9292_v57  ;;  %v9298_v14 = vld [vmem:[#allocation141_spill] sm:$0xff]  ;;  %v9311_v57 = vld [vmem:[#allocation164_spill] sm:$0xff] }
0x2309   :  { %v206_v35 = vadd.f32 %v202_v55, %v121_v32  ;;  %v627_v48 = vsel %vm8610_vm11, %v9299_v23, %v9298_v14  ;;  %v9312_v55 = vld [vmem:[#allocation67_spill] sm:$0xff]  ;;  %v543_v32 = vsel %vm541_vm5, %v9293_v52, %v9314_v21  ;;  %v9322_v52 = vld [vmem:[#allocation185_spill] sm:$0xff] }
0x230a   :  { %v631_v16 = vadd.f32 %v627_v48, %v546_v15  ;;  %v816_v13 = vsel %vm9313_vm8, %v9312_v55, %v9311_v57  ;;  %vm9324_vm8 = vcmask 506880   ;;  %v9325_v15 = vld [vmem:[#allocation186_spill] sm:$0xff] }
0x230b   :  { %v292_v50 = vadd.f32 %v288_v56, %v206_v35  ;;  %v9318_v56 = vld [vmem:[#allocation175_spill] sm:$0xff]  ;;  %v9321_v35 = vld [vmem:[#allocation56_spill] sm:$0xff]  ;;  %v820_v45 = vadd.f32 %v816_v13, %v735_v53  ;;  %vm9327_vm1 = vmmov %vm9324_vm8 }
0x230c   :  { %v717_v29 = vadd.f32 %v713_v20, %v631_v16  ;;  %v901_v54 = vsel %vm9320_vm6, %v9319_v38, %v9318_v56  ;;  %v628_v23 = vsel %vm8610_vm11, %v9298_v14, %v9321_v35  ;;  %v714_v20 = vsel %vm712_vm7, %v9303_v18, %v9328_v59  ;;  %v9329_v14 = vld [vmem:[#allocation196_spill] sm:$0xff]  ;;  %v9336_v18 = vld [vmem:[#allocation103_spill] sm:$0xff]  ;;  %v9341_v38 = vld [vmem:[#allocation74_spill] sm:$0xff] }
0x230d   :  { %v377_v37 = vadd.f32 %v373_v1, %v292_v50  ;;  %v968_v1 = vsel %vm9324_vm8, %v9323_v62, %v9322_v52  ;;  %v986_v50 = vsel %vm9327_vm1, %v9326_v0, %v9325_v15  ;;  %v905_v63 = vadd.f32 %v901_v54, %v820_v45  ;;  %v9343_v45 = vld [vmem:[#allocation117_spill] sm:$0xff]  ;;  %v9574_v15 = vld [vmem:[#allocation182_spill] sm:$0xff] }
0x230e   :  { %v802_v48 = vadd.f32 %v798_v41, %v717_v29  ;;  %v9333_v41 = vld [vmem:[#allocation68_spill] sm:$0xff]  ;;  %vm9334_vm6 = vcmask 629760   ;;  %v9335_v29 = vld [vmem:[#allocation106_spill] sm:$0xff]  ;;  %vm9337_vm1 = vcmask 1039360   ;;  %vm9342_vm8 = vcmask 523264   ;;  %v9346_v62 = vld [vmem:[#allocation113_spill] sm:$0xff] }
0x230f   :  { %v462_v47 = vadd.f32 %v458_v12, %v377_v37  ;;  %v9330_v12 = vld [vmem:[#allocation91_spill] sm:$0xff]  ;;  %v9332_v37 = vld [vmem:[#allocation92_spill] sm:$0xff]  ;;  %v799_v55 = vsel %vm9334_vm6, %v9308_v10, %v9333_v41  ;;  %v990_v21 = vadd.f32 %v986_v50, %v905_v63  ;;  %v1177_v53 = vsel %vm9337_vm1, %v9336_v18, %v9335_v29  ;;  %vm9340_vm14 = vmmov %vm9337_vm1 }
0x2310   :  { %v887_v25 = vadd.f32 %v883_v11, %v802_v48  ;;  %v1053_v16 = vsel %vm8608_vm9, %v9330_v12, %v9329_v14  ;;  %v1071_v33 = vsel %vm8608_vm9, %v9332_v37, %v9331_v44  ;;  %v884_v54 = vsel %vm9342_vm8, %v9315_v28, %v9341_v38  ;;  %v9344_v10 = vld [vmem:[#allocation114_spill] sm:$0xff]  ;;  %v9349_v50 = vld [vmem:[#allocation85_spill] sm:$0xff]  ;;  %v9355_v37 = vld [vmem:[#allocation220_spill] sm:$0xff] }
0x2311   :  { %v547_v24 = vadd.f32 %v543_v32, %v462_v47  ;;  %v9338_v47 = vld [vmem:[#allocation102_spill] sm:$0xff]  ;;  %vm9345_vm6 = vcmask 1022976   ;;  %vm9350_vm1 = vcmask 506880   ;;  %v9352_v28 = vld [vmem:[#allocation125_spill] sm:$0xff]  ;;  %v9359_v18 = vld [vmem:[#allocation136_spill] sm:$0xff] }
0x2312   :  { %v972_v13 = vadd.f32 %v968_v1, %v887_v25  ;;  %v1151_v11 = vsel %vm9340_vm14, %v9339_v26, %v9338_v47  ;;  %v9347_v1 = vld [vmem:[#allocation211_spill] sm:$0xff]  ;;  %vm9348_vm12 = vmmov %vm9345_vm6  ;;  %v969_v59 = vsel %vm9350_vm1, %v9322_v52, %v9349_v50  ;;  %vm9353_vm14 = vcmask 916480   ;;  %v9357_v41 = vld [vmem:[#allocation98_spill] sm:$0xff] }
0x2313   :  { %v632_v51 = vadd.f32 %v628_v23, %v547_v24  ;;  %v1075_v23 = vadd.f32 %v1071_v33, %v990_v21  ;;  %v1262_v24 = vsel %vm9345_vm6, %v9344_v10, %v9343_v45  ;;  %v1244_v0 = vsel %vm9348_vm12, %v9347_v1, %v9346_v62  ;;  %vm9356_vm8 = vmmov %vm9353_vm14  ;;  %v9358_v52 = vld [vmem:[#allocation139_spill] sm:$0xff]  ;;  %v9369_v50 = vld [vmem:[#allocation230_spill] sm:$0xff] }
0x2314   :  { %v1057_v35 = vadd.f32 %v1053_v16, %v972_v13  ;;  %v9354_v16 = vld [vmem:[#allocation124_spill] sm:$0xff]  ;;  %vm1498_vm12 = vcmask 883712   ;;  %vm9360_vm6 = vcmask 900096   ;;  %v9361_v26 = vld [vmem:[#allocation135_spill] sm:$0xff]  ;;  %v9571_v29 = vld [vmem:[#allocation29_spill] sm:$0xff] }
0x2315   :  { %v718_v32 = vadd.f32 %v714_v20, %v632_v51  ;;  %v1181_v20 = vadd.f32 %v1177_v53, %v1075_v23  ;;  %v9351_v51 = vld [vmem:[#allocation128_spill] sm:$0xff]  ;;  %v1329_v33 = vsel %vm9356_vm8, %v9355_v37, %v9354_v16  ;;  %v1432_v53 = vsel %vm9360_vm6, %v9359_v18, %v9358_v52  ;;  %vm9363_vm1 = vmmov %vm9360_vm6  ;;  %v9564_v52 = vld [vmem:[#allocation138_spill] sm:$0xff] }
0x2316   :  { %v1155_v25 = vadd.f32 %v1151_v11, %v1057_v35  ;;  %v1347_v12 = vsel %vm9353_vm14, %v9352_v28, %v9351_v51  ;;  %v9362_v11 = vld [vmem:[#allocation225_spill] sm:$0xff]  ;;  %vm9365_vm14 = vcmask 1039360   ;;  %vm9371_vm8 = vcmask 1022976  }
0x2317   :  { %v803_v48 = vadd.f32 %v799_v55, %v718_v32  ;;  %v1054_v55 = vsel %vm8608_vm9, %v9329_v14, %v9357_v41  ;;  %v1266_v13 = vadd.f32 %v1262_v24, %v1181_v20  ;;  %v1414_v38 = vsel %vm9363_vm1, %v9362_v11, %v9361_v26  ;;  %v9366_v14 = vld [vmem:[#allocation150_spill] sm:$0xff]  ;;  %v9367_v24 = vld [vmem:[#allocation147_spill] sm:$0xff]  ;;  %v9370_v20 = vld [vmem:[#allocation212_spill] sm:$0xff] }
0x2318   :  { %v1248_v21 = vadd.f32 %v1244_v0, %v1155_v25  ;;  %v1517_v1 = vsel %vm1498_vm12, %v9367_v24, %v9366_v14  ;;  %v9368_v0 = vld [vmem:[#allocation146_spill] sm:$0xff]  ;;  %v1245_v25 = vsel %vm9371_vm8, %v9346_v62, %v9370_v20  ;;  %v9372_v41 = vld [vmem:[#allocation161_spill] sm:$0xff]  ;;  %vm9374_vm6 = vcmask 777216   ;;  %v9380_v24 = vld [vmem:[#allocation172_spill] sm:$0xff] }
0x2319   :  { %v888_v63 = vadd.f32 %v884_v54, %v803_v48  ;;  %v9364_v54 = vld [vmem:[#allocation207_spill] sm:$0xff]  ;;  %v1351_v23 = vadd.f32 %v1347_v12, %v1266_v13  ;;  %vm9377_vm1 = vmmov %vm9374_vm6  ;;  %v9381_v62 = vld [vmem:[#allocation169_spill] sm:$0xff]  ;;  %vm9382_vm8 = vcmask 760832  }
0x231a   :  { %v1152_v35 = vsel %vm9365_vm14, %v9338_v47, %v9364_v54  ;;  %v1333_v48 = vadd.f32 %v1329_v33, %v1248_v21  ;;  %v9373_v47 = vld [vmem:[#allocation158_spill] sm:$0xff]  ;;  %v9375_v33 = vld [vmem:[#allocation157_spill] sm:$0xff]  ;;  %vm9379_vm14 = vcmask 916480   ;;  %vm9385_vm9 = vmmov %vm9382_vm8 }
0x231b   :  { %v973_v32 = vadd.f32 %v969_v59, %v888_v63  ;;  %v1499_v59 = vsel %vm1498_vm12, %v9369_v50, %v9368_v0  ;;  %v1436_v63 = vadd.f32 %v1432_v53, %v1351_v23  ;;  %v1603_v12 = vsel %vm9374_vm6, %v9373_v47, %v9372_v41  ;;  %v9378_v21 = vld [vmem:[#allocation221_spill] sm:$0xff] }
0x231c   :  { %v1418_v28 = vadd.f32 %v1414_v38, %v1333_v48  ;;  %v1688_v53 = vsel %vm9382_vm8, %v9381_v62, %v9380_v24  ;;  %v9383_v38 = vld [vmem:[#allocation168_spill] sm:$0xff]  ;;  %v9386_v48 = vld [vmem:[#allocation226_spill] sm:$0xff]  ;;  %vm9387_vm6 = vcmask 900096   ;;  %vm9400_vm8 = vcmask 777216  }
0x231d   :  { %v1058_v10 = vadd.f32 %v1054_v55, %v973_v32  ;;  %v9376_v55 = vld [vmem:[#allocation238_spill] sm:$0xff]  ;;  %v1330_v32 = vsel %vm9379_vm14, %v9354_v16, %v9378_v21  ;;  %v1521_v18 = vadd.f32 %v1517_v1, %v1436_v63  ;;  %v9389_v16 = vld [vmem:[#allocation180_spill] sm:$0xff] }
0x231e   :  { %v1585_v13 = vsel %vm9377_vm1, %v9376_v55, %v9375_v33  ;;  %v1503_v11 = vadd.f32 %v1499_v59, %v1418_v28  ;;  %v9388_v55 = vld [vmem:[#allocation183_spill] sm:$0xff]  ;;  %vm9390_vm1 = vcmask 654336  }
0x231f   :  { %v1156_v37 = vadd.f32 %v1152_v35, %v1058_v10  ;;  %v9384_v35 = vld [vmem:[#allocation243_spill] sm:$0xff]  ;;  %v1415_v10 = vsel %vm9387_vm6, %v9361_v26, %v9386_v48  ;;  %v1607_v50 = vadd.f32 %v1603_v12, %v1521_v18  ;;  %v1773_v1 = vsel %vm9390_vm1, %v9389_v16, %v9388_v55  ;;  %vm9393_vm14 = vmmov %vm9390_vm1  ;;  %v9395_v26 = vld [vmem:[#allocation194_spill] sm:$0xff] }
0x2320   :  { %v1670_v23 = vsel %vm9385_vm9, %v9384_v35, %v9383_v38  ;;  %v1589_v20 = vadd.f32 %v1585_v13, %v1503_v11  ;;  %v9391_v59 = vld [vmem:[#allocation179_spill] sm:$0xff]  ;;  %vm1924_vm9 = vcmask 621568   ;;  %v9398_v18 = vld [vmem:[#allocation257_spill] sm:$0xff]  ;;  %vm9402_vm6 = vcmask 760832  }
0x2321   :  { %v1249_v54 = vadd.f32 %v1245_v25, %v1156_v37  ;;  %v9392_v25 = vld [vmem:[#allocation251_spill] sm:$0xff]  ;;  %v1692_v21 = vadd.f32 %v1688_v53, %v1607_v50  ;;  %v9403_v50 = vld [vmem:[#allocation205_spill] sm:$0xff] }
0x2322   :  { %v1755_v63 = vsel %vm9393_vm14, %v9392_v25, %v9391_v59  ;;  %v9394_v28 = vld [vmem:[#allocation231_spill] sm:$0xff]  ;;  %v1674_v62 = vadd.f32 %v1670_v23, %v1589_v20  ;;  %v9401_v23 = vld [vmem:[#allocation244_spill] sm:$0xff]  ;;  %v9404_v20 = vld [vmem:[#allocation202_spill] sm:$0xff]  ;;  %vm9415_vm14 = vcmask 498688  }
0x2323   :  { %v1334_v47 = vadd.f32 %v1330_v32, %v1249_v54  ;;  %v1500_v37 = vsel %vm1498_vm12, %v9368_v0, %v9394_v28  ;;  %v9396_v12 = vld [vmem:[#allocation191_spill] sm:$0xff]  ;;  %v9397_v32 = vld [vmem:[#allocation190_spill] sm:$0xff]  ;;  %v1777_v2 = vadd.f32 %v1773_v1, %v1692_v21  ;;  %v9405_v28 = vld [vmem:[#allocation201_spill] sm:$0xff] }
0x2324   :  { %v1858_v13 = vsel %vm1839_vm15, %v9396_v12, %v9395_v26  ;;  %v1840_v11 = vsel %vm1839_vm15, %v9398_v18, %v9397_v32  ;;  %v2169_v54 = vld [vmem:[#allocation5 + $0x2] ss:$8 sm:$0x3]  ;;  %v2180_v48 = vld [vmem:[#allocation5 + $0x6] ss:$8 sm:$0x3]  ;;  %v1759_v0 = vadd.f32 %v1755_v63, %v1674_v62 }
0x2325   :  { %v1419_v35 = vadd.f32 %v1415_v10, %v1334_v47  ;;  %v9399_v16 = vld [vmem:[#allocation239_spill] sm:$0xff]  ;;  %v1671_v10 = vsel %vm9402_vm6, %v9383_v38, %v9401_v23  ;;  %v1943_v47 = vsel %vm1924_vm9, %v9404_v20, %v9403_v50  ;;  %v9406_v12 = vld [vmem:[#allocation262_spill] sm:$0xff]  ;;  %v1862_v26 = vadd.f32 %v1858_v13, %v1777_v2  ;;  %v9407_v1 = vld [vmem:[#allocation232_spill] sm:$0xff] }
0x2326   :  { %v1586_v25 = vsel %vm9400_vm8, %v9375_v33, %v9399_v16  ;;  %v1925_v18 = vsel %vm1924_vm9, %v9406_v12, %v9405_v28  ;;  %v1844_v55 = vadd.f32 %v1840_v11, %v1759_v0  ;;  %v2171_v24 = vperm.slane %v2169_v54, 0  ;;  %v9408_v63 = vld [vmem:[#allocation219_spill] sm:$0xff]  ;;  %v9409_v21 = vld [vmem:[#allocation217_spill] sm:$0xff]  ;;  %v9412_v2 = vld [vmem:[#allocation258_spill] sm:$0xff] }
0x2327   :  { %v1504_v53 = vadd.f32 %v1500_v37, %v1419_v35  ;;  %v2182_v41 = vperm.slane %v2180_v48, 0  ;;  %v2029_v37 = vsel %vm2010_vm13, %v9408_v63, %v9407_v1  ;;  %v9410_v62 = vld [vmem:[#allocation275_spill] sm:$0xff]  ;;  %v9411_v35 = vld [vmem:[#allocation253_spill] sm:$0xff]  ;;  %v1947_v23 = vadd.f32 %v1943_v47, %v1862_v26  ;;  %v9413_v11 = vld [vmem:[#allocation292_spill] sm:$0xff] }
0x2328   :  { %v2011_v38 = vsel %vm2010_vm13, %v9410_v62, %v9409_v21  ;;  %v1756_v16 = vsel %vm9390_vm1, %v9391_v59, %v9411_v35  ;;  %v1929_v20 = vadd.f32 %v1925_v18, %v1844_v55  ;;  %v1841_v13 = vsel %vm1839_vm15, %v9397_v32, %v9412_v2  ;;  %v9414_v48 = vld [vmem:[#allocation252_spill] sm:$0xff]  ;;  %v9416_v0 = vld [vmem:[#allocation250_spill] sm:$0xff]  ;;  %vm9418_vm8 = vmmov %vm9415_vm14 }
0x2329   :  { %v1590_v33 = vadd.f32 %v1586_v25, %v1504_v53  ;;  %v2114_v25 = vsel %vm9415_vm14, %v9414_v48, %v9413_v11  ;;  %v9417_v53 = vld [vmem:[#allocation280_spill] sm:$0xff]  ;;  %v2033_v62 = vadd.f32 %v2029_v37, %v1947_v23  ;;  %v9419_v50 = vld [vmem:[#allocation295_spill] sm:$0xff]  ;;  %v9422_v2 = vld [vmem:[#allocation286_spill] sm:$0xff]  ;;  %vm9463_vm1 = vcmask 629760  }
0x232a   :  { %v2096_v63 = vsel %vm9418_vm8, %v9417_v53, %v9416_v0  ;;  %v2015_v1 = vadd.f32 %v2011_v38, %v1929_v20  ;;  %v2175_v14 = vmul.f32 %v2171_v24, %v9419_v50  ;;  %v2186_v59 = vmul.f32 %v2182_v41, %v9419_v50  ;;  %v9420_v26 = vld [vmem:[#allocation263_spill] sm:$0xff]  ;;  %v9421_v35 = vld [vmem:[#allocation288_spill] sm:$0xff]  ;;  %v9423_v53 = vld [vmem:[#allocation289_spill] sm:$0xff]  ;;  %v7471_v20 = vpop.permute.xlu2 %3576 }
0x232b   :  { %v1675_v12 = vadd.f32 %v1671_v10, %v1590_v33  ;;  %v1926_v10 = vsel %vm1924_vm9, %v9405_v28, %v9420_v26  ;;  %v2118_v32 = vadd.f32 %v2114_v25, %v2033_v62  ;;  %v2172_v33 = vperm.slane %v2169_v54, 1  ;;  %v9424_v37 = vld [vmem:[#allocation287_spill] sm:$0xff]  ;;  %v9425_v24 = vld [vmem:[#allocation276_spill] sm:$0xff]  ;;  %v9429_v25 = vld [vmem:[#allocation301_spill] sm:$0xff] }
0x232c   :  { %v2100_v47 = vadd.f32 %v2096_v63, %v2015_v1  ;;  %v2238_v48 = vsel %vm115_vm0, %v9422_v2, %v9421_v35  ;;  %v2256_v38 = vsel %vm115_vm0, %v9424_v37, %v9423_v53  ;;  %v2012_v41 = vsel %vm2010_vm13, %v9409_v21, %v9425_v24  ;;  %v9426_v1 = vld [vmem:[#allocation367_spill] sm:$0xff]  ;;  %v9430_v62 = vld [vmem:[#allocation281_spill] sm:$0xff]  ;;  %vm9431_vm6 = vmmov %vm9418_vm8 }
0x232d   :  { %v1760_v55 = vadd.f32 %v1756_v16, %v1675_v12  ;;  %v2188_v23 = vadd.f32 %v2186_v59, %v2118_v32  ;;  %v9427_v12 = vld [vmem:[#allocation300_spill] sm:$0xff]  ;;  %v9433_v32 = vld [vmem:[#allocation307_spill] sm:$0xff]  ;;  %v9437_v53 = vld [vmem:[#allocation314_spill] sm:$0xff]  ;;  %vm9470_vm8 = vcmask 523264  }
0x232e   :  { %v2177_v16 = vadd.f32 %v2175_v14, %v2100_v47  ;;  %v2322_v54 = vsel %vm200_vm10, %v9427_v12, %v9426_v1  ;;  %v2176_v14 = vmul.f32 %v2172_v33, %v9419_v50  ;;  %v9432_v59 = vld [vmem:[#allocation376_spill] sm:$0xff]  ;;  %v9434_v47 = vld [vmem:[#allocation377_spill] sm:$0xff]  ;;  %vm9466_vm14 = vmmov %vm9463_vm1 }
0x232f   :  { %v1845_v18 = vadd.f32 %v1841_v13, %v1760_v55  ;;  %v9428_v13 = vld [vmem:[#allocation372_spill] sm:$0xff]  ;;  %v2097_v55 = vsel %vm9431_vm6, %v9416_v0, %v9430_v62  ;;  %v2260_v2 = vadd.f32 %v2256_v38, %v2188_v23  ;;  %v9439_v38 = vld [vmem:[#allocation315_spill] sm:$0xff]  ;;  %vm9473_vm6 = vmmov %vm9470_vm8 }
0x2330   :  { %v2340_v63 = vsel %vm200_vm10, %v9429_v25, %v9428_v13  ;;  %v2242_v26 = vadd.f32 %v2238_v48, %v2177_v16  ;;  %v9436_v13 = vld [vmem:[#allocation384_spill] sm:$0xff]  ;;  %v9482_v11 = vld [vmem:[#allocation441_spill] sm:$0xff] }
0x2331   :  { %v1930_v28 = vadd.f32 %v1926_v10, %v1845_v18  ;;  %v2406_v10 = vsel %vm286_vm2, %v9433_v32, %v9432_v59  ;;  %v9435_v18 = vld [vmem:[#allocation308_spill] sm:$0xff]  ;;  %v2344_v12 = vadd.f32 %v2340_v63, %v2260_v2  ;;  %v2490_v0 = vsel %vm371_vm3, %v9437_v53, %v9436_v13  ;;  %v9441_v32 = vld [vmem:[#allocation395_spill] sm:$0xff]  ;;  %v9445_v53 = vld [vmem:[#allocation302_spill] sm:$0xff] }
0x2332   :  { %v2424_v37 = vsel %vm286_vm2, %v9435_v18, %v9434_v47  ;;  %v2326_v24 = vadd.f32 %v2322_v54, %v2242_v26  ;;  %v9438_v48 = vld [vmem:[#allocation388_spill] sm:$0xff]  ;;  %v9442_v18 = vld [vmem:[#allocation321_spill] sm:$0xff]  ;;  %v2323_v2 = vsel %vm200_vm10, %v9426_v1, %v9445_v53  ;;  %v4752_v47 = vmov 86  }
0x2333   :  { %v2016_v21 = vadd.f32 %v2012_v41, %v1930_v28  ;;  %v2508_v41 = vsel %vm371_vm3, %v9439_v38, %v9438_v48  ;;  %v9440_v33 = vld [vmem:[#allocation296_spill] sm:$0xff]  ;;  %v2428_v28 = vadd.f32 %v2424_v37, %v2344_v12  ;;  %v2574_v54 = vsel %vm456_vm4, %v9442_v18, %v9441_v32  ;;  %v9449_v12 = vld [vmem:[#allocation329_spill] sm:$0xff]  ;;  %4535 = vset.pattern.permute.xlu0 %v4752_v47 }
0x2334   :  { %v2239_v16 = vsel %vm115_vm0, %v9421_v35, %v9440_v33  ;;  %v2410_v23 = vadd.f32 %v2406_v10, %v2326_v24  ;;  %v9443_v63 = vld [vmem:[#allocation396_spill] sm:$0xff]  ;;  %v9446_v10 = vld [vmem:[#allocation403_spill] sm:$0xff]  ;;  %v9448_v24 = vld [vmem:[#allocation405_spill] sm:$0xff] }
0x2335   :  { %v2101_v25 = vadd.f32 %v2097_v55, %v2016_v21  ;;  %v9444_v55 = vld [vmem:[#allocation322_spill] sm:$0xff]  ;;  %v2512_v38 = vadd.f32 %v2508_v41, %v2428_v28  ;;  %v9447_v37 = vld [vmem:[#allocation328_spill] sm:$0xff]  ;;  %v9450_v33 = vld [vmem:[#allocation309_spill] sm:$0xff] }
0x2336   :  { %v2592_v26 = vsel %vm456_vm4, %v9444_v55, %v9443_v63  ;;  %v2494_v21 = vadd.f32 %v2490_v0, %v2410_v23  ;;  %v2407_v18 = vsel %vm286_vm2, %v9432_v59, %v9450_v33  ;;  %v9451_v0 = vld [vmem:[#allocation411_spill] sm:$0xff]  ;;  %v9454_v28 = vld [vmem:[#allocation336_spill] sm:$0xff] }
0x2337   :  { %v2178_v62 = vadd.f32 %v2176_v14, %v2101_v25  ;;  %v2658_v14 = vsel %vm541_vm5, %v9447_v37, %v9446_v10  ;;  %v2676_v25 = vsel %vm541_vm5, %v9449_v12, %v9448_v24  ;;  %v2596_v63 = vadd.f32 %v2592_v26, %v2512_v38  ;;  %v9452_v41 = vld [vmem:[#allocation335_spill] sm:$0xff]  ;;  %v9455_v53 = vld [vmem:[#allocation316_spill] sm:$0xff]  ;;  %v9457_v26 = vld [vmem:[#allocation342_spill] sm:$0xff] }
0x2338   :  { %v2578_v55 = vadd.f32 %v2574_v54, %v2494_v21  ;;  %v2742_v23 = vsel %vm8610_vm11, %v9452_v41, %v9451_v0  ;;  %v2491_v37 = vsel %vm371_vm3, %v9436_v13, %v9455_v53  ;;  %v9456_v54 = vld [vmem:[#allocation416_spill] sm:$0xff]  ;;  %v9458_v21 = vld [vmem:[#allocation417_spill] sm:$0xff]  ;;  %v9459_v38 = vld [vmem:[#allocation343_spill] sm:$0xff] }
0x2339   :  { %v2243_v35 = vadd.f32 %v2239_v16, %v2178_v62  ;;  %v9453_v16 = vld [vmem:[#allocation412_spill] sm:$0xff]  ;;  %v2680_v24 = vadd.f32 %v2676_v25, %v2596_v63  ;;  %v9460_v33 = vld [vmem:[#allocation323_spill] sm:$0xff]  ;;  %v9462_v63 = vld [vmem:[#allocation349_spill] sm:$0xff] }
0x233a   :  { %v2760_v62 = vsel %vm8610_vm11, %v9454_v28, %v9453_v16  ;;  %v2662_v12 = vadd.f32 %v2658_v14, %v2578_v55  ;;  %v2575_v41 = vsel %vm456_vm4, %v9441_v32, %v9460_v33  ;;  %v9461_v14 = vld [vmem:[#allocation422_spill] sm:$0xff]  ;;  %v9464_v25 = vld [vmem:[#allocation424_spill] sm:$0xff]  ;;  %v9468_v32 = vld [vmem:[#allocation429_spill] sm:$0xff] }
0x233b   :  { %v2327_v1 = vadd.f32 %v2323_v2, %v2243_v35  ;;  %v2826_v2 = vsel %vm712_vm7, %v9457_v26, %v9456_v54  ;;  %v2844_v35 = vsel %vm712_vm7, %v9459_v38, %v9458_v21  ;;  %v2764_v16 = vadd.f32 %v2760_v62, %v2680_v24  ;;  %v9471_v62 = vld [vmem:[#allocation430_spill] sm:$0xff] }
0x233c   :  { %v2746_v28 = vadd.f32 %v2742_v23, %v2662_v12  ;;  %v2910_v47 = vsel %vm9463_vm1, %v9462_v63, %v9461_v14  ;;  %v9469_v23 = vld [vmem:[#allocation356_spill] sm:$0xff]  ;;  %vm9477_vm1 = vcmask 506880  }
0x233d   :  { %v2411_v59 = vadd.f32 %v2407_v18, %v2327_v1  ;;  %v9465_v18 = vld [vmem:[#allocation350_spill] sm:$0xff]  ;;  %v2848_v38 = vadd.f32 %v2844_v35, %v2764_v16  ;;  %v2994_v24 = vsel %vm9470_vm8, %v9469_v23, %v9468_v32  ;;  %v9478_v35 = vld [vmem:[#allocation436_spill] sm:$0xff]  ;;  %vm9484_vm8 = vcmask 490496  }
0x233e   :  { %v2928_v55 = vsel %vm9466_vm14, %v9465_v18, %v9464_v25  ;;  %v9467_v1 = vld [vmem:[#allocation330_spill] sm:$0xff]  ;;  %v2830_v26 = vadd.f32 %v2826_v2, %v2746_v28  ;;  %v9476_v2 = vld [vmem:[#allocation363_spill] sm:$0xff]  ;;  %vm9480_vm14 = vmmov %vm9477_vm1 }
0x233f   :  { %v2495_v13 = vadd.f32 %v2491_v37, %v2411_v59  ;;  %v2659_v53 = vsel %vm541_vm5, %v9446_v10, %v9467_v1  ;;  %v9472_v37 = vld [vmem:[#allocation357_spill] sm:$0xff]  ;;  %v2932_v18 = vadd.f32 %v2928_v55, %v2848_v38  ;;  %v9475_v10 = vld [vmem:[#allocation434_spill] sm:$0xff] }
0x2340   :  { %v3012_v12 = vsel %vm9473_vm6, %v9472_v37, %v9471_v62  ;;  %v9474_v59 = vld [vmem:[#allocation337_spill] sm:$0xff]  ;;  %v2914_v63 = vadd.f32 %v2910_v47, %v2830_v26  ;;  %v3078_v16 = vsel %vm9477_vm1, %v9476_v2, %v9475_v10  ;;  %v9486_v55 = vld [vmem:[#allocation382_spill] sm:$0xff]  ;;  %vm9487_vm6 = vmmov %vm9484_vm8  ;;  %vm9489_vm1 = vcmask 629760  }
0x2341   :  { %v2579_v50 = vadd.f32 %v2575_v41, %v2495_v13  ;;  %v2743_v33 = vsel %vm8610_vm11, %v9451_v0, %v9474_v59  ;;  %v9479_v41 = vld [vmem:[#allocation364_spill] sm:$0xff]  ;;  %v3016_v37 = vadd.f32 %v3012_v12, %v2932_v18  ;;  %v9488_v2 = vld [vmem:[#allocation351_spill] sm:$0xff]  ;;  %vm9494_vm11 = vcmask 523264   ;;  %v9495_v18 = vld [vmem:[#allocation406_spill] sm:$0xff] }
0x2342   :  { %v3096_v28 = vsel %vm9480_vm14, %v9479_v41, %v9478_v35  ;;  %v9481_v13 = vld [vmem:[#allocation344_spill] sm:$0xff]  ;;  %v2998_v23 = vadd.f32 %v2994_v24, %v2914_v63  ;;  %v2911_v41 = vsel %vm9489_vm1, %v9461_v14, %v9488_v2  ;;  %v9490_v35 = vld [vmem:[#allocation421_spill] sm:$0xff]  ;;  %vm9492_vm14 = vcmask 1039360  }
0x2343   :  { %v2663_v25 = vadd.f32 %v2659_v53, %v2579_v50  ;;  %v2827_v1 = vsel %vm712_vm7, %v9456_v54, %v9481_v13  ;;  %v9483_v0 = vld [vmem:[#allocation380_spill] sm:$0xff]  ;;  %v9485_v50 = vld [vmem:[#allocation442_spill] sm:$0xff]  ;;  %v3100_v38 = vadd.f32 %v3096_v28, %v3016_v37  ;;  %vm9505_vm1 = vcmask 506880  }
0x2344   :  { %v3162_v47 = vsel %vm9484_vm8, %v9483_v0, %v9482_v11  ;;  %v3180_v53 = vsel %vm9487_vm6, %v9486_v55, %v9485_v50  ;;  %v3082_v26 = vadd.f32 %v3078_v16, %v2998_v23  ;;  %v9491_v54 = vld [vmem:[#allocation408_spill] sm:$0xff]  ;;  %vm9497_vm8 = vmmov %vm9492_vm14  ;;  %vm9500_vm6 = vcmask 1022976   ;;  %v9563_v50 = vld [vmem:[#allocation127_spill] sm:$0xff] }
0x2345   :  { %v2747_v62 = vadd.f32 %v2743_v33, %v2663_v25  ;;  %v3284_v24 = vsel %vm9492_vm14, %v9491_v54, %v9490_v35  ;;  %v9493_v25 = vld [vmem:[#allocation358_spill] sm:$0xff]  ;;  %v3184_v63 = vadd.f32 %v3180_v53, %v3100_v38  ;;  %v9496_v13 = vld [vmem:[#allocation444_spill] sm:$0xff]  ;;  %vm9508_vm14 = vcmask 916480  }
0x2346   :  { %v2995_v12 = vsel %vm9494_vm11, %v9468_v32, %v9493_v25  ;;  %v3166_v33 = vadd.f32 %v3162_v47, %v3082_v26  ;;  %v3258_v16 = vsel %vm9497_vm8, %v9496_v13, %v9495_v18  ;;  %v9501_v32 = vld [vmem:[#allocation438_spill] sm:$0xff]  ;;  %v9502_v47 = vld [vmem:[#allocation449_spill] sm:$0xff]  ;;  %vm9503_vm11 = vmmov %vm9500_vm6 }
0x2347   :  { %v2831_v59 = vadd.f32 %v2827_v1, %v2747_v62  ;;  %v9498_v62 = vld [vmem:[#allocation294_spill] sm:$0xff]  ;;  %v9499_v1 = vld [vmem:[#allocation439_spill] sm:$0xff]  ;;  %v3288_v2 = vadd.f32 %v3284_v24, %v3184_v63  ;;  %v3350_v53 = vsel %vm9503_vm11, %v9502_v47, %v9501_v32  ;;  %v9504_v26 = vld [vmem:[#allocation368_spill] sm:$0xff]  ;;  %vm9515_vm11 = vcmask 900096  }
0x2348   :  { %v3368_v23 = vsel %vm9500_vm6, %v9499_v1, %v9498_v62  ;;  %v3079_v38 = vsel %vm9505_vm1, %v9475_v10, %v9504_v26  ;;  %v3262_v54 = vadd.f32 %v3258_v16, %v3166_v33  ;;  %v9506_v25 = vld [vmem:[#allocation340_spill] sm:$0xff]  ;;  %v9507_v13 = vld [vmem:[#allocation319_spill] sm:$0xff]  ;;  %v9510_v24 = vld [vmem:[#allocation326_spill] sm:$0xff]  ;;  %vm9513_vm6 = vcmask 490496  }
0x2349   :  { %v2915_v55 = vadd.f32 %v2911_v41, %v2831_v59  ;;  %v3452_v1 = vsel %vm9508_vm14, %v9507_v13, %v9506_v25  ;;  %v3372_v59 = vadd.f32 %v3368_v23, %v3288_v2  ;;  %v9509_v41 = vld [vmem:[#allocation312_spill] sm:$0xff]  ;;  %vm9511_vm8 = vmmov %vm9508_vm14  ;;  %v9512_v47 = vld [vmem:[#allocation398_spill] sm:$0xff]  ;;  %vm9517_vm1 = vcmask 1039360  }
0x234a   :  { %v3434_v63 = vsel %vm9511_vm8, %v9510_v24, %v9509_v41  ;;  %v3163_v10 = vsel %vm9513_vm6, %v9482_v11, %v9512_v47  ;;  %v3354_v33 = vadd.f32 %v3350_v53, %v3262_v54  ;;  %v9514_v16 = vld [vmem:[#allocation28_spill] sm:$0xff]  ;;  %v9516_v23 = vld [vmem:[#allocation445_spill] sm:$0xff]  ;;  %vm9521_vm14 = vcmask 1022976  }
0x234b   :  { %v2999_v62 = vadd.f32 %v2995_v12, %v2915_v55  ;;  %v3536_v26 = vsel %vm9515_vm11, %v9514_v16, %v7207_v22  ;;  %v3456_v13 = vadd.f32 %v3452_v1, %v3372_v59  ;;  %v3259_v55 = vsel %vm9517_vm1, %v9495_v18, %v9516_v23 }
0x234c   :  { %vm9525_vm6 = vcmask 793600  }
0x234d   :  { %v3540_v2 = vadd.f32 %v3536_v26, %v3456_v13  ;;  %v9523_v26 = vld [vmem:[#allocation34_spill] sm:$0xff]  ;;  %vm9526_vm11 = vmmov %vm9525_vm6 }
0x234e   :  { %vm9527_vm1 = vmmov %vm9525_vm6 }
0x2350   :  { %v7507_v48 = vpop.permute.xlu2 %3598 }
0x2358   :  { %v3615_v21 = vpop.permute.xlu2 %3614 }
0x2360   :  { %v3628_v28 = vpop.permute.xlu2 %3627 }
0x2361   :  { %v3632_v14 = vmul.f32 %v3628_v28, %v9268_v40  ;;  %v3630_v37 = vmul.f32 %v3628_v28, %v9266_v36  ;;  %v3631_v0 = vmul.f32 %v3628_v28, %v9265_v4  ;;  %v3652_v54 = vmul.f32 %v3628_v28, %v9269_v58 }
0x2363   :  { %3640 = vrot.lane.b32.xlu2 %v3632_v14, %s4694_s9  ;;  %3636 = vrot.lane.b32.xlu0 %v3630_v37, %s4694_s9  ;;  %v3083_v14 = vadd.f32 %v3079_v38, %v2999_v62  ;;  %v3438_v37 = vadd.f32 %v3434_v63, %v3354_v33  ;;  %v3650_v62 = vmul.f32 %v3628_v28, %v9267_v43  ;;  %v9520_v38 = vld [vmem:[#allocation236_spill] sm:$0xff] }
0x2364   :  { %3638 = vrot.lane.b32.xlu1 %v3631_v0, %s4694_s9  ;;  %v9519_v0 = vld [vmem:[#allocation12_spill] sm:$0xff]  ;;  %v3351_v1 = vsel %vm9521_vm14, %v9501_v32, %v9520_v38  ;;  %v3651_v63 = vmul.f32 %v3628_v28, %v9264_v39  ;;  %vm9529_vm14 = vcmask 777216  }
0x2365   :  { %v3167_v12 = vadd.f32 %v3163_v10, %v3083_v14  ;;  %v3522_v25 = vadd.f32 %v9519_v0, %v3438_v37 }
0x2367   :  { %v3263_v47 = vadd.f32 %v3259_v55, %v3167_v12  ;;  %v4753_v55 = vmov 87  }
0x2368   :  { %v7611_v24 = vpop.permute.xlu0 %3616  ;;  %4536 = vset.pattern.permute.xlu2 %v4753_v55 }
0x2369   :  { %9518 = vst [vmem:[#allocation97_spill] sm:$0xff] %v7611_v24  ;;  %v3620_v11 = vsel %vm1498_vm12, %v3615_v21, %v7611_v24  ;;  %v3597_v53 = vpop.permute.xlu1 %3596  ;;  %v9522_v21 = vld [vmem:[#allocation333_spill] sm:$0xff]  ;;  %v3355_v16 = vadd.f32 %v3351_v1, %v3263_v47  ;;  %v9560_v24 = vld [vmem:[#allocation94_spill] sm:$0xff] }
0x236a   :  { %v3624_v59 = vadd.f32 %v3620_v11, %v3540_v2  ;;  %v3602_v18 = vsel %vm1498_vm12, %v3597_v53, %v7507_v48  ;;  %v3435_v33 = vsel %vm9511_vm8, %v9509_v41, %v9522_v21  ;;  %vm9530_vm8 = vmmov %vm9529_vm14 }
0x236b   :  { %v3606_v10 = vadd.f32 %v3602_v18, %v3522_v25  ;;  %3660 = vrot.lane.b32.xlu2 %v3652_v54, %s4694_s9  ;;  %3656 = vrot.lane.b32.xlu0 %v3650_v62, %s4694_s9  ;;  %v3439_v32 = vadd.f32 %v3435_v33, %v3355_v16  ;;  %v4754_v16 = vmov 88  }
0x236c   :  { %3658 = vrot.lane.b32.xlu1 %v3651_v63, %s4694_s9 }
0x236d   :  { %v3523_v14 = vadd.f32 %v9523_v26, %v3439_v32 }
0x2371   :  { %v3601_v13 = vpop.permute.xlu1 %3600 }
0x2372   :  { %v3603_v28 = vsel %vm1498_vm12, %v7507_v48, %v3601_v13 }
0x2373   :  { %v3607_v37 = vadd.f32 %v3603_v28, %v3523_v14  ;;  %3671 = vperm.xlu0 %4535, %v7243_v60  }
0x2379   :  { %v7635_v23 = vpop.permute.xlu1 %3618 }
0x237a   :  { %9524 = vst [vmem:[#allocation40_spill] sm:$0xff] %v7635_v23 }
0x237b   :  { %4537 = vset.pattern.permute.xlu0 %v4754_v16 }
0x23bd   :  { %v3641_v25 = vpop.permute.xlu2 %3640 }
0x23be   :  { %v3649_v12 = vadd.f32 %v3641_v25, %v7181_v7 }
0x23c5   :  { %v7659_v21 = vpop.permute.xlu2 %3660 }
0x23d5   :  { %v3637_v41 = vpop.permute.xlu0 %3636 }
0x23d6   :  { %v3639_v2 = vpop.permute.xlu1 %3638 }
0x23d7   :  { %v3642_v0 = vsel %vm9525_vm6, %v3637_v41, %v3639_v2  ;;  %v3643_v11 = vsel %vm9526_vm11, %v3639_v2, %v3641_v25  ;;  %vm9531_vm6 = vmmov %vm9530_vm8 }
0x23d8   :  { %v3647_v53 = vadd.f32 %v3642_v0, %v7221_v8  ;;  %v3648_v48 = vadd.f32 %v3643_v11, %v7223_v17  ;;  %vm9533_vm11 = vmmov %vm9531_vm6 }
0x23dd   :  { %v3657_v54 = vpop.permute.xlu0 %3656 }
0x23de   :  { %v7641_v62 = vpop.permute.xlu1 %3658 }
0x23df   :  { %v3662_v7 = vsel %vm9527_vm1, %v3657_v54, %v7641_v62  ;;  %vm9534_vm1 = vmmov %vm9531_vm6 }
0x23e0   :  { %v3667_v38 = vadd.f32 %v3662_v7, %v7230_v9 }
0x23e5   :  { %v3672_v1 = vpop.permute.xlu0 %3671 }
0x23e6   :  { %v3693_v18 = vmul.f32 %v3672_v1, %v9264_v39  ;;  %v3675_v63 = vmul.f32 %v3672_v1, %v9265_v4  ;;  %v3674_v47 = vmul.f32 %v3672_v1, %v9266_v36  ;;  %v3692_v8 = vmul.f32 %v3672_v1, %v9267_v43 }
0x23e7   :  { %v3676_v17 = vmul.f32 %v3672_v1, %v9268_v40  ;;  %v3694_v9 = vmul.f32 %v3672_v1, %v9269_v58 }
0x23e8   :  { %3700 = vrot.lane.b32.xlu0 %v3693_v18, %s4696_s10  ;;  %3682 = vrot.lane.b32.xlu2 %v3675_v63, %s4696_s10 }
0x23e9   :  { %3680 = vrot.lane.b32.xlu1 %v3674_v47, %s4696_s10 }
0x23f0   :  { %3698 = vrot.lane.b32.xlu2 %v3692_v8, %s4696_s10 }
0x23f1   :  { %3684 = vrot.lane.b32.xlu1 %v3676_v17, %s4696_s10 }
0x23f8   :  { %3711 = vperm.xlu2 %4536, %v7243_v60  }
0x23f9   :  { %3702 = vrot.lane.b32.xlu1 %v3694_v9, %s4696_s10  ;;  %v4755_v9 = vmov 89  }
0x2400   :  { %4538 = vset.pattern.permute.xlu2 %v4755_v9 }
0x2442   :  { %v3683_v33 = vpop.permute.xlu2 %3682 }
0x244a   :  { %v3699_v32 = vpop.permute.xlu2 %3698 }
0x2452   :  { %v3712_v26 = vpop.permute.xlu2 %3711 }
0x2453   :  { %v3716_v14 = vmul.f32 %v3712_v26, %v9268_v40  ;;  %v3714_v13 = vmul.f32 %v3712_v26, %v9266_v36  ;;  %v3715_v28 = vmul.f32 %v3712_v26, %v9265_v4  ;;  %v3736_v2 = vmul.f32 %v3712_v26, %v9269_v58 }
0x2454   :  { %v3734_v0 = vmul.f32 %v3712_v26, %v9267_v43  ;;  %v3735_v7 = vmul.f32 %v3712_v26, %v9264_v39 }
0x2455   :  { %3724 = vrot.lane.b32.xlu2 %v3716_v14, %s4696_s10  ;;  %3720 = vrot.lane.b32.xlu0 %v3714_v13, %s4696_s10 }
0x2456   :  { %3722 = vrot.lane.b32.xlu1 %v3715_v28, %s4696_s10 }
0x245a   :  { %v7667_v25 = vpop.permute.xlu0 %3700 }
0x245b   :  { %9528 = vst [vmem:[#allocation110_spill] sm:$0xff] %v7667_v25  ;;  %v3704_v55 = vsel %vm9529_vm14, %v3699_v32, %v7667_v25  ;;  %v3681_v41 = vpop.permute.xlu1 %3680  ;;  %vm9535_vm14 = vmmov %vm9534_vm1 }
0x245c   :  { %v3708_v11 = vadd.f32 %v3704_v55, %v3624_v59  ;;  %v3686_v54 = vsel %vm9530_vm8, %v3681_v41, %v3683_v33  ;;  %vm9537_vm8 = vcmask 760832  }
0x245d   :  { %v3690_v1 = vadd.f32 %v3686_v54, %v3606_v10  ;;  %3744 = vrot.lane.b32.xlu2 %v3736_v2, %s4696_s10  ;;  %3740 = vrot.lane.b32.xlu0 %v3734_v0, %s4696_s10 }
0x245e   :  { %3742 = vrot.lane.b32.xlu1 %v3735_v7, %s4696_s10 }
0x2463   :  { %v3685_v18 = vpop.permute.xlu1 %3684 }
0x2464   :  { %v3687_v63 = vsel %vm9531_vm6, %v3683_v33, %v3685_v18  ;;  %v4756_v18 = vmov 90   ;;  %vm9538_vm6 = vmmov %vm9537_vm8 }
0x2465   :  { %v3691_v47 = vadd.f32 %v3687_v63, %v3607_v37  ;;  %3755 = vperm.xlu0 %4537, %v7243_v60  }
0x246b   :  { %v7680_v59 = vpop.permute.xlu1 %3702 }
0x246c   :  { %9532 = vst [vmem:[#allocation46_spill] sm:$0xff] %v7680_v59 }
0x246d   :  { %4539 = vset.pattern.permute.xlu0 %v4756_v18 }
0x24af   :  { %v3725_v8 = vpop.permute.xlu2 %3724 }
0x24b0   :  { %v3733_v17 = vadd.f32 %v3725_v8, %v3649_v12 }
0x24b7   :  { %v7701_v54 = vpop.permute.xlu2 %3744 }
0x24c7   :  { %v3721_v16 = vpop.permute.xlu0 %3720 }
0x24c8   :  { %v3723_v10 = vpop.permute.xlu1 %3722 }
0x24c9   :  { %v3726_v32 = vsel %vm9533_vm11, %v3721_v16, %v3723_v10  ;;  %v3727_v26 = vsel %vm9534_vm1, %v3723_v10, %v3725_v8  ;;  %vm9539_vm11 = vmmov %vm9538_vm6 }
0x24ca   :  { %v3731_v14 = vadd.f32 %v3726_v32, %v3647_v53  ;;  %v3732_v13 = vadd.f32 %v3727_v26, %v3648_v48  ;;  %vm9541_vm1 = vmmov %vm9538_vm6 }
0x24cf   :  { %v3741_v28 = vpop.permute.xlu0 %3740 }
0x24d0   :  { %v7684_v55 = vpop.permute.xlu1 %3742 }
0x24d1   :  { %v3746_v37 = vsel %vm9535_vm14, %v3741_v28, %v7684_v55  ;;  %vm9542_vm14 = vmmov %vm9541_vm1 }
0x24d2   :  { %v3751_v33 = vadd.f32 %v3746_v37, %v3667_v38 }
0x24d7   :  { %v3756_v12 = vpop.permute.xlu0 %3755 }
0x24d8   :  { %v3777_v41 = vmul.f32 %v3756_v12, %v9264_v39  ;;  %v3759_v2 = vmul.f32 %v3756_v12, %v9265_v4  ;;  %v3758_v0 = vmul.f32 %v3756_v12, %v9266_v36  ;;  %v3776_v53 = vmul.f32 %v3756_v12, %v9267_v43 }
0x24d9   :  { %v3760_v48 = vmul.f32 %v3756_v12, %v9268_v40  ;;  %v3778_v38 = vmul.f32 %v3756_v12, %v9269_v58 }
0x24da   :  { %3784 = vrot.lane.b32.xlu0 %v3777_v41, %s4699_s11  ;;  %3766 = vrot.lane.b32.xlu2 %v3759_v2, %s4699_s11 }
0x24db   :  { %3764 = vrot.lane.b32.xlu1 %v3758_v0, %s4699_s11 }
0x24e2   :  { %3782 = vrot.lane.b32.xlu2 %v3776_v53, %s4699_s11 }
0x24e3   :  { %3768 = vrot.lane.b32.xlu1 %v3760_v48, %s4699_s11 }
0x24ea   :  { %3795 = vperm.xlu2 %4538, %v7243_v60  }
0x24eb   :  { %3786 = vrot.lane.b32.xlu1 %v3778_v38, %s4699_s11 }
0x2534   :  { %v3767_v7 = vpop.permute.xlu2 %3766 }
0x253c   :  { %v3783_v63 = vpop.permute.xlu2 %3782 }
0x2544   :  { %v3796_v8 = vpop.permute.xlu2 %3795 }
0x2545   :  { %v3800_v9 = vmul.f32 %v3796_v8, %v9268_v40  ;;  %v3798_v16 = vmul.f32 %v3796_v8, %v9266_v36  ;;  %v3799_v10 = vmul.f32 %v3796_v8, %v9265_v4  ;;  %v3820_v37 = vmul.f32 %v3796_v8, %v9269_v58 }
0x2546   :  { %v3818_v12 = vmul.f32 %v3796_v8, %v9267_v43  ;;  %v3819_v0 = vmul.f32 %v3796_v8, %v9264_v39 }
0x2547   :  { %3808 = vrot.lane.b32.xlu2 %v3800_v9, %s4699_s11  ;;  %3804 = vrot.lane.b32.xlu0 %v3798_v16, %s4699_s11  ;;  %v4757_v16 = vmov 91  }
0x2548   :  { %3806 = vrot.lane.b32.xlu1 %v3799_v10, %s4699_s11  ;;  %4540 = vset.pattern.permute.xlu2 %v4757_v16 }
0x254c   :  { %v7709_v32 = vpop.permute.xlu0 %3784 }
0x254d   :  { %9536 = vst [vmem:[#allocation121_spill] sm:$0xff] %v7709_v32  ;;  %v3788_v26 = vsel %vm9537_vm8, %v3783_v63, %v7709_v32  ;;  %v3765_v28 = vpop.permute.xlu1 %3764  ;;  %vm9543_vm8 = vmmov %vm9541_vm1 }
0x254e   :  { %v3792_v41 = vadd.f32 %v3788_v26, %v3708_v11  ;;  %v3770_v2 = vsel %vm9538_vm6, %v3765_v28, %v3767_v7  ;;  %vm9545_vm6 = vcmask 654336  }
0x254f   :  { %v3774_v53 = vadd.f32 %v3770_v2, %v3690_v1  ;;  %3828 = vrot.lane.b32.xlu2 %v3820_v37, %s4699_s11  ;;  %3824 = vrot.lane.b32.xlu0 %v3818_v12, %s4699_s11 }
0x2550   :  { %3826 = vrot.lane.b32.xlu1 %v3819_v0, %s4699_s11 }
0x2555   :  { %v3769_v48 = vpop.permute.xlu1 %3768 }
0x2556   :  { %v3771_v38 = vsel %vm9539_vm11, %v3767_v7, %v3769_v48  ;;  %vm9546_vm11 = vmmov %vm9545_vm6 }
0x2557   :  { %v3775_v18 = vadd.f32 %v3771_v38, %v3691_v47  ;;  %3839 = vperm.xlu0 %4539, %v7243_v60  }
0x255d   :  { %v7722_v11 = vpop.permute.xlu1 %3786 }
0x255e   :  { %9540 = vst [vmem:[#allocation52_spill] sm:$0xff] %v7722_v11 }
0x25a1   :  { %v3809_v63 = vpop.permute.xlu2 %3808 }
0x25a2   :  { %v3817_v9 = vadd.f32 %v3809_v63, %v3733_v17 }
0x25b9   :  { %v3805_v8 = vpop.permute.xlu0 %3804 }
0x25ba   :  { %v3807_v1 = vpop.permute.xlu1 %3806 }
0x25bb   :  { %v3810_v10 = vsel %vm9541_vm1, %v3805_v8, %v3807_v1  ;;  %v3811_v26 = vsel %vm9542_vm14, %v3807_v1, %v3809_v63  ;;  %v7743_v63 = vpop.permute.xlu2 %3828  ;;  %v4758_v8 = vmov 92   ;;  %vm9547_vm1 = vmmov %vm9545_vm6 }
0x25bc   :  { %v3815_v28 = vadd.f32 %v3810_v10, %v3731_v14  ;;  %v3816_v37 = vadd.f32 %v3811_v26, %v3732_v13  ;;  %4541 = vset.pattern.permute.xlu0 %v4758_v8  ;;  %vm9549_vm14 = vmmov %vm9547_vm1 }
0x25c1   :  { %v3825_v12 = vpop.permute.xlu0 %3824 }
0x25c2   :  { %v7726_v2 = vpop.permute.xlu1 %3826 }
0x25c3   :  { %v3830_v47 = vsel %vm9543_vm8, %v3825_v12, %v7726_v2  ;;  %vm9550_vm8 = vmmov %vm9547_vm1 }
0x25c4   :  { %v3835_v7 = vadd.f32 %v3830_v47, %v3751_v33 }
0x25c9   :  { %v3840_v17 = vpop.permute.xlu0 %3839 }
0x25ca   :  { %v3861_v0 = vmul.f32 %v3840_v17, %v9264_v39  ;;  %v3843_v48 = vmul.f32 %v3840_v17, %v9265_v4  ;;  %v3842_v38 = vmul.f32 %v3840_v17, %v9266_v36  ;;  %v3860_v14 = vmul.f32 %v3840_v17, %v9267_v43 }
0x25cb   :  { %v3844_v13 = vmul.f32 %v3840_v17, %v9268_v40  ;;  %v3862_v33 = vmul.f32 %v3840_v17, %v9269_v58 }
0x25cc   :  { %3868 = vrot.lane.b32.xlu0 %v3861_v0, %s4702_s12  ;;  %3850 = vrot.lane.b32.xlu2 %v3843_v48, %s4702_s12 }
0x25cd   :  { %3848 = vrot.lane.b32.xlu1 %v3842_v38, %s4702_s12 }
0x25d4   :  { %3866 = vrot.lane.b32.xlu2 %v3860_v14, %s4702_s12 }
0x25d5   :  { %3852 = vrot.lane.b32.xlu1 %v3844_v13, %s4702_s12 }
0x25dc   :  { %3879 = vperm.xlu2 %4540, %v7243_v60  }
0x25dd   :  { %3870 = vrot.lane.b32.xlu1 %v3862_v33, %s4702_s12 }
0x2626   :  { %v3851_v16 = vpop.permute.xlu2 %3850 }
0x262e   :  { %v3867_v1 = vpop.permute.xlu2 %3866 }
0x2636   :  { %v3880_v10 = vpop.permute.xlu2 %3879 }
0x2637   :  { %v3884_v26 = vmul.f32 %v3880_v10, %v9268_v40  ;;  %v3882_v12 = vmul.f32 %v3880_v10, %v9266_v36  ;;  %v3883_v47 = vmul.f32 %v3880_v10, %v9265_v4  ;;  %v3904_v38 = vmul.f32 %v3880_v10, %v9269_v58 }
0x2638   :  { %v3902_v14 = vmul.f32 %v3880_v10, %v9267_v43  ;;  %v3903_v8 = vmul.f32 %v3880_v10, %v9264_v39 }
0x2639   :  { %3892 = vrot.lane.b32.xlu2 %v3884_v26, %s4702_s12  ;;  %3888 = vrot.lane.b32.xlu0 %v3882_v12, %s4702_s12 }
0x263a   :  { %3890 = vrot.lane.b32.xlu1 %v3883_v47, %s4702_s12 }
0x263e   :  { %v7751_v17 = vpop.permute.xlu0 %3868 }
0x263f   :  { %9544 = vst [vmem:[#allocation132_spill] sm:$0xff] %v7751_v17  ;;  %v3872_v0 = vsel %vm9545_vm6, %v3867_v1, %v7751_v17  ;;  %v3849_v48 = vpop.permute.xlu1 %3848  ;;  %vm9551_vm6 = vmmov %vm9547_vm1 }
0x2640   :  { %v3876_v13 = vadd.f32 %v3872_v0, %v3792_v41  ;;  %v3854_v33 = vsel %vm9546_vm11, %v3849_v48, %v3851_v16  ;;  %v4759_v0 = vmov 93   ;;  %vm9559_vm11 = vcmask 531456  }
0x2641   :  { %v3858_v26 = vadd.f32 %v3854_v33, %v3774_v53  ;;  %3912 = vrot.lane.b32.xlu2 %v3904_v38, %s4702_s12  ;;  %3908 = vrot.lane.b32.xlu0 %v3902_v14, %s4702_s12 }
0x2642   :  { %3910 = vrot.lane.b32.xlu1 %v3903_v8, %s4702_s12  ;;  %4542 = vset.pattern.permute.xlu2 %v4759_v0 }
0x2647   :  { %v3853_v12 = vpop.permute.xlu1 %3852 }
0x2648   :  { %v3855_v1 = vsel %vm9547_vm1, %v3851_v16, %v3853_v12  ;;  %vm9569_vm1 = vcmask 924672  }
0x2649   :  { %v3859_v47 = vadd.f32 %v3855_v1, %v3775_v18  ;;  %3923 = vperm.xlu0 %4541, %v7243_v60  }
0x264f   :  { %v7764_v41 = vpop.permute.xlu1 %3870 }
0x2650   :  { %9548 = vst [vmem:[#allocation58_spill] sm:$0xff] %v7764_v41 }
0x2693   :  { %v3893_v17 = vpop.permute.xlu2 %3892 }
0x2694   :  { %v3901_v32 = vadd.f32 %v3893_v17, %v3817_v9 }
0x26ab   :  { %v3889_v10 = vpop.permute.xlu0 %3888 }
0x26ac   :  { %v3891_v53 = vpop.permute.xlu1 %3890 }
0x26ad   :  { %v3894_v48 = vsel %vm9549_vm14, %v3889_v10, %v3891_v53  ;;  %v3895_v38 = vsel %vm9550_vm8, %v3891_v53, %v3893_v17  ;;  %v7785_v17 = vpop.permute.xlu2 %3912  ;;  %v4760_v53 = vmov 94   ;;  %vm9580_vm14 = vcmask 662528  }
0x26ae   :  { %v3899_v14 = vadd.f32 %v3894_v48, %v3815_v28  ;;  %v3900_v33 = vadd.f32 %v3895_v38, %v3816_v37  ;;  %4543 = vset.pattern.permute.xlu0 %v4760_v53  ;;  %vm9585_vm8 = vcmask 629760  }
0x26b3   :  { %v3909_v8 = vpop.permute.xlu0 %3908 }
0x26b4   :  { %v7768_v11 = vpop.permute.xlu1 %3910 }
0x26b5   :  { %v3914_v18 = vsel %vm9551_vm6, %v3909_v8, %v7768_v11  ;;  %vm9588_vm6 = vcmask 523264  }
0x26b6   :  { %v3919_v16 = vadd.f32 %v3914_v18, %v3835_v7 }
0x26bb   :  { %v3924_v9 = vpop.permute.xlu0 %3923 }
0x26bc   :  { %v3945_v12 = vmul.f32 %v3924_v9, %v9264_v39  ;;  %v3927_v1 = vmul.f32 %v3924_v9, %v9265_v4  ;;  %v3926_v0 = vmul.f32 %v3924_v9, %v9266_v36  ;;  %v3944_v28 = vmul.f32 %v3924_v9, %v9267_v43 }
0x26bd   :  { %v3928_v37 = vmul.f32 %v3924_v9, %v9268_v40  ;;  %v3946_v7 = vmul.f32 %v3924_v9, %v9269_v58 }
0x26be   :  { %3952 = vrot.lane.b32.xlu0 %v3945_v12, %s4705_s13  ;;  %3934 = vrot.lane.b32.xlu2 %v3927_v1, %s4705_s13 }
0x26bf   :  { %3932 = vrot.lane.b32.xlu1 %v3926_v0, %s4705_s13 }
0x26c6   :  { %3950 = vrot.lane.b32.xlu2 %v3944_v28, %s4705_s13 }
0x26c7   :  { %3936 = vrot.lane.b32.xlu1 %v3928_v37, %s4705_s13 }
0x26ce   :  { %3963 = vperm.xlu2 %4542, %v7243_v60  }
0x26cf   :  { %3954 = vrot.lane.b32.xlu1 %v3946_v7, %s4705_s13 }
0x2718   :  { %v3935_v10 = vpop.permute.xlu2 %3934 }
0x2720   :  { %v3951_v48 = vpop.permute.xlu2 %3950 }
0x2728   :  { %v3964_v38 = vpop.permute.xlu2 %3963 }
0x2729   :  { %v3968_v8 = vmul.f32 %v3964_v38, %v9268_v40  ;;  %v3966_v18 = vmul.f32 %v3964_v38, %v9266_v36  ;;  %v3967_v12 = vmul.f32 %v3964_v38, %v9265_v4  ;;  %v3988_v0 = vmul.f32 %v3964_v38, %v9269_v58 }
0x272a   :  { %v3986_v28 = vmul.f32 %v3964_v38, %v9267_v43  ;;  %v3987_v53 = vmul.f32 %v3964_v38, %v9264_v39  ;;  %v4761_v38 = vmov 95  }
0x272b   :  { %3976 = vrot.lane.b32.xlu2 %v3968_v8, %s4705_s13  ;;  %3972 = vrot.lane.b32.xlu0 %v3966_v18, %s4705_s13 }
0x272c   :  { %3974 = vrot.lane.b32.xlu1 %v3967_v12, %s4705_s13  ;;  %4544 = vset.pattern.permute.xlu2 %v4761_v38  ;;  %v4763_v38 = vmov 99  }
0x2730   :  { %v7793_v60 = vpop.permute.xlu0 %3952 }
0x2731   :  { %9552 = vst [vmem:[#allocation143_spill] sm:$0xff] %v7793_v60  ;;  %v3956_v9 = vsel %vm1839_vm15, %v3951_v48, %v7793_v60  ;;  %v3933_v1 = vpop.permute.xlu1 %3932  ;;  %v7811_v60 = vld [vmem:[#allocation2] sm:$0xf] }
0x2732   :  { %v7799_v37 = vadd.f32 %v3956_v9, %v3876_v13  ;;  %v3938_v7 = vsel %vm1839_vm15, %v3933_v1, %v3935_v10 }
0x2733   :  { %v7803_v8 = vadd.f32 %v3938_v7, %v3858_v26  ;;  %3996 = vrot.lane.b32.xlu2 %v3988_v0, %s4705_s13  ;;  %3992 = vrot.lane.b32.xlu0 %v3986_v28, %s4705_s13 }
0x2734   :  { %3994 = vrot.lane.b32.xlu1 %v3987_v53, %s4705_s13  ;;  %v4762_v53 = vmov 97  }
0x2735   :  { %4545 = vset.pattern.permute.xlu1 %v4762_v53 }
0x2739   :  { %v3937_v48 = vpop.permute.xlu1 %3936 }
0x273a   :  { %v3939_v18 = vsel %vm1839_vm15, %v3935_v10, %v3937_v48 }
0x273b   :  { %v7809_v12 = vadd.f32 %v3939_v18, %v3859_v47  ;;  %4007 = vperm.xlu0 %4543, %v7811_v60  }
0x2741   :  { %v7816_v26 = vpop.permute.xlu1 %3954 }
0x2742   :  { %9553 = vst [vmem:[#allocation64_spill] sm:$0xff] %v7816_v26 }
0x2743   :  { %4549 = vset.pattern.permute.xlu0 %v4763_v38 }
0x2785   :  { %v3977_v13 = vpop.permute.xlu2 %3976 }
0x2786   :  { %v7814_v9 = vadd.f32 %v3977_v13, %v3901_v32 }
0x279d   :  { %v3973_v1 = vpop.permute.xlu0 %3972 }
0x279e   :  { %v3975_v0 = vpop.permute.xlu1 %3974 }
0x279f   :  { %v3978_v28 = vsel %vm1839_vm15, %v3973_v1, %v3975_v0  ;;  %v3979_v7 = vsel %vm1839_vm15, %v3975_v0, %v3977_v13 }
0x27a0   :  { %v7820_v10 = vadd.f32 %v3978_v28, %v3899_v14  ;;  %v7822_v47 = vadd.f32 %v3979_v7, %v3900_v33  ;;  %v7845_v28 = vpop.permute.xlu2 %3996  ;;  %v4764_v7 = vmov 96  }
0x27a5   :  { %v3993_v48 = vpop.permute.xlu0 %3992 }
0x27a6   :  { %v7824_v18 = vpop.permute.xlu1 %3994 }
0x27a7   :  { %v3998_v32 = vsel %vm1839_vm15, %v3993_v48, %v7824_v18 }
0x27a8   :  { %v7828_v26 = vadd.f32 %v3998_v32, %v3919_v16 }
0x27ad   :  { %v4008_v41 = vpop.permute.xlu0 %4007 }
0x27ae   :  { %v4029_v1 = vmul.f32 %v4008_v41, %v9264_v39  ;;  %v4011_v14 = vmul.f32 %v4008_v41, %v9265_v4  ;;  %v4010_v33 = vmul.f32 %v4008_v41, %v9266_v36  ;;  %v4028_v13 = vmul.f32 %v4008_v41, %v9267_v43 }
0x27af   :  { %v4012_v16 = vmul.f32 %v4008_v41, %v9268_v40  ;;  %v4030_v0 = vmul.f32 %v4008_v41, %v9269_v58 }
0x27b0   :  { %4036 = vrot.lane.b32.xlu0 %v4029_v1, %s4708_s14  ;;  %4018 = vrot.lane.b32.xlu2 %v4011_v14, %s4708_s14 }
0x27b1   :  { %4016 = vrot.lane.b32.xlu1 %v4010_v33, %s4708_s14 }
0x27b8   :  { %4034 = vrot.lane.b32.xlu2 %v4028_v13, %s4708_s14 }
0x27b9   :  { %4020 = vrot.lane.b32.xlu1 %v4012_v16, %s4708_s14 }
0x27c0   :  { %4047 = vperm.xlu2 %4544, %v7811_v60  }
0x27c1   :  { %4038 = vrot.lane.b32.xlu1 %v4030_v0, %s4708_s14 }
0x27c8   :  { %4546 = vset.pattern.permute.xlu2 %v4763_v38 }
0x27c9   :  { %4131 = vperm.xlu1 %4545, %v7811_v60   ;;  %4215 = vperm.xlu2 %4546, %v7811_v60  }
0x27d1   :  { %4547 = vset.pattern.permute.xlu2 %v4764_v7 }
0x280a   :  { %v4019_v53 = vpop.permute.xlu2 %4018 }
0x2812   :  { %v4035_v48 = vpop.permute.xlu2 %4034 }
0x281a   :  { %v4048_v32 = vpop.permute.xlu2 %4047 }
0x281b   :  { %v4070_v1 = vmul.f32 %v4048_v32, %v9267_v43  ;;  %v4050_v41 = vmul.f32 %v4048_v32, %v9266_v36  ;;  %v4052_v14 = vmul.f32 %v4048_v32, %v9268_v40  ;;  %v4051_v16 = vmul.f32 %v4048_v32, %v9265_v4 }
0x281c   :  { %v4072_v25 = vmul.f32 %v4048_v32, %v9269_v58 }
0x281d   :  { %4076 = vrot.lane.b32.xlu2 %v4070_v1, %s4710_s15  ;;  %4056 = vrot.lane.b32.xlu0 %v4050_v41, %s4710_s15  ;;  %v4071_v41 = vmul.f32 %v4048_v32, %v9264_v39 }
0x281e   :  { %4060 = vrot.lane.b32.xlu1 %v4052_v14, %s4710_s15 }
0x2822   :  { %v7853_v38 = vpop.permute.xlu0 %4036 }
0x2823   :  { %9554 = vst [vmem:[#allocation154_spill] sm:$0xff] %v7853_v38  ;;  %v4040_v33 = vsel %vm1924_vm9, %v4035_v48, %v7853_v38  ;;  %v4017_v13 = vpop.permute.xlu1 %4016 }
0x2824   :  { %v7859_v0 = vadd.f32 %v4040_v33, %v7799_v37  ;;  %v4022_v7 = vsel %vm1924_vm9, %v4017_v13, %v4019_v53  ;;  %v4765_v33 = vmov 98  }
0x2825   :  { %v7864_v1 = vadd.f32 %v4022_v7, %v7803_v8  ;;  %4091 = vperm.xlu2 %4547, %v7811_v60   ;;  %4058 = vrot.lane.b32.xlu0 %v4051_v16, %s4710_s15 }
0x2826   :  { %9555 = vst [vmem:[#allocation70_spill] sm:$0xff] %v7859_v0  ;;  %4080 = vrot.lane.b32.xlu1 %v4072_v25, %s4710_s15 }
0x282b   :  { %v4021_v48 = vpop.permute.xlu1 %4020 }
0x282c   :  { %v4023_v14 = vsel %vm1924_vm9, %v4019_v53, %v4021_v48  ;;  %v4216_v53 = vpop.permute.xlu2 %4215 }
0x282d   :  { %v7872_v37 = vadd.f32 %v4023_v14, %v7809_v12  ;;  %4078 = vrot.lane.b32.xlu0 %v4071_v41, %s4710_s15  ;;  %4548 = vset.pattern.permute.xlu2 %v4765_v33  ;;  %v4240_v12 = vmul.f32 %v4216_v53, %v9269_v58  ;;  %v4220_v32 = vmul.f32 %v4216_v53, %v9268_v40 }
0x282e   :  { %v4218_v59 = vmul.f32 %v4216_v53, %v9266_v36 }
0x2833   :  { %v7875_v8 = vpop.permute.xlu1 %4038 }
0x2834   :  { %9556 = vst [vmem:[#allocation165_spill] sm:$0xff] %v7875_v8  ;;  %v4219_v8 = vmul.f32 %v4216_v53, %v9265_v4 }
0x283b   :  { %v4132_v13 = vpop.permute.xlu1 %4131 }
0x283c   :  { %v4154_v7 = vmul.f32 %v4132_v13, %v9267_v43  ;;  %v4136_v25 = vmul.f32 %v4132_v13, %v9268_v40  ;;  %v4156_v33 = vmul.f32 %v4132_v13, %v9269_v58 }
0x283e   :  { %4160 = vrot.lane.b32.xlu2 %v4154_v7, %s4712_s16  ;;  %v4155_v7 = vmul.f32 %v4132_v13, %v9264_v39 }
0x2846   :  { %4175 = vperm.xlu2 %4548, %v7811_v60  }
0x284e   :  { %4144 = vrot.lane.b32.xlu2 %v4136_v25, %s4712_s16 }
0x2856   :  { %4248 = vrot.lane.b32.xlu2 %v4240_v12, %s4715_s17  ;;  %v4135_v12 = vmul.f32 %v4132_v13, %v9265_v4 }
0x285e   :  { %4228 = vrot.lane.b32.xlu2 %v4220_v32, %s4715_s17  ;;  %v4134_v32 = vmul.f32 %v4132_v13, %v9266_v36  ;;  %v9558_v13 = vld [vmem:[#allocation83_spill] sm:$0xff] }
0x2877   :  { %v4077_v16 = vpop.permute.xlu2 %4076 }
0x287f   :  { %v4092_v48 = vpop.permute.xlu2 %4091 }
0x2880   :  { %v4094_v41 = vmul.f32 %v4092_v48, %v9266_v36  ;;  %v4095_v14 = vmul.f32 %v4092_v48, %v9265_v4  ;;  %v4114_v60 = vmul.f32 %v4092_v48, %v9269_v58 }
0x2882   :  { %4100 = vrot.lane.b32.xlu0 %v4094_v41, %s4712_s16  ;;  %4102 = vrot.lane.b32.xlu1 %v4095_v14, %s4712_s16 }
0x2883   :  { %4122 = vrot.lane.b32.xlu2 %v4114_v60, %s4712_s16  ;;  %v4239_v60 = vmul.f32 %v4216_v53, %v9264_v39 }
0x288a   :  { %4164 = vrot.lane.b32.xlu1 %v4156_v33, %s4712_s16  ;;  %4162 = vrot.lane.b32.xlu0 %v4155_v7, %s4712_s16  ;;  %v4238_v33 = vmul.f32 %v4216_v53, %v9267_v43  ;;  %v9557_v7 = vld [vmem:[#allocation13_spill] sm:$0xff] }
0x288b   :  { %v95_v0 = vmul.f32 %v9557_v7, %v4836_v34  ;;  %v9561_v7 = vld [vmem:[#allocation105_spill] sm:$0xff] }
0x288d   :  { %v183_v38 = vadd.f32 %v9558_v13, %v95_v0 }
0x288f   :  { %v7896_v25 = vpop.permute.xlu0 %4056  ;;  %v269_v23 = vadd.f32 %v9560_v24, %v183_v38  ;;  %v4113_v38 = vmul.f32 %v4092_v48, %v9264_v39 }
0x2891   :  { %v354_v22 = vadd.f32 %v9561_v7, %v269_v23  ;;  %v9565_v23 = vld [vmem:[#allocation19_spill] sm:$0xff] }
0x2892   :  { %4142 = vrot.lane.b32.xlu1 %v4135_v12, %s4712_s16  ;;  %4140 = vrot.lane.b32.xlu0 %v4134_v32, %s4712_s16 }
0x2897   :  { %v7902_v41 = vpop.permute.xlu0 %4058 }
0x2898   :  { %v7904_v14 = vpop.permute.xlu2 %4160 }
0x289a   :  { %4246 = vrot.lane.b32.xlu1 %v4239_v60, %s4715_s17  ;;  %4244 = vrot.lane.b32.xlu0 %v4238_v33, %s4715_s17 }
0x289f   :  { %v7913_v12 = vpop.permute.xlu0 %4078 }
0x28a0   :  { %v4082_v32 = vsel %vm9559_vm11, %v4077_v16, %v7913_v12  ;;  %v4176_v33 = vpop.permute.xlu2 %4175  ;;  %v9562_v16 = vld [vmem:[#allocation116_spill] sm:$0xff]  ;;  %vm9591_vm11 = vcmask 506880  }
0x28a1   :  { %v7921_v60 = vadd.f32 %v4082_v32, %v7828_v26  ;;  %v4197_v0 = vmul.f32 %v4176_v33, %v9264_v39  ;;  %v439_v35 = vadd.f32 %v9562_v16, %v354_v22  ;;  %v4112_v26 = vmul.f32 %v4092_v48, %v9267_v43  ;;  %v9568_v39 = vld [vmem:[#allocation23_spill] sm:$0xff] }
0x28a2   :  { %4226 = vrot.lane.b32.xlu1 %v4219_v8, %s4715_s17  ;;  %4224 = vrot.lane.b32.xlu0 %v4218_v59, %s4715_s17  ;;  %v4179_v32 = vmul.f32 %v4176_v33, %v9265_v4  ;;  %v177_v59 = vsel %vm115_vm0, %v9565_v23, %v9558_v13  ;;  %v263_v4 = vsel %vm9569_vm1, %v9568_v39, %v9560_v24  ;;  %v9572_v23 = vld [vmem:[#allocation171_spill] sm:$0xff]  ;;  %vm9594_vm1 = vcmask 7168  }
0x28a3   :  { %4204 = vrot.lane.b32.xlu2 %v4197_v0, %s4715_s17  ;;  %v524_v53 = vadd.f32 %v9563_v50, %v439_v35  ;;  %v9566_v0 = vld [vmem:[#allocation149_spill] sm:$0xff]  ;;  %v9567_v35 = vld [vmem:[#allocation15_spill] sm:$0xff]  ;;  %v348_v13 = vsel %vm286_vm2, %v9571_v29, %v9561_v7 }
0x28a4   :  { %v94_v51 = vmul.f32 %v9567_v35, %v4836_v34  ;;  %v4096_v34 = vmul.f32 %v4092_v48, %v9268_v40  ;;  %v9577_v48 = vld [vmem:[#allocation53_spill] sm:$0xff] }
0x28a5   :  { %v609_v8 = vadd.f32 %v9564_v52, %v524_v53  ;;  %v9570_v53 = vld [vmem:[#allocation160_spill] sm:$0xff] }
0x28a7   :  { %v695_v22 = vadd.f32 %v9566_v0, %v609_v8 }
0x28a9   :  { %v780_v45 = vadd.f32 %v9570_v53, %v695_v22  ;;  %v9578_v22 = vld [vmem:[#allocation101_spill] sm:$0xff] }
0x28aa   :  { %4120 = vrot.lane.b32.xlu1 %v4113_v38, %s4712_s16  ;;  %4118 = vrot.lane.b32.xlu0 %v4112_v26, %s4712_s16  ;;  %v182_v38 = vadd.f32 %v177_v59, %v94_v51  ;;  %v4196_v26 = vmul.f32 %v4176_v33, %v9267_v43  ;;  %v9575_v43 = vld [vmem:[#allocation47_spill] sm:$0xff]  ;;  %v9576_v51 = vld [vmem:[#allocation193_spill] sm:$0xff]  ;;  %v603_v59 = vsel %vm541_vm5, %v9577_v48, %v9564_v52 }
0x28ab   :  { %4186 = vrot.lane.b32.xlu2 %v4179_v32, %s4715_s17  ;;  %v865_v8 = vadd.f32 %v9572_v23, %v780_v45  ;;  %v9573_v32 = vld [vmem:[#allocation41_spill] sm:$0xff]  ;;  %v518_v29 = vsel %vm456_vm4, %v9575_v43, %v9563_v50  ;;  %v9586_v43 = vld [vmem:[#allocation134_spill] sm:$0xff] }
0x28ac   :  { %v268_v44 = vadd.f32 %v263_v4, %v182_v38  ;;  %v433_v35 = vsel %vm371_vm3, %v9573_v32, %v9562_v16  ;;  %v4198_v38 = vmul.f32 %v4176_v33, %v9269_v58  ;;  %v9582_v32 = vld [vmem:[#allocation65_spill] sm:$0xff] }
0x28ad   :  { %v950_v24 = vadd.f32 %v9574_v15, %v865_v8  ;;  %v9581_v8 = vld [vmem:[#allocation112_spill] sm:$0xff]  ;;  %v9589_v48 = vld [vmem:[#allocation145_spill] sm:$0xff] }
0x28ae   :  { %v353_v39 = vadd.f32 %v348_v13, %v268_v44  ;;  %v4178_v44 = vmul.f32 %v4176_v33, %v9266_v36  ;;  %v9584_v36 = vld [vmem:[#allocation71_spill] sm:$0xff] }
0x28af   :  { %v1035_v45 = vadd.f32 %v9576_v51, %v950_v24  ;;  %v9583_v24 = vld [vmem:[#allocation123_spill] sm:$0xff]  ;;  %v859_v58 = vsel %vm9585_vm8, %v9584_v36, %v9572_v23  ;;  %vm9600_vm8 = vcmask 1022976  }
0x28b0   :  { %v438_v7 = vadd.f32 %v433_v35, %v353_v39  ;;  %v774_v35 = vsel %vm712_vm7, %v9582_v32, %v9570_v53  ;;  %v9593_v23 = vld [vmem:[#allocation203_spill] sm:$0xff] }
0x28b1   :  { %v1125_v16 = vadd.f32 %v9578_v22, %v1035_v45  ;;  %v9587_v45 = vld [vmem:[#allocation79_spill] sm:$0xff] }
0x28b2   :  { %4202 = vrot.lane.b32.xlu1 %v4196_v26, %s4715_s17  ;;  %4104 = vrot.lane.b32.xlu0 %v4096_v34, %s4712_s16  ;;  %v523_v4 = vadd.f32 %v518_v29, %v438_v7  ;;  %v9579_v26 = vld [vmem:[#allocation59_spill] sm:$0xff]  ;;  %v944_v7 = vsel %vm9588_vm6, %v9587_v45, %v9574_v15  ;;  %v9596_v15 = vld [vmem:[#allocation210_spill] sm:$0xff]  ;;  %vm9603_vm6 = vcmask 916480  }
0x28b3   :  { %v689_v13 = vsel %vm9580_vm14, %v9579_v26, %v9566_v0  ;;  %v1226_v50 = vadd.f32 %v9581_v8, %v1125_v16  ;;  %v4180_v16 = vmul.f32 %v4176_v33, %v9268_v40  ;;  %vm9597_vm14 = vcmask 1039360   ;;  %v9598_v33 = vld [vmem:[#allocation178_spill] sm:$0xff] }
0x28b4   :  { %v608_v34 = vadd.f32 %v603_v59, %v523_v4  ;;  %v9590_v4 = vld [vmem:[#allocation90_spill] sm:$0xff]  ;;  %v1220_v40 = vsel %vm9597_vm14, %v9596_v15, %v9581_v8  ;;  %vm9613_vm14 = vcmask 777216  }
0x28b5   :  { %v1311_v52 = vadd.f32 %v9583_v24, %v1226_v50  ;;  %v1119_v50 = vsel %vm9594_vm1, %v9593_v23, %v9578_v22  ;;  %v9602_v22 = vld [vmem:[#allocation224_spill] sm:$0xff]  ;;  %vm9609_vm1 = vcmask 793600   ;;  %v9612_v15 = vld [vmem:[#allocation242_spill] sm:$0xff] }
0x28b6   :  { %v694_v39 = vadd.f32 %v689_v13, %v608_v34  ;;  %v9595_v34 = vld [vmem:[#allocation167_spill] sm:$0xff]  ;;  %v1390_v45 = vsel %vm9603_vm6, %v9602_v22, %v9586_v43  ;;  %v9610_v23 = vld [vmem:[#allocation248_spill] sm:$0xff]  ;;  %vm9618_vm6 = vcmask 654336  }
0x28b7   :  { %v1396_v0 = vadd.f32 %v9586_v43, %v1311_v52 }
0x28b8   :  { %v779_v29 = vadd.f32 %v774_v35, %v694_v39 }
0x28b9   :  { %v1481_v53 = vadd.f32 %v9589_v48, %v1396_v0 }
0x28ba   :  { %4184 = vrot.lane.b32.xlu1 %v4178_v44, %s4715_s17  ;;  %4206 = vrot.lane.b32.xlu0 %v4198_v38, %s4715_s17  ;;  %v864_v59 = vadd.f32 %v859_v58, %v779_v29  ;;  %v1029_v44 = vsel %vm9591_vm11, %v9590_v4, %v9576_v51  ;;  %v9592_v38 = vld [vmem:[#allocation156_spill] sm:$0xff]  ;;  %v9599_v51 = vld [vmem:[#allocation218_spill] sm:$0xff]  ;;  %v9601_v58 = vld [vmem:[#allocation189_spill] sm:$0xff]  ;;  %vm9606_vm11 = vcmask 900096  }
0x28bb   :  { %v1567_v26 = vadd.f32 %v9592_v38, %v1481_v53  ;;  %v1305_v36 = vsel %vm9600_vm8, %v9599_v51, %v9583_v24  ;;  %v9607_v4 = vld [vmem:[#allocation215_spill] sm:$0xff]  ;;  %v9615_v51 = vld [vmem:[#allocation249_spill] sm:$0xff]  ;;  %vm9616_vm8 = vcmask 760832  }
0x28bc   :  { %v949_v13 = vadd.f32 %v944_v7, %v864_v59  ;;  %v9604_v7 = vld [vmem:[#allocation200_spill] sm:$0xff] }
0x28bd   :  { %v1652_v32 = vadd.f32 %v9595_v34, %v1567_v26 }
0x28be   :  { %v1034_v35 = vadd.f32 %v1029_v44, %v949_v13  ;;  %v9608_v13 = vld [vmem:[#allocation237_spill] sm:$0xff] }
0x28bf   :  { %v1737_v52 = vadd.f32 %v9598_v33, %v1652_v32  ;;  %v1561_v24 = vsel %vm9609_vm1, %v9608_v13, %v9592_v38  ;;  %v9611_v32 = vld [vmem:[#allocation272_spill] sm:$0xff]  ;;  %v9622_v13 = vld [vmem:[#allocation274_spill] sm:$0xff]  ;;  %vm9628_vm1 = vcmask 498688  }
0x28c0   :  { %v1124_v39 = vadd.f32 %v1119_v50, %v1034_v35  ;;  %v2218_v35 = vmul.f32 %v9611_v32, %v9060_v46  ;;  %v9617_v38 = vld [vmem:[#allocation256_spill] sm:$0xff] }
0x28c1   :  { %v1822_v0 = vadd.f32 %v9601_v58, %v1737_v52  ;;  %v9614_v52 = vld [vmem:[#allocation266_spill] sm:$0xff]  ;;  %v1816_v22 = vsel %vm9618_vm6, %v9617_v38, %v9601_v58  ;;  %vm9651_vm6 = vcmask 629760  }
0x28c2   :  { %4188 = vrot.lane.b32.xlu0 %v4180_v16, %s4715_s17  ;;  %v1225_v29 = vadd.f32 %v1220_v40, %v1124_v39  ;;  %v9605_v16 = vld [vmem:[#allocation229_spill] sm:$0xff]  ;;  %v1646_v40 = vsel %vm9613_vm14, %v9612_v15, %v9595_v34  ;;  %vm9635_vm14 = vcmask 924672  }
0x28c3   :  { %v1907_v53 = vadd.f32 %v9604_v7, %v1822_v0  ;;  %v1475_v8 = vsel %vm9606_vm11, %v9605_v16, %v9589_v48  ;;  %v9620_v16 = vld [vmem:[#allocation261_spill] sm:$0xff]  ;;  %vm9623_vm11 = vcmask 531456  }
0x28c4   :  { %v1310_v59 = vadd.f32 %v1305_v36, %v1225_v29  ;;  %v1731_v36 = vsel %vm9616_vm8, %v9615_v51, %v9598_v33  ;;  %v1901_v34 = vsel %vm1839_vm15, %v9620_v16, %v9604_v7  ;;  %v1987_v33 = vsel %vm9623_vm11, %v9622_v13, %v9607_v4 }
0x28c5   :  { %v1993_v44 = vadd.f32 %v9607_v4, %v1907_v53  ;;  %vm9646_vm8 = vcmask 662528   ;;  %vm9654_vm11 = vcmask 523264  }
0x28c6   :  { %v1395_v26 = vadd.f32 %v1390_v45, %v1310_v59  ;;  %v9619_v45 = vld [vmem:[#allocation366_spill] sm:$0xff] }
0x28c7   :  { %v2078_v50 = vadd.f32 %v9610_v23, %v1993_v44 }
0x28c8   :  { %v1480_v43 = vadd.f32 %v1475_v8, %v1395_v26  ;;  %v9621_v8 = vld [vmem:[#allocation375_spill] sm:$0xff] }
0x28c9   :  { %v2163_v39 = vadd.f32 %v9614_v52, %v2078_v50 }
0x28ca   :  { %v1566_v48 = vadd.f32 %v1561_v24, %v1480_v43  ;;  %v9624_v24 = vld [vmem:[#allocation383_spill] sm:$0xff]  ;;  %v9626_v43 = vld [vmem:[#allocation394_spill] sm:$0xff] }
0x28cb   :  { %v2221_v0 = vadd.f32 %v2218_v35, %v2163_v39  ;;  %v9625_v35 = vld [vmem:[#allocation279_spill] sm:$0xff]  ;;  %v9627_v39 = vld [vmem:[#allocation284_spill] sm:$0xff] }
0x28cc   :  { %v1651_v29 = vadd.f32 %v1646_v40, %v1566_v48  ;;  %v2072_v58 = vsel %vm2010_vm13, %v9625_v35, %v9610_v23  ;;  %v2157_v7 = vsel %vm9628_vm1, %v9627_v39, %v9614_v52  ;;  %v9629_v48 = vld [vmem:[#allocation401_spill] sm:$0xff]  ;;  %vm9656_vm1 = vcmask 506880  }
0x28cd   :  { %v2305_v53 = vadd.f32 %v9619_v45, %v2221_v0  ;;  %v9630_v0 = vld [vmem:[#allocation271_spill] sm:$0xff]  ;;  %v9640_v39 = vld [vmem:[#allocation433_spill] sm:$0xff] }
0x28ce   :  { %v1736_v59 = vadd.f32 %v1731_v36, %v1651_v29  ;;  %v2217_v4 = vmul.f32 %v9630_v0, %v9060_v46  ;;  %v9631_v29 = vld [vmem:[#allocation410_spill] sm:$0xff]  ;;  %v9642_v0 = vld [vmem:[#allocation440_spill] sm:$0xff] }
0x28cf   :  { %v2389_v44 = vadd.f32 %v9621_v8, %v2305_v53  ;;  %v9632_v53 = vld [vmem:[#allocation299_spill] sm:$0xff] }
0x28d0   :  { %v1821_v26 = vadd.f32 %v1816_v22, %v1736_v59  ;;  %v2299_v23 = vsel %vm115_vm0, %v9632_v53, %v9619_v45  ;;  %v9633_v59 = vld [vmem:[#allocation415_spill] sm:$0xff]  ;;  %v9639_v45 = vld [vmem:[#allocation320_spill] sm:$0xff] }
0x28d1   :  { %v2473_v50 = vadd.f32 %v9624_v24, %v2389_v44  ;;  %v9634_v44 = vld [vmem:[#allocation306_spill] sm:$0xff]  ;;  %v9644_v53 = vld [vmem:[#allocation404_spill] sm:$0xff] }
0x28d2   :  { %v1906_v32 = vadd.f32 %v1901_v34, %v1821_v26  ;;  %v2383_v52 = vsel %vm9635_vm14, %v9634_v44, %v9621_v8  ;;  %v9636_v26 = vld [vmem:[#allocation420_spill] sm:$0xff]  ;;  %v9641_v8 = vld [vmem:[#allocation327_spill] sm:$0xff]  ;;  %v9647_v44 = vld [vmem:[#allocation437_spill] sm:$0xff]  ;;  %vm9658_vm14 = vcmask 7168  }
0x28d3   :  { %v2557_v15 = vadd.f32 %v9626_v43, %v2473_v50  ;;  %v9637_v50 = vld [vmem:[#allocation313_spill] sm:$0xff] }
0x28d4   :  { %v1992_v40 = vadd.f32 %v1987_v33, %v1906_v32  ;;  %v2467_v46 = vsel %vm286_vm2, %v9637_v50, %v9624_v24  ;;  %v9638_v32 = vld [vmem:[#allocation428_spill] sm:$0xff]  ;;  %v9643_v24 = vld [vmem:[#allocation334_spill] sm:$0xff]  ;;  %v9649_v50 = vld [vmem:[#allocation305_spill] sm:$0xff] }
0x28d5   :  { %v2641_v51 = vadd.f32 %v9629_v48, %v2557_v15  ;;  %v8061_v15 = vpop.permute.xlu1 %4060 }
0x28d6   :  { %v2077_v36 = vadd.f32 %v2072_v58, %v1992_v40  ;;  %v2551_v40 = vsel %vm371_vm3, %v9639_v45, %v9626_v43 }
0x28d7   :  { %v2725_v38 = vadd.f32 %v9631_v29, %v2641_v51 }
0x28d8   :  { %v2162_v22 = vadd.f32 %v2157_v7, %v2077_v36  ;;  %v2635_v36 = vsel %vm456_vm4, %v9641_v8, %v9629_v48 }
0x28d9   :  { %v2809_v16 = vadd.f32 %v9633_v59, %v2725_v38 }
0x28da   :  { %v2220_v34 = vadd.f32 %v2217_v4, %v2162_v22  ;;  %v2719_v22 = vsel %vm541_vm5, %v9643_v24, %v9631_v29  ;;  %v9650_v29 = vld [vmem:[#allocation355_spill] sm:$0xff] }
0x28db   :  { %v2893_v13 = vadd.f32 %v9636_v26, %v2809_v16  ;;  %v2971_v45 = vsel %vm9651_vm6, %v9650_v29, %v9638_v32  ;;  %vm9662_vm6 = vcmask 1022976  }
0x28dc   :  { %v2304_v33 = vadd.f32 %v2299_v23, %v2220_v34  ;;  %v9645_v34 = vld [vmem:[#allocation341_spill] sm:$0xff] }
0x28dd   :  { %v2977_v35 = vadd.f32 %v9638_v32, %v2893_v13  ;;  %v2803_v43 = vsel %vm9646_vm8, %v9645_v34, %v9633_v59  ;;  %v9653_v59 = vld [vmem:[#allocation362_spill] sm:$0xff]  ;;  %v9657_v32 = vld [vmem:[#allocation443_spill] sm:$0xff]  ;;  %vm9660_vm8 = vcmask 1039360  }
0x28de   :  { %v2388_v58 = vadd.f32 %v2383_v52, %v2304_v33  ;;  %v9648_v33 = vld [vmem:[#allocation348_spill] sm:$0xff]  ;;  %v3055_v8 = vsel %vm9654_vm11, %v9653_v59, %v9640_v39  ;;  %vm9664_vm11 = vcmask 916480  }
0x28df   :  { %v3061_v7 = vadd.f32 %v9640_v39, %v2977_v35  ;;  %v2887_v48 = vsel %vm712_vm7, %v9648_v33, %v9636_v26 }
0x28e0   :  { %v2472_v51 = vadd.f32 %v2467_v46, %v2388_v58  ;;  %v4081_v58 = vpop.permute.xlu1 %4080 }
0x28e1   :  { %v3145_v4 = vadd.f32 %v9642_v0, %v3061_v7 }
0x28e2   :  { %v2556_v38 = vadd.f32 %v2551_v40, %v2472_v51  ;;  %v9652_v40 = vld [vmem:[#allocation18_spill] sm:$0xff] }
0x28e3   :  { %v3233_v23 = vadd.f32 %v9644_v53, %v3145_v4  ;;  %v8091_v4 = vpop.permute.xlu2 %4144 }
0x28e4   :  { %v2640_v16 = vadd.f32 %v2635_v36, %v2556_v38  ;;  %v9655_v38 = vld [vmem:[#allocation378_spill] sm:$0xff] }
0x28e5   :  { %v3333_v52 = vadd.f32 %v9647_v44, %v3233_v23  ;;  %v3139_v24 = vsel %vm9656_vm1, %v9655_v38, %v9642_v0  ;;  %vm9665_vm1 = vcmask 900096  }
0x28e6   :  { %v2724_v13 = vadd.f32 %v2719_v22, %v2640_v16  ;;  %v3227_v16 = vsel %vm9658_vm14, %v9657_v32, %v9644_v53  ;;  %v9661_v53 = vld [vmem:[#allocation291_spill] sm:$0xff]  ;;  %vm9666_vm14 = vcmask 793600  }
0x28e7   :  { %v3417_v46 = vadd.f32 %v9649_v50, %v3333_v52  ;;  %v3411_v29 = vsel %vm9662_vm6, %v9661_v53, %v9649_v50  ;;  %v3663_v50 = vsel %vm9666_vm14, %v7641_v62, %v7659_v21  ;;  %vm9668_vm6 = vcmask 760832  }
0x28e8   :  { %v2808_v35 = vadd.f32 %v2803_v43, %v2724_v13  ;;  %v9659_v13 = vld [vmem:[#allocation448_spill] sm:$0xff]  ;;  %v4069_v62 = vadd.f32 %v8061_v15, %v7814_v9  ;;  %vm9671_vm14 = vcmask 498688  }
0x28e9   :  { %v3501_v7 = vadd.f32 %v9652_v40, %v3417_v46  ;;  %v3327_v33 = vsel %vm9660_vm8, %v9659_v13, %v9647_v44  ;;  %vm9667_vm8 = vcmask 777216  }
0x28ea   :  { %v2892_v51 = vadd.f32 %v2887_v48, %v2808_v35 }
0x28eb   :  { %v3585_v36 = vadd.f32 %v7471_v20, %v3501_v7 }
0x28ec   :  { %v2976_v26 = vadd.f32 %v2971_v45, %v2892_v51  ;;  %v9663_v51 = vld [vmem:[#allocation371_spill] sm:$0xff] }
0x28ed   :  { %v3669_v22 = vadd.f32 %v7659_v21, %v3585_v36  ;;  %v3495_v44 = vsel %vm9664_vm11, %v9663_v51, %v9652_v40  ;;  %v3747_v40 = vsel %vm9667_vm8, %v7684_v55, %v7701_v54  ;;  %vm9669_vm11 = vcmask 654336   ;;  %vm9672_vm8 = vmmov %vm9671_vm14 }
0x28ee   :  { %v3060_v23 = vadd.f32 %v3055_v8, %v2976_v26  ;;  %v4249_v8 = vpop.permute.xlu2 %4248 }
0x28ef   :  { %v3753_v34 = vadd.f32 %v7701_v54, %v3669_v22  ;;  %v3999_v54 = vsel %vm1839_vm15, %v7824_v18, %v7845_v28 }
0x28f0   :  { %v3144_v43 = vadd.f32 %v3139_v24, %v3060_v23 }
0x28f1   :  { %v3837_v48 = vadd.f32 %v7743_v63, %v3753_v34 }
0x28f2   :  { %v3232_v46 = vadd.f32 %v3227_v16, %v3144_v43  ;;  %v3915_v43 = vsel %vm9669_vm11, %v7768_v11, %v7785_v17 }
0x28f3   :  { %v3921_v45 = vadd.f32 %v7785_v17, %v3837_v48 }
0x28f4   :  { %v4101_v39 = vpop.permute.xlu0 %4100  ;;  %v8101_v52 = vpop.permute.xlu1 %4102  ;;  %v3332_v7 = vadd.f32 %v3327_v33, %v3232_v46 }
0x28f5   :  { %v4106_v0 = vsel %vm2010_vm13, %v4101_v39, %v8101_v52  ;;  %v4005_v59 = vadd.f32 %v7845_v28, %v3921_v45 }
0x28f6   :  { %v8110_v35 = vadd.f32 %v4106_v0, %v7864_v1  ;;  %v3416_v36 = vadd.f32 %v3411_v29, %v3332_v7  ;;  %v3579_v1 = vsel %vm9665_vm1, %v7225_v49, %v7471_v20  ;;  %v3831_v49 = vsel %vm9668_vm6, %v7726_v2, %v7743_v63  ;;  %v4229_v21 = vpop.permute.xlu2 %4228 }
0x28f7   :  { %v4089_v26 = vadd.f32 %v4081_v58, %v4005_v59  ;;  %v4153_v2 = vadd.f32 %v8091_v4, %v4069_v62  ;;  %vm9670_vm1 = vcmask 531456  }
0x28f8   :  { %v3500_v38 = vadd.f32 %v3495_v44, %v3416_v36  ;;  %v4083_v33 = vsel %vm9670_vm1, %v7913_v12, %v4081_v58  ;;  %vm9673_vm6 = vmmov %vm9670_vm1 }
0x28f9   :  { %v4237_v48 = vadd.f32 %v4229_v21, %v4153_v2  ;;  %vm9674_vm11 = vmmov %vm9670_vm1  ;;  %v9685_v2 = vld [vmem:[#allocation63_spill] sm:$0xff] }
0x28fa   :  { %v3584_v32 = vadd.f32 %v3579_v1, %v3500_v38  ;;  %v4063_v7 = vsel %vm9674_vm11, %v7902_v41, %v8061_v15  ;;  %vm9676_vm1 = vmmov %vm9672_vm8  ;;  %vm9689_vm11 = vcmask 523264  }
0x28fb   :  { %v4068_v36 = vadd.f32 %v4063_v7, %v7822_v47  ;;  %v9700_v7 = vld [vmem:[#allocation117_spill] sm:$0xff] }
0x28fc   :  { %v4163_v24 = vpop.permute.xlu0 %4162  ;;  %v4165_v22 = vpop.permute.xlu1 %4164  ;;  %v3668_v34 = vadd.f32 %v3663_v50, %v3584_v32 }
0x28fd   :  { %v4173_v23 = vadd.f32 %v4165_v22, %v4089_v26  ;;  %v4166_v11 = vsel %vm2010_vm13, %v7904_v14, %v4163_v24  ;;  %v4167_v17 = vsel %vm2010_vm13, %v4163_v24, %v4165_v22  ;;  %v4062_v14 = vsel %vm9673_vm6, %v7896_v25, %v7902_v41  ;;  %v9675_v25 = vld [vmem:[#allocation17_spill] sm:$0xff] }
0x28fe   :  { %v3752_v20 = vadd.f32 %v3747_v40, %v3668_v34  ;;  %v4171_v46 = vadd.f32 %v4166_v11, %v7921_v60  ;;  %v4555_v60 = vld [vmem:[#allocation5 + $0x4] ss:$8 sm:$0x3]  ;;  %v135_v1 = vsel %vm115_vm0, %v9272_v27, %v9675_v25  ;;  %v9679_v40 = vld [vmem:[#allocation36_spill] sm:$0xff]  ;;  %vm9687_vm6 = vcmask 629760  }
0x28ff   :  { %v4257_v16 = vadd.f32 %v4249_v8, %v4173_v23  ;;  %v60_v51 = vperm.slane %v4555_v60, 1  ;;  %v9678_v23 = vld [vmem:[#allocation33_spill] sm:$0xff]  ;;  %v306_v27 = vsel %vm286_vm2, %v9281_v42, %v9679_v40  ;;  %v9688_v11 = vld [vmem:[#allocation75_spill] sm:$0xff] }
0x2900   :  { %v3836_v39 = vadd.f32 %v3831_v49, %v3752_v20  ;;  %v9681_v20 = vld [vmem:[#allocation45_spill] sm:$0xff]  ;;  %v9706_v25 = vld [vmem:[#allocation139_spill] sm:$0xff] }
0x2901   :  { %4280 = vrot.lane.b32.xlu0 %v4257_v16, %s4680_s4  ;;  %v64_v24 = vmul.f32 %v60_v51, %v9274_v6  ;;  %v9680_v16 = vld [vmem:[#allocation39_spill] sm:$0xff]  ;;  %v9702_v51 = vld [vmem:[#allocation222_spill] sm:$0xff] }
0x2902   :  { %v3920_v63 = vadd.f32 %v3915_v43, %v3836_v39  ;;  %v391_v34 = vsel %vm371_vm3, %v9285_v3, %v9680_v16  ;;  %v732_v3 = vsel %vm712_vm7, %v9305_v61, %v9685_v2  ;;  %v9691_v61 = vld [vmem:[#allocation186_spill] sm:$0xff]  ;;  %v9723_v2 = vld [vmem:[#allocation277_spill] sm:$0xff] }
0x2903   :  { %v139_v32 = vadd.f32 %v135_v1, %v64_v24 }
0x2904   :  { %v4141_v13 = vpop.permute.xlu0 %4140  ;;  %v4143_v55 = vpop.permute.xlu1 %4142  ;;  %v4004_v0 = vadd.f32 %v3999_v54, %v3920_v63 }
0x2905   :  { %v4146_v44 = vsel %vm2010_vm13, %v4141_v13, %v4143_v55  ;;  %v4147_v59 = vsel %vm2010_vm13, %v4143_v55, %v8091_v4  ;;  %v9683_v13 = vld [vmem:[#allocation57_spill] sm:$0xff] }
0x2906   :  { %v4088_v9 = vadd.f32 %v4083_v33, %v4004_v0  ;;  %v4152_v15 = vadd.f32 %v4147_v59, %v4068_v36  ;;  %v9686_v33 = vld [vmem:[#allocation69_spill] sm:$0xff]  ;;  %v9705_v36 = vld [vmem:[#allocation227_spill] sm:$0xff] }
0x2908   :  { %v4172_v53 = vadd.f32 %v4167_v17, %v4088_v9  ;;  %v902_v17 = vsel %vm9689_vm11, %v9318_v56, %v9688_v11  ;;  %v9699_v56 = vld [vmem:[#allocation214_spill] sm:$0xff]  ;;  %vm9704_vm11 = vcmask 916480   ;;  %v9728_v11 = vld [vmem:[#allocation295_spill] sm:$0xff] }
0x2909   :  { %4265 = vrot.lane.b32.xlu0 %v4237_v48, %s4680_s4 }
0x290c   :  { %v4245_v18 = vpop.permute.xlu0 %4244  ;;  %v4247_v28 = vpop.permute.xlu1 %4246 }
0x290d   :  { %v4250_v29 = vsel %vm9671_vm14, %v4245_v18, %v4247_v28  ;;  %v4251_v45 = vsel %vm9672_vm8, %v4247_v28, %v4249_v8  ;;  %v4067_v8 = vadd.f32 %v4062_v14, %v7820_v10  ;;  %vm9677_vm14 = vmmov %vm9676_vm1  ;;  %v220_v10 = vsel %vm200_vm10, %v9277_v19, %v9678_v23  ;;  %v9693_v28 = vld [vmem:[#allocation99_spill] sm:$0xff] }
0x290e   :  { %v4255_v12 = vadd.f32 %v4250_v29, %v4171_v46  ;;  %v4256_v58 = vadd.f32 %v4251_v45, %v4172_v53  ;;  %v224_v6 = vadd.f32 %v220_v10, %v139_v32  ;;  %v476_v19 = vsel %vm456_vm4, %v9290_v31, %v9681_v20  ;;  %v9690_v46 = vld [vmem:[#allocation86_spill] sm:$0xff] }
0x290f   :  { %v4151_v41 = vadd.f32 %v4146_v44, %v4067_v8  ;;  %vm9684_vm8 = vcmask 752640   ;;  %v817_v31 = vsel %vm9687_vm6, %v9311_v57, %v9686_v33  ;;  %v9694_v57 = vld [vmem:[#allocation197_spill] sm:$0xff]  ;;  %vm9701_vm6 = vcmask 1022976   ;;  %v9703_v44 = vld [vmem:[#allocation128_spill] sm:$0xff]  ;;  %v9720_v20 = vld [vmem:[#allocation194_spill] sm:$0xff] }
0x2910   :  { %4278 = vrot.lane.b32.xlu2 %v4256_v58, %s4680_s4  ;;  %4276 = vrot.lane.b32.xlu1 %v4255_v12, %s4680_s4  ;;  %v310_v49 = vadd.f32 %v306_v27, %v224_v6  ;;  %v646_v55 = vsel %vm9684_vm8, %v9300_v5, %v9683_v13  ;;  %v9696_v12 = vld [vmem:[#allocation208_spill] sm:$0xff]  ;;  %vm9698_vm8 = vcmask 1039360   ;;  %v1348_v59 = vsel %vm9704_vm11, %v9703_v44, %v9702_v51  ;;  %v9716_v27 = vld [vmem:[#allocation254_spill] sm:$0xff]  ;;  %v9717_v6 = vld [vmem:[#allocation183_spill] sm:$0xff] }
0x2911   :  { %vm9727_vm11 = vcmask 498688   ;;  %v9737_v51 = vld [vmem:[#allocation324_spill] sm:$0xff] }
0x2912   :  { %v395_v62 = vadd.f32 %v391_v34, %v310_v49  ;;  %v9719_v49 = vld [vmem:[#allocation259_spill] sm:$0xff]  ;;  %v9738_v44 = vld [vmem:[#allocation396_spill] sm:$0xff] }
0x2914   :  { %v4225_v26 = vpop.permute.xlu0 %4224  ;;  %v4227_v38 = vpop.permute.xlu1 %4226  ;;  %v480_v39 = vadd.f32 %v476_v19, %v395_v62  ;;  %v1859_v19 = vsel %vm1839_vm15, %v9720_v20, %v9719_v49  ;;  %v9752_v20 = vld [vmem:[#allocation369_spill] sm:$0xff] }
0x2915   :  { %v4230_v22 = vsel %vm9676_vm1, %v4225_v26, %v4227_v38  ;;  %v4231_v50 = vsel %vm9677_vm14, %v4227_v38, %v4229_v21  ;;  %v9682_v21 = vld [vmem:[#allocation51_spill] sm:$0xff]  ;;  %vm9692_vm1 = vcmask 506880   ;;  %vm9695_vm14 = vcmask 490496   ;;  %v9709_v26 = vld [vmem:[#allocation150_spill] sm:$0xff] }
0x2916   :  { %v4235_v4 = vadd.f32 %v4230_v22, %v4151_v41  ;;  %v4236_v47 = vadd.f32 %v4231_v50, %v4152_v15  ;;  %v561_v42 = vsel %vm541_vm5, %v9295_v30, %v9682_v21  ;;  %v987_v53 = vsel %vm9692_vm1, %v9691_v61, %v9690_v46  ;;  %v9708_v15 = vld [vmem:[#allocation233_spill] sm:$0xff]  ;;  %v9710_v22 = vld [vmem:[#allocation240_spill] sm:$0xff] }
0x2917   :  { %v565_v54 = vadd.f32 %v561_v42, %v480_v39  ;;  %v1072_v29 = vsel %vm9695_vm14, %v9694_v57, %v9693_v28  ;;  %vm9707_vm1 = vcmask 900096   ;;  %v1518_v38 = vsel %vm1498_vm12, %v9709_v26, %v9708_v15  ;;  %v9711_v50 = vld [vmem:[#allocation161_spill] sm:$0xff]  ;;  %v9731_v28 = vld [vmem:[#allocation303_spill] sm:$0xff]  ;;  %v9732_v57 = vld [vmem:[#allocation372_spill] sm:$0xff] }
0x2918   :  { %4263 = vrot.lane.b32.xlu2 %v4236_v47, %s4680_s4  ;;  %4261 = vrot.lane.b32.xlu1 %v4235_v4, %s4680_s4  ;;  %v1433_v1 = vsel %vm9707_vm1, %v9706_v25, %v9705_v36  ;;  %vm9712_vm14 = vcmask 777216   ;;  %v9713_v4 = vld [vmem:[#allocation245_spill] sm:$0xff]  ;;  %v9714_v47 = vld [vmem:[#allocation172_spill] sm:$0xff]  ;;  %v9739_v36 = vld [vmem:[#allocation331_spill] sm:$0xff]  ;;  %vm9766_vm1 = vcmask 916480  }
0x2919   :  { %v650_v63 = vadd.f32 %v646_v55, %v565_v54  ;;  %v1604_v23 = vsel %vm9712_vm14, %v9711_v50, %v9710_v22  ;;  %v9721_v21 = vld [vmem:[#allocation265_spill] sm:$0xff]  ;;  %v4556_v55 = vld [vmem:[#allocation5 + $0x6] ss:$8 sm:$0x3]  ;;  %v9742_v26 = vld [vmem:[#allocation412_spill] sm:$0xff]  ;;  %vm9769_vm14 = vcmask 900096  }
0x291a   :  { %v9722_v42 = vld [vmem:[#allocation205_spill] sm:$0xff]  ;;  %v2183_v54 = vperm.slane %v4556_v55, 1  ;;  %v9741_v15 = vld [vmem:[#allocation338_spill] sm:$0xff] }
0x291b   :  { %v736_v0 = vadd.f32 %v732_v3, %v650_v63  ;;  %v1944_v39 = vsel %vm1924_vm9, %v9722_v42, %v9721_v21  ;;  %v9724_v3 = vld [vmem:[#allocation232_spill] sm:$0xff]  ;;  %v9729_v46 = vld [vmem:[#allocation297_spill] sm:$0xff] }
0x291c   :  { %v8184_v43 = vpop.permute.xlu0 %4118  ;;  %v2030_v63 = vsel %vm2010_vm13, %v9724_v3, %v9723_v2  ;;  %v9730_v61 = vld [vmem:[#allocation289_spill] sm:$0xff]  ;;  %v9755_v42 = vld [vmem:[#allocation400_spill] sm:$0xff] }
0x291d   :  { %v821_v9 = vadd.f32 %v817_v31, %v736_v0  ;;  %v9725_v31 = vld [vmem:[#allocation282_spill] sm:$0xff]  ;;  %v9740_v25 = vld [vmem:[#allocation405_spill] sm:$0xff] }
0x291e   :  { %v9744_v22 = vld [vmem:[#allocation345_spill] sm:$0xff] }
0x291f   :  { %v906_v18 = vadd.f32 %v902_v17, %v821_v9  ;;  %v2187_v17 = vmul.f32 %v2183_v54, %v9728_v11  ;;  %v9745_v50 = vld [vmem:[#allocation417_spill] sm:$0xff]  ;;  %v9758_v54 = vld [vmem:[#allocation446_spill] sm:$0xff] }
0x2920   :  { %v9759_v2 = vld [vmem:[#allocation421_spill] sm:$0xff] }
0x2921   :  { %v991_v45 = vadd.f32 %v987_v53, %v906_v18  ;;  %v2257_v53 = vsel %vm115_vm0, %v9730_v61, %v9729_v46  ;;  %vm9743_vm0 = vcmask 752640  }
0x2923   :  { %v1076_v14 = vadd.f32 %v1072_v29, %v991_v45  ;;  %v2341_v29 = vsel %vm200_vm10, %v9732_v57, %v9731_v28  ;;  %vm9763_vm10 = vcmask 1022976  }
0x2924   :  { %v4105_v48 = vpop.permute.xlu0 %4104 }
0x2925   :  { %v4107_v30 = vsel %vm2010_vm13, %v8101_v52, %v4105_v48  ;;  %v9697_v52 = vld [vmem:[#allocation106_spill] sm:$0xff]  ;;  %v9726_v48 = vld [vmem:[#allocation292_spill] sm:$0xff] }
0x2926   :  { %v8204_v5 = vadd.f32 %v4107_v30, %v7872_v37  ;;  %v1178_v58 = vsel %vm9698_vm8, %v9697_v52, %v9696_v12  ;;  %v1263_v37 = vsel %vm9701_vm6, %v9700_v7, %v9699_v56  ;;  %vm9715_vm8 = vcmask 760832   ;;  %v9733_v12 = vld [vmem:[#allocation310_spill] sm:$0xff]  ;;  %v9734_v52 = vld [vmem:[#allocation377_spill] sm:$0xff]  ;;  %v9736_v7 = vld [vmem:[#allocation388_spill] sm:$0xff] }
0x2927   :  { %v1182_v60 = vadd.f32 %v1178_v58, %v1076_v14  ;;  %v1689_v32 = vsel %vm9715_vm8, %v9714_v47, %v9713_v4  ;;  %vm9718_vm6 = vcmask 654336   ;;  %v2115_v0 = vsel %vm9727_vm11, %v9726_v48, %v9725_v31  ;;  %v9735_v56 = vld [vmem:[#allocation317_spill] sm:$0xff]  ;;  %v9746_v4 = vld [vmem:[#allocation352_spill] sm:$0xff]  ;;  %v9762_v48 = vld [vmem:[#allocation294_spill] sm:$0xff] }
0x2928   :  { %v1774_v16 = vsel %vm9718_vm6, %v9717_v6, %v9716_v27  ;;  %v2425_v58 = vsel %vm286_vm2, %v9734_v52, %v9733_v12  ;;  %v9747_v47 = vld [vmem:[#allocation424_spill] sm:$0xff]  ;;  %vm9748_vm2 = vcmask 629760   ;;  %v4123_v27 = vpop.permute.xlu2 %4122  ;;  %v9749_v6 = vld [vmem:[#allocation359_spill] sm:$0xff]  ;;  %v9761_v31 = vld [vmem:[#allocation285_spill] sm:$0xff]  ;;  %v4121_v52 = vpop.permute.xlu1 %4120  ;;  %vm9774_vm8 = vcmask 777216  }
0x2929   :  { %v1267_v8 = vadd.f32 %v1263_v37, %v1182_v60  ;;  %v2509_v37 = vsel %vm371_vm3, %v9736_v7, %v9735_v56  ;;  %vm9751_vm3 = vcmask 523264   ;;  %v9773_v56 = vld [vmem:[#allocation110_spill] sm:$0xff]  ;;  %vm9777_vm6 = vcmask 760832  }
0x292a   :  { %vm9780_vm11 = vcmask 654336  }
0x292b   :  { %v1352_v41 = vadd.f32 %v1348_v59, %v1267_v8  ;;  %v2593_v59 = vsel %vm456_vm4, %v9738_v44, %v9737_v51  ;;  %vm9754_vm4 = vcmask 506880   ;;  %v9775_v51 = vld [vmem:[#allocation52_spill] sm:$0xff]  ;;  %v9776_v44 = vld [vmem:[#allocation121_spill] sm:$0xff] }
0x292c   :  { %v4207_v11 = vpop.permute.xlu0 %4206 }
0x292d   :  { %v1437_v24 = vadd.f32 %v1433_v1, %v1352_v41  ;;  %v2677_v1 = vsel %vm541_vm5, %v9740_v25, %v9739_v36  ;;  %vm9757_vm5 = vcmask 490496   ;;  %v9778_v25 = vld [vmem:[#allocation58_spill] sm:$0xff] }
0x292f   :  { %v1522_v10 = vadd.f32 %v1518_v38, %v1437_v24  ;;  %v2761_v38 = vsel %vm9743_vm0, %v9742_v26, %v9741_v15  ;;  %v9781_v26 = vld [vmem:[#allocation64_spill] sm:$0xff] }
0x2931   :  { %v1608_v40 = vadd.f32 %v1604_v23, %v1522_v10  ;;  %v2845_v23 = vsel %vm712_vm7, %v9745_v50, %v9744_v22  ;;  %vm9760_vm7 = vcmask 1039360   ;;  %v9783_v50 = vld [vmem:[#allocation165_spill] sm:$0xff] }
0x2932   :  { %v3285_v3 = vsel %vm9760_vm7, %v9759_v2, %v9758_v54  ;;  %vm9786_vm0 = vmmov %vm9760_vm7 }
0x2933   :  { %v1693_v34 = vadd.f32 %v1689_v32, %v1608_v40  ;;  %v2929_v32 = vsel %vm9748_vm2, %v9747_v47, %v9746_v4  ;;  %v4203_v4 = vpop.permute.xlu1 %4202 }
0x2934   :  { %v4189_v36 = vpop.permute.xlu0 %4188 }
0x2935   :  { %v1778_v62 = vadd.f32 %v1774_v16, %v1693_v34  ;;  %v9750_v16 = vld [vmem:[#allocation430_spill] sm:$0xff] }
0x2936   :  { %v3013_v34 = vsel %vm9751_vm3, %v9750_v16, %v9749_v6 }
0x2937   :  { %v1863_v13 = vadd.f32 %v1859_v19, %v1778_v62  ;;  %v9753_v19 = vld [vmem:[#allocation436_spill] sm:$0xff] }
0x2938   :  { %v3097_v62 = vsel %vm9754_vm4, %v9753_v19, %v9752_v20  ;;  %vm9791_vm4 = vmmov %vm9786_vm0 }
0x2939   :  { %v1948_v33 = vadd.f32 %v1944_v39, %v1863_v13  ;;  %v9756_v39 = vld [vmem:[#allocation442_spill] sm:$0xff] }
0x293a   :  { %v3181_v13 = vsel %vm9757_vm5, %v9756_v39, %v9755_v42 }
0x293b   :  { %v2034_v30 = vadd.f32 %v2030_v63, %v1948_v33  ;;  %v4205_v33 = vpop.permute.xlu2 %4204  ;;  %v4185_v42 = vpop.permute.xlu1 %4184 }
0x293d   :  { %v2119_v9 = vadd.f32 %v2115_v0, %v2034_v30  ;;  %v3369_v0 = vsel %vm9763_vm10, %v9762_v48, %v9761_v31 }
0x293f   :  { %v2189_v18 = vadd.f32 %v2187_v17, %v2119_v9  ;;  %v9764_v17 = vld [vmem:[#allocation347_spill] sm:$0xff]  ;;  %v9765_v9 = vld [vmem:[#allocation340_spill] sm:$0xff] }
0x2940   :  { %v3453_v46 = vsel %vm9766_vm1, %v9765_v9, %v9764_v17 }
0x2941   :  { %v2261_v45 = vadd.f32 %v2257_v53, %v2189_v18  ;;  %v9767_v53 = vld [vmem:[#allocation37_spill] sm:$0xff] }
0x2942   :  { %v9768_v18 = vld [vmem:[#allocation89_spill] sm:$0xff] }
0x2943   :  { %v2345_v14 = vadd.f32 %v2341_v29, %v2261_v45  ;;  %v3537_v28 = vsel %vm9769_vm14, %v9768_v18, %v9767_v53  ;;  %v9770_v29 = vld [vmem:[#allocation40_spill] sm:$0xff]  ;;  %v9771_v45 = vld [vmem:[#allocation97_spill] sm:$0xff] }
0x2944   :  { %v3621_v12 = vsel %vm1498_vm12, %v9771_v45, %v9770_v29  ;;  %vm9785_vm12 = vcmask 498688  }
0x2945   :  { %v2429_v60 = vadd.f32 %v2425_v58, %v2345_v14  ;;  %v9772_v14 = vld [vmem:[#allocation46_spill] sm:$0xff]  ;;  %vm9787_vm2 = vmmov %vm9785_vm12 }
0x2946   :  { %v3705_v7 = vsel %vm9774_vm8, %v9773_v56, %v9772_v14  ;;  %vm9789_vm3 = vmmov %vm9787_vm2 }
0x2947   :  { %v2513_v8 = vadd.f32 %v2509_v37, %v2429_v60  ;;  %v4187_v60 = vpop.permute.xlu2 %4186  ;;  %v4208_v48 = vsel %vm9789_vm3, %v4203_v4, %v4205_v33  ;;  %vm9792_vm5 = vmmov %vm9787_vm2 }
0x2948   :  { %v4190_v17 = vsel %vm9792_vm5, %v4185_v42, %v4187_v60 }
0x2949   :  { %v2597_v41 = vadd.f32 %v2593_v59, %v2513_v8  ;;  %v3789_v59 = vsel %vm9777_vm6, %v9776_v44, %v9775_v51 }
0x294b   :  { %v2681_v24 = vadd.f32 %v2677_v1, %v2597_v41  ;;  %v9779_v1 = vld [vmem:[#allocation132_spill] sm:$0xff] }
0x294c   :  { %v3873_v41 = vsel %vm9780_vm11, %v9779_v1, %v9778_v25 }
0x294d   :  { %v2765_v10 = vadd.f32 %v2761_v38, %v2681_v24  ;;  %v9782_v38 = vld [vmem:[#allocation143_spill] sm:$0xff] }
0x294e   :  { %v3957_v24 = vsel %vm1839_vm15, %v9782_v38, %v9781_v26  ;;  %vm9788_vm15 = vmmov %vm9786_vm0 }
0x294f   :  { %v2849_v40 = vadd.f32 %v2845_v23, %v2765_v10  ;;  %v9784_v23 = vld [vmem:[#allocation154_spill] sm:$0xff] }
0x2950   :  { %v4041_v10 = vsel %vm1924_vm9, %v9784_v23, %v9783_v50  ;;  %vm4294_vm9 = vcmask 1043456  }
0x2951   :  { %v2933_v49 = vadd.f32 %v2929_v32, %v2849_v40  ;;  %v4125_v40 = vsel %vm2010_vm13, %v4121_v52, %v4123_v27 }
0x2953   :  { %v3017_v21 = vadd.f32 %v3013_v34, %v2933_v49  ;;  %v4209_v34 = vsel %vm9785_vm12, %v4205_v33, %v4207_v11 }
0x2955   :  { %v3101_v55 = vadd.f32 %v3097_v62, %v3017_v21  ;;  %v4191_v62 = vsel %vm9787_vm2, %v4187_v60, %v4189_v36 }
0x2956   :  { %v4195_v39 = vadd.f32 %v4191_v62, %v8204_v5 }
0x2957   :  { %v3185_v63 = vadd.f32 %v3181_v13, %v3101_v55 }
0x2959   :  { %v3289_v30 = vadd.f32 %v3285_v3, %v3185_v63  ;;  %v4124_v63 = vsel %vm2010_vm13, %v8184_v43, %v4121_v52  ;;  %vm9793_vm13 = vmmov %vm9786_vm0 }
0x295b   :  { %v3373_v61 = vadd.f32 %v3369_v0, %v3289_v30  ;;  %v9790_v0 = vld [vmem:[#allocation70_spill] sm:$0xff] }
0x295c   :  { %v4128_v30 = vadd.f32 %v4124_v63, %v9790_v0 }
0x295d   :  { %v3457_v57 = vadd.f32 %v3453_v46, %v3373_v61  ;;  %v4194_v46 = vadd.f32 %v4190_v17, %v8110_v35 }
0x295e   :  { %v4212_v11 = vadd.f32 %v4208_v48, %v4128_v30 }
0x295f   :  { %v3541_v58 = vadd.f32 %v3537_v28, %v3457_v57 }
0x2961   :  { %v3625_v37 = vadd.f32 %v3621_v12, %v3541_v58 }
0x2963   :  { %v3709_v8 = vadd.f32 %v3705_v7, %v3625_v37 }
0x2965   :  { %v3793_v15 = vadd.f32 %v3789_v59, %v3709_v8 }
0x2967   :  { %v3877_v22 = vadd.f32 %v3873_v41, %v3793_v15 }
0x2969   :  { %v3961_v47 = vadd.f32 %v3957_v24, %v3877_v22 }
0x296a   :  { %v4279_v32 = vpop.permute.xlu2 %4278 }
0x296b   :  { %v4045_v6 = vadd.f32 %v4041_v10, %v3961_v47 }
0x296d   :  { %v4129_v49 = vadd.f32 %v4125_v40, %v4045_v6 }
0x296f   :  { %v4213_v19 = vadd.f32 %v4209_v34, %v4129_v49 }
0x2972   :  { %v4264_v13 = vpop.permute.xlu2 %4263 }
0x2973   :  { %v4281_v16 = vpop.permute.xlu0 %4280 }
0x2974   :  { %v4283_v20 = vsel %vm9786_vm0, %v4279_v32, %v4281_v16 }
0x2975   :  { %v4287_v21 = vadd.f32 %v4283_v20, %v4213_v19 }
0x2977   :  { %v4291_v27 = vrot.slane %v4287_v21, 4 }
0x297b   :  { %v4266_v55 = vpop.permute.xlu0 %4265 }
0x297c   :  { %v4268_v54 = vsel %vm9788_vm15, %v4264_v13, %v4266_v55 }
0x297d   :  { %v4272_v2 = vadd.f32 %v4268_v54, %v4195_v39 }
0x297f   :  { %v4296_v3 = vsel %vm4294_vm9, %v4272_v2, %v4291_v27 }
0x2980   :  { %4298 = vst [vmem:[#allocation7 + $0x8] sm:$0xff] %v4296_v3 }
0x2982   :  { %v4277_v31 = vpop.permute.xlu1 %4276 }
0x2983   :  { %v4282_v5 = vsel %vm9791_vm4, %v4277_v31, %v4279_v32 }
0x2984   :  { %v4286_v9 = vadd.f32 %v4282_v5, %v4212_v11 }
0x2986   :  { %v4290_v33 = vrot.slane %v4286_v9, 4 }
0x298a   :  { %v4262_v61 = vpop.permute.xlu1 %4261 }
0x298b   :  { %v4267_v43 = vsel %vm9793_vm13, %v4262_v61, %v4264_v13 }
0x298c   :  { %v4271_v53 = vadd.f32 %v4267_v43, %v4194_v46 }
0x298e   :  { %v4295_v18 = vsel %vm4294_vm9, %v4271_v53, %v4290_v33 }
0x298f   :  { %4297 = vst [vmem:[#allocation7] sm:$0xff] %v4295_v18 }
0x2990   :  { %4309 = dma.vmem_to_hbm [thread:$0]  %s4305_s0, 256, %s4307_s20, [#allocation4]  }
0x2991   :  { %4633 = dma.done.wait [#allocation4], 256  }
0x2992   :  { %4634 = vsyncadd [#allocation4], 4294967040 }
0x2993   :  { %4314 = vsyncpa [#allocation3], 1 }
0x2994   :  { %4315 = vsyncpa [#allocation6], 1 }
0x2995   :  { %4316 = vsyncpa [#allocation4], 1 }

</bundles_post_ra>
